<compile_context>
chip_gen: v7x
topology: tpu7x:2x2x1
jax: 0.10.0
libtpu: 0.0.40
codegen_flags: <defaults>
</compile_context>

<pallas_src>
import jax
import jax.numpy as jnp
import numpy as np
from jax.experimental import pallas as pl
from jax.experimental.pallas import tpu as pltpu

EPS = 1e-5
LANES = 128
VMEM_LIMIT = 48 * 1024 * 1024   # safe on all generations (v7x physical = 64 MiB)


# ----------------------------------------------------------------------------
# Flat zero-padded layout
#   buffer = [LEAD zeros | (H+2) padded rows of width Wp=W+2 | TAIL zeros]
#   real pixel (y, x) lives at flat index  wstart + y*Wp + x,
#   wstart = LEAD + Wp + 1 (chosen to be a multiple of 8 -> aligned stores).
# ----------------------------------------------------------------------------
def _layout(H, W):
    Wp = W + 2
    M = H * Wp                              # wide-output rows
    lead = (-(Wp + 1)) % 8                  # makes wstart sublane-aligned
    body = (H + 2) * Wp
    Lp = ((lead + body + 2 + 7) // 8) * 8   # >= max tap read, multiple of 8
    tail = Lp - lead - body
    wstart = lead + Wp + 1
    # All 9 tap windows [lead+o, lead+o+M) must stay in bounds (VMEM reads
    # have no runtime bounds check).
    assert lead + 2 * Wp + 2 + M <= Lp
    assert wstart % 8 == 0
    return Wp, M, lead, tail, Lp, wstart


def _flatten_pad(x_nhwc, lead, tail):
    n, h, w, c = x_nhwc.shape
    xp = jnp.pad(x_nhwc, ((0, 0), (1, 1), (1, 1), (0, 0)))
    xf = xp.reshape(n, (h + 2) * (w + 2), c)
    return jnp.pad(xf, ((0, 0), (lead, tail), (0, 0)))


def _conv_masks(H, W):
    Wp, M, lead, _, Lp, _ = _layout(H, W)
    i = np.arange(Lp)
    j = i - lead
    pr, pc = j // Wp, j % Wp
    in_valid = (j >= 0) & (pr >= 1) & (pr <= H) & (pc >= 1) & (pc <= W)
    out_valid = (np.arange(M) % Wp) < W
    return (jnp.asarray(in_valid.astype(np.float32).reshape(Lp, 1)),
            jnp.asarray(out_valid.astype(np.float32).reshape(M, 1)))


# ----------------------------------------------------------------------------
# Kernels
# ----------------------------------------------------------------------------
def _make_conv_kernel(H, W):
    """3x3 conv (+ folded input BN affine) + per-image BN stat partials."""
    Wp, M, lead, _, Lp, wstart = _layout(H, W)
    offs = tuple(dy * Wp + dx for dy in range(3) for dx in range(3))

    def kernel(x_ref, w_ref, b_ref, sc_ref, sh_ref, inm_ref, outm_ref,
               y_ref, sum_ref, ssq_ref, xa_ref, acc_ref):
        # x_ref  : (1, Lp, Cs)   flattened zero-padded input
        # w_ref  : (9, Cs, Cop)  per-tap weights (Cout lane-padded to 128)
        # b_ref  : (1, Cop)
        # sc/sh  : (1, Cs)       previous layer's folded BN affine (1/0 if none)
        # inm/outm: (Lp,1)/(M,1) real-pixel / valid-column masks
        # y_ref  : (1, Lp, Cop)  output, already in the NEXT conv's layout
        # sum/ssq: (1, 1, Cop)   per-image partial BN statistics
        # xa_ref : (Lp, Cs)      affined input scratch (MXU dtype)
        # acc_ref: (M, Cop)      f32 accumulator scratch

        # ---- hoisted input affine: ONE masked pass (not 9x per tap) ----
        x = x_ref[0].astype(jnp.float32)
        xa_ref[...] = (x * sc_ref[...]
                       + sh_ref[...] * inm_ref[...]).astype(xa_ref.dtype)

        # ---- 9 shifted-window MXU matmuls, f32 accumulation in VMEM ----
        for k, o in enumerate(offs):
            tap = xa_ref[lead + o:lead + o + M, :]              # (M, Cs)
            p = jnp.dot(tap, w_ref[k], preferred_element_type=jnp.float32)
            if k == 0:
                acc_ref[...] = p + b_ref[...]
            else:
                acc_ref[...] += p

        # ---- stats (junk columns zeroed; mv*mv == mv*acc since mask is 0/1)
        yv = acc_ref[...] * outm_ref[...]                       # (M, Cop)
        sum_ref[0] = jnp.sum(yv, axis=0, keepdims=True)
        ssq_ref[0] = jnp.sum(yv * yv, axis=0, keepdims=True)

        # ---- store directly in the next conv's zero-padded flat layout ----
        cop = yv.shape[1]
        y_ref[0, 0:wstart, :] = jnp.zeros((wstart, cop), y_ref.dtype)
        y_ref[0, wstart:wstart + M, :] = yv.astype(y_ref.dtype)
        y_ref[0, wstart + M:Lp, :] = jnp.zeros((Lp - wstart - M, cop),
                                               y_ref.dtype)

    return kernel, M, Lp


def _make_bn_unwiden_kernel(H, W, cout):
    """Final BN affine fused with un-widen + channel slice -> (1,H,W,Cout)."""
    Wp, _, _, _, _, wstart = _layout(H, W)

    def kernel(y_ref, sc_ref, sh_ref, o_ref):
        sc = sc_ref[:, :cout]                                   # (1, cout)
        sh = sh_ref[:, :cout]
        for r in range(H):
            base = wstart + r * Wp                              # row r, col 0
            v = y_ref[0, base:base + W, :cout].astype(jnp.float32)
            o_ref[0, r, :, :] = (v * sc + sh).astype(o_ref.dtype)

    return kernel


# ----------------------------------------------------------------------------
# Pallas wrappers
# ----------------------------------------------------------------------------
def _conv3x3_layer(x_flat, w9, b_pad, in_scale, in_shift, in_mask, out_mask,
                   H, W, out_dtype):
    N, Lp, Cs = x_flat.shape
    _, _, Cop = w9.shape
    kernel, M, Lp_k = _make_conv_kernel(H, W)
    assert Lp == Lp_k
    return pl.pallas_call(
        kernel,
        out_shape=(jax.ShapeDtypeStruct((N, Lp, Cop), out_dtype),
                   jax.ShapeDtypeStruct((N, 1, Cop), jnp.float32),
                   jax.ShapeDtypeStruct((N, 1, Cop), jnp.float32)),
        grid=(N,),
        in_specs=[pl.BlockSpec((1, Lp, Cs), lambda n: (n, 0, 0)),
                  pl.BlockSpec((9, Cs, Cop), lambda n: (0, 0, 0)),
                  pl.BlockSpec((1, Cop), lambda n: (0, 0)),
                  pl.BlockSpec((1, Cs), lambda n: (0, 0)),
                  pl.BlockSpec((1, Cs), lambda n: (0, 0)),
                  pl.BlockSpec((Lp, 1), lambda n: (0, 0)),
                  pl.BlockSpec((M, 1), lambda n: (0, 0))],
        out_specs=[pl.BlockSpec((1, Lp, Cop), lambda n: (n, 0, 0)),
                   pl.BlockSpec((1, 1, Cop), lambda n: (n, 0, 0)),
                   pl.BlockSpec((1, 1, Cop), lambda n: (n, 0, 0))],
        scratch_shapes=[pltpu.VMEM((Lp, Cs), w9.dtype),        # affined input
                        pltpu.VMEM((M, Cop), jnp.float32)],    # f32 accumulator
        compiler_params=pltpu.CompilerParams(
            dimension_semantics=("parallel",),    # stats are per-step partials
            vmem_limit_bytes=VMEM_LIMIT),
    )(x_flat, w9, b_pad, in_scale, in_shift, in_mask, out_mask)


def _bn_affine_unwiden(y_pad, scale_pad, shift_pad, H, W, cout):
    N, Lp, Cop = y_pad.shape
    kernel = _make_bn_unwiden_kernel(H, W, cout)
    return pl.pallas_call(
        kernel,
        out_shape=jax.ShapeDtypeStruct((N, H, W, cout), jnp.float32),
        grid=(N,),
        in_specs=[pl.BlockSpec((1, Lp, Cop), lambda n: (n, 0, 0)),
                  pl.BlockSpec((1, Cop), lambda n: (0, 0)),
                  pl.BlockSpec((1, Cop), lambda n: (0, 0))],
        out_specs=pl.BlockSpec((1, H, W, cout), lambda n: (n, 0, 0, 0)),
        compiler_params=pltpu.CompilerParams(
            dimension_semantics=("parallel",),
            vmem_limit_bytes=VMEM_LIMIT),
    )(y_pad, scale_pad, shift_pad)


# ----------------------------------------------------------------------------
# Plain-JAX glue (tiny scalar/param work only; all bulk math is in kernels)
# ----------------------------------------------------------------------------
def _bn_scale_shift(sums, sumsq, count, gamma, beta):
    c = gamma.shape[0]
    s = jnp.sum(sums[:, 0, :c], axis=0)
    q = jnp.sum(sumsq[:, 0, :c], axis=0)
    mean = s / count
    var = q / count - mean * mean          # biased variance (train-mode BN)
    # TODO(synk): single-pass E[x^2]-mean^2 can cancel at very large N*H*W;
    # switch to a two-pass reduction if scaling up.
    scale = gamma * jax.lax.rsqrt(var + EPS)
    shift = beta - mean * scale
    return scale, shift


def _prep_conv_params(w_oihw, b, cin_store, mxu_dtype):
    """OIHW weight -> per-tap (9, Cin_store, Cout_pad) + lane-padded bias."""
    cout, cin = w_oihw.shape[0], w_oihw.shape[1]
    cop = pl.cdiv(cout, LANES) * LANES
    w = jnp.transpose(w_oihw, (2, 3, 1, 0)).reshape(9, cin, cout)
    w = jnp.pad(w, ((0, 0), (0, cin_store - cin),
                    (0, cop - cout))).astype(mxu_dtype)
    bp = jnp.pad(b, (0, cop - cout)).reshape(1, cop).astype(jnp.float32)
    return w, bp


def make_params(w1_oihw, b1, g1, be1, w2_oihw, b2, g2, be2,
                mxu_dtype=jnp.float32):
    cin = w1_oihw.shape[1]
    cmid = w1_oihw.shape[0]
    cmid_pad = pl.cdiv(cmid, LANES) * LANES
    w1, b1p = _prep_conv_params(w1_oihw, b1, cin, mxu_dtype)
    w2, b2p = _prep_conv_params(w2_oihw, b2, cmid_pad, mxu_dtype)
    assert w2.shape[1] == w1.shape[2]      # conv1 stores what conv2 reads
    return {"w1": w1, "b1": b1p, "g1": g1, "be1": be1,
            "w2": w2, "b2": b2p, "g2": g2, "be2": be2}


def conv_module_forward(x_nchw, params):
    """Forward of the PyTorch `conv` module. Input/output are NCHW f32."""
    mxu_dtype = params["w1"].dtype
    store_dtype = jnp.bfloat16 if mxu_dtype == jnp.bfloat16 else jnp.float32

    x = jnp.transpose(x_nchw, (0, 2, 3, 1)).astype(jnp.float32)   # NCHW->NHWC
    n, h, w, cin = x.shape
    _, _, lead, tail, _, _ = _layout(h, w)
    in_mask, out_mask = _conv_masks(h, w)
    count = n * h * w
    cmid = params["g1"].shape[0]
    cout = params["g2"].shape[0]
    cmp_ = params["w2"].shape[1]     # lane-padded mid channels (conv2's Cs)
    cop2 = params["w2"].shape[2]

    # ---- layer 1: conv1 + batch-stat partials (BN1 affine is deferred and
    #      folded into the conv2 kernel's single input-affine pass) ----
    x1 = _flatten_pad(x, lead, tail)                           # (N, Lp, Cin)
    ones = jnp.ones((1, cin), jnp.float32)
    zeros = jnp.zeros((1, cin), jnp.float32)
    y1p, s1, q1 = _conv3x3_layer(x1, params["w1"], params["b1"], ones, zeros,
                                 in_mask, out_mask, h, w, store_dtype)
    scale1, shift1 = _bn_scale_shift(s1, q1, count, params["g1"], params["be1"])
    sc1 = jnp.zeros((1, cmp_), jnp.float32).at[0, :cmid].set(scale1)
    sh1 = jnp.zeros((1, cmp_), jnp.float32).at[0, :cmid].set(shift1)

    # ---- layer 2: conv2 reads conv1's padded-layout output directly (no XLA
    #      un-widen / re-pad HBM round trip) with BN1 fused as input affine ----
    y2p, s2, q2 = _conv3x3_layer(y1p, params["w2"], params["b2"], sc1, sh1,
                                 in_mask, out_mask, h, w, store_dtype)
    scale2, shift2 = _bn_scale_shift(s2, q2, count, params["g2"], params["be2"])
    sc2 = jnp.zeros((1, cop2), jnp.float32).at[0, :cout].set(scale2)
    sh2 = jnp.zeros((1, cop2), jnp.float32).at[0, :cout].set(shift2)

    # ---- final BN2 affine fused with un-widen + channel slice ----
    out_nhwc = _bn_affine_unwiden(y2p, sc2, sh2, h, w, cout)   # (N,H,W,Cout)
    return jnp.transpose(out_nhwc, (0, 3, 1, 2))               # NHWC -> NCHW


# ----------------------------------------------------------------------------
# Pure-JAX reference (for self-check)
# ----------------------------------------------------------------------------
def _ref_forward(x_nchw, p):
    def conv(x, w_oihw, b):
        y = jax.lax.conv_general_dilated(
            x, w_oihw, (1, 1), "SAME",
            dimension_numbers=("NCHW", "OIHW", "NCHW"))
        return y + b[None, :, None, None]

    def bn(x, g, be):
        mean = jnp.mean(x, axis=(0, 2, 3))
        var = jnp.var(x, axis=(0, 2, 3))
        xn = (x - mean[None, :, None, None]) * jax.lax.rsqrt(
            var + EPS)[None, :, None, None]
        return xn * g[None, :, None, None] + be[None, :, None, None]

    y = bn(conv(x_nchw, p["w1_oihw"], p["b1"]), p["g1"], p["be1"])
    y = bn(conv(y, p["w2_oihw"], p["b2"]), p["g2"], p["be2"])
    return y


# ----------------------------------------------------------------------------
if __name__ == "__main__":
    N, IN_C, MID_C, OUT_C, H, W = 2, 4, 8, 4, 16, 16

    key = jax.random.PRNGKey(0)
    ks = jax.random.split(key, 9)
    w1_oihw = jax.random.normal(ks[0], (MID_C, IN_C, 3, 3), jnp.float32) * 0.2
    b1 = jax.random.normal(ks[1], (MID_C,), jnp.float32) * 0.1
    w2_oihw = jax.random.normal(ks[2], (OUT_C, MID_C, 3, 3), jnp.float32) * 0.2
    b2 = jax.random.normal(ks[3], (OUT_C,), jnp.float32) * 0.1
    g1 = 1.0 + 0.1 * jax.random.normal(ks[4], (MID_C,), jnp.float32)
    be1 = 0.1 * jax.random.normal(ks[5], (MID_C,), jnp.float32)
    g2 = 1.0 + 0.1 * jax.random.normal(ks[6], (OUT_C,), jnp.float32)
    be2 = 0.1 * jax.random.normal(ks[7], (OUT_C,), jnp.float32)
    x = jax.random.normal(ks[8], (N, IN_C, H, W), jnp.float32)

    ref_params = {"w1_oihw": w1_oihw, "b1": b1, "g1": g1, "be1": be1,
                  "w2_oihw": w2_oihw, "b2": b2, "g2": g2, "be2": be2}
    ref = jax.block_until_ready(_ref_forward(x, ref_params))

    fwd = jax.jit(conv_module_forward)

    # f32 MXU path: exact-algorithm check (tight tolerance).
    p32 = make_params(w1_oihw, b1, g1, be1, w2_oihw, b2, g2, be2,
                      mxu_dtype=jnp.float32)
    out32 = jax.block_until_ready(fwd(x, p32))
    np.testing.assert_allclose(np.asarray(out32), np.asarray(ref),
                               rtol=2e-3, atol=2e-3)

    # bf16 MXU-operand / bf16 intermediate path (v6e/v7x production config):
    # f32 accumulation + f32 BN math, looser tolerance for bf16 rounding.
    pbf = make_params(w1_oihw, b1, g1, be1, w2_oihw, b2, g2, be2,
                      mxu_dtype=jnp.bfloat16)
    outbf = jax.block_until_ready(fwd(x, pbf))
    np.testing.assert_allclose(np.asarray(outbf), np.asarray(ref),
                               rtol=5e-2, atol=5e-2)

    print("KERNEL_OK")
</pallas_src>

<mosaic_0001>
module attributes {stable_mosaic.version = 11 : i64} {
  func.func @kernel(%arg0: i32, %arg1: memref<1x336x4xf32, #tpu.memory_space<vmem>>, %arg2: memref<9x4x128xf32, #tpu.memory_space<vmem>>, %arg3: memref<1x128xf32, #tpu.memory_space<vmem>>, %arg4: memref<1x4xf32, #tpu.memory_space<vmem>>, %arg5: memref<1x4xf32, #tpu.memory_space<vmem>>, %arg6: memref<336x1xf32, #tpu.memory_space<vmem>>, %arg7: memref<288x1xf32, #tpu.memory_space<vmem>>, %arg8: memref<1x336x128xf32, #tpu.memory_space<vmem>>, %arg9: memref<1x1x128xf32, #tpu.memory_space<vmem>>, %arg10: memref<1x1x128xf32, #tpu.memory_space<vmem>>, %arg11: memref<336x4xf32, #tpu.memory_space<vmem>>, %arg12: memref<288x128xf32, #tpu.memory_space<vmem>>) attributes {dimension_semantics = [#tpu.dimension_semantics<parallel>], iteration_bounds = array<i64: 2>, scalar_prefetch = 0 : i64, scratch_operands = 2 : i64, tpu.core_type = #tpu.core_type<tc>, window_params = [{transform_indices = @transform_0, window_bounds = array<i64: 1, 336, 4>}, {pipeline_mode = #tpu.pipeline_mode<synchronous>, transform_indices = @transform_1, window_bounds = array<i64: 9, 4, 128>}, {pipeline_mode = #tpu.pipeline_mode<synchronous>, transform_indices = @transform_2, window_bounds = array<i64: 1, 128>}, {pipeline_mode = #tpu.pipeline_mode<synchronous>, transform_indices = @transform_3, window_bounds = array<i64: 1, 4>}, {pipeline_mode = #tpu.pipeline_mode<synchronous>, transform_indices = @transform_4, window_bounds = array<i64: 1, 4>}, {pipeline_mode = #tpu.pipeline_mode<synchronous>, transform_indices = @transform_5, window_bounds = array<i64: 336, 1>}, {pipeline_mode = #tpu.pipeline_mode<synchronous>, transform_indices = @transform_6, window_bounds = array<i64: 288, 1>}, {transform_indices = @transform_7, window_bounds = array<i64: 1, 336, 128>}, {transform_indices = @transform_8, window_bounds = array<i64: 1, 1, 128>}, {transform_indices = @transform_9, window_bounds = array<i64: 1, 1, 128>}]} {
    %c0 = arith.constant 0 : index
    %c0_0 = arith.constant 0 : index
    %c0_1 = arith.constant 0 : index
    %0 = vector.load %arg1[%c0, %c0_0, %c0_1] : memref<1x336x4xf32, #tpu.memory_space<vmem>>, vector<1x336x4xf32>
    %1 = vector.shape_cast %0 : vector<1x336x4xf32> to vector<336x4xf32>
    %c0_2 = arith.constant 0 : index
    %c0_3 = arith.constant 0 : index
    %2 = vector.load %arg4[%c0_2, %c0_3] : memref<1x4xf32, #tpu.memory_space<vmem>>, vector<1x4xf32>
    %3 = vector.broadcast %2 : vector<1x4xf32> to vector<336x4xf32>
    %4 = arith.mulf %1, %3 : vector<336x4xf32>
    %c0_4 = arith.constant 0 : index
    %c0_5 = arith.constant 0 : index
    %5 = vector.load %arg5[%c0_4, %c0_5] : memref<1x4xf32, #tpu.memory_space<vmem>>, vector<1x4xf32>
    %c0_6 = arith.constant 0 : index
    %c0_7 = arith.constant 0 : index
    %6 = vector.load %arg6[%c0_6, %c0_7] : memref<336x1xf32, #tpu.memory_space<vmem>>, vector<336x1xf32>
    %7 = vector.broadcast %5 : vector<1x4xf32> to vector<336x4xf32>
    %8 = vector.broadcast %6 : vector<336x1xf32> to vector<336x4xf32>
    %9 = arith.mulf %7, %8 : vector<336x4xf32>
    %10 = arith.addf %4, %9 : vector<336x4xf32>
    %c0_8 = arith.constant 0 : index
    %c0_9 = arith.constant 0 : index
    %11 = vector.load %arg11[%c0_8, %c0_9] : memref<336x4xf32, #tpu.memory_space<vmem>>, vector<336x4xf32>
    tpu.vector_store %arg11[%c0_8, %c0_9], %10 {strides = array<i32>} : memref<336x4xf32, #tpu.memory_space<vmem>>, vector<336x4xf32>,
    %c5 = arith.constant 5 : index
    %c0_10 = arith.constant 0 : index
    %12 = vector.load %arg11[%c5, %c0_10] : memref<336x4xf32, #tpu.memory_space<vmem>>, vector<288x4xf32>
    %c0_11 = arith.constant 0 : index
    %c0_12 = arith.constant 0 : index
    %c0_13 = arith.constant 0 : index
    %13 = vector.load %arg2[%c0_11, %c0_12, %c0_13] : memref<9x4x128xf32, #tpu.memory_space<vmem>>, vector<1x4x128xf32>
    %14 = vector.shape_cast %13 : vector<1x4x128xf32> to vector<4x128xf32>
    %cst = arith.constant dense<0.000000e+00> : vector<288x128xf32>
    %15 = tpu.matmul %12, %14, %cst {dimension_numbers = #tpu.dot_dimension_numbers<[1], [0], [0], [1], [0, 0, 1, 1], [], []>} : vector<288x4xf32>, vector<4x128xf32>, vector<288x128xf32> -> vector<288x128xf32>
    %c0_14 = arith.constant 0 : index
    %c0_15 = arith.constant 0 : index
    %16 = vector.load %arg3[%c0_14, %c0_15] : memref<1x128xf32, #tpu.memory_space<vmem>>, vector<1x128xf32>
    %17 = vector.broadcast %16 : vector<1x128xf32> to vector<288x128xf32>
    %18 = arith.addf %15, %17 : vector<288x128xf32>
    %c0_16 = arith.constant 0 : index
    %c0_17 = arith.constant 0 : index
    %19 = vector.load %arg12[%c0_16, %c0_17] : memref<288x128xf32, #tpu.memory_space<vmem>>, vector<288x128xf32>
    tpu.vector_store %arg12[%c0_16, %c0_17], %18 {strides = array<i32>} : memref<288x128xf32, #tpu.memory_space<vmem>>, vector<288x128xf32>,
    %c6 = arith.constant 6 : index
    %c0_18 = arith.constant 0 : index
    %20 = vector.load %arg11[%c6, %c0_18] : memref<336x4xf32, #tpu.memory_space<vmem>>, vector<288x4xf32>
    %c1 = arith.constant 1 : index
    %c0_19 = arith.constant 0 : index
    %c0_20 = arith.constant 0 : index
    %21 = vector.load %arg2[%c1, %c0_19, %c0_20] : memref<9x4x128xf32, #tpu.memory_space<vmem>>, vector<1x4x128xf32>
    %22 = vector.shape_cast %21 : vector<1x4x128xf32> to vector<4x128xf32>
    %cst_21 = arith.constant dense<0.000000e+00> : vector<288x128xf32>
    %23 = tpu.matmul %20, %22, %cst_21 {dimension_numbers = #tpu.dot_dimension_numbers<[1], [0], [0], [1], [0, 0, 1, 1], [], []>} : vector<288x4xf32>, vector<4x128xf32>, vector<288x128xf32> -> vector<288x128xf32>
    %c0_22 = arith.constant 0 : index
    %c0_23 = arith.constant 0 : index
    %24 = vector.load %arg12[%c0_22, %c0_23] : memref<288x128xf32, #tpu.memory_space<vmem>>, vector<288x128xf32>
    %25 = arith.addf %24, %23 : vector<288x128xf32>
    %c0_24 = arith.constant 0 : index
    %c0_25 = arith.constant 0 : index
    %26 = vector.load %arg12[%c0_24, %c0_25] : memref<288x128xf32, #tpu.memory_space<vmem>>, vector<288x128xf32>
    tpu.vector_store %arg12[%c0_24, %c0_25], %25 {strides = array<i32>} : memref<288x128xf32, #tpu.memory_space<vmem>>, vector<288x128xf32>,
    %c7 = arith.constant 7 : index
    %c0_26 = arith.constant 0 : index
    %27 = vector.load %arg11[%c7, %c0_26] : memref<336x4xf32, #tpu.memory_space<vmem>>, vector<288x4xf32>
    %c2 = arith.constant 2 : index
    %c0_27 = arith.constant 0 : index
    %c0_28 = arith.constant 0 : index
    %28 = vector.load %arg2[%c2, %c0_27, %c0_28] : memref<9x4x128xf32, #tpu.memory_space<vmem>>, vector<1x4x128xf32>
    %29 = vector.shape_cast %28 : vector<1x4x128xf32> to vector<4x128xf32>
    %cst_29 = arith.constant dense<0.000000e+00> : vector<288x128xf32>
    %30 = tpu.matmul %27, %29, %cst_29 {dimension_numbers = #tpu.dot_dimension_numbers<[1], [0], [0], [1], [0, 0, 1, 1], [], []>} : vector<288x4xf32>, vector<4x128xf32>, vector<288x128xf32> -> vector<288x128xf32>
    %c0_30 = arith.constant 0 : index
    %c0_31 = arith.constant 0 : index
    %31 = vector.load %arg12[%c0_30, %c0_31] : memref<288x128xf32, #tpu.memory_space<vmem>>, vector<288x128xf32>
    %32 = arith.addf %31, %30 : vector<288x128xf32>
    %c0_32 = arith.constant 0 : index
    %c0_33 = arith.constant 0 : index
    %33 = vector.load %arg12[%c0_32, %c0_33] : memref<288x128xf32, #tpu.memory_space<vmem>>, vector<288x128xf32>
    tpu.vector_store %arg12[%c0_32, %c0_33], %32 {strides = array<i32>} : memref<288x128xf32, #tpu.memory_space<vmem>>, vector<288x128xf32>,
    %c23 = arith.constant 23 : index
    %c0_34 = arith.constant 0 : index
    %34 = vector.load %arg11[%c23, %c0_34] : memref<336x4xf32, #tpu.memory_space<vmem>>, vector<288x4xf32>
    %c3 = arith.constant 3 : index
    %c0_35 = arith.constant 0 : index
    %c0_36 = arith.constant 0 : index
    %35 = vector.load %arg2[%c3, %c0_35, %c0_36] : memref<9x4x128xf32, #tpu.memory_space<vmem>>, vector<1x4x128xf32>
    %36 = vector.shape_cast %35 : vector<1x4x128xf32> to vector<4x128xf32>
    %cst_37 = arith.constant dense<0.000000e+00> : vector<288x128xf32>
    %37 = tpu.matmul %34, %36, %cst_37 {dimension_numbers = #tpu.dot_dimension_numbers<[1], [0], [0], [1], [0, 0, 1, 1], [], []>} : vector<288x4xf32>, vector<4x128xf32>, vector<288x128xf32> -> vector<288x128xf32>
    %c0_38 = arith.constant 0 : index
    %c0_39 = arith.constant 0 : index
    %38 = vector.load %arg12[%c0_38, %c0_39] : memref<288x128xf32, #tpu.memory_space<vmem>>, vector<288x128xf32>
    %39 = arith.addf %38, %37 : vector<288x128xf32>
    %c0_40 = arith.constant 0 : index
    %c0_41 = arith.constant 0 : index
    %40 = vector.load %arg12[%c0_40, %c0_41] : memref<288x128xf32, #tpu.memory_space<vmem>>, vector<288x128xf32>
    tpu.vector_store %arg12[%c0_40, %c0_41], %39 {strides = array<i32>} : memref<288x128xf32, #tpu.memory_space<vmem>>, vector<288x128xf32>,
    %c24 = arith.constant 24 : index
    %c0_42 = arith.constant 0 : index
    %41 = vector.load %arg11[%c24, %c0_42] : memref<336x4xf32, #tpu.memory_space<vmem>>, vector<288x4xf32>
    %c4 = arith.constant 4 : index
    %c0_43 = arith.constant 0 : index
    %c0_44 = arith.constant 0 : index
    %42 = vector.load %arg2[%c4, %c0_43, %c0_44] : memref<9x4x128xf32, #tpu.memory_space<vmem>>, vector<1x4x128xf32>
    %43 = vector.shape_cast %42 : vector<1x4x128xf32> to vector<4x128xf32>
    %cst_45 = arith.constant dense<0.000000e+00> : vector<288x128xf32>
    %44 = tpu.matmul %41, %43, %cst_45 {dimension_numbers = #tpu.dot_dimension_numbers<[1], [0], [0], [1], [0, 0, 1, 1], [], []>} : vector<288x4xf32>, vector<4x128xf32>, vector<288x128xf32> -> vector<288x128xf32>
    %c0_46 = arith.constant 0 : index
    %c0_47 = arith.constant 0 : index
    %45 = vector.load %arg12[%c0_46, %c0_47] : memref<288x128xf32, #tpu.memory_space<vmem>>, vector<288x128xf32>
    %46 = arith.addf %45, %44 : vector<288x128xf32>
    %c0_48 = arith.constant 0 : index
    %c0_49 = arith.constant 0 : index
    %47 = vector.load %arg12[%c0_48, %c0_49] : memref<288x128xf32, #tpu.memory_space<vmem>>, vector<288x128xf32>
    tpu.vector_store %arg12[%c0_48, %c0_49], %46 {strides = array<i32>} : memref<288x128xf32, #tpu.memory_space<vmem>>, vector<288x128xf32>,
    %c25 = arith.constant 25 : index
    %c0_50 = arith.constant 0 : index
    %48 = vector.load %arg11[%c25, %c0_50] : memref<336x4xf32, #tpu.memory_space<vmem>>, vector<288x4xf32>
    %c5_51 = arith.constant 5 : index
    %c0_52 = arith.constant 0 : index
    %c0_53 = arith.constant 0 : index
    %49 = vector.load %arg2[%c5_51, %c0_52, %c0_53] : memref<9x4x128xf32, #tpu.memory_space<vmem>>, vector<1x4x128xf32>
    %50 = vector.shape_cast %49 : vector<1x4x128xf32> to vector<4x128xf32>
    %cst_54 = arith.constant dense<0.000000e+00> : vector<288x128xf32>
    %51 = tpu.matmul %48, %50, %cst_54 {dimension_numbers = #tpu.dot_dimension_numbers<[1], [0], [0], [1], [0, 0, 1, 1], [], []>} : vector<288x4xf32>, vector<4x128xf32>, vector<288x128xf32> -> vector<288x128xf32>
    %c0_55 = arith.constant 0 : index
    %c0_56 = arith.constant 0 : index
    %52 = vector.load %arg12[%c0_55, %c0_56] : memref<288x128xf32, #tpu.memory_space<vmem>>, vector<288x128xf32>
    %53 = arith.addf %52, %51 : vector<288x128xf32>
    %c0_57 = arith.constant 0 : index
    %c0_58 = arith.constant 0 : index
    %54 = vector.load %arg12[%c0_57, %c0_58] : memref<288x128xf32, #tpu.memory_space<vmem>>, vector<288x128xf32>
    tpu.vector_store %arg12[%c0_57, %c0_58], %53 {strides = array<i32>} : memref<288x128xf32, #tpu.memory_space<vmem>>, vector<288x128xf32>,
    %c41 = arith.constant 41 : index
    %c0_59 = arith.constant 0 : index
    %55 = vector.load %arg11[%c41, %c0_59] : memref<336x4xf32, #tpu.memory_space<vmem>>, vector<288x4xf32>
    %c6_60 = arith.constant 6 : index
    %c0_61 = arith.constant 0 : index
    %c0_62 = arith.constant 0 : index
    %56 = vector.load %arg2[%c6_60, %c0_61, %c0_62] : memref<9x4x128xf32, #tpu.memory_space<vmem>>, vector<1x4x128xf32>
    %57 = vector.shape_cast %56 : vector<1x4x128xf32> to vector<4x128xf32>
    %cst_63 = arith.constant dense<0.000000e+00> : vector<288x128xf32>
    %58 = tpu.matmul %55, %57, %cst_63 {dimension_numbers = #tpu.dot_dimension_numbers<[1], [0], [0], [1], [0, 0, 1, 1], [], []>} : vector<288x4xf32>, vector<4x128xf32>, vector<288x128xf32> -> vector<288x128xf32>
    %c0_64 = arith.constant 0 : index
    %c0_65 = arith.constant 0 : index
    %59 = vector.load %arg12[%c0_64, %c0_65] : memref<288x128xf32, #tpu.memory_space<vmem>>, vector<288x128xf32>
    %60 = arith.addf %59, %58 : vector<288x128xf32>
    %c0_66 = arith.constant 0 : index
    %c0_67 = arith.constant 0 : index
    %61 = vector.load %arg12[%c0_66, %c0_67] : memref<288x128xf32, #tpu.memory_space<vmem>>, vector<288x128xf32>
    tpu.vector_store %arg12[%c0_66, %c0_67], %60 {strides = array<i32>} : memref<288x128xf32, #tpu.memory_space<vmem>>, vector<288x128xf32>,
    %c42 = arith.constant 42 : index
    %c0_68 = arith.constant 0 : index
    %62 = vector.load %arg11[%c42, %c0_68] : memref<336x4xf32, #tpu.memory_space<vmem>>, vector<288x4xf32>
    %c7_69 = arith.constant 7 : index
    %c0_70 = arith.constant 0 : index
    %c0_71 = arith.constant 0 : index
    %63 = vector.load %arg2[%c7_69, %c0_70, %c0_71] : memref<9x4x128xf32, #tpu.memory_space<vmem>>, vector<1x4x128xf32>
    %64 = vector.shape_cast %63 : vector<1x4x128xf32> to vector<4x128xf32>
    %cst_72 = arith.constant dense<0.000000e+00> : vector<288x128xf32>
    %65 = tpu.matmul %62, %64, %cst_72 {dimension_numbers = #tpu.dot_dimension_numbers<[1], [0], [0], [1], [0, 0, 1, 1], [], []>} : vector<288x4xf32>, vector<4x128xf32>, vector<288x128xf32> -> vector<288x128xf32>
    %c0_73 = arith.constant 0 : index
    %c0_74 = arith.constant 0 : index
    %66 = vector.load %arg12[%c0_73, %c0_74] : memref<288x128xf32, #tpu.memory_space<vmem>>, vector<288x128xf32>
    %67 = arith.addf %66, %65 : vector<288x128xf32>
    %c0_75 = arith.constant 0 : index
    %c0_76 = arith.constant 0 : index
    %68 = vector.load %arg12[%c0_75, %c0_76] : memref<288x128xf32, #tpu.memory_space<vmem>>, vector<288x128xf32>
    tpu.vector_store %arg12[%c0_75, %c0_76], %67 {strides = array<i32>} : memref<288x128xf32, #tpu.memory_space<vmem>>, vector<288x128xf32>,
    %c43 = arith.constant 43 : index
    %c0_77 = arith.constant 0 : index
    %69 = vector.load %arg11[%c43, %c0_77] : memref<336x4xf32, #tpu.memory_space<vmem>>, vector<288x4xf32>
    %c8 = arith.constant 8 : index
    %c0_78 = arith.constant 0 : index
    %c0_79 = arith.constant 0 : index
    %70 = vector.load %arg2[%c8, %c0_78, %c0_79] : memref<9x4x128xf32, #tpu.memory_space<vmem>>, vector<1x4x128xf32>
    %71 = vector.shape_cast %70 : vector<1x4x128xf32> to vector<4x128xf32>
    %cst_80 = arith.constant dense<0.000000e+00> : vector<288x128xf32>
    %72 = tpu.matmul %69, %71, %cst_80 {dimension_numbers = #tpu.dot_dimension_numbers<[1], [0], [0], [1], [0, 0, 1, 1], [], []>} : vector<288x4xf32>, vector<4x128xf32>, vector<288x128xf32> -> vector<288x128xf32>
    %c0_81 = arith.constant 0 : index
    %c0_82 = arith.constant 0 : index
    %73 = vector.load %arg12[%c0_81, %c0_82] : memref<288x128xf32, #tpu.memory_space<vmem>>, vector<288x128xf32>
    %74 = arith.addf %73, %72 : vector<288x128xf32>
    %c0_83 = arith.constant 0 : index
    %c0_84 = arith.constant 0 : index
    %75 = vector.load %arg12[%c0_83, %c0_84] : memref<288x128xf32, #tpu.memory_space<vmem>>, vector<288x128xf32>
    tpu.vector_store %arg12[%c0_83, %c0_84], %74 {strides = array<i32>} : memref<288x128xf32, #tpu.memory_space<vmem>>, vector<288x128xf32>,
    %c0_85 = arith.constant 0 : index
    %c0_86 = arith.constant 0 : index
    %76 = vector.load %arg12[%c0_85, %c0_86] : memref<288x128xf32, #tpu.memory_space<vmem>>, vector<288x128xf32>
    %c0_87 = arith.constant 0 : index
    %c0_88 = arith.constant 0 : index
    %77 = vector.load %arg7[%c0_87, %c0_88] : memref<288x1xf32, #tpu.memory_space<vmem>>, vector<288x1xf32>
    %78 = vector.broadcast %77 : vector<288x1xf32> to vector<288x128xf32>
    %79 = arith.mulf %76, %78 : vector<288x128xf32>
    %cst_89 = arith.constant dense<0.000000e+00> : vector<128xf32>
    %80 = vector.multi_reduction <add>, %79, %cst_89 [0] : vector<288x128xf32> to vector<128xf32>
    %81 = vector.shape_cast %80 : vector<128xf32> to vector<1x128xf32>
    %c0_90 = arith.constant 0 : index
    %c0_91 = arith.constant 0 : index
    %c0_92 = arith.constant 0 : index
    %82 = vector.load %arg9[%c0_90, %c0_91, %c0_92] : memref<1x1x128xf32, #tpu.memory_space<vmem>>, vector<1x1x128xf32>
    %83 = vector.shape_cast %82 : vector<1x1x128xf32> to vector<1x128xf32>
    %84 = vector.shape_cast %81 : vector<1x128xf32> to vector<1x1x128xf32>
    tpu.vector_store %arg9[%c0_90, %c0_91, %c0_92], %84 {strides = array<i32>} : memref<1x1x128xf32, #tpu.memory_space<vmem>>, vector<1x1x128xf32>,
    %85 = arith.mulf %79, %79 : vector<288x128xf32>
    %cst_93 = arith.constant dense<0.000000e+00> : vector<128xf32>
    %86 = vector.multi_reduction <add>, %85, %cst_93 [0] : vector<288x128xf32> to vector<128xf32>
    %87 = vector.shape_cast %86 : vector<128xf32> to vector<1x128xf32>
    %c0_94 = arith.constant 0 : index
    %c0_95 = arith.constant 0 : index
    %c0_96 = arith.constant 0 : index
    %88 = vector.load %arg10[%c0_94, %c0_95, %c0_96] : memref<1x1x128xf32, #tpu.memory_space<vmem>>, vector<1x1x128xf32>
    %89 = vector.shape_cast %88 : vector<1x1x128xf32> to vector<1x128xf32>
    %90 = vector.shape_cast %87 : vector<1x128xf32> to vector<1x1x128xf32>
    tpu.vector_store %arg10[%c0_94, %c0_95, %c0_96], %90 {strides = array<i32>} : memref<1x1x128xf32, #tpu.memory_space<vmem>>, vector<1x1x128xf32>,
    %cst_97 = arith.constant 0.000000e+00 : f32
    %91 = vector.broadcast %cst_97 : f32 to vector<24x128xf32>
    %c0_98 = arith.constant 0 : index
    %c0_99 = arith.constant 0 : index
    %c0_100 = arith.constant 0 : index
    %92 = vector.load %arg8[%c0_98, %c0_99, %c0_100] : memref<1x336x128xf32, #tpu.memory_space<vmem>>, vector<1x24x128xf32>
    %93 = vector.shape_cast %92 : vector<1x24x128xf32> to vector<24x128xf32>
    %94 = vector.shape_cast %91 : vector<24x128xf32> to vector<1x24x128xf32>
    tpu.vector_store %arg8[%c0_98, %c0_99, %c0_100], %94 {strides = array<i32>} : memref<1x336x128xf32, #tpu.memory_space<vmem>>, vector<1x24x128xf32>,
    %c0_101 = arith.constant 0 : index
    %c24_102 = arith.constant 24 : index
    %c0_103 = arith.constant 0 : index
    %95 = vector.load %arg8[%c0_101, %c24_102, %c0_103] : memref<1x336x128xf32, #tpu.memory_space<vmem>>, vector<1x288x128xf32>
    %96 = vector.shape_cast %95 : vector<1x288x128xf32> to vector<288x128xf32>
    %97 = vector.shape_cast %79 : vector<288x128xf32> to vector<1x288x128xf32>
    tpu.vector_store %arg8[%c0_101, %c24_102, %c0_103], %97 {strides = array<i32>} : memref<1x336x128xf32, #tpu.memory_space<vmem>>, vector<1x288x128xf32>,
    %cst_104 = arith.constant 0.000000e+00 : f32
    %98 = vector.broadcast %cst_104 : f32 to vector<24x128xf32>
    %c0_105 = arith.constant 0 : index
    %c312 = arith.constant 312 : index
    %c0_106 = arith.constant 0 : index
    %99 = vector.load %arg8[%c0_105, %c312, %c0_106] : memref<1x336x128xf32, #tpu.memory_space<vmem>>, vector<1x24x128xf32>
    %100 = vector.shape_cast %99 : vector<1x24x128xf32> to vector<24x128xf32>
    %101 = vector.shape_cast %98 : vector<24x128xf32> to vector<1x24x128xf32>
    tpu.vector_store %arg8[%c0_105, %c312, %c0_106], %101 {strides = array<i32>} : memref<1x336x128xf32, #tpu.memory_space<vmem>>, vector<1x24x128xf32>,
    return
  }
  func.func @transform_0(%arg0: i32) -> (i32, i32, i32) {
    %c0_i32 = arith.constant 0 : i32
    %c0_i32_0 = arith.constant 0 : i32
    %c0_i32_1 = arith.constant 0 : i32
    return %arg0, %c0_i32, %c0_i32_0 : i32, i32, i32
  }
  func.func @transform_1(%arg0: i32) -> (i32, i32, i32) {
    %c0_i32 = arith.constant 0 : i32
    %c0_i32_0 = arith.constant 0 : i32
    %c0_i32_1 = arith.constant 0 : i32
    %c0_i32_2 = arith.constant 0 : i32
    return %c0_i32, %c0_i32_0, %c0_i32_1 : i32, i32, i32
  }
  func.func @transform_2(%arg0: i32) -> (i32, i32) {
    %c0_i32 = arith.constant 0 : i32
    %c0_i32_0 = arith.constant 0 : i32
    %c0_i32_1 = arith.constant 0 : i32
    return %c0_i32, %c0_i32_0 : i32, i32
  }
  func.func @transform_3(%arg0: i32) -> (i32, i32) {
    %c0_i32 = arith.constant 0 : i32
    %c0_i32_0 = arith.constant 0 : i32
    %c0_i32_1 = arith.constant 0 : i32
    return %c0_i32, %c0_i32_0 : i32, i32
  }
  func.func @transform_4(%arg0: i32) -> (i32, i32) {
    %c0_i32 = arith.constant 0 : i32
    %c0_i32_0 = arith.constant 0 : i32
    %c0_i32_1 = arith.constant 0 : i32
    return %c0_i32, %c0_i32_0 : i32, i32
  }
  func.func @transform_5(%arg0: i32) -> (i32, i32) {
    %c0_i32 = arith.constant 0 : i32
    %c0_i32_0 = arith.constant 0 : i32
    %c0_i32_1 = arith.constant 0 : i32
    return %c0_i32, %c0_i32_0 : i32, i32
  }
  func.func @transform_6(%arg0: i32) -> (i32, i32) {
    %c0_i32 = arith.constant 0 : i32
    %c0_i32_0 = arith.constant 0 : i32
    %c0_i32_1 = arith.constant 0 : i32
    return %c0_i32, %c0_i32_0 : i32, i32
  }
  func.func @transform_7(%arg0: i32) -> (i32, i32, i32) {
    %c0_i32 = arith.constant 0 : i32
    %c0_i32_0 = arith.constant 0 : i32
    %c0_i32_1 = arith.constant 0 : i32
    return %arg0, %c0_i32, %c0_i32_0 : i32, i32, i32
  }
  func.func @transform_8(%arg0: i32) -> (i32, i32, i32) {
    %c0_i32 = arith.constant 0 : i32
    %c0_i32_0 = arith.constant 0 : i32
    %c0_i32_1 = arith.constant 0 : i32
    return %arg0, %c0_i32, %c0_i32_0 : i32, i32, i32
  }
  func.func @transform_9(%arg0: i32) -> (i32, i32, i32) {
    %c0_i32 = arith.constant 0 : i32
    %c0_i32_0 = arith.constant 0 : i32
    %c0_i32_1 = arith.constant 0 : i32
    return %arg0, %c0_i32, %c0_i32_0 : i32, i32, i32
  }
}

module attributes {stable_mosaic.version = 11 : i64} {
  func.func @kernel(%arg0: i32, %arg1: memref<1x336x128xf32, #tpu.memory_space<vmem>>, %arg2: memref<9x128x128xf32, #tpu.memory_space<vmem>>, %arg3: memref<1x128xf32, #tpu.memory_space<vmem>>, %arg4: memref<1x128xf32, #tpu.memory_space<vmem>>, %arg5: memref<1x128xf32, #tpu.memory_space<vmem>>, %arg6: memref<336x1xf32, #tpu.memory_space<vmem>>, %arg7: memref<288x1xf32, #tpu.memory_space<vmem>>, %arg8: memref<1x336x128xf32, #tpu.memory_space<vmem>>, %arg9: memref<1x1x128xf32, #tpu.memory_space<vmem>>, %arg10: memref<1x1x128xf32, #tpu.memory_space<vmem>>, %arg11: memref<336x128xf32, #tpu.memory_space<vmem>>, %arg12: memref<288x128xf32, #tpu.memory_space<vmem>>) attributes {dimension_semantics = [#tpu.dimension_semantics<parallel>], iteration_bounds = array<i64: 2>, scalar_prefetch = 0 : i64, scratch_operands = 2 : i64, tpu.core_type = #tpu.core_type<tc>, window_params = [{transform_indices = @transform_0, window_bounds = array<i64: 1, 336, 128>}, {pipeline_mode = #tpu.pipeline_mode<synchronous>, transform_indices = @transform_1, window_bounds = array<i64: 9, 128, 128>}, {pipeline_mode = #tpu.pipeline_mode<synchronous>, transform_indices = @transform_2, window_bounds = array<i64: 1, 128>}, {pipeline_mode = #tpu.pipeline_mode<synchronous>, transform_indices = @transform_3, window_bounds = array<i64: 1, 128>}, {pipeline_mode = #tpu.pipeline_mode<synchronous>, transform_indices = @transform_4, window_bounds = array<i64: 1, 128>}, {pipeline_mode = #tpu.pipeline_mode<synchronous>, transform_indices = @transform_5, window_bounds = array<i64: 336, 1>}, {pipeline_mode = #tpu.pipeline_mode<synchronous>, transform_indices = @transform_6, window_bounds = array<i64: 288, 1>}, {transform_indices = @transform_7, window_bounds = array<i64: 1, 336, 128>}, {transform_indices = @transform_8, window_bounds = array<i64: 1, 1, 128>}, {transform_indices = @transform_9, window_bounds = array<i64: 1, 1, 128>}]} {
    %c0 = arith.constant 0 : index
    %c0_0 = arith.constant 0 : index
    %c0_1 = arith.constant 0 : index
    %0 = vector.load %arg1[%c0, %c0_0, %c0_1] : memref<1x336x128xf32, #tpu.memory_space<vmem>>, vector<1x336x128xf32>
    %1 = vector.shape_cast %0 : vector<1x336x128xf32> to vector<336x128xf32>
    %c0_2 = arith.constant 0 : index
    %c0_3 = arith.constant 0 : index
    %2 = vector.load %arg4[%c0_2, %c0_3] : memref<1x128xf32, #tpu.memory_space<vmem>>, vector<1x128xf32>
    %3 = vector.broadcast %2 : vector<1x128xf32> to vector<336x128xf32>
    %4 = arith.mulf %1, %3 : vector<336x128xf32>
    %c0_4 = arith.constant 0 : index
    %c0_5 = arith.constant 0 : index
    %5 = vector.load %arg5[%c0_4, %c0_5] : memref<1x128xf32, #tpu.memory_space<vmem>>, vector<1x128xf32>
    %c0_6 = arith.constant 0 : index
    %c0_7 = arith.constant 0 : index
    %6 = vector.load %arg6[%c0_6, %c0_7] : memref<336x1xf32, #tpu.memory_space<vmem>>, vector<336x1xf32>
    %7 = vector.broadcast %5 : vector<1x128xf32> to vector<336x128xf32>
    %8 = vector.broadcast %6 : vector<336x1xf32> to vector<336x128xf32>
    %9 = arith.mulf %7, %8 : vector<336x128xf32>
    %10 = arith.addf %4, %9 : vector<336x128xf32>
    %c0_8 = arith.constant 0 : index
    %c0_9 = arith.constant 0 : index
    %11 = vector.load %arg11[%c0_8, %c0_9] : memref<336x128xf32, #tpu.memory_space<vmem>>, vector<336x128xf32>
    tpu.vector_store %arg11[%c0_8, %c0_9], %10 {strides = array<i32>} : memref<336x128xf32, #tpu.memory_space<vmem>>, vector<336x128xf32>,
    %c5 = arith.constant 5 : index
    %c0_10 = arith.constant 0 : index
    %12 = vector.load %arg11[%c5, %c0_10] : memref<336x128xf32, #tpu.memory_space<vmem>>, vector<288x128xf32>
    %c0_11 = arith.constant 0 : index
    %c0_12 = arith.constant 0 : index
    %c0_13 = arith.constant 0 : index
    %13 = vector.load %arg2[%c0_11, %c0_12, %c0_13] : memref<9x128x128xf32, #tpu.memory_space<vmem>>, vector<1x128x128xf32>
    %14 = vector.shape_cast %13 : vector<1x128x128xf32> to vector<128x128xf32>
    %cst = arith.constant dense<0.000000e+00> : vector<288x128xf32>
    %15 = tpu.matmul %12, %14, %cst {dimension_numbers = #tpu.dot_dimension_numbers<[1], [0], [0], [1], [0, 0, 1, 1], [], []>} : vector<288x128xf32>, vector<128x128xf32>, vector<288x128xf32> -> vector<288x128xf32>
    %c0_14 = arith.constant 0 : index
    %c0_15 = arith.constant 0 : index
    %16 = vector.load %arg3[%c0_14, %c0_15] : memref<1x128xf32, #tpu.memory_space<vmem>>, vector<1x128xf32>
    %17 = vector.broadcast %16 : vector<1x128xf32> to vector<288x128xf32>
    %18 = arith.addf %15, %17 : vector<288x128xf32>
    %c0_16 = arith.constant 0 : index
    %c0_17 = arith.constant 0 : index
    %19 = vector.load %arg12[%c0_16, %c0_17] : memref<288x128xf32, #tpu.memory_space<vmem>>, vector<288x128xf32>
    tpu.vector_store %arg12[%c0_16, %c0_17], %18 {strides = array<i32>} : memref<288x128xf32, #tpu.memory_space<vmem>>, vector<288x128xf32>,
    %c6 = arith.constant 6 : index
    %c0_18 = arith.constant 0 : index
    %20 = vector.load %arg11[%c6, %c0_18] : memref<336x128xf32, #tpu.memory_space<vmem>>, vector<288x128xf32>
    %c1 = arith.constant 1 : index
    %c0_19 = arith.constant 0 : index
    %c0_20 = arith.constant 0 : index
    %21 = vector.load %arg2[%c1, %c0_19, %c0_20] : memref<9x128x128xf32, #tpu.memory_space<vmem>>, vector<1x128x128xf32>
    %22 = vector.shape_cast %21 : vector<1x128x128xf32> to vector<128x128xf32>
    %cst_21 = arith.constant dense<0.000000e+00> : vector<288x128xf32>
    %23 = tpu.matmul %20, %22, %cst_21 {dimension_numbers = #tpu.dot_dimension_numbers<[1], [0], [0], [1], [0, 0, 1, 1], [], []>} : vector<288x128xf32>, vector<128x128xf32>, vector<288x128xf32> -> vector<288x128xf32>
    %c0_22 = arith.constant 0 : index
    %c0_23 = arith.constant 0 : index
    %24 = vector.load %arg12[%c0_22, %c0_23] : memref<288x128xf32, #tpu.memory_space<vmem>>, vector<288x128xf32>
    %25 = arith.addf %24, %23 : vector<288x128xf32>
    %c0_24 = arith.constant 0 : index
    %c0_25 = arith.constant 0 : index
    %26 = vector.load %arg12[%c0_24, %c0_25] : memref<288x128xf32, #tpu.memory_space<vmem>>, vector<288x128xf32>
    tpu.vector_store %arg12[%c0_24, %c0_25], %25 {strides = array<i32>} : memref<288x128xf32, #tpu.memory_space<vmem>>, vector<288x128xf32>,
    %c7 = arith.constant 7 : index
    %c0_26 = arith.constant 0 : index
    %27 = vector.load %arg11[%c7, %c0_26] : memref<336x128xf32, #tpu.memory_space<vmem>>, vector<288x128xf32>
    %c2 = arith.constant 2 : index
    %c0_27 = arith.constant 0 : index
    %c0_28 = arith.constant 0 : index
    %28 = vector.load %arg2[%c2, %c0_27, %c0_28] : memref<9x128x128xf32, #tpu.memory_space<vmem>>, vector<1x128x128xf32>
    %29 = vector.shape_cast %28 : vector<1x128x128xf32> to vector<128x128xf32>
    %cst_29 = arith.constant dense<0.000000e+00> : vector<288x128xf32>
    %30 = tpu.matmul %27, %29, %cst_29 {dimension_numbers = #tpu.dot_dimension_numbers<[1], [0], [0], [1], [0, 0, 1, 1], [], []>} : vector<288x128xf32>, vector<128x128xf32>, vector<288x128xf32> -> vector<288x128xf32>
    %c0_30 = arith.constant 0 : index
    %c0_31 = arith.constant 0 : index
    %31 = vector.load %arg12[%c0_30, %c0_31] : memref<288x128xf32, #tpu.memory_space<vmem>>, vector<288x128xf32>
    %32 = arith.addf %31, %30 : vector<288x128xf32>
    %c0_32 = arith.constant 0 : index
    %c0_33 = arith.constant 0 : index
    %33 = vector.load %arg12[%c0_32, %c0_33] : memref<288x128xf32, #tpu.memory_space<vmem>>, vector<288x128xf32>
    tpu.vector_store %arg12[%c0_32, %c0_33], %32 {strides = array<i32>} : memref<288x128xf32, #tpu.memory_space<vmem>>, vector<288x128xf32>,
    %c23 = arith.constant 23 : index
    %c0_34 = arith.constant 0 : index
    %34 = vector.load %arg11[%c23, %c0_34] : memref<336x128xf32, #tpu.memory_space<vmem>>, vector<288x128xf32>
    %c3 = arith.constant 3 : index
    %c0_35 = arith.constant 0 : index
    %c0_36 = arith.constant 0 : index
    %35 = vector.load %arg2[%c3, %c0_35, %c0_36] : memref<9x128x128xf32, #tpu.memory_space<vmem>>, vector<1x128x128xf32>
    %36 = vector.shape_cast %35 : vector<1x128x128xf32> to vector<128x128xf32>
    %cst_37 = arith.constant dense<0.000000e+00> : vector<288x128xf32>
    %37 = tpu.matmul %34, %36, %cst_37 {dimension_numbers = #tpu.dot_dimension_numbers<[1], [0], [0], [1], [0, 0, 1, 1], [], []>} : vector<288x128xf32>, vector<128x128xf32>, vector<288x128xf32> -> vector<288x128xf32>
    %c0_38 = arith.constant 0 : index
    %c0_39 = arith.constant 0 : index
    %38 = vector.load %arg12[%c0_38, %c0_39] : memref<288x128xf32, #tpu.memory_space<vmem>>, vector<288x128xf32>
    %39 = arith.addf %38, %37 : vector<288x128xf32>
    %c0_40 = arith.constant 0 : index
    %c0_41 = arith.constant 0 : index
    %40 = vector.load %arg12[%c0_40, %c0_41] : memref<288x128xf32, #tpu.memory_space<vmem>>, vector<288x128xf32>
    tpu.vector_store %arg12[%c0_40, %c0_41], %39 {strides = array<i32>} : memref<288x128xf32, #tpu.memory_space<vmem>>, vector<288x128xf32>,
    %c24 = arith.constant 24 : index
    %c0_42 = arith.constant 0 : index
    %41 = vector.load %arg11[%c24, %c0_42] : memref<336x128xf32, #tpu.memory_space<vmem>>, vector<288x128xf32>
    %c4 = arith.constant 4 : index
    %c0_43 = arith.constant 0 : index
    %c0_44 = arith.constant 0 : index
    %42 = vector.load %arg2[%c4, %c0_43, %c0_44] : memref<9x128x128xf32, #tpu.memory_space<vmem>>, vector<1x128x128xf32>
    %43 = vector.shape_cast %42 : vector<1x128x128xf32> to vector<128x128xf32>
    %cst_45 = arith.constant dense<0.000000e+00> : vector<288x128xf32>
    %44 = tpu.matmul %41, %43, %cst_45 {dimension_numbers = #tpu.dot_dimension_numbers<[1], [0], [0], [1], [0, 0, 1, 1], [], []>} : vector<288x128xf32>, vector<128x128xf32>, vector<288x128xf32> -> vector<288x128xf32>
    %c0_46 = arith.constant 0 : index
    %c0_47 = arith.constant 0 : index
    %45 = vector.load %arg12[%c0_46, %c0_47] : memref<288x128xf32, #tpu.memory_space<vmem>>, vector<288x128xf32>
    %46 = arith.addf %45, %44 : vector<288x128xf32>
    %c0_48 = arith.constant 0 : index
    %c0_49 = arith.constant 0 : index
    %47 = vector.load %arg12[%c0_48, %c0_49] : memref<288x128xf32, #tpu.memory_space<vmem>>, vector<288x128xf32>
    tpu.vector_store %arg12[%c0_48, %c0_49], %46 {strides = array<i32>} : memref<288x128xf32, #tpu.memory_space<vmem>>, vector<288x128xf32>,
    %c25 = arith.constant 25 : index
    %c0_50 = arith.constant 0 : index
    %48 = vector.load %arg11[%c25, %c0_50] : memref<336x128xf32, #tpu.memory_space<vmem>>, vector<288x128xf32>
    %c5_51 = arith.constant 5 : index
    %c0_52 = arith.constant 0 : index
    %c0_53 = arith.constant 0 : index
    %49 = vector.load %arg2[%c5_51, %c0_52, %c0_53] : memref<9x128x128xf32, #tpu.memory_space<vmem>>, vector<1x128x128xf32>
    %50 = vector.shape_cast %49 : vector<1x128x128xf32> to vector<128x128xf32>
    %cst_54 = arith.constant dense<0.000000e+00> : vector<288x128xf32>
    %51 = tpu.matmul %48, %50, %cst_54 {dimension_numbers = #tpu.dot_dimension_numbers<[1], [0], [0], [1], [0, 0, 1, 1], [], []>} : vector<288x128xf32>, vector<128x128xf32>, vector<288x128xf32> -> vector<288x128xf32>
    %c0_55 = arith.constant 0 : index
    %c0_56 = arith.constant 0 : index
    %52 = vector.load %arg12[%c0_55, %c0_56] : memref<288x128xf32, #tpu.memory_space<vmem>>, vector<288x128xf32>
    %53 = arith.addf %52, %51 : vector<288x128xf32>
    %c0_57 = arith.constant 0 : index
    %c0_58 = arith.constant 0 : index
    %54 = vector.load %arg12[%c0_57, %c0_58] : memref<288x128xf32, #tpu.memory_space<vmem>>, vector<288x128xf32>
    tpu.vector_store %arg12[%c0_57, %c0_58], %53 {strides = array<i32>} : memref<288x128xf32, #tpu.memory_space<vmem>>, vector<288x128xf32>,
    %c41 = arith.constant 41 : index
    %c0_59 = arith.constant 0 : index
    %55 = vector.load %arg11[%c41, %c0_59] : memref<336x128xf32, #tpu.memory_space<vmem>>, vector<288x128xf32>
    %c6_60 = arith.constant 6 : index
    %c0_61 = arith.constant 0 : index
    %c0_62 = arith.constant 0 : index
    %56 = vector.load %arg2[%c6_60, %c0_61, %c0_62] : memref<9x128x128xf32, #tpu.memory_space<vmem>>, vector<1x128x128xf32>
    %57 = vector.shape_cast %56 : vector<1x128x128xf32> to vector<128x128xf32>
    %cst_63 = arith.constant dense<0.000000e+00> : vector<288x128xf32>
    %58 = tpu.matmul %55, %57, %cst_63 {dimension_numbers = #tpu.dot_dimension_numbers<[1], [0], [0], [1], [0, 0, 1, 1], [], []>} : vector<288x128xf32>, vector<128x128xf32>, vector<288x128xf32> -> vector<288x128xf32>
    %c0_64 = arith.constant 0 : index
    %c0_65 = arith.constant 0 : index
    %59 = vector.load %arg12[%c0_64, %c0_65] : memref<288x128xf32, #tpu.memory_space<vmem>>, vector<288x128xf32>
    %60 = arith.addf %59, %58 : vector<288x128xf32>
    %c0_66 = arith.constant 0 : index
    %c0_67 = arith.constant 0 : index
    %61 = vector.load %arg12[%c0_66, %c0_67] : memref<288x128xf32, #tpu.memory_space<vmem>>, vector<288x128xf32>
    tpu.vector_store %arg12[%c0_66, %c0_67], %60 {strides = array<i32>} : memref<288x128xf32, #tpu.memory_space<vmem>>, vector<288x128xf32>,
    %c42 = arith.constant 42 : index
    %c0_68 = arith.constant 0 : index
    %62 = vector.load %arg11[%c42, %c0_68] : memref<336x128xf32, #tpu.memory_space<vmem>>, vector<288x128xf32>
    %c7_69 = arith.constant 7 : index
    %c0_70 = arith.constant 0 : index
    %c0_71 = arith.constant 0 : index
    %63 = vector.load %arg2[%c7_69, %c0_70, %c0_71] : memref<9x128x128xf32, #tpu.memory_space<vmem>>, vector<1x128x128xf32>
    %64 = vector.shape_cast %63 : vector<1x128x128xf32> to vector<128x128xf32>
    %cst_72 = arith.constant dense<0.000000e+00> : vector<288x128xf32>
    %65 = tpu.matmul %62, %64, %cst_72 {dimension_numbers = #tpu.dot_dimension_numbers<[1], [0], [0], [1], [0, 0, 1, 1], [], []>} : vector<288x128xf32>, vector<128x128xf32>, vector<288x128xf32> -> vector<288x128xf32>
    %c0_73 = arith.constant 0 : index
    %c0_74 = arith.constant 0 : index
    %66 = vector.load %arg12[%c0_73, %c0_74] : memref<288x128xf32, #tpu.memory_space<vmem>>, vector<288x128xf32>
    %67 = arith.addf %66, %65 : vector<288x128xf32>
    %c0_75 = arith.constant 0 : index
    %c0_76 = arith.constant 0 : index
    %68 = vector.load %arg12[%c0_75, %c0_76] : memref<288x128xf32, #tpu.memory_space<vmem>>, vector<288x128xf32>
    tpu.vector_store %arg12[%c0_75, %c0_76], %67 {strides = array<i32>} : memref<288x128xf32, #tpu.memory_space<vmem>>, vector<288x128xf32>,
    %c43 = arith.constant 43 : index
    %c0_77 = arith.constant 0 : index
    %69 = vector.load %arg11[%c43, %c0_77] : memref<336x128xf32, #tpu.memory_space<vmem>>, vector<288x128xf32>
    %c8 = arith.constant 8 : index
    %c0_78 = arith.constant 0 : index
    %c0_79 = arith.constant 0 : index
    %70 = vector.load %arg2[%c8, %c0_78, %c0_79] : memref<9x128x128xf32, #tpu.memory_space<vmem>>, vector<1x128x128xf32>
    %71 = vector.shape_cast %70 : vector<1x128x128xf32> to vector<128x128xf32>
    %cst_80 = arith.constant dense<0.000000e+00> : vector<288x128xf32>
    %72 = tpu.matmul %69, %71, %cst_80 {dimension_numbers = #tpu.dot_dimension_numbers<[1], [0], [0], [1], [0, 0, 1, 1], [], []>} : vector<288x128xf32>, vector<128x128xf32>, vector<288x128xf32> -> vector<288x128xf32>
    %c0_81 = arith.constant 0 : index
    %c0_82 = arith.constant 0 : index
    %73 = vector.load %arg12[%c0_81, %c0_82] : memref<288x128xf32, #tpu.memory_space<vmem>>, vector<288x128xf32>
    %74 = arith.addf %73, %72 : vector<288x128xf32>
    %c0_83 = arith.constant 0 : index
    %c0_84 = arith.constant 0 : index
    %75 = vector.load %arg12[%c0_83, %c0_84] : memref<288x128xf32, #tpu.memory_space<vmem>>, vector<288x128xf32>
    tpu.vector_store %arg12[%c0_83, %c0_84], %74 {strides = array<i32>} : memref<288x128xf32, #tpu.memory_space<vmem>>, vector<288x128xf32>,
    %c0_85 = arith.constant 0 : index
    %c0_86 = arith.constant 0 : index
    %76 = vector.load %arg12[%c0_85, %c0_86] : memref<288x128xf32, #tpu.memory_space<vmem>>, vector<288x128xf32>
    %c0_87 = arith.constant 0 : index
    %c0_88 = arith.constant 0 : index
    %77 = vector.load %arg7[%c0_87, %c0_88] : memref<288x1xf32, #tpu.memory_space<vmem>>, vector<288x1xf32>
    %78 = vector.broadcast %77 : vector<288x1xf32> to vector<288x128xf32>
    %79 = arith.mulf %76, %78 : vector<288x128xf32>
    %cst_89 = arith.constant dense<0.000000e+00> : vector<128xf32>
    %80 = vector.multi_reduction <add>, %79, %cst_89 [0] : vector<288x128xf32> to vector<128xf32>
    %81 = vector.shape_cast %80 : vector<128xf32> to vector<1x128xf32>
    %c0_90 = arith.constant 0 : index
    %c0_91 = arith.constant 0 : index
    %c0_92 = arith.constant 0 : index
    %82 = vector.load %arg9[%c0_90, %c0_91, %c0_92] : memref<1x1x128xf32, #tpu.memory_space<vmem>>, vector<1x1x128xf32>
    %83 = vector.shape_cast %82 : vector<1x1x128xf32> to vector<1x128xf32>
    %84 = vector.shape_cast %81 : vector<1x128xf32> to vector<1x1x128xf32>
    tpu.vector_store %arg9[%c0_90, %c0_91, %c0_92], %84 {strides = array<i32>} : memref<1x1x128xf32, #tpu.memory_space<vmem>>, vector<1x1x128xf32>,
    %85 = arith.mulf %79, %79 : vector<288x128xf32>
    %cst_93 = arith.constant dense<0.000000e+00> : vector<128xf32>
    %86 = vector.multi_reduction <add>, %85, %cst_93 [0] : vector<288x128xf32> to vector<128xf32>
    %87 = vector.shape_cast %86 : vector<128xf32> to vector<1x128xf32>
    %c0_94 = arith.constant 0 : index
    %c0_95 = arith.constant 0 : index
    %c0_96 = arith.constant 0 : index
    %88 = vector.load %arg10[%c0_94, %c0_95, %c0_96] : memref<1x1x128xf32, #tpu.memory_space<vmem>>, vector<1x1x128xf32>
    %89 = vector.shape_cast %88 : vector<1x1x128xf32> to vector<1x128xf32>
    %90 = vector.shape_cast %87 : vector<1x128xf32> to vector<1x1x128xf32>
    tpu.vector_store %arg10[%c0_94, %c0_95, %c0_96], %90 {strides = array<i32>} : memref<1x1x128xf32, #tpu.memory_space<vmem>>, vector<1x1x128xf32>,
    %cst_97 = arith.constant 0.000000e+00 : f32
    %91 = vector.broadcast %cst_97 : f32 to vector<24x128xf32>
    %c0_98 = arith.constant 0 : index
    %c0_99 = arith.constant 0 : index
    %c0_100 = arith.constant 0 : index
    %92 = vector.load %arg8[%c0_98, %c0_99, %c0_100] : memref<1x336x128xf32, #tpu.memory_space<vmem>>, vector<1x24x128xf32>
    %93 = vector.shape_cast %92 : vector<1x24x128xf32> to vector<24x128xf32>
    %94 = vector.shape_cast %91 : vector<24x128xf32> to vector<1x24x128xf32>
    tpu.vector_store %arg8[%c0_98, %c0_99, %c0_100], %94 {strides = array<i32>} : memref<1x336x128xf32, #tpu.memory_space<vmem>>, vector<1x24x128xf32>,
    %c0_101 = arith.constant 0 : index
    %c24_102 = arith.constant 24 : index
    %c0_103 = arith.constant 0 : index
    %95 = vector.load %arg8[%c0_101, %c24_102, %c0_103] : memref<1x336x128xf32, #tpu.memory_space<vmem>>, vector<1x288x128xf32>
    %96 = vector.shape_cast %95 : vector<1x288x128xf32> to vector<288x128xf32>
    %97 = vector.shape_cast %79 : vector<288x128xf32> to vector<1x288x128xf32>
    tpu.vector_store %arg8[%c0_101, %c24_102, %c0_103], %97 {strides = array<i32>} : memref<1x336x128xf32, #tpu.memory_space<vmem>>, vector<1x288x128xf32>,
    %cst_104 = arith.constant 0.000000e+00 : f32
    %98 = vector.broadcast %cst_104 : f32 to vector<24x128xf32>
    %c0_105 = arith.constant 0 : index
    %c312 = arith.constant 312 : index
    %c0_106 = arith.constant 0 : index
    %99 = vector.load %arg8[%c0_105, %c312, %c0_106] : memref<1x336x128xf32, #tpu.memory_space<vmem>>, vector<1x24x128xf32>
    %100 = vector.shape_cast %99 : vector<1x24x128xf32> to vector<24x128xf32>
    %101 = vector.shape_cast %98 : vector<24x128xf32> to vector<1x24x128xf32>
    tpu.vector_store %arg8[%c0_105, %c312, %c0_106], %101 {strides = array<i32>} : memref<1x336x128xf32, #tpu.memory_space<vmem>>, vector<1x24x128xf32>,
    return
  }
  func.func @transform_0(%arg0: i32) -> (i32, i32, i32) {
    %c0_i32 = arith.constant 0 : i32
    %c0_i32_0 = arith.constant 0 : i32
    %c0_i32_1 = arith.constant 0 : i32
    return %arg0, %c0_i32, %c0_i32_0 : i32, i32, i32
  }
  func.func @transform_1(%arg0: i32) -> (i32, i32, i32) {
    %c0_i32 = arith.constant 0 : i32
    %c0_i32_0 = arith.constant 0 : i32
    %c0_i32_1 = arith.constant 0 : i32
    %c0_i32_2 = arith.constant 0 : i32
    return %c0_i32, %c0_i32_0, %c0_i32_1 : i32, i32, i32
  }
  func.func @transform_2(%arg0: i32) -> (i32, i32) {
    %c0_i32 = arith.constant 0 : i32
    %c0_i32_0 = arith.constant 0 : i32
    %c0_i32_1 = arith.constant 0 : i32
    return %c0_i32, %c0_i32_0 : i32, i32
  }
  func.func @transform_3(%arg0: i32) -> (i32, i32) {
    %c0_i32 = arith.constant 0 : i32
    %c0_i32_0 = arith.constant 0 : i32
    %c0_i32_1 = arith.constant 0 : i32
    return %c0_i32, %c0_i32_0 : i32, i32
  }
  func.func @transform_4(%arg0: i32) -> (i32, i32) {
    %c0_i32 = arith.constant 0 : i32
    %c0_i32_0 = arith.constant 0 : i32
    %c0_i32_1 = arith.constant 0 : i32
    return %c0_i32, %c0_i32_0 : i32, i32
  }
  func.func @transform_5(%arg0: i32) -> (i32, i32) {
    %c0_i32 = arith.constant 0 : i32
    %c0_i32_0 = arith.constant 0 : i32
    %c0_i32_1 = arith.constant 0 : i32
    return %c0_i32, %c0_i32_0 : i32, i32
  }
  func.func @transform_6(%arg0: i32) -> (i32, i32) {
    %c0_i32 = arith.constant 0 : i32
    %c0_i32_0 = arith.constant 0 : i32
    %c0_i32_1 = arith.constant 0 : i32
    return %c0_i32, %c0_i32_0 : i32, i32
  }
  func.func @transform_7(%arg0: i32) -> (i32, i32, i32) {
    %c0_i32 = arith.constant 0 : i32
    %c0_i32_0 = arith.constant 0 : i32
    %c0_i32_1 = arith.constant 0 : i32
    return %arg0, %c0_i32, %c0_i32_0 : i32, i32, i32
  }
  func.func @transform_8(%arg0: i32) -> (i32, i32, i32) {
    %c0_i32 = arith.constant 0 : i32
    %c0_i32_0 = arith.constant 0 : i32
    %c0_i32_1 = arith.constant 0 : i32
    return %arg0, %c0_i32, %c0_i32_0 : i32, i32, i32
  }
  func.func @transform_9(%arg0: i32) -> (i32, i32, i32) {
    %c0_i32 = arith.constant 0 : i32
    %c0_i32_0 = arith.constant 0 : i32
    %c0_i32_1 = arith.constant 0 : i32
    return %arg0, %c0_i32, %c0_i32_0 : i32, i32, i32
  }
}

module attributes {stable_mosaic.version = 11 : i64} {
  func.func @kernel(%arg0: i32, %arg1: memref<1x336x128xf32, #tpu.memory_space<vmem>>, %arg2: memref<1x128xf32, #tpu.memory_space<vmem>>, %arg3: memref<1x128xf32, #tpu.memory_space<vmem>>, %arg4: memref<1x16x16x4xf32, #tpu.memory_space<vmem>>) attributes {dimension_semantics = [#tpu.dimension_semantics<parallel>], iteration_bounds = array<i64: 2>, scalar_prefetch = 0 : i64, scratch_operands = 0 : i64, tpu.core_type = #tpu.core_type<tc>, window_params = [{transform_indices = @transform_0, window_bounds = array<i64: 1, 336, 128>}, {pipeline_mode = #tpu.pipeline_mode<synchronous>, transform_indices = @transform_1, window_bounds = array<i64: 1, 128>}, {pipeline_mode = #tpu.pipeline_mode<synchronous>, transform_indices = @transform_2, window_bounds = array<i64: 1, 128>}, {transform_indices = @transform_3, window_bounds = array<i64: 1, 16, 16, 4>}]} {
    %c0 = arith.constant 0 : index
    %c0_0 = arith.constant 0 : index
    %0 = vector.load %arg2[%c0, %c0_0] : memref<1x128xf32, #tpu.memory_space<vmem>>, vector<1x4xf32>
    %c0_1 = arith.constant 0 : index
    %c0_2 = arith.constant 0 : index
    %1 = vector.load %arg3[%c0_1, %c0_2] : memref<1x128xf32, #tpu.memory_space<vmem>>, vector<1x4xf32>
    %c0_3 = arith.constant 0 : index
    %c24 = arith.constant 24 : index
    %c0_4 = arith.constant 0 : index
    %2 = vector.load %arg1[%c0_3, %c24, %c0_4] : memref<1x336x128xf32, #tpu.memory_space<vmem>>, vector<1x16x4xf32>
    %3 = vector.shape_cast %2 : vector<1x16x4xf32> to vector<16x4xf32>
    %4 = vector.broadcast %0 : vector<1x4xf32> to vector<16x4xf32>
    %5 = arith.mulf %3, %4 : vector<16x4xf32>
    %6 = vector.broadcast %1 : vector<1x4xf32> to vector<16x4xf32>
    %7 = arith.addf %5, %6 : vector<16x4xf32>
    %c0_5 = arith.constant 0 : index
    %c0_6 = arith.constant 0 : index
    %c0_7 = arith.constant 0 : index
    %c0_8 = arith.constant 0 : index
    %8 = vector.load %arg4[%c0_5, %c0_6, %c0_7, %c0_8] : memref<1x16x16x4xf32, #tpu.memory_space<vmem>>, vector<1x1x16x4xf32>
    %9 = vector.shape_cast %8 : vector<1x1x16x4xf32> to vector<16x4xf32>
    %10 = vector.shape_cast %7 : vector<16x4xf32> to vector<1x1x16x4xf32>
    tpu.vector_store %arg4[%c0_5, %c0_6, %c0_7, %c0_8], %10 {strides = array<i32>} : memref<1x16x16x4xf32, #tpu.memory_space<vmem>>, vector<1x1x16x4xf32>,
    %c0_9 = arith.constant 0 : index
    %c42 = arith.constant 42 : index
    %c0_10 = arith.constant 0 : index
    %11 = vector.load %arg1[%c0_9, %c42, %c0_10] : memref<1x336x128xf32, #tpu.memory_space<vmem>>, vector<1x16x4xf32>
    %12 = vector.shape_cast %11 : vector<1x16x4xf32> to vector<16x4xf32>
    %13 = vector.broadcast %0 : vector<1x4xf32> to vector<16x4xf32>
    %14 = arith.mulf %12, %13 : vector<16x4xf32>
    %15 = vector.broadcast %1 : vector<1x4xf32> to vector<16x4xf32>
    %16 = arith.addf %14, %15 : vector<16x4xf32>
    %c0_11 = arith.constant 0 : index
    %c1 = arith.constant 1 : index
    %c0_12 = arith.constant 0 : index
    %c0_13 = arith.constant 0 : index
    %17 = vector.load %arg4[%c0_11, %c1, %c0_12, %c0_13] : memref<1x16x16x4xf32, #tpu.memory_space<vmem>>, vector<1x1x16x4xf32>
    %18 = vector.shape_cast %17 : vector<1x1x16x4xf32> to vector<16x4xf32>
    %19 = vector.shape_cast %16 : vector<16x4xf32> to vector<1x1x16x4xf32>
    tpu.vector_store %arg4[%c0_11, %c1, %c0_12, %c0_13], %19 {strides = array<i32>} : memref<1x16x16x4xf32, #tpu.memory_space<vmem>>, vector<1x1x16x4xf32>,
    %c0_14 = arith.constant 0 : index
    %c60 = arith.constant 60 : index
    %c0_15 = arith.constant 0 : index
    %20 = vector.load %arg1[%c0_14, %c60, %c0_15] : memref<1x336x128xf32, #tpu.memory_space<vmem>>, vector<1x16x4xf32>
    %21 = vector.shape_cast %20 : vector<1x16x4xf32> to vector<16x4xf32>
    %22 = vector.broadcast %0 : vector<1x4xf32> to vector<16x4xf32>
    %23 = arith.mulf %21, %22 : vector<16x4xf32>
    %24 = vector.broadcast %1 : vector<1x4xf32> to vector<16x4xf32>
    %25 = arith.addf %23, %24 : vector<16x4xf32>
    %c0_16 = arith.constant 0 : index
    %c2 = arith.constant 2 : index
    %c0_17 = arith.constant 0 : index
    %c0_18 = arith.constant 0 : index
    %26 = vector.load %arg4[%c0_16, %c2, %c0_17, %c0_18] : memref<1x16x16x4xf32, #tpu.memory_space<vmem>>, vector<1x1x16x4xf32>
    %27 = vector.shape_cast %26 : vector<1x1x16x4xf32> to vector<16x4xf32>
    %28 = vector.shape_cast %25 : vector<16x4xf32> to vector<1x1x16x4xf32>
    tpu.vector_store %arg4[%c0_16, %c2, %c0_17, %c0_18], %28 {strides = array<i32>} : memref<1x16x16x4xf32, #tpu.memory_space<vmem>>, vector<1x1x16x4xf32>,
    %c0_19 = arith.constant 0 : index
    %c78 = arith.constant 78 : index
    %c0_20 = arith.constant 0 : index
    %29 = vector.load %arg1[%c0_19, %c78, %c0_20] : memref<1x336x128xf32, #tpu.memory_space<vmem>>, vector<1x16x4xf32>
    %30 = vector.shape_cast %29 : vector<1x16x4xf32> to vector<16x4xf32>
    %31 = vector.broadcast %0 : vector<1x4xf32> to vector<16x4xf32>
    %32 = arith.mulf %30, %31 : vector<16x4xf32>
    %33 = vector.broadcast %1 : vector<1x4xf32> to vector<16x4xf32>
    %34 = arith.addf %32, %33 : vector<16x4xf32>
    %c0_21 = arith.constant 0 : index
    %c3 = arith.constant 3 : index
    %c0_22 = arith.constant 0 : index
    %c0_23 = arith.constant 0 : index
    %35 = vector.load %arg4[%c0_21, %c3, %c0_22, %c0_23] : memref<1x16x16x4xf32, #tpu.memory_space<vmem>>, vector<1x1x16x4xf32>
    %36 = vector.shape_cast %35 : vector<1x1x16x4xf32> to vector<16x4xf32>
    %37 = vector.shape_cast %34 : vector<16x4xf32> to vector<1x1x16x4xf32>
    tpu.vector_store %arg4[%c0_21, %c3, %c0_22, %c0_23], %37 {strides = array<i32>} : memref<1x16x16x4xf32, #tpu.memory_space<vmem>>, vector<1x1x16x4xf32>,
    %c0_24 = arith.constant 0 : index
    %c96 = arith.constant 96 : index
    %c0_25 = arith.constant 0 : index
    %38 = vector.load %arg1[%c0_24, %c96, %c0_25] : memref<1x336x128xf32, #tpu.memory_space<vmem>>, vector<1x16x4xf32>
    %39 = vector.shape_cast %38 : vector<1x16x4xf32> to vector<16x4xf32>
    %40 = vector.broadcast %0 : vector<1x4xf32> to vector<16x4xf32>
    %41 = arith.mulf %39, %40 : vector<16x4xf32>
    %42 = vector.broadcast %1 : vector<1x4xf32> to vector<16x4xf32>
    %43 = arith.addf %41, %42 : vector<16x4xf32>
    %c0_26 = arith.constant 0 : index
    %c4 = arith.constant 4 : index
    %c0_27 = arith.constant 0 : index
    %c0_28 = arith.constant 0 : index
    %44 = vector.load %arg4[%c0_26, %c4, %c0_27, %c0_28] : memref<1x16x16x4xf32, #tpu.memory_space<vmem>>, vector<1x1x16x4xf32>
    %45 = vector.shape_cast %44 : vector<1x1x16x4xf32> to vector<16x4xf32>
    %46 = vector.shape_cast %43 : vector<16x4xf32> to vector<1x1x16x4xf32>
    tpu.vector_store %arg4[%c0_26, %c4, %c0_27, %c0_28], %46 {strides = array<i32>} : memref<1x16x16x4xf32, #tpu.memory_space<vmem>>, vector<1x1x16x4xf32>,
    %c0_29 = arith.constant 0 : index
    %c114 = arith.constant 114 : index
    %c0_30 = arith.constant 0 : index
    %47 = vector.load %arg1[%c0_29, %c114, %c0_30] : memref<1x336x128xf32, #tpu.memory_space<vmem>>, vector<1x16x4xf32>
    %48 = vector.shape_cast %47 : vector<1x16x4xf32> to vector<16x4xf32>
    %49 = vector.broadcast %0 : vector<1x4xf32> to vector<16x4xf32>
    %50 = arith.mulf %48, %49 : vector<16x4xf32>
    %51 = vector.broadcast %1 : vector<1x4xf32> to vector<16x4xf32>
    %52 = arith.addf %50, %51 : vector<16x4xf32>
    %c0_31 = arith.constant 0 : index
    %c5 = arith.constant 5 : index
    %c0_32 = arith.constant 0 : index
    %c0_33 = arith.constant 0 : index
    %53 = vector.load %arg4[%c0_31, %c5, %c0_32, %c0_33] : memref<1x16x16x4xf32, #tpu.memory_space<vmem>>, vector<1x1x16x4xf32>
    %54 = vector.shape_cast %53 : vector<1x1x16x4xf32> to vector<16x4xf32>
    %55 = vector.shape_cast %52 : vector<16x4xf32> to vector<1x1x16x4xf32>
    tpu.vector_store %arg4[%c0_31, %c5, %c0_32, %c0_33], %55 {strides = array<i32>} : memref<1x16x16x4xf32, #tpu.memory_space<vmem>>, vector<1x1x16x4xf32>,
    %c0_34 = arith.constant 0 : index
    %c132 = arith.constant 132 : index
    %c0_35 = arith.constant 0 : index
    %56 = vector.load %arg1[%c0_34, %c132, %c0_35] : memref<1x336x128xf32, #tpu.memory_space<vmem>>, vector<1x16x4xf32>
    %57 = vector.shape_cast %56 : vector<1x16x4xf32> to vector<16x4xf32>
    %58 = vector.broadcast %0 : vector<1x4xf32> to vector<16x4xf32>
    %59 = arith.mulf %57, %58 : vector<16x4xf32>
    %60 = vector.broadcast %1 : vector<1x4xf32> to vector<16x4xf32>
    %61 = arith.addf %59, %60 : vector<16x4xf32>
    %c0_36 = arith.constant 0 : index
    %c6 = arith.constant 6 : index
    %c0_37 = arith.constant 0 : index
    %c0_38 = arith.constant 0 : index
    %62 = vector.load %arg4[%c0_36, %c6, %c0_37, %c0_38] : memref<1x16x16x4xf32, #tpu.memory_space<vmem>>, vector<1x1x16x4xf32>
    %63 = vector.shape_cast %62 : vector<1x1x16x4xf32> to vector<16x4xf32>
    %64 = vector.shape_cast %61 : vector<16x4xf32> to vector<1x1x16x4xf32>
    tpu.vector_store %arg4[%c0_36, %c6, %c0_37, %c0_38], %64 {strides = array<i32>} : memref<1x16x16x4xf32, #tpu.memory_space<vmem>>, vector<1x1x16x4xf32>,
    %c0_39 = arith.constant 0 : index
    %c150 = arith.constant 150 : index
    %c0_40 = arith.constant 0 : index
    %65 = vector.load %arg1[%c0_39, %c150, %c0_40] : memref<1x336x128xf32, #tpu.memory_space<vmem>>, vector<1x16x4xf32>
    %66 = vector.shape_cast %65 : vector<1x16x4xf32> to vector<16x4xf32>
    %67 = vector.broadcast %0 : vector<1x4xf32> to vector<16x4xf32>
    %68 = arith.mulf %66, %67 : vector<16x4xf32>
    %69 = vector.broadcast %1 : vector<1x4xf32> to vector<16x4xf32>
    %70 = arith.addf %68, %69 : vector<16x4xf32>
    %c0_41 = arith.constant 0 : index
    %c7 = arith.constant 7 : index
    %c0_42 = arith.constant 0 : index
    %c0_43 = arith.constant 0 : index
    %71 = vector.load %arg4[%c0_41, %c7, %c0_42, %c0_43] : memref<1x16x16x4xf32, #tpu.memory_space<vmem>>, vector<1x1x16x4xf32>
    %72 = vector.shape_cast %71 : vector<1x1x16x4xf32> to vector<16x4xf32>
    %73 = vector.shape_cast %70 : vector<16x4xf32> to vector<1x1x16x4xf32>
    tpu.vector_store %arg4[%c0_41, %c7, %c0_42, %c0_43], %73 {strides = array<i32>} : memref<1x16x16x4xf32, #tpu.memory_space<vmem>>, vector<1x1x16x4xf32>,
    %c0_44 = arith.constant 0 : index
    %c168 = arith.constant 168 : index
    %c0_45 = arith.constant 0 : index
    %74 = vector.load %arg1[%c0_44, %c168, %c0_45] : memref<1x336x128xf32, #tpu.memory_space<vmem>>, vector<1x16x4xf32>
    %75 = vector.shape_cast %74 : vector<1x16x4xf32> to vector<16x4xf32>
    %76 = vector.broadcast %0 : vector<1x4xf32> to vector<16x4xf32>
    %77 = arith.mulf %75, %76 : vector<16x4xf32>
    %78 = vector.broadcast %1 : vector<1x4xf32> to vector<16x4xf32>
    %79 = arith.addf %77, %78 : vector<16x4xf32>
    %c0_46 = arith.constant 0 : index
    %c8 = arith.constant 8 : index
    %c0_47 = arith.constant 0 : index
    %c0_48 = arith.constant 0 : index
    %80 = vector.load %arg4[%c0_46, %c8, %c0_47, %c0_48] : memref<1x16x16x4xf32, #tpu.memory_space<vmem>>, vector<1x1x16x4xf32>
    %81 = vector.shape_cast %80 : vector<1x1x16x4xf32> to vector<16x4xf32>
    %82 = vector.shape_cast %79 : vector<16x4xf32> to vector<1x1x16x4xf32>
    tpu.vector_store %arg4[%c0_46, %c8, %c0_47, %c0_48], %82 {strides = array<i32>} : memref<1x16x16x4xf32, #tpu.memory_space<vmem>>, vector<1x1x16x4xf32>,
    %c0_49 = arith.constant 0 : index
    %c186 = arith.constant 186 : index
    %c0_50 = arith.constant 0 : index
    %83 = vector.load %arg1[%c0_49, %c186, %c0_50] : memref<1x336x128xf32, #tpu.memory_space<vmem>>, vector<1x16x4xf32>
    %84 = vector.shape_cast %83 : vector<1x16x4xf32> to vector<16x4xf32>
    %85 = vector.broadcast %0 : vector<1x4xf32> to vector<16x4xf32>
    %86 = arith.mulf %84, %85 : vector<16x4xf32>
    %87 = vector.broadcast %1 : vector<1x4xf32> to vector<16x4xf32>
    %88 = arith.addf %86, %87 : vector<16x4xf32>
    %c0_51 = arith.constant 0 : index
    %c9 = arith.constant 9 : index
    %c0_52 = arith.constant 0 : index
    %c0_53 = arith.constant 0 : index
    %89 = vector.load %arg4[%c0_51, %c9, %c0_52, %c0_53] : memref<1x16x16x4xf32, #tpu.memory_space<vmem>>, vector<1x1x16x4xf32>
    %90 = vector.shape_cast %89 : vector<1x1x16x4xf32> to vector<16x4xf32>
    %91 = vector.shape_cast %88 : vector<16x4xf32> to vector<1x1x16x4xf32>
    tpu.vector_store %arg4[%c0_51, %c9, %c0_52, %c0_53], %91 {strides = array<i32>} : memref<1x16x16x4xf32, #tpu.memory_space<vmem>>, vector<1x1x16x4xf32>,
    %c0_54 = arith.constant 0 : index
    %c204 = arith.constant 204 : index
    %c0_55 = arith.constant 0 : index
    %92 = vector.load %arg1[%c0_54, %c204, %c0_55] : memref<1x336x128xf32, #tpu.memory_space<vmem>>, vector<1x16x4xf32>
    %93 = vector.shape_cast %92 : vector<1x16x4xf32> to vector<16x4xf32>
    %94 = vector.broadcast %0 : vector<1x4xf32> to vector<16x4xf32>
    %95 = arith.mulf %93, %94 : vector<16x4xf32>
    %96 = vector.broadcast %1 : vector<1x4xf32> to vector<16x4xf32>
    %97 = arith.addf %95, %96 : vector<16x4xf32>
    %c0_56 = arith.constant 0 : index
    %c10 = arith.constant 10 : index
    %c0_57 = arith.constant 0 : index
    %c0_58 = arith.constant 0 : index
    %98 = vector.load %arg4[%c0_56, %c10, %c0_57, %c0_58] : memref<1x16x16x4xf32, #tpu.memory_space<vmem>>, vector<1x1x16x4xf32>
    %99 = vector.shape_cast %98 : vector<1x1x16x4xf32> to vector<16x4xf32>
    %100 = vector.shape_cast %97 : vector<16x4xf32> to vector<1x1x16x4xf32>
    tpu.vector_store %arg4[%c0_56, %c10, %c0_57, %c0_58], %100 {strides = array<i32>} : memref<1x16x16x4xf32, #tpu.memory_space<vmem>>, vector<1x1x16x4xf32>,
    %c0_59 = arith.constant 0 : index
    %c222 = arith.constant 222 : index
    %c0_60 = arith.constant 0 : index
    %101 = vector.load %arg1[%c0_59, %c222, %c0_60] : memref<1x336x128xf32, #tpu.memory_space<vmem>>, vector<1x16x4xf32>
    %102 = vector.shape_cast %101 : vector<1x16x4xf32> to vector<16x4xf32>
    %103 = vector.broadcast %0 : vector<1x4xf32> to vector<16x4xf32>
    %104 = arith.mulf %102, %103 : vector<16x4xf32>
    %105 = vector.broadcast %1 : vector<1x4xf32> to vector<16x4xf32>
    %106 = arith.addf %104, %105 : vector<16x4xf32>
    %c0_61 = arith.constant 0 : index
    %c11 = arith.constant 11 : index
    %c0_62 = arith.constant 0 : index
    %c0_63 = arith.constant 0 : index
    %107 = vector.load %arg4[%c0_61, %c11, %c0_62, %c0_63] : memref<1x16x16x4xf32, #tpu.memory_space<vmem>>, vector<1x1x16x4xf32>
    %108 = vector.shape_cast %107 : vector<1x1x16x4xf32> to vector<16x4xf32>
    %109 = vector.shape_cast %106 : vector<16x4xf32> to vector<1x1x16x4xf32>
    tpu.vector_store %arg4[%c0_61, %c11, %c0_62, %c0_63], %109 {strides = array<i32>} : memref<1x16x16x4xf32, #tpu.memory_space<vmem>>, vector<1x1x16x4xf32>,
    %c0_64 = arith.constant 0 : index
    %c240 = arith.constant 240 : index
    %c0_65 = arith.constant 0 : index
    %110 = vector.load %arg1[%c0_64, %c240, %c0_65] : memref<1x336x128xf32, #tpu.memory_space<vmem>>, vector<1x16x4xf32>
    %111 = vector.shape_cast %110 : vector<1x16x4xf32> to vector<16x4xf32>
    %112 = vector.broadcast %0 : vector<1x4xf32> to vector<16x4xf32>
    %113 = arith.mulf %111, %112 : vector<16x4xf32>
    %114 = vector.broadcast %1 : vector<1x4xf32> to vector<16x4xf32>
    %115 = arith.addf %113, %114 : vector<16x4xf32>
    %c0_66 = arith.constant 0 : index
    %c12 = arith.constant 12 : index
    %c0_67 = arith.constant 0 : index
    %c0_68 = arith.constant 0 : index
    %116 = vector.load %arg4[%c0_66, %c12, %c0_67, %c0_68] : memref<1x16x16x4xf32, #tpu.memory_space<vmem>>, vector<1x1x16x4xf32>
    %117 = vector.shape_cast %116 : vector<1x1x16x4xf32> to vector<16x4xf32>
    %118 = vector.shape_cast %115 : vector<16x4xf32> to vector<1x1x16x4xf32>
    tpu.vector_store %arg4[%c0_66, %c12, %c0_67, %c0_68], %118 {strides = array<i32>} : memref<1x16x16x4xf32, #tpu.memory_space<vmem>>, vector<1x1x16x4xf32>,
    %c0_69 = arith.constant 0 : index
    %c258 = arith.constant 258 : index
    %c0_70 = arith.constant 0 : index
    %119 = vector.load %arg1[%c0_69, %c258, %c0_70] : memref<1x336x128xf32, #tpu.memory_space<vmem>>, vector<1x16x4xf32>
    %120 = vector.shape_cast %119 : vector<1x16x4xf32> to vector<16x4xf32>
    %121 = vector.broadcast %0 : vector<1x4xf32> to vector<16x4xf32>
    %122 = arith.mulf %120, %121 : vector<16x4xf32>
    %123 = vector.broadcast %1 : vector<1x4xf32> to vector<16x4xf32>
    %124 = arith.addf %122, %123 : vector<16x4xf32>
    %c0_71 = arith.constant 0 : index
    %c13 = arith.constant 13 : index
    %c0_72 = arith.constant 0 : index
    %c0_73 = arith.constant 0 : index
    %125 = vector.load %arg4[%c0_71, %c13, %c0_72, %c0_73] : memref<1x16x16x4xf32, #tpu.memory_space<vmem>>, vector<1x1x16x4xf32>
    %126 = vector.shape_cast %125 : vector<1x1x16x4xf32> to vector<16x4xf32>
    %127 = vector.shape_cast %124 : vector<16x4xf32> to vector<1x1x16x4xf32>
    tpu.vector_store %arg4[%c0_71, %c13, %c0_72, %c0_73], %127 {strides = array<i32>} : memref<1x16x16x4xf32, #tpu.memory_space<vmem>>, vector<1x1x16x4xf32>,
    %c0_74 = arith.constant 0 : index
    %c276 = arith.constant 276 : index
    %c0_75 = arith.constant 0 : index
    %128 = vector.load %arg1[%c0_74, %c276, %c0_75] : memref<1x336x128xf32, #tpu.memory_space<vmem>>, vector<1x16x4xf32>
    %129 = vector.shape_cast %128 : vector<1x16x4xf32> to vector<16x4xf32>
    %130 = vector.broadcast %0 : vector<1x4xf32> to vector<16x4xf32>
    %131 = arith.mulf %129, %130 : vector<16x4xf32>
    %132 = vector.broadcast %1 : vector<1x4xf32> to vector<16x4xf32>
    %133 = arith.addf %131, %132 : vector<16x4xf32>
    %c0_76 = arith.constant 0 : index
    %c14 = arith.constant 14 : index
    %c0_77 = arith.constant 0 : index
    %c0_78 = arith.constant 0 : index
    %134 = vector.load %arg4[%c0_76, %c14, %c0_77, %c0_78] : memref<1x16x16x4xf32, #tpu.memory_space<vmem>>, vector<1x1x16x4xf32>
    %135 = vector.shape_cast %134 : vector<1x1x16x4xf32> to vector<16x4xf32>
    %136 = vector.shape_cast %133 : vector<16x4xf32> to vector<1x1x16x4xf32>
    tpu.vector_store %arg4[%c0_76, %c14, %c0_77, %c0_78], %136 {strides = array<i32>} : memref<1x16x16x4xf32, #tpu.memory_space<vmem>>, vector<1x1x16x4xf32>,
    %c0_79 = arith.constant 0 : index
    %c294 = arith.constant 294 : index
    %c0_80 = arith.constant 0 : index
    %137 = vector.load %arg1[%c0_79, %c294, %c0_80] : memref<1x336x128xf32, #tpu.memory_space<vmem>>, vector<1x16x4xf32>
    %138 = vector.shape_cast %137 : vector<1x16x4xf32> to vector<16x4xf32>
    %139 = vector.broadcast %0 : vector<1x4xf32> to vector<16x4xf32>
    %140 = arith.mulf %138, %139 : vector<16x4xf32>
    %141 = vector.broadcast %1 : vector<1x4xf32> to vector<16x4xf32>
    %142 = arith.addf %140, %141 : vector<16x4xf32>
    %c0_81 = arith.constant 0 : index
    %c15 = arith.constant 15 : index
    %c0_82 = arith.constant 0 : index
    %c0_83 = arith.constant 0 : index
    %143 = vector.load %arg4[%c0_81, %c15, %c0_82, %c0_83] : memref<1x16x16x4xf32, #tpu.memory_space<vmem>>, vector<1x1x16x4xf32>
    %144 = vector.shape_cast %143 : vector<1x1x16x4xf32> to vector<16x4xf32>
    %145 = vector.shape_cast %142 : vector<16x4xf32> to vector<1x1x16x4xf32>
    tpu.vector_store %arg4[%c0_81, %c15, %c0_82, %c0_83], %145 {strides = array<i32>} : memref<1x16x16x4xf32, #tpu.memory_space<vmem>>, vector<1x1x16x4xf32>,
    return
  }
  func.func @transform_0(%arg0: i32) -> (i32, i32, i32) {
    %c0_i32 = arith.constant 0 : i32
    %c0_i32_0 = arith.constant 0 : i32
    %c0_i32_1 = arith.constant 0 : i32
    return %arg0, %c0_i32, %c0_i32_0 : i32, i32, i32
  }
  func.func @transform_1(%arg0: i32) -> (i32, i32) {
    %c0_i32 = arith.constant 0 : i32
    %c0_i32_0 = arith.constant 0 : i32
    %c0_i32_1 = arith.constant 0 : i32
    return %c0_i32, %c0_i32_0 : i32, i32
  }
  func.func @transform_2(%arg0: i32) -> (i32, i32) {
    %c0_i32 = arith.constant 0 : i32
    %c0_i32_0 = arith.constant 0 : i32
    %c0_i32_1 = arith.constant 0 : i32
    return %c0_i32, %c0_i32_0 : i32, i32
  }
  func.func @transform_3(%arg0: i32) -> (i32, i32, i32, i32) {
    %c0_i32 = arith.constant 0 : i32
    %c0_i32_0 = arith.constant 0 : i32
    %c0_i32_1 = arith.constant 0 : i32
    %c0_i32_2 = arith.constant 0 : i32
    return %arg0, %c0_i32, %c0_i32_0, %c0_i32_1 : i32, i32, i32, i32
  }
}

</mosaic_0001>

<bundles_post_ra>
// kernel: conv_module_forward.5
= control target key start
LH: loop header
LB: loop body
LE: loop exit
PB: predicated region body
PF: predicated region fallthrough
CT: control target
= control target key end

     0   :  { %s464_s12 = smov 0   ;;  %s655_s0 = inlined_call_operand.vmem [shape: f32[2,336,128], index: 0, kind: input, shape index: {}]   ;;  %s656_s1 = inlined_call_operand.vmem [shape: f32[1,128], index: 1, kind: input, shape index: {}]   ;;  %s657_s2 = inlined_call_operand.vmem [shape: f32[1,128], index: 2, kind: input, shape index: {}]   ;;  %s658_s3 = inlined_call_operand.vmem [shape: f32[2,16,16,4], index: 3, kind: output, shape index: {}]  }
   0x1 LB: > { %s384_s13 = sadd.s32 4294967295, %s442_s12   ;;  %p388_p0 = scmp.ge.s32.totalorder %s442_s12, 1  ;;  %s442_s12 = sphi %s464_s12, %s13_s12  }
   0x2   : > { %p137_p1 = scmp.lt.s32.totalorder %s442_s12, 3 }
   0x4   : > { %p138_p2 = pnand %p388_p0, %p137_p1 }
   0x5   : > { %p161_p3 = scmp.lt.s32.totalorder (!%p138_p2), %s384_s13, 1  ;;  %v475_v0 = vld [vmem:[%s656_s1] ss:$0 sm:$0xff] (!%p138_p2)  ;;  %vm191_vm0 = vcmask (!%p138_p2), 31744  }
   0x6   : > { %141 = sbr.rel (%p138_p2) target bundleno = 41 (0x29), region = 32  ;;  %v485_v1 = vld [vmem:[%s657_s2] ss:$0 sm:$0xff] (!%p138_p2) }
   0xd   : > { %s660_s13 = smov (!%p161_p3, %s384_s13), 1 }
   0xe   : > { %s427_s14 = smul.u32 336, %s660_s13  ;;  %s426_s20 = sshll.u32 %s660_s13, 8 }
   0xf   : > { %s499_s25 = scalar_lea.vmem %s658_s3, %s426_s20 }
  0x10   : > { %s480_s19 = scalar_lea.vmem %s655_s0, %s427_s14 }
  0x11   : > { %v173_v2 = vld [vmem:[%s480_s19 + $0x18] sm:$0xff]  ;;  %v174_v3 = vld [vmem:[%s480_s19 + $0x20] sm:$0xff]  ;;  %v194_v4 = vld [vmem:[%s480_s19 + $0x2a] sm:$0xff] }
  0x12   : > { %v181_v5 = vmul.f32 %v475_v0, %v173_v2  ;;  %v182_v6 = vmul.f32 %v475_v0, %v174_v3  ;;  %v196_v7 = vmul.f32 %v475_v0, %v194_v4  ;;  %v195_v8 = vld [vmem:[%s480_s19 + $0x32] sm:$0xff]  ;;  %v203_v9 = vld [vmem:[%s480_s19 + $0x3c] sm:$0xff]  ;;  %v204_v10 = vld [vmem:[%s480_s19 + $0x44] sm:$0xff] }
  0x13   : > { %v197_v11 = vmul.f32 %v475_v0, %v195_v8  ;;  %v205_v12 = vmul.f32 %v475_v0, %v203_v9  ;;  %v206_v13 = vmul.f32 %v475_v0, %v204_v10  ;;  %v212_v14 = vld [vmem:[%s480_s19 + $0x4e] sm:$0xff]  ;;  %v213_v15 = vld [vmem:[%s480_s19 + $0x56] sm:$0xff]  ;;  %v221_v16 = vld [vmem:[%s480_s19 + $0x60] sm:$0xff] }
  0x14   : > { %v189_v17 = vadd.f32 %v485_v1, %v181_v5  ;;  %v190_v18 = vadd.f32 %v485_v1, %v182_v6  ;;  %v198_v19 = vadd.f32 %v485_v1, %v196_v7  ;;  %v214_v20 = vmul.f32 %v475_v0, %v212_v14  ;;  %v222_v21 = vld [vmem:[%s480_s19 + $0x68] sm:$0xff]  ;;  %v230_v22 = vld [vmem:[%s480_s19 + $0x72] sm:$0xff]  ;;  %v231_v23 = vld [vmem:[%s480_s19 + $0x7a] sm:$0xff] }
  0x15   : > { %v199_v24 = vadd.f32 %v485_v1, %v197_v11  ;;  %v207_v25 = vadd.f32 %v485_v1, %v205_v12  ;;  %v208_v26 = vadd.f32 %v485_v1, %v206_v13  ;;  %v215_v27 = vmul.f32 %v475_v0, %v213_v15  ;;  %v239_v28 = vld [vmem:[%s480_s19 + $0x84] sm:$0xff]  ;;  %v240_v29 = vld [vmem:[%s480_s19 + $0x8c] sm:$0xff]  ;;  %v248_v30 = vld [vmem:[%s480_s19 + $0x96] sm:$0xff] }
  0x16   : > { %192 = vst.msk [vmem:[%s499_s25] sm:$0xff] %vm191_vm0, %v189_v17  ;;  %193 = vst.msk [vmem:[%s499_s25 + $0x8] sm:$0xff] %vm191_vm0, %v190_v18  ;;  %v216_v31 = vadd.f32 %v485_v1, %v214_v20  ;;  %v223_v32 = vmul.f32 %v475_v0, %v221_v16  ;;  %v224_v33 = vmul.f32 %v475_v0, %v222_v21  ;;  %v249_v35 = vld [vmem:[%s480_s19 + $0x9e] sm:$0xff]  ;;  %v257_v40 = vld [vmem:[%s480_s19 + $0xa8] sm:$0xff] }
  0x17   : > { %394 = vst.msk [vmem:[%s499_s25 + $0x10] sm:$0xff] %vm191_vm0, %v198_v19  ;;  %v232_v34 = vmul.f32 %v475_v0, %v230_v22  ;;  %395 = vst.msk [vmem:[%s499_s25 + $0x18] sm:$0xff] %vm191_vm0, %v199_v24  ;;  %v217_v36 = vadd.f32 %v485_v1, %v215_v27  ;;  %v233_v37 = vmul.f32 %v475_v0, %v231_v23  ;;  %v258_v41 = vld [vmem:[%s480_s19 + $0xb0] sm:$0xff]  ;;  %v266_v42 = vld [vmem:[%s480_s19 + $0xba] sm:$0xff] }
  0x18   : > { %396 = vst.msk [vmem:[%s499_s25 + $0x20] sm:$0xff] %vm191_vm0, %v207_v25  ;;  %397 = vst.msk [vmem:[%s499_s25 + $0x28] sm:$0xff] %vm191_vm0, %v208_v26  ;;  %v241_v38 = vmul.f32 %v475_v0, %v239_v28  ;;  %v242_v39 = vmul.f32 %v475_v0, %v240_v29  ;;  %v225_v43 = vadd.f32 %v485_v1, %v223_v32  ;;  %v267_v47 = vld [vmem:[%s480_s19 + $0xc2] sm:$0xff]  ;;  %v275_v48 = vld [vmem:[%s480_s19 + $0xcc] sm:$0xff] }
  0x19   : > { %398 = vst.msk [vmem:[%s499_s25 + $0x30] sm:$0xff] %vm191_vm0, %v216_v31  ;;  %v226_v44 = vadd.f32 %v485_v1, %v224_v33  ;;  %v234_v45 = vadd.f32 %v485_v1, %v232_v34  ;;  %v250_v46 = vmul.f32 %v475_v0, %v248_v30  ;;  %v276_v49 = vld [vmem:[%s480_s19 + $0xd4] sm:$0xff]  ;;  %399 = vst.msk [vmem:[%s499_s25 + $0x38] sm:$0xff] %vm191_vm0, %v217_v36  ;;  %v284_v54 = vld [vmem:[%s480_s19 + $0xde] sm:$0xff] }
  0x1a   : > { %v235_v50 = vadd.f32 %v485_v1, %v233_v37  ;;  %v243_v51 = vadd.f32 %v485_v1, %v241_v38  ;;  %v244_v52 = vadd.f32 %v485_v1, %v242_v39  ;;  %v251_v53 = vmul.f32 %v475_v0, %v249_v35  ;;  %400 = vst.msk [vmem:[%s499_s25 + $0x40] sm:$0xff] %vm191_vm0, %v225_v43  ;;  %v285_v59 = vld [vmem:[%s480_s19 + $0xe6] sm:$0xff]  ;;  %v293_v2 = vld [vmem:[%s480_s19 + $0xf0] sm:$0xff]  ;;  %v294_v3 = vld [vmem:[%s480_s19 + $0xf8] sm:$0xff] }
  0x1b   : > { %401 = vst.msk [vmem:[%s499_s25 + $0x48] sm:$0xff] %vm191_vm0, %v226_v44  ;;  %402 = vst.msk [vmem:[%s499_s25 + $0x50] sm:$0xff] %vm191_vm0, %v234_v45  ;;  %v252_v55 = vadd.f32 %v485_v1, %v250_v46  ;;  %v259_v56 = vmul.f32 %v475_v0, %v257_v40  ;;  %v260_v57 = vmul.f32 %v475_v0, %v258_v41  ;;  %v302_v4 = vld [vmem:[%s480_s19 + $0x102] sm:$0xff]  ;;  %v303_v9 = vld [vmem:[%s480_s19 + $0x10a] sm:$0xff] }
  0x1c   : > { %v268_v58 = vmul.f32 %v475_v0, %v266_v42  ;;  %403 = vst.msk [vmem:[%s499_s25 + $0x58] sm:$0xff] %vm191_vm0, %v235_v50  ;;  %404 = vst.msk [vmem:[%s499_s25 + $0x60] sm:$0xff] %vm191_vm0, %v243_v51  ;;  %v253_v60 = vadd.f32 %v485_v1, %v251_v53  ;;  %v269_v61 = vmul.f32 %v475_v0, %v267_v47  ;;  %v311_v10 = vld [vmem:[%s480_s19 + $0x114] sm:$0xff]  ;;  %v312_v11 = vld [vmem:[%s480_s19 + $0x11c] sm:$0xff] }
  0x1d   : > { %405 = vst.msk [vmem:[%s499_s25 + $0x68] sm:$0xff] %vm191_vm0, %v244_v52  ;;  %v277_v62 = vmul.f32 %v475_v0, %v275_v48  ;;  %v278_v63 = vmul.f32 %v475_v0, %v276_v49  ;;  %406 = vst.msk [vmem:[%s499_s25 + $0x70] sm:$0xff] %vm191_vm0, %v252_v55  ;;  %v261_v5 = vadd.f32 %v485_v1, %v259_v56  ;;  %v320_v16 = vld [vmem:[%s480_s19 + $0x126] sm:$0xff]  ;;  %v321_v21 = vld [vmem:[%s480_s19 + $0x12e] sm:$0xff] }
  0x1e   : > { %v262_v6 = vadd.f32 %v485_v1, %v260_v57  ;;  %v270_v7 = vadd.f32 %v485_v1, %v268_v58  ;;  %v286_v8 = vmul.f32 %v475_v0, %v284_v54  ;;  %407 = vst.msk [vmem:[%s499_s25 + $0x78] sm:$0xff] %vm191_vm0, %v253_v60  ;;  %v271_v12 = vadd.f32 %v485_v1, %v269_v61 }
  0x1f   : > { %v279_v13 = vadd.f32 %v485_v1, %v277_v62  ;;  %v280_v14 = vadd.f32 %v485_v1, %v278_v63  ;;  %v287_v15 = vmul.f32 %v475_v0, %v285_v59  ;;  %408 = vst.msk [vmem:[%s499_s25 + $0x80] sm:$0xff] %vm191_vm0, %v261_v5  ;;  %v295_v18 = vmul.f32 %v475_v0, %v293_v2 }
  0x20   : > { %409 = vst.msk [vmem:[%s499_s25 + $0x88] sm:$0xff] %vm191_vm0, %v262_v6  ;;  %410 = vst.msk [vmem:[%s499_s25 + $0x90] sm:$0xff] %vm191_vm0, %v270_v7  ;;  %v288_v17 = vadd.f32 %v485_v1, %v286_v8  ;;  %v296_v19 = vmul.f32 %v475_v0, %v294_v3  ;;  %v304_v20 = vmul.f32 %v475_v0, %v302_v4 }
  0x21   : > { %411 = vst.msk [vmem:[%s499_s25 + $0x98] sm:$0xff] %vm191_vm0, %v271_v12  ;;  %412 = vst.msk [vmem:[%s499_s25 + $0xa0] sm:$0xff] %vm191_vm0, %v279_v13  ;;  %v289_v22 = vadd.f32 %v485_v1, %v287_v15  ;;  %v305_v23 = vmul.f32 %v475_v0, %v303_v9  ;;  %v313_v24 = vmul.f32 %v475_v0, %v311_v10 }
  0x22   : > { %413 = vst.msk [vmem:[%s499_s25 + $0xa8] sm:$0xff] %vm191_vm0, %v280_v14  ;;  %v314_v25 = vmul.f32 %v475_v0, %v312_v11  ;;  %414 = vst.msk [vmem:[%s499_s25 + $0xb0] sm:$0xff] %vm191_vm0, %v288_v17  ;;  %v297_v26 = vadd.f32 %v485_v1, %v295_v18  ;;  %v298_v27 = vadd.f32 %v485_v1, %v296_v19 }
  0x23   : > { %v306_v28 = vadd.f32 %v485_v1, %v304_v20  ;;  %v322_v29 = vmul.f32 %v475_v0, %v320_v16  ;;  %415 = vst.msk [vmem:[%s499_s25 + $0xb8] sm:$0xff] %vm191_vm0, %v289_v22  ;;  %v307_v30 = vadd.f32 %v485_v1, %v305_v23  ;;  %v315_v31 = vadd.f32 %v485_v1, %v313_v24 }
  0x24   : > { %v316_v32 = vadd.f32 %v485_v1, %v314_v25  ;;  %v323_v33 = vmul.f32 %v475_v0, %v321_v21  ;;  %416 = vst.msk [vmem:[%s499_s25 + $0xc0] sm:$0xff] %vm191_vm0, %v297_v26  ;;  %417 = vst.msk [vmem:[%s499_s25 + $0xc8] sm:$0xff] %vm191_vm0, %v298_v27 }
  0x25   : > { %418 = vst.msk [vmem:[%s499_s25 + $0xd0] sm:$0xff] %vm191_vm0, %v306_v28  ;;  %v324_v34 = vadd.f32 %v485_v1, %v322_v29  ;;  %419 = vst.msk [vmem:[%s499_s25 + $0xd8] sm:$0xff] %vm191_vm0, %v307_v30 }
  0x26   : > { %420 = vst.msk [vmem:[%s499_s25 + $0xe0] sm:$0xff] %vm191_vm0, %v315_v31  ;;  %421 = vst.msk [vmem:[%s499_s25 + $0xe8] sm:$0xff] %vm191_vm0, %v316_v32  ;;  %v325_v35 = vadd.f32 %v485_v1, %v323_v33 }
  0x27   : > { %422 = vst.msk [vmem:[%s499_s25 + $0xf0] sm:$0xff] %vm191_vm0, %v324_v34 }
  0x28   : > { %423 = vst.msk [vmem:[%s499_s25 + $0xf8] sm:$0xff] %vm191_vm0, %v325_v35 }
  0x29 PF: > { %s13_s12 = sadd.s32 1, %s442_s12  }
  0x2a   : > { %p10_p4 = scmp.ge.s32.totalorder %s13_s12, 4  }
  0x2c   :  { %12 = sbr.rel (!%p10_p4) target bundleno = 1 (0x1), region = 77 }

// kernel: conv_module_forward.3
= control target key start
LH: loop header
LB: loop body
LE: loop exit
PB: predicated region body
PF: predicated region fallthrough
CT: control target
= control target key end

     0   :  { %s7425_s30 = smov 0   ;;  %s8755_s0 = inlined_call_operand.vmem [shape: f32[2,336,4], index: 0, kind: input, shape index: {}]   ;;  %s8756_s1 = inlined_call_operand.vmem [shape: f32[9,4,128], index: 1, kind: input, shape index: {}]   ;;  %s8757_s2 = inlined_call_operand.vmem [shape: f32[1,128], index: 2, kind: input, shape index: {}]   ;;  %s8758_s3 = inlined_call_operand.vmem [shape: f32[1,4], index: 3, kind: input, shape index: {}]   ;;  %s8759_s4 = inlined_call_operand.vmem [shape: f32[1,4], index: 4, kind: input, shape index: {}]   ;;  %s8760_s5 = inlined_call_operand.vmem [shape: f32[336,1], index: 5, kind: input, shape index: {}]   ;;  %s8761_s6 = inlined_call_operand.vmem [shape: f32[288,1], index: 6, kind: input, shape index: {}]   ;;  %s8762_s7 = inlined_call_operand.vmem [shape: f32[2,336,128], index: 7, kind: output, shape index: {0}]   ;;  %s8763_s8 = inlined_call_operand.vmem [shape: f32[2,1,128], index: 8, kind: output, shape index: {1}]   ;;  %s8764_s9 = inlined_call_operand.vmem [shape: f32[2,1,128], index: 9, kind: output, shape index: {2}]  }
   0x1 LB: > { %s5835_s10 = sadd.s32 4294967295, %s7371_s30   ;;  %p5839_p0 = scmp.ge.s32.totalorder %s7371_s30, 1  ;;  %s7371_s30 = sphi %s7425_s30, %s20_s30  }
   0x2   : > { %p292_p1 = scmp.lt.s32.totalorder %s7371_s30, 3 }
   0x4   : > { %p293_p2 = pnand %p5839_p0, %p292_p1 }
   0x5   : > { %v444_v0 = vld [vmem:[%s8760_s5 + $0x10] sm:$0xff] (!%p293_p2)  ;;  %v442_v1 = vld [vmem:[%s8760_s5] sm:$0xff] (!%p293_p2)  ;;  %v7373_v2 = vmov (!%p293_p2), 0   ;;  %v445_v3 = vld [vmem:[%s8760_s5 + $0x18] sm:$0xff] (!%p293_p2)  ;;  %vm979_vm0 = vcmask (!%p293_p2), 1043456   ;;  %p334_p3 = scmp.lt.s32.totalorder (!%p293_p2), %s5835_s10, 1 }
   0x6   : > { %296 = sbr.rel (%p293_p2) target bundleno = 713 (0x2c9), region = 48  ;;  %7363 = vset.pattern.permute.xlu1 (!%p293_p2), %v7373_v2  ;;  %7362 = vset.pattern.permute.xlu0 (!%p293_p2), %v7373_v2  ;;  %v443_v4 = vld [vmem:[%s8760_s5 + $0x8] sm:$0xff] (!%p293_p2)  ;;  %v446_v6 = vld [vmem:[%s8760_s5 + $0x20] sm:$0xff] (!%p293_p2)  ;;  %v449_v7 = vld [vmem:[%s8760_s5 + $0x38] sm:$0xff] (!%p293_p2)  ;;  %vm784_vm1 = vcmask (!%p293_p2), 31744  }
   0x7   : > { %502 = vperm.xlu1 (!%p293_p2), %7363, %v444_v0   ;;  %492 = vperm.xlu0 (!%p293_p2), %7362, %v442_v1   ;;  %v447_v5 = vld [vmem:[%s8760_s5 + $0x28] sm:$0xff] (!%p293_p2)  ;;  %v448_v8 = vld [vmem:[%s8760_s5 + $0x30] sm:$0xff] (!%p293_p2)  ;;  %v450_v10 = vld [vmem:[%s8760_s5 + $0x40] sm:$0xff] (!%p293_p2) }
   0x8   : > { %v451_v9 = vld [vmem:[%s8760_s5 + $0x48] sm:$0xff] (!%p293_p2)  ;;  %v453_v11 = vld [vmem:[%s8760_s5 + $0x58] sm:$0xff] (!%p293_p2)  ;;  %v452_v12 = vld [vmem:[%s8760_s5 + $0x50] sm:$0xff] (!%p293_p2) }
   0x9   : > { %v455_v13 = vld [vmem:[%s8760_s5 + $0x68] sm:$0xff] (!%p293_p2)  ;;  %v454_v14 = vld [vmem:[%s8760_s5 + $0x60] sm:$0xff] (!%p293_p2)  ;;  %v457_v15 = vld [vmem:[%s8760_s5 + $0x78] sm:$0xff] (!%p293_p2) }
   0xa   : > { %v456_v16 = vld [vmem:[%s8760_s5 + $0x70] sm:$0xff] (!%p293_p2)  ;;  %v863_v17 = vld [vmem:[%s8756_s1] sm:$0xf] (!%p293_p2)  ;;  %v7489_v18 = vld [vmem:[%s8756_s1 + $0x4] sm:$0xf] (!%p293_p2) }
   0xb   : > { %507 = vperm.xlu1 (!%p293_p2), %7363, %v445_v3   ;;  %497 = vperm.xlu0 (!%p293_p2), %7362, %v443_v4   ;;  %v5996_v19 = vld [vmem:[%s8756_s1 + $0x10] sm:$0xf] (!%p293_p2)  ;;  %v7497_v20 = vld [vmem:[%s8756_s1 + $0x14] sm:$0xf] (!%p293_p2)  ;;  %v459_v21 = vld [vmem:[%s8760_s5 + $0x88] sm:$0xff] (!%p293_p2) }
   0xc   : > { %6521 = vmatprep.subr.msk.mxu1 (!%p293_p2), %vm979_vm0, %v863_v17  ;;  %v458_v22 = vld [vmem:[%s8760_s5 + $0x80] sm:$0xff] (!%p293_p2)  ;;  %6745 = vmatprep.subr.msk.mxu0 (!%p293_p2), %vm979_vm0, %v5996_v19  ;;  %v461_v23 = vld [vmem:[%s8760_s5 + $0x98] sm:$0xff] (!%p293_p2)  ;;  %v460_v24 = vld [vmem:[%s8760_s5 + $0x90] sm:$0xff] (!%p293_p2) }
   0xd   : > { %6522 = vmatpush3.msk.msra.mxu1 %vm979_vm0, %v863_v17  ;;  %6746 = vmatpush3.msk.msra.mxu0 %vm979_vm0, %v5996_v19  ;;  %v463_v25 = vld [vmem:[%s8760_s5 + $0xa8] sm:$0xff]  ;;  %v462_v26 = vld [vmem:[%s8760_s5 + $0xa0] sm:$0xff]  ;;  %v465_v27 = vld [vmem:[%s8760_s5 + $0xb8] sm:$0xff]  ;;  %s8766_s10 = smov (!%p334_p3, %s5835_s10), 1 }
   0xe   : > { %6577 = vmatprep.subr.msk.mxu1 %vm979_vm0, %v7489_v18  ;;  %6801 = vmatprep.subr.msk.mxu0 %vm979_vm0, %v7497_v20  ;;  %v464_v28 = vld [vmem:[%s8760_s5 + $0xb0] sm:$0xff]  ;;  %v467_v29 = vld [vmem:[%s8760_s5 + $0xc8] sm:$0xff]  ;;  %v466_v30 = vld [vmem:[%s8760_s5 + $0xc0] sm:$0xff]  ;;  %s7351_s26 = smul.u32 336, %s8766_s10  ;;  %s346_s22 = scalar_lea.vmem %s8763_s8, %s8766_s10 }
   0xf   : > { %517 = vperm.xlu1 %7363, %v447_v5   ;;  %512 = vperm.xlu0 %7362, %v446_v6   ;;  %v469_v31 = vld [vmem:[%s8760_s5 + $0xd8] sm:$0xff]  ;;  %v468_v32 = vld [vmem:[%s8760_s5 + $0xd0] sm:$0xff]  ;;  %v471_v33 = vld [vmem:[%s8760_s5 + $0xe8] sm:$0xff]  ;;  %s349_s25 = scalar_lea.vmem %s8764_s9, %s8766_s10 }
  0x10   : > { %v470_v34 = vld [vmem:[%s8760_s5 + $0xe0] sm:$0xff]  ;;  %v473_v35 = vld [vmem:[%s8760_s5 + $0xf8] sm:$0xff]  ;;  %v472_v36 = vld [vmem:[%s8760_s5 + $0xf0] sm:$0xff]  ;;  %s7571_s14 = scalar_lea.vmem %s8755_s0, %s7351_s26  ;;  %s8572_s18 = scalar_lea.vmem %s8762_s7, %s7351_s26 }
  0x11   : > { %v475_v37 = vld [vmem:[%s8760_s5 + $0x108] sm:$0xff]  ;;  %v474_v38 = vld [vmem:[%s8760_s5 + $0x100] sm:$0xff]  ;;  %v477_v41 = vld [vmem:[%s8760_s5 + $0x118] sm:$0xff] }
  0x12   : > { %v7576_v39 = vld [vmem:[%s8758_s3] ss:$0 sm:$0xff]  ;;  %v383_v40 = vld [vmem:[%s7571_s14 + $0x108] sm:$0xff]  ;;  %v476_v42 = vld [vmem:[%s8760_s5 + $0x110] sm:$0xff] }
  0x13   : > { %527 = vperm.xlu1 %7363, %v449_v7   ;;  %522 = vperm.xlu0 %7362, %v448_v8   ;;  %v7586_v43 = vmul.f32 %v7576_v39, %v383_v40  ;;  %v382_v44 = vld [vmem:[%s7571_s14 + $0x100] sm:$0xff]  ;;  %v385_v46 = vld [vmem:[%s7571_s14 + $0x118] sm:$0xff]  ;;  %v479_v47 = vld [vmem:[%s8760_s5 + $0x128] sm:$0xff] }
  0x14   : > { %v7590_v45 = vmul.f32 %v7576_v39, %v382_v44  ;;  %v478_v48 = vld [vmem:[%s8760_s5 + $0x120] sm:$0xff]  ;;  %v7600_v49 = vmul.f32 %v7576_v39, %v385_v46  ;;  %v384_v50 = vld [vmem:[%s7571_s14 + $0x110] sm:$0xff]  ;;  %v387_v52 = vld [vmem:[%s7571_s14 + $0x128] sm:$0xff] }
  0x15   : > { %v7604_v51 = vmul.f32 %v7576_v39, %v384_v50  ;;  %v481_v53 = vld [vmem:[%s8760_s5 + $0x138] sm:$0xff]  ;;  %v480_v54 = vld [vmem:[%s8760_s5 + $0x130] sm:$0xff]  ;;  %v7614_v55 = vmul.f32 %v7576_v39, %v387_v52  ;;  %v386_v56 = vld [vmem:[%s7571_s14 + $0x120] sm:$0xff] }
  0x16   : > { %v7618_v57 = vmul.f32 %v7576_v39, %v386_v56  ;;  %v389_v58 = vld [vmem:[%s7571_s14 + $0x138] sm:$0xff]  ;;  %v483_v59 = vld [vmem:[%s8760_s5 + $0x148] sm:$0xff]  ;;  %v482_v60 = vld [vmem:[%s8760_s5 + $0x140] sm:$0xff] }
  0x17   : > { %537 = vperm.xlu1 %7363, %v451_v9   ;;  %532 = vperm.xlu0 %7362, %v450_v10   ;;  %v7628_v61 = vmul.f32 %v7576_v39, %v389_v58  ;;  %v388_v62 = vld [vmem:[%s7571_s14 + $0x130] sm:$0xff]  ;;  %v391_v0 = vld [vmem:[%s7571_s14 + $0x148] sm:$0xff]  ;;  %v5316_v2 = vld [vmem:[%s8761_s6] sm:$0xff] }
  0x18   : > { %v7632_v63 = vmul.f32 %v7576_v39, %v388_v62  ;;  %v5317_v1 = vld [vmem:[%s8761_s6 + $0x8] sm:$0xff]  ;;  %v7642_v3 = vmul.f32 %v7576_v39, %v391_v0  ;;  %v390_v4 = vld [vmem:[%s7571_s14 + $0x140] sm:$0xff]  ;;  %v5319_v6 = vld [vmem:[%s8761_s6 + $0x18] sm:$0xff] }
  0x19   : > { %v7646_v5 = vmul.f32 %v7576_v39, %v390_v4  ;;  %v5318_v7 = vld [vmem:[%s8761_s6 + $0x10] sm:$0xff]  ;;  %v5321_v8 = vld [vmem:[%s8761_s6 + $0x28] sm:$0xff]  ;;  %v5320_v9 = vld [vmem:[%s8761_s6 + $0x20] sm:$0xff] }
  0x1a   : > { %v5323_v10 = vld [vmem:[%s8761_s6 + $0x38] sm:$0xff]  ;;  %v5328_v17 = vld [vmem:[%s8761_s6 + $0x60] sm:$0xff]  ;;  %v5342_v62 = vld [vmem:[%s8761_s6 + $0xd0] sm:$0xff] }
  0x1b   : > { %547 = vperm.xlu1 %7363, %v453_v11   ;;  %542 = vperm.xlu0 %7362, %v452_v12   ;;  %v5322_v11 = vld [vmem:[%s8761_s6 + $0x30] sm:$0xff]  ;;  %v5325_v12 = vld [vmem:[%s8761_s6 + $0x48] sm:$0xff]  ;;  %v5331_v19 = vld [vmem:[%s8761_s6 + $0x78] sm:$0xff] }
  0x1c   : > { %v5340_v44 = vld [vmem:[%s8761_s6 + $0xc0] sm:$0xff] }
  0x1d   : > { %v354_v56 = vld [vmem:[%s7571_s14 + $0x20] sm:$0xff] }
  0x1e   : > { %v403_v4 = vmul.f32 %v7576_v39, %v354_v56  ;;  %v7798_v56 = vld [vmem:[%s8756_s1 + $0x8] sm:$0xf] }
  0x1f   : > { %557 = vperm.xlu1 %7363, %v455_v13   ;;  %552 = vperm.xlu0 %7362, %v454_v14   ;;  %v5324_v13 = vld [vmem:[%s8761_s6 + $0x40] sm:$0xff]  ;;  %v5327_v14 = vld [vmem:[%s8761_s6 + $0x58] sm:$0xff] }
  0x23   : > { %567 = vperm.xlu1 %7363, %v457_v15   ;;  %562 = vperm.xlu0 %7362, %v456_v16   ;;  %v5326_v15 = vld [vmem:[%s8761_s6 + $0x50] sm:$0xff]  ;;  %v5329_v16 = vld [vmem:[%s8761_s6 + $0x68] sm:$0xff] }
  0x27   : > { %577 = vperm.xlu1 %7363, %v459_v21   ;;  %572 = vperm.xlu0 %7362, %v458_v22   ;;  %v5330_v21 = vld [vmem:[%s8761_s6 + $0x70] sm:$0xff]  ;;  %v5333_v22 = vld [vmem:[%s8761_s6 + $0x88] sm:$0xff] }
  0x2b   : > { %587 = vperm.xlu1 %7363, %v461_v23   ;;  %582 = vperm.xlu0 %7362, %v460_v24   ;;  %v5332_v23 = vld [vmem:[%s8761_s6 + $0x80] sm:$0xff]  ;;  %v5335_v24 = vld [vmem:[%s8761_s6 + $0x98] sm:$0xff] }
  0x2f   : > { %597 = vperm.xlu1 %7363, %v463_v25   ;;  %592 = vperm.xlu0 %7362, %v462_v26   ;;  %v5334_v25 = vld [vmem:[%s8761_s6 + $0x90] sm:$0xff]  ;;  %v5337_v26 = vld [vmem:[%s8761_s6 + $0xa8] sm:$0xff] }
  0x33   : > { %607 = vperm.xlu1 %7363, %v465_v27   ;;  %602 = vperm.xlu0 %7362, %v464_v28   ;;  %v5336_v27 = vld [vmem:[%s8761_s6 + $0xa0] sm:$0xff]  ;;  %v352_v28 = vld [vmem:[%s7571_s14 + $0x10] sm:$0xff] }
  0x37   : > { %617 = vperm.xlu1 %7363, %v467_v29   ;;  %612 = vperm.xlu0 %7362, %v466_v30   ;;  %v350_v29 = vld [vmem:[%s7571_s14] sm:$0xff] }
  0x38   : > { %v7713_v30 = vld [vmem:[%s8759_s4] ss:$0 sm:$0xff] }
  0x3b   : > { %627 = vperm.xlu1 %7363, %v469_v31   ;;  %622 = vperm.xlu0 %7362, %v468_v32   ;;  %v5339_v31 = vld [vmem:[%s8761_s6 + $0xb8] sm:$0xff]  ;;  %v5338_v32 = vld [vmem:[%s8761_s6 + $0xb0] sm:$0xff] }
  0x3f   : > { %637 = vperm.xlu1 %7363, %v471_v33   ;;  %632 = vperm.xlu0 %7362, %v470_v34   ;;  %v401_v33 = vmul.f32 %v7576_v39, %v352_v28  ;;  %v399_v34 = vmul.f32 %v7576_v39, %v350_v29 }
  0x43   : > { %647 = vperm.xlu1 %7363, %v473_v35   ;;  %642 = vperm.xlu0 %7362, %v472_v36  }
  0x47   : > { %657 = vperm.xlu1 %7363, %v475_v37   ;;  %652 = vperm.xlu0 %7362, %v474_v38   ;;  %v353_v37 = vld [vmem:[%s7571_s14 + $0x18] sm:$0xff]  ;;  %v351_v38 = vld [vmem:[%s7571_s14 + $0x8] sm:$0xff] }
  0x48   : > { %v400_v50 = vmul.f32 %v7576_v39, %v351_v38 }
  0x4b   : > { %667 = vperm.xlu1 %7363, %v477_v41   ;;  %662 = vperm.xlu0 %7362, %v476_v42   ;;  %v5341_v42 = vld [vmem:[%s8761_s6 + $0xc8] sm:$0xff] }
  0x4f   : > { %677 = vperm.xlu1 %7363, %v479_v47   ;;  %672 = vperm.xlu0 %7362, %v478_v48   ;;  %v402_v48 = vmul.f32 %v7576_v39, %v353_v37 }
  0x53   : > { %687 = vperm.xlu1 %7363, %v481_v53   ;;  %682 = vperm.xlu0 %7362, %v480_v54   ;;  %v355_v54 = vld [vmem:[%s7571_s14 + $0x28] sm:$0xff] }
  0x57   : > { %697 = vperm.xlu1 %7363, %v483_v59   ;;  %692 = vperm.xlu0 %7362, %v482_v60   ;;  %v5343_v60 = vld [vmem:[%s8761_s6 + $0xd8] sm:$0xff] }
  0x5b   : > { %5359 = vperm.xlu1 %7363, %v5317_v1   ;;  %5354 = vperm.xlu0 %7362, %v5316_v2   ;;  %v404_v2 = vmul.f32 %v7576_v39, %v355_v54  ;;  %v363_v54 = vld [vmem:[%s7571_s14 + $0x68] sm:$0xff] }
  0x5f   : > { %5369 = vperm.xlu1 %7363, %v5319_v6   ;;  %5364 = vperm.xlu0 %7362, %v5318_v7  }
  0x63   : > { %5379 = vperm.xlu1 %7363, %v5321_v8   ;;  %5374 = vperm.xlu0 %7362, %v5320_v9   ;;  %v357_v8 = vld [vmem:[%s7571_s14 + $0x38] sm:$0xff]  ;;  %v356_v9 = vld [vmem:[%s7571_s14 + $0x30] sm:$0xff] }
  0x67   : > { %5389 = vperm.xlu1 %7363, %v5323_v10   ;;  %5384 = vperm.xlu0 %7362, %v5322_v11  }
  0x6b   : > { %5399 = vperm.xlu1 %7363, %v5325_v12   ;;  %5394 = vperm.xlu0 %7362, %v5324_v13   ;;  %v5345_v12 = vld [vmem:[%s8761_s6 + $0xe8] sm:$0xff]  ;;  %v5344_v13 = vld [vmem:[%s8761_s6 + $0xe0] sm:$0xff] }
  0x6f   : > { %5409 = vperm.xlu1 %7363, %v5327_v14   ;;  %5404 = vperm.xlu0 %7362, %v5326_v15  }
  0x73   : > { %5419 = vperm.xlu1 %7363, %v5329_v16   ;;  %5414 = vperm.xlu0 %7362, %v5328_v17   ;;  %v406_v16 = vmul.f32 %v7576_v39, %v357_v8  ;;  %v405_v17 = vmul.f32 %v7576_v39, %v356_v9  ;;  %v365_v8 = vld [vmem:[%s7571_s14 + $0x78] sm:$0xff] }
  0x77   : > { %5429 = vperm.xlu1 %7363, %v5331_v19   ;;  %5424 = vperm.xlu0 %7362, %v5330_v21  }
  0x7b   : > { %5439 = vperm.xlu1 %7363, %v5333_v22   ;;  %5434 = vperm.xlu0 %7362, %v5332_v23   ;;  %v359_v22 = vld [vmem:[%s7571_s14 + $0x48] sm:$0xff]  ;;  %v358_v23 = vld [vmem:[%s7571_s14 + $0x40] sm:$0xff] }
  0x7f   : > { %5449 = vperm.xlu1 %7363, %v5335_v24   ;;  %5444 = vperm.xlu0 %7362, %v5334_v25  }
  0x83   : > { %5459 = vperm.xlu1 %7363, %v5337_v26   ;;  %5454 = vperm.xlu0 %7362, %v5336_v27   ;;  %v5347_v26 = vld [vmem:[%s8761_s6 + $0xf8] sm:$0xff]  ;;  %v5346_v27 = vld [vmem:[%s8761_s6 + $0xf0] sm:$0xff] }
  0x86   : > { %v503_v35 = vpop.permute.xlu1 %502  ;;  %v493_v36 = vpop.permute.xlu0 %492 }
  0x87   : > { %v702_v40 = vmul.f32 %v7713_v30, %v503_v35  ;;  %v700_v41 = vmul.f32 %v7713_v30, %v493_v36  ;;  %5469 = vperm.xlu1 %7363, %v5339_v31   ;;  %5464 = vperm.xlu0 %7362, %v5338_v32   ;;  %v408_v31 = vmul.f32 %v7576_v39, %v359_v22 }
  0x88   : > { %v407_v32 = vmul.f32 %v7576_v39, %v358_v23  ;;  %v414_v23 = vmul.f32 %v7576_v39, %v365_v8 }
  0x89   : > { %v744_v46 = vadd.f32 %v702_v40, %v401_v33  ;;  %v742_v47 = vadd.f32 %v700_v41, %v399_v34  ;;  %v361_v33 = vld [vmem:[%s7571_s14 + $0x58] sm:$0xff]  ;;  %v360_v34 = vld [vmem:[%s7571_s14 + $0x50] sm:$0xff] }
  0x8a   : > { %v508_v52 = vpop.permute.xlu1 %507  ;;  %v498_v53 = vpop.permute.xlu0 %497 }
  0x8b   : > { %787 = vst.msk [vmem:[#allocation2 + $0x10] sm:$0xff] %vm784_vm1, %v744_v46  ;;  %785 = vst.msk [vmem:[#allocation2] sm:$0xff] %vm784_vm1, %v742_v47  ;;  %v703_v58 = vmul.f32 %v7713_v30, %v508_v52  ;;  %v701_v59 = vmul.f32 %v7713_v30, %v498_v53  ;;  %5479 = vperm.xlu1 %7363, %v5341_v42   ;;  %5474 = vperm.xlu0 %7362, %v5340_v44   ;;  %v5349_v44 = vld [vmem:[%s8761_s6 + $0x108] sm:$0xff]  ;;  %v5348_v46 = vld [vmem:[%s8761_s6 + $0x100] sm:$0xff] }
  0x8c   : > { %v410_v52 = vmul.f32 %v7576_v39, %v361_v33  ;;  %v409_v53 = vmul.f32 %v7576_v39, %v360_v34 }
  0x8d   : > { %v745_v0 = vadd.f32 %v703_v58, %v402_v48  ;;  %v743_v1 = vadd.f32 %v701_v59, %v400_v50 }
  0x8e   : > { %v518_v6 = vpop.permute.xlu1 %517  ;;  %v513_v7 = vpop.permute.xlu0 %512 }
  0x8f   : > { %788 = vst.msk [vmem:[#allocation2 + $0x18] sm:$0xff] %vm784_vm1, %v745_v0  ;;  %786 = vst.msk [vmem:[#allocation2 + $0x8] sm:$0xff] %vm784_vm1, %v743_v1  ;;  %v705_v10 = vmul.f32 %v7713_v30, %v518_v6  ;;  %v704_v11 = vmul.f32 %v7713_v30, %v513_v7  ;;  %5489 = vperm.xlu1 %7363, %v5343_v60   ;;  %5484 = vperm.xlu0 %7362, %v5342_v62   ;;  %v362_v0 = vld [vmem:[%s7571_s14 + $0x60] sm:$0xff]  ;;  %v5351_v6 = vld [vmem:[%s8761_s6 + $0x118] sm:$0xff] }
  0x90   : > { %v5350_v7 = vld [vmem:[%s8761_s6 + $0x110] sm:$0xff] }
  0x91   : > { %v747_v14 = vadd.f32 %v705_v10, %v404_v2  ;;  %v746_v15 = vadd.f32 %v704_v11, %v403_v4 }
  0x92   : > { %v528_v19 = vpop.permute.xlu1 %527  ;;  %v523_v21 = vpop.permute.xlu0 %522 }
  0x93   : > { %790 = vst.msk [vmem:[#allocation2 + $0x28] sm:$0xff] %vm784_vm1, %v747_v14  ;;  %789 = vst.msk [vmem:[#allocation2 + $0x20] sm:$0xff] %vm784_vm1, %v746_v15  ;;  %v707_v24 = vmul.f32 %v7713_v30, %v528_v19  ;;  %v706_v25 = vmul.f32 %v7713_v30, %v523_v21  ;;  %5499 = vperm.xlu1 %7363, %v5345_v12   ;;  %5494 = vperm.xlu0 %7362, %v5344_v13   ;;  %v364_v13 = vld [vmem:[%s7571_s14 + $0x70] sm:$0xff]  ;;  %v7827_v14 = vld [vmem:[%s8756_s1 + $0x18] sm:$0xf] }
  0x94   : > { %v411_v12 = vmul.f32 %v7576_v39, %v362_v0 }
  0x95   : > { %v749_v28 = vadd.f32 %v707_v24, %v406_v16  ;;  %v748_v29 = vadd.f32 %v706_v25, %v405_v17 }
  0x96   : > { %v538_v35 = vpop.permute.xlu1 %537  ;;  %v533_v36 = vpop.permute.xlu0 %532  ;;  %v827_v37 = vld [vmem:[#allocation2 + $0x5] sm:$0xff]  ;;  %v2770_v38 = vld [vmem:[#allocation2 + $0x18] sm:$0xff]  ;;  %v828_v40 = vld [vmem:[#allocation2 + $0xd] sm:$0xff] }
  0x97   : > { %792 = vst.msk [vmem:[#allocation2 + $0x38] sm:$0xff] %vm784_vm1, %v749_v28  ;;  %791 = vst.msk [vmem:[#allocation2 + $0x30] sm:$0xff] %vm784_vm1, %v748_v29  ;;  %v709_v41 = vmul.f32 %v7713_v30, %v538_v35  ;;  %v708_v42 = vmul.f32 %v7713_v30, %v533_v36  ;;  %5509 = vperm.xlu1 %7363, %v5347_v26   ;;  %5504 = vperm.xlu0 %7362, %v5346_v27   ;;  %v829_v50 = vld [vmem:[#allocation2 + $0x15] sm:$0xff]  ;;  %v367_v28 = vld [vmem:[%s7571_s14 + $0x88] sm:$0xff] }
  0x98   : > { %6523 = vmatprep.mubr.msk.f32.mxu1 %vm784_vm1, %v827_v37  ;;  %6747 = vmatprep.mubr.msk.f32.mxu0 %vm784_vm1, %v2770_v38  ;;  %v413_v27 = vmul.f32 %v7576_v39, %v364_v13  ;;  %v366_v29 = vld [vmem:[%s7571_s14 + $0x80] sm:$0xff]  ;;  %v416_v38 = vmul.f32 %v7576_v39, %v367_v28 }
  0x99   : > { %v751_v47 = vadd.f32 %v709_v41, %v408_v31  ;;  %v750_v48 = vadd.f32 %v708_v42, %v407_v32  ;;  %6524 = vmatmul.mubr.msk.f32.vlgmr.msra.gmra.mrb[0].mxu1 %vm784_vm1, %v828_v40 }
  0x9a   : > { %6526 = vmatprep.mubr.msk.f32.mxu1 %vm784_vm1, %v829_v50  ;;  %6578 = vmatpush3.msk.msra.mxu1 %vm979_vm0, %v7489_v18  ;;  %v548_v58 = vpop.permute.xlu1 %547  ;;  %v543_v59 = vpop.permute.xlu0 %542  ;;  %v2771_v60 = vld [vmem:[#allocation2 + $0x20] sm:$0xff]  ;;  %v2772_v4 = vld [vmem:[#allocation2 + $0x28] sm:$0xff]  ;;  %v412_v18 = vmul.f32 %v7576_v39, %v363_v54 }
  0x9b   : > { %v830_v62 = vld [vmem:[#allocation2 + $0x1d] sm:$0xff]  ;;  %794 = vst.msk [vmem:[#allocation2 + $0x48] sm:$0xff] %vm784_vm1, %v751_v47  ;;  %793 = vst.msk [vmem:[#allocation2 + $0x40] sm:$0xff] %vm784_vm1, %v750_v48  ;;  %v711_v1 = vmul.f32 %v7713_v30, %v548_v58  ;;  %v710_v2 = vmul.f32 %v7713_v30, %v543_v59  ;;  %5519 = vperm.xlu1 %7363, %v5349_v44   ;;  %5514 = vperm.xlu0 %7362, %v5348_v46   ;;  %v831_v11 = vld [vmem:[#allocation2 + $0x25] sm:$0xff] }
  0x9c   : > { %6748 = vmatmul.mubr.msk.f32.vlgmr.msra.gmra.mrb[0].mxu0 %vm784_vm1, %v2771_v60  ;;  %6633 = vmatprep.subr.msk.mxu1 %vm979_vm0, %v7798_v56  ;;  %v415_v44 = vmul.f32 %v7576_v39, %v366_v29  ;;  %v369_v46 = vld [vmem:[%s7571_s14 + $0x98] sm:$0xff]  ;;  %v368_v47 = vld [vmem:[%s7571_s14 + $0x90] sm:$0xff] }
  0x9d   : > { %v753_v9 = vadd.f32 %v711_v1, %v410_v52  ;;  %v752_v10 = vadd.f32 %v710_v2, %v409_v53  ;;  %6802 = vmatpush3.msk.msra.mxu0 %vm979_vm0, %v7497_v20  ;;  %6527 = vmatmul.mubr.msk.f32.gmra.mrb[2].mxu1 %vm784_vm1, %v830_v62  ;;  %v418_v60 = vmul.f32 %v7576_v39, %v369_v46 }
  0x9e   : > { %6750 = vmatprep.mubr.msk.f32.mxu0 %vm784_vm1, %v2772_v4  ;;  %6529 = vmatprep.mubr.msk.f32.mxu1 %vm784_vm1, %v831_v11  ;;  %v558_v15 = vpop.permute.xlu1 %557  ;;  %v553_v16 = vpop.permute.xlu0 %552  ;;  %v2773_v17 = vld [vmem:[#allocation2 + $0x30] sm:$0xff]  ;;  %v2774_v20 = vld [vmem:[#allocation2 + $0x38] sm:$0xff]  ;;  %v417_v2 = vmul.f32 %v7576_v39, %v368_v47  ;;  %v371_v4 = vld [vmem:[%s7571_s14 + $0xa8] sm:$0xff] }
  0x9f   : > { %v832_v19 = vld [vmem:[#allocation2 + $0x2d] sm:$0xff]  ;;  %796 = vst.msk [vmem:[#allocation2 + $0x58] sm:$0xff] %vm784_vm1, %v753_v9  ;;  %795 = vst.msk [vmem:[#allocation2 + $0x50] sm:$0xff] %vm784_vm1, %v752_v10  ;;  %v713_v21 = vmul.f32 %v7713_v30, %v558_v15  ;;  %v712_v22 = vmul.f32 %v7713_v30, %v553_v16  ;;  %5529 = vperm.xlu1 %7363, %v5351_v6   ;;  %5524 = vperm.xlu0 %7362, %v5350_v7   ;;  %v833_v26 = vld [vmem:[#allocation2 + $0x35] sm:$0xff] }
  0xa0   : > { %6751 = vmatmul.mubr.msk.f32.gmra.mrb[2].mxu0 %vm784_vm1, %v2773_v17  ;;  %6857 = vmatprep.subr.msk.mxu0 %vm979_vm0, %v7827_v14  ;;  %v420_v13 = vmul.f32 %v7576_v39, %v371_v4 }
  0xa1   : > { %v755_v24 = vadd.f32 %v713_v21, %v412_v18  ;;  %v754_v25 = vadd.f32 %v712_v22, %v411_v12  ;;  %6530 = vmatmul.mubr.msk.f32.gmra.mrb[4].mxu1 %vm784_vm1, %v832_v19  ;;  %6753 = vmatprep.mubr.msk.f32.mxu0 %vm784_vm1, %v2774_v20  ;;  %v370_v18 = vld [vmem:[%s7571_s14 + $0xa0] sm:$0xff]  ;;  %v373_v20 = vld [vmem:[%s7571_s14 + $0xb8] sm:$0xff]  ;;  %v372_v21 = vld [vmem:[%s7571_s14 + $0xb0] sm:$0xff] }
  0xa2   : > { %6532 = vmatprep.mubr.msk.f32.mxu1 %vm784_vm1, %v833_v26  ;;  %v568_v31 = vpop.permute.xlu1 %567  ;;  %v563_v32 = vpop.permute.xlu0 %562  ;;  %v2775_v33 = vld [vmem:[#allocation2 + $0x40] sm:$0xff]  ;;  %v2776_v35 = vld [vmem:[#allocation2 + $0x48] sm:$0xff]  ;;  %v419_v19 = vmul.f32 %v7576_v39, %v370_v18  ;;  %v422_v29 = vmul.f32 %v7576_v39, %v373_v20 }
  0xa3   : > { %v834_v34 = vld [vmem:[#allocation2 + $0x3d] sm:$0xff]  ;;  %798 = vst.msk [vmem:[#allocation2 + $0x68] sm:$0xff] %vm784_vm1, %v755_v24  ;;  %797 = vst.msk [vmem:[#allocation2 + $0x60] sm:$0xff] %vm784_vm1, %v754_v25  ;;  %v715_v36 = vmul.f32 %v7713_v30, %v568_v31  ;;  %v714_v37 = vmul.f32 %v7713_v30, %v563_v32  ;;  %v835_v42 = vld [vmem:[#allocation2 + $0x45] sm:$0xff] }
  0xa4   : > { %6754 = vmatmul.mubr.msk.f32.gmra.mrb[4].mxu0 %vm784_vm1, %v2775_v33  ;;  %v3272_v20 = vld [vmem:[#allocation2 + $0x19] sm:$0xff] }
  0xa5   : > { %v757_v40 = vadd.f32 %v715_v36, %v414_v23  ;;  %v756_v41 = vadd.f32 %v714_v37, %v413_v27  ;;  %6533 = vmatmul.mubr.msk.f32.gmra.mrb[6].mxu1 %vm784_vm1, %v834_v34  ;;  %6756 = vmatprep.mubr.msk.f32.mxu0 %vm784_vm1, %v2776_v35  ;;  %v421_v34 = vmul.f32 %v7576_v39, %v372_v21  ;;  %v375_v35 = vld [vmem:[%s7571_s14 + $0xc8] sm:$0xff]  ;;  %v374_v36 = vld [vmem:[%s7571_s14 + $0xc0] sm:$0xff] }
  0xa6   : > { %6535 = vmatprep.mubr.msk.f32.mxu1 %vm784_vm1, %v835_v42  ;;  %v578_v48 = vpop.permute.xlu1 %577  ;;  %v573_v50 = vpop.permute.xlu0 %572  ;;  %v2777_v52 = vld [vmem:[#allocation2 + $0x50] sm:$0xff]  ;;  %v2778_v54 = vld [vmem:[#allocation2 + $0x58] sm:$0xff]  ;;  %v424_v47 = vmul.f32 %v7576_v39, %v375_v35 }
  0xa7   : > { %v836_v53 = vld [vmem:[#allocation2 + $0x4d] sm:$0xff]  ;;  %800 = vst.msk [vmem:[#allocation2 + $0x78] sm:$0xff] %vm784_vm1, %v757_v40  ;;  %799 = vst.msk [vmem:[#allocation2 + $0x70] sm:$0xff] %vm784_vm1, %v756_v41  ;;  %v717_v58 = vmul.f32 %v7713_v30, %v578_v48  ;;  %v716_v59 = vmul.f32 %v7713_v30, %v573_v50  ;;  %v837_v1 = vld [vmem:[#allocation2 + $0x55] sm:$0xff] }
  0xa8   : > { %6757 = vmatmul.mubr.msk.f32.gmra.mrb[6].mxu0 %vm784_vm1, %v2777_v52 }
  0xa9   : > { %v759_v62 = vadd.f32 %v717_v58, %v416_v38  ;;  %v758_v0 = vadd.f32 %v716_v59, %v415_v44  ;;  %6536 = vmatmul.mubr.msk.f32.gmra.mrb[8].mxu1 %vm784_vm1, %v836_v53  ;;  %6759 = vmatprep.mubr.msk.f32.mxu0 %vm784_vm1, %v2778_v54  ;;  %v423_v53 = vmul.f32 %v7576_v39, %v374_v36  ;;  %v377_v54 = vld [vmem:[%s7571_s14 + $0xd8] sm:$0xff]  ;;  %v376_v58 = vld [vmem:[%s7571_s14 + $0xd0] sm:$0xff] }
  0xaa   : > { %6538 = vmatprep.mubr.msk.f32.mxu1 %vm784_vm1, %v837_v1  ;;  %v588_v6 = vpop.permute.xlu1 %587  ;;  %v583_v7 = vpop.permute.xlu0 %582  ;;  %v2779_v8 = vld [vmem:[#allocation2 + $0x60] sm:$0xff]  ;;  %v2780_v10 = vld [vmem:[#allocation2 + $0x68] sm:$0xff]  ;;  %v426_v18 = vmul.f32 %v7576_v39, %v377_v54  ;;  %v7938_v36 = vld [vmem:[%s8756_s1 + $0x1c] sm:$0xf] }
  0xab   : > { %v838_v9 = vld [vmem:[#allocation2 + $0x5d] sm:$0xff]  ;;  %802 = vst.msk [vmem:[#allocation2 + $0x88] sm:$0xff] %vm784_vm1, %v759_v62  ;;  %801 = vst.msk [vmem:[#allocation2 + $0x80] sm:$0xff] %vm784_vm1, %v758_v0  ;;  %v719_v11 = vmul.f32 %v7713_v30, %v588_v6  ;;  %v718_v12 = vmul.f32 %v7713_v30, %v583_v7  ;;  %v839_v17 = vld [vmem:[#allocation2 + $0x65] sm:$0xff] }
  0xac   : > { %6760 = vmatmul.mubr.msk.f32.gmra.mrb[8].mxu0 %vm784_vm1, %v2779_v8 }
  0xad   : > { %v761_v15 = vadd.f32 %v719_v11, %v418_v60  ;;  %v760_v16 = vadd.f32 %v718_v12, %v417_v2  ;;  %6539 = vmatmul.mubr.msk.f32.gmra.mrb[10].mxu1 %vm784_vm1, %v838_v9  ;;  %6762 = vmatprep.mubr.msk.f32.mxu0 %vm784_vm1, %v2780_v10  ;;  %v425_v9 = vmul.f32 %v7576_v39, %v376_v58  ;;  %v379_v10 = vld [vmem:[%s7571_s14 + $0xe8] sm:$0xff] }
  0xae   : > { %6541 = vmatprep.mubr.msk.f32.mxu1 %vm784_vm1, %v839_v17  ;;  %v598_v22 = vpop.permute.xlu1 %597  ;;  %v593_v23 = vpop.permute.xlu0 %592  ;;  %v2781_v24 = vld [vmem:[#allocation2 + $0x70] sm:$0xff]  ;;  %v2782_v26 = vld [vmem:[#allocation2 + $0x78] sm:$0xff]  ;;  %v428_v21 = vmul.f32 %v7576_v39, %v379_v10 }
  0xaf   : > { %v840_v25 = vld [vmem:[#allocation2 + $0x6d] sm:$0xff]  ;;  %804 = vst.msk [vmem:[#allocation2 + $0x98] sm:$0xff] %vm784_vm1, %v761_v15  ;;  %803 = vst.msk [vmem:[#allocation2 + $0x90] sm:$0xff] %vm784_vm1, %v760_v16  ;;  %v721_v27 = vmul.f32 %v7713_v30, %v598_v22  ;;  %v720_v28 = vmul.f32 %v7713_v30, %v593_v23  ;;  %v841_v33 = vld [vmem:[#allocation2 + $0x75] sm:$0xff] }
  0xb0   : > { %6763 = vmatmul.mubr.msk.f32.gmra.mrb[10].mxu0 %vm784_vm1, %v2781_v24  ;;  %v378_v16 = vld [vmem:[%s7571_s14 + $0xe0] sm:$0xff] }
  0xb1   : > { %v763_v31 = vadd.f32 %v721_v27, %v420_v13  ;;  %v762_v32 = vadd.f32 %v720_v28, %v419_v19  ;;  %6542 = vmatmul.mubr.msk.f32.gmra.mrb[12].mxu1 %vm784_vm1, %v840_v25  ;;  %6765 = vmatprep.mubr.msk.f32.mxu0 %vm784_vm1, %v2782_v26  ;;  %v427_v25 = vmul.f32 %v7576_v39, %v378_v16  ;;  %v381_v26 = vld [vmem:[%s7571_s14 + $0xf8] sm:$0xff] }
  0xb2   : > { %6544 = vmatprep.mubr.msk.f32.mxu1 %vm784_vm1, %v841_v33  ;;  %v608_v37 = vpop.permute.xlu1 %607  ;;  %v603_v38 = vpop.permute.xlu0 %602  ;;  %v2783_v40 = vld [vmem:[#allocation2 + $0x80] sm:$0xff]  ;;  %v2784_v42 = vld [vmem:[#allocation2 + $0x88] sm:$0xff]  ;;  %v430_v35 = vmul.f32 %v7576_v39, %v381_v26 }
  0xb3   : > { %v842_v41 = vld [vmem:[#allocation2 + $0x7d] sm:$0xff]  ;;  %806 = vst.msk [vmem:[#allocation2 + $0xa8] sm:$0xff] %vm784_vm1, %v763_v31  ;;  %805 = vst.msk [vmem:[#allocation2 + $0xa0] sm:$0xff] %vm784_vm1, %v762_v32  ;;  %v723_v44 = vmul.f32 %v7713_v30, %v608_v37  ;;  %v722_v46 = vmul.f32 %v7713_v30, %v603_v38  ;;  %v843_v52 = vld [vmem:[#allocation2 + $0x85] sm:$0xff] }
  0xb4   : > { %6766 = vmatmul.mubr.msk.f32.gmra.mrb[12].mxu0 %vm784_vm1, %v2783_v40  ;;  %v380_v31 = vld [vmem:[%s7571_s14 + $0xf0] sm:$0xff] }
  0xb5   : > { %v765_v48 = vadd.f32 %v723_v44, %v422_v29  ;;  %v764_v50 = vadd.f32 %v722_v46, %v421_v34  ;;  %6545 = vmatmul.mubr.msk.f32.gmra.mrb[14].mxu1 %vm784_vm1, %v842_v41  ;;  %6768 = vmatprep.mubr.msk.f32.mxu0 %vm784_vm1, %v2784_v42  ;;  %v3273_v34 = vld [vmem:[#allocation2 + $0x21] sm:$0xff]  ;;  %v7943_v40 = vld [vmem:[#allocation2 + $0x29] sm:$0xff]  ;;  %v429_v42 = vmul.f32 %v7576_v39, %v380_v31  ;;  %v7959_v39 = vld [vmem:[#allocation2 + $0x39] sm:$0xff] }
  0xb6   : > { %6547 = vmatprep.mubr.msk.f32.mxu1 %vm784_vm1, %v843_v52  ;;  %v618_v59 = vpop.permute.xlu1 %617  ;;  %v613_v60 = vpop.permute.xlu0 %612  ;;  %v2785_v62 = vld [vmem:[#allocation2 + $0x90] sm:$0xff]  ;;  %v2786_v1 = vld [vmem:[#allocation2 + $0x98] sm:$0xff] }
  0xb7   : > { %v844_v0 = vld [vmem:[#allocation2 + $0x8d] sm:$0xff]  ;;  %808 = vst.msk [vmem:[#allocation2 + $0xb8] sm:$0xff] %vm784_vm1, %v765_v48  ;;  %807 = vst.msk [vmem:[#allocation2 + $0xb0] sm:$0xff] %vm784_vm1, %v764_v50  ;;  %v725_v2 = vmul.f32 %v7713_v30, %v618_v59  ;;  %v724_v4 = vmul.f32 %v7713_v30, %v613_v60  ;;  %v845_v8 = vld [vmem:[#allocation2 + $0x95] sm:$0xff] }
  0xb8   : > { %6769 = vmatmul.mubr.msk.f32.gmra.mrb[14].mxu0 %vm784_vm1, %v2785_v62  ;;  %v7953_v50 = vld [vmem:[#allocation2 + $0x31] sm:$0xff] }
  0xb9   : > { %v767_v6 = vadd.f32 %v725_v2, %v424_v47  ;;  %v766_v7 = vadd.f32 %v724_v4, %v423_v53  ;;  %6548 = vmatmul.mubr.msk.f32.gmra.mrb[16].mxu1 %vm784_vm1, %v844_v0  ;;  %6771 = vmatprep.mubr.msk.f32.mxu0 %vm784_vm1, %v2786_v1  ;;  %v7969_v1 = vld [vmem:[#allocation2 + $0x41] sm:$0xff]  ;;  %v7973_v2 = vld [vmem:[#allocation2 + $0x49] sm:$0xff] }
  0xba   : > { %6550 = vmatprep.mubr.msk.f32.mxu1 %vm784_vm1, %v845_v8  ;;  %v628_v11 = vpop.permute.xlu1 %627  ;;  %v623_v12 = vpop.permute.xlu0 %622  ;;  %v2787_v13 = vld [vmem:[#allocation2 + $0xa0] sm:$0xff] }
  0xbb   : > { %v846_v15 = vld [vmem:[#allocation2 + $0x9d] sm:$0xff]  ;;  %810 = vst.msk [vmem:[#allocation2 + $0xc8] sm:$0xff] %vm784_vm1, %v767_v6  ;;  %809 = vst.msk [vmem:[#allocation2 + $0xc0] sm:$0xff] %vm784_vm1, %v766_v7  ;;  %v727_v17 = vmul.f32 %v7713_v30, %v628_v11  ;;  %v726_v19 = vmul.f32 %v7713_v30, %v623_v12  ;;  %v847_v24 = vld [vmem:[#allocation2 + $0xa5] sm:$0xff] }
  0xbc   : > { %6772 = vmatmul.mubr.msk.f32.gmra.mrb[16].mxu0 %vm784_vm1, %v2787_v13  ;;  %v7989_v11 = vld [vmem:[#allocation2 + $0x59] sm:$0xff] }
  0xbd   : > { %v769_v22 = vadd.f32 %v727_v17, %v426_v18  ;;  %v768_v23 = vadd.f32 %v726_v19, %v425_v9  ;;  %6551 = vmatmul.mubr.msk.f32.gmra.mrb[18].mxu1 %vm784_vm1, %v846_v15  ;;  %6803 = vmatprep.mubr.msk.f32.mxu0 %vm784_vm1, %v3272_v20 }
  0xbe   : > { %6553 = vmatprep.mubr.msk.f32.mxu1 %vm784_vm1, %v847_v24  ;;  %v638_v27 = vpop.permute.xlu1 %637  ;;  %v633_v28 = vpop.permute.xlu0 %632  ;;  %v848_v29 = vld [vmem:[#allocation2 + $0xad] sm:$0xff]  ;;  %v849_v41 = vld [vmem:[#allocation2 + $0xb5] sm:$0xff] }
  0xbf   : > { %812 = vst.msk [vmem:[#allocation2 + $0xd8] sm:$0xff] %vm784_vm1, %v769_v22  ;;  %811 = vst.msk [vmem:[#allocation2 + $0xd0] sm:$0xff] %vm784_vm1, %v768_v23  ;;  %v729_v32 = vmul.f32 %v7713_v30, %v638_v27  ;;  %v728_v33 = vmul.f32 %v7713_v30, %v633_v28 }
  0xc0   : > { %6804 = vmatmul.mubr.msk.f32.vlgmr.msra.gmra.mrb[0].mxu0 %vm784_vm1, %v3273_v34 }
  0xc1   : > { %v771_v37 = vadd.f32 %v729_v32, %v428_v21  ;;  %v770_v38 = vadd.f32 %v728_v33, %v427_v25  ;;  %6858 = vmatpush3.msk.msra.mxu0 %vm979_vm0, %v7827_v14  ;;  %6554 = vmatmul.mubr.msk.f32.gmra.mrb[20].mxu1 %vm784_vm1, %v848_v29  ;;  %v8005_v21 = vld [vmem:[#allocation2 + $0x69] sm:$0xff]  ;;  %v8021_v29 = vld [vmem:[#allocation2 + $0x79] sm:$0xff] }
  0xc2   : > { %6806 = vmatprep.mubr.msk.f32.mxu0 %vm784_vm1, %v7943_v40  ;;  %6556 = vmatprep.mubr.msk.f32.mxu1 %vm784_vm1, %v849_v41  ;;  %v648_v44 = vpop.permute.xlu1 %647  ;;  %v643_v46 = vpop.permute.xlu0 %642  ;;  %v850_v47 = vld [vmem:[#allocation2 + $0xbd] sm:$0xff]  ;;  %v851_v54 = vld [vmem:[#allocation2 + $0xc5] sm:$0xff] }
  0xc3   : > { %814 = vst.msk [vmem:[#allocation2 + $0xe8] sm:$0xff] %vm784_vm1, %v771_v37  ;;  %813 = vst.msk [vmem:[#allocation2 + $0xe0] sm:$0xff] %vm784_vm1, %v770_v38  ;;  %v731_v14 = vmul.f32 %v7713_v30, %v648_v44  ;;  %v730_v48 = vmul.f32 %v7713_v30, %v643_v46  ;;  %6913 = vmatprep.subr.msk.mxu0 %vm979_vm0, %v7938_v36  ;;  %v8037_v41 = vld [vmem:[#allocation2 + $0x89] sm:$0xff] }
  0xc4   : > { %6807 = vmatmul.mubr.msk.f32.gmra.mrb[2].mxu0 %vm784_vm1, %v7953_v50 }
  0xc5   : > { %v773_v52 = vadd.f32 %v731_v14, %v430_v35  ;;  %v772_v53 = vadd.f32 %v730_v48, %v429_v42  ;;  %6557 = vmatmul.mubr.msk.f32.gmra.mrb[22].mxu1 %vm784_vm1, %v850_v47  ;;  %6809 = vmatprep.mubr.msk.f32.mxu0 %vm784_vm1, %v7959_v39  ;;  %v8047_v47 = vld [vmem:[#allocation2 + $0x91] sm:$0xff]  ;;  %v8057_v14 = vld [vmem:[#allocation2 + $0xa1] sm:$0xff] }
  0xc6   : > { %6559 = vmatprep.mubr.msk.f32.mxu1 %vm784_vm1, %v851_v54  ;;  %v658_v58 = vpop.permute.xlu1 %657  ;;  %v653_v59 = vpop.permute.xlu0 %652  ;;  %v852_v60 = vld [vmem:[#allocation2 + $0xcd] sm:$0xff]  ;;  %v853_v6 = vld [vmem:[#allocation2 + $0xd5] sm:$0xff] }
  0xc7   : > { %816 = vst.msk [vmem:[#allocation2 + $0xf8] sm:$0xff] %vm784_vm1, %v773_v52  ;;  %815 = vst.msk [vmem:[#allocation2 + $0xf0] sm:$0xff] %vm784_vm1, %v772_v53  ;;  %v733_v62 = vmul.f32 %v7713_v30, %v658_v58  ;;  %v732_v0 = vmul.f32 %v7713_v30, %v653_v59  ;;  %v1265_v48 = vld [vmem:[#allocation2 + $0xe] sm:$0xff]  ;;  %v1266_v54 = vld [vmem:[#allocation2 + $0x16] sm:$0xff] }
  0xc8   : > { %6810 = vmatmul.mubr.msk.f32.gmra.mrb[4].mxu0 %vm784_vm1, %v7969_v1  ;;  %v8061_v52 = vld [vmem:[#allocation2 + $0xa9] sm:$0xff]  ;;  %v8074_v58 = vld [vmem:[#allocation2 + $0xb1] sm:$0xff]  ;;  %v1267_v59 = vld [vmem:[#allocation2 + $0x1e] sm:$0xff] }
  0xc9   : > { %v775_v4 = vadd.f32 %v733_v62, %v7586_v43  ;;  %v774_v18 = vadd.f32 %v732_v0, %v7590_v45  ;;  %6560 = vmatmul.mubr.msk.f32.gmra.mrb[24].mxu1 %vm784_vm1, %v852_v60  ;;  %6812 = vmatprep.mubr.msk.f32.mxu0 %vm784_vm1, %v7973_v2  ;;  %v7985_v45 = vld [vmem:[#allocation2 + $0x51] sm:$0xff]  ;;  %v8066_v53 = vld [vmem:[%s8756_s1 + $0xc] sm:$0xf]  ;;  %v8080_v60 = vld [vmem:[#allocation2 + $0xb9] sm:$0xff] }
  0xca   : > { %6562 = vmatprep.mubr.msk.f32.mxu1 %vm784_vm1, %v853_v6  ;;  %v668_v7 = vpop.permute.xlu1 %667  ;;  %v663_v8 = vpop.permute.xlu0 %662  ;;  %v854_v9 = vld [vmem:[#allocation2 + $0xdd] sm:$0xff]  ;;  %v855_v15 = vld [vmem:[#allocation2 + $0xe5] sm:$0xff]  ;;  %v1269_v0 = vld [vmem:[#allocation2 + $0x2e] sm:$0xff] }
  0xcb   : > { %818 = vst.msk [vmem:[#allocation2 + $0x108] sm:$0xff] %vm784_vm1, %v775_v4  ;;  %817 = vst.msk [vmem:[#allocation2 + $0x100] sm:$0xff] %vm784_vm1, %v774_v18  ;;  %v735_v10 = vmul.f32 %v7713_v30, %v668_v7  ;;  %v734_v43 = vmul.f32 %v7713_v30, %v663_v8  ;;  %v1268_v62 = vld [vmem:[#allocation2 + $0x26] sm:$0xff]  ;;  %v1270_v18 = vld [vmem:[#allocation2 + $0x36] sm:$0xff] }
  0xcc   : > { %6813 = vmatmul.mubr.msk.f32.gmra.mrb[6].mxu0 %vm784_vm1, %v7985_v45  ;;  %v8090_v4 = vld [vmem:[#allocation2 + $0xc9] sm:$0xff]  ;;  %v8096_v6 = vld [vmem:[#allocation2 + $0xd1] sm:$0xff]  ;;  %v1271_v7 = vld [vmem:[#allocation2 + $0x3e] sm:$0xff] }
  0xcd   : > { %v777_v12 = vadd.f32 %v735_v10, %v7600_v49  ;;  %v776_v13 = vadd.f32 %v734_v43, %v7604_v51  ;;  %6563 = vmatmul.mubr.msk.f32.gmra.mrb[26].mxu1 %vm784_vm1, %v854_v9  ;;  %6815 = vmatprep.mubr.msk.f32.mxu0 %vm784_vm1, %v7989_v11  ;;  %v8001_v51 = vld [vmem:[#allocation2 + $0x61] sm:$0xff]  ;;  %v8100_v8 = vld [vmem:[#allocation2 + $0xd9] sm:$0xff]  ;;  %v1273_v43 = vld [vmem:[#allocation2 + $0x4e] sm:$0xff] }
  0xce   : > { %6565 = vmatprep.mubr.msk.f32.mxu1 %vm784_vm1, %v855_v15  ;;  %v678_v16 = vpop.permute.xlu1 %677  ;;  %v673_v17 = vpop.permute.xlu0 %672  ;;  %v856_v19 = vld [vmem:[#allocation2 + $0xed] sm:$0xff]  ;;  %v857_v24 = vld [vmem:[#allocation2 + $0xf5] sm:$0xff]  ;;  %v8106_v10 = vld [vmem:[#allocation2 + $0xe1] sm:$0xff] }
  0xcf   : > { %820 = vst.msk [vmem:[#allocation2 + $0x118] sm:$0xff] %vm784_vm1, %v777_v12  ;;  %819 = vst.msk [vmem:[#allocation2 + $0x110] sm:$0xff] %vm784_vm1, %v776_v13  ;;  %v737_v20 = vmul.f32 %v7713_v30, %v678_v16  ;;  %v736_v49 = vmul.f32 %v7713_v30, %v673_v17  ;;  %v1272_v9 = vld [vmem:[#allocation2 + $0x46] sm:$0xff]  ;;  %v1274_v13 = vld [vmem:[#allocation2 + $0x56] sm:$0xff] }
  0xd0   : > { %6816 = vmatmul.mubr.msk.f32.gmra.mrb[8].mxu0 %vm784_vm1, %v8001_v51  ;;  %v8110_v12 = vld [vmem:[#allocation2 + $0xe9] sm:$0xff]  ;;  %v8116_v15 = vld [vmem:[#allocation2 + $0xf1] sm:$0xff]  ;;  %v1275_v16 = vld [vmem:[#allocation2 + $0x5e] sm:$0xff] }
  0xd1   : > { %v779_v22 = vadd.f32 %v737_v20, %v7614_v55  ;;  %v778_v23 = vadd.f32 %v736_v49, %v7618_v57  ;;  %6566 = vmatmul.mubr.msk.f32.gmra.mrb[28].mxu1 %vm784_vm1, %v856_v19  ;;  %6818 = vmatprep.mubr.msk.f32.mxu0 %vm784_vm1, %v8005_v21  ;;  %v8017_v57 = vld [vmem:[#allocation2 + $0x71] sm:$0xff]  ;;  %v1276_v19 = vld [vmem:[#allocation2 + $0x66] sm:$0xff] }
  0xd2   : > { %6568 = vmatprep.mubr.msk.f32.mxu1 %vm784_vm1, %v857_v24  ;;  %v688_v25 = vpop.permute.xlu1 %687  ;;  %v683_v26 = vpop.permute.xlu0 %682  ;;  %v858_v27 = vld [vmem:[#allocation2 + $0xfd] sm:$0xff]  ;;  %v859_v33 = vld [vmem:[#allocation2 + $0x105] sm:$0xff]  ;;  %v1277_v49 = vld [vmem:[#allocation2 + $0x6e] sm:$0xff] }
  0xd3   : > { %822 = vst.msk [vmem:[#allocation2 + $0x128] sm:$0xff] %vm784_vm1, %v779_v22  ;;  %821 = vst.msk [vmem:[#allocation2 + $0x120] sm:$0xff] %vm784_vm1, %v778_v23  ;;  %v739_v28 = vmul.f32 %v7713_v30, %v688_v25  ;;  %v738_v55 = vmul.f32 %v7713_v30, %v683_v26  ;;  %v8120_v17 = vld [vmem:[#allocation2 + $0xf9] sm:$0xff]  ;;  %v8126_v20 = vld [vmem:[#allocation2 + $0x101] sm:$0xff] }
  0xd4   : > { %6819 = vmatmul.mubr.msk.f32.gmra.mrb[10].mxu0 %vm784_vm1, %v8017_v57  ;;  %v1278_v23 = vld [vmem:[#allocation2 + $0x76] sm:$0xff]  ;;  %v1279_v25 = vld [vmem:[#allocation2 + $0x7e] sm:$0xff] }
  0xd5   : > { %v781_v31 = vadd.f32 %v739_v28, %v7628_v61  ;;  %v780_v32 = vadd.f32 %v738_v55, %v7632_v63  ;;  %6569 = vmatmul.mubr.msk.f32.gmra.mrb[30].mxu1 %vm784_vm1, %v858_v27  ;;  %6821 = vmatprep.mubr.msk.f32.mxu0 %vm784_vm1, %v8021_v29  ;;  %v8033_v63 = vld [vmem:[#allocation2 + $0x81] sm:$0xff]  ;;  %v1281_v55 = vld [vmem:[#allocation2 + $0x8e] sm:$0xff] }
  0xd6   : > { %6571 = vmatprep.mubr.msk.f32.mxu1 %vm784_vm1, %v859_v33  ;;  %v698_v34 = vpop.permute.xlu1 %697  ;;  %v693_v35 = vpop.permute.xlu0 %692  ;;  %v860_v37 = vld [vmem:[#allocation2 + $0x10d] sm:$0xff]  ;;  %v861_v46 = vld [vmem:[#allocation2 + $0x115] sm:$0xff] }
  0xd7   : > { %824 = vst.msk [vmem:[#allocation2 + $0x138] sm:$0xff] %vm784_vm1, %v781_v31  ;;  %823 = vst.msk [vmem:[#allocation2 + $0x130] sm:$0xff] %vm784_vm1, %v780_v32  ;;  %v741_v38 = vmul.f32 %v7713_v30, %v698_v34  ;;  %v740_v61 = vmul.f32 %v7713_v30, %v693_v35  ;;  %v8130_v22 = vld [vmem:[#allocation2 + $0x109] sm:$0xff]  ;;  %v8136_v24 = vld [vmem:[#allocation2 + $0x111] sm:$0xff] }
  0xd8   : > { %6822 = vmatmul.mubr.msk.f32.gmra.mrb[12].mxu0 %vm784_vm1, %v8033_v63  ;;  %v1280_v27 = vld [vmem:[#allocation2 + $0x86] sm:$0xff]  ;;  %v1282_v32 = vld [vmem:[#allocation2 + $0x96] sm:$0xff]  ;;  %v1283_v34 = vld [vmem:[#allocation2 + $0x9e] sm:$0xff] }
  0xd9   : > { %v783_v42 = vadd.f32 %v741_v38, %v7642_v3  ;;  %v782_v44 = vadd.f32 %v740_v61, %v7646_v5  ;;  %6572 = vmatmul.mubr.msk.f32.gmra.mrb[32].mxu1 %vm784_vm1, %v860_v37  ;;  %6824 = vmatprep.mubr.msk.f32.mxu0 %vm784_vm1, %v8037_v41  ;;  %v8051_v3 = vld [vmem:[#allocation2 + $0x99] sm:$0xff]  ;;  %v1264_v5 = vld [vmem:[#allocation2 + $0x6] sm:$0xff]  ;;  %v1285_v37 = vld [vmem:[#allocation2 + $0xae] sm:$0xff] }
  0xda   : > { %6574 = vmatprep.mubr.msk.f32.mxu1 %vm784_vm1, %v861_v46  ;;  %v862_v30 = vld [vmem:[#allocation2 + $0x11d] sm:$0xff]  ;;  %v1284_v35 = vld [vmem:[#allocation2 + $0xa6] sm:$0xff]  ;;  %v8235_v46 = vld [vmem:[%s8756_s1 + $0x10] sm:$0xf] }
  0xdb   : > { %826 = vst.msk [vmem:[#allocation2 + $0x148] sm:$0xff] %vm784_vm1, %v783_v42  ;;  %825 = vst.msk [vmem:[#allocation2 + $0x140] sm:$0xff] %vm784_vm1, %v782_v44  ;;  %v8140_v26 = vld [vmem:[#allocation2 + $0x119] sm:$0xff]  ;;  %v8146_v28 = vld [vmem:[#allocation2 + $0x121] sm:$0xff] }
  0xdc   : > { %6825 = vmatmul.mubr.msk.f32.gmra.mrb[14].mxu0 %vm784_vm1, %v8047_v47  ;;  %v8169_v38 = vld [vmem:[%s8756_s1 + $0x20] sm:$0xf]  ;;  %v1286_v61 = vld [vmem:[#allocation2 + $0xb6] sm:$0xff] }
  0xdd   : > { %6575 = vmatmul.mubr.msk.f32.gmra.mrb[34].mxu1 %vm784_vm1, %v862_v30  ;;  %6827 = vmatprep.mubr.msk.f32.mxu0 %vm784_vm1, %v8051_v3  ;;  %v1767_v42 = vld [vmem:[#allocation2 + $0xf] sm:$0xff]  ;;  %v8226_v44 = vld [vmem:[#allocation2 + $0x17] sm:$0xff]  ;;  %v8241_v30 = vld [vmem:[#allocation2 + $0x1f] sm:$0xff] }
  0xde   : > { %6579 = vmatprep.mubr.msk.f32.mxu1 %vm784_vm1, %v1264_v5  ;;  %v8150_v31 = vld [vmem:[#allocation2 + $0x129] sm:$0xff]  ;;  %v8156_v33 = vld [vmem:[#allocation2 + $0x131] sm:$0xff] }
  0xdf   : > { %v8259_v5 = vld [vmem:[#allocation2 + $0x37] sm:$0xff] }
  0xe0   : > { %6828 = vmatmul.mubr.msk.f32.gmra.mrb[16].mxu0 %vm784_vm1, %v8057_v14 }
  0xe1   : > { %6580 = vmatmul.mubr.msk.f32.vlgmr.msra.gmra.mrb[0].mxu1 %vm784_vm1, %v1265_v48  ;;  %6830 = vmatprep.mubr.msk.f32.mxu0 %vm784_vm1, %v8061_v52  ;;  %v8271_v48 = vld [vmem:[#allocation2 + $0x47] sm:$0xff] }
  0xe2   : > { %6582 = vmatprep.mubr.msk.f32.mxu1 %vm784_vm1, %v1266_v54  ;;  %6634 = vmatpush3.msk.msra.mxu1 %vm979_vm0, %v7798_v56  ;;  %v8086_v56 = vld [vmem:[#allocation2 + $0xc1] sm:$0xff] }
  0xe3   : > { %6689 = vmatprep.subr.msk.mxu1 %vm979_vm0, %v8066_v53  ;;  %v8289_v54 = vld [vmem:[#allocation2 + $0x5f] sm:$0xff] }
  0xe4   : > { %6831 = vmatmul.mubr.msk.f32.gmra.mrb[18].mxu0 %vm784_vm1, %v8074_v58 }
  0xe5   : > { %6583 = vmatmul.mubr.msk.f32.gmra.mrb[2].mxu1 %vm784_vm1, %v1267_v59  ;;  %6833 = vmatprep.mubr.msk.f32.mxu0 %vm784_vm1, %v8080_v60  ;;  %v8301_v59 = vld [vmem:[#allocation2 + $0x6f] sm:$0xff] }
  0xe6   : > { %6585 = vmatprep.mubr.msk.f32.mxu1 %vm784_vm1, %v1268_v62  ;;  %v8313_v62 = vld [vmem:[#allocation2 + $0x7f] sm:$0xff] }
  0xe8   : > { %6834 = vmatmul.mubr.msk.f32.gmra.mrb[20].mxu0 %vm784_vm1, %v8086_v56 }
  0xe9   : > { %6586 = vmatmul.mubr.msk.f32.gmra.mrb[4].mxu1 %vm784_vm1, %v1269_v0  ;;  %6836 = vmatprep.mubr.msk.f32.mxu0 %vm784_vm1, %v8090_v4  ;;  %v8325_v0 = vld [vmem:[#allocation2 + $0x8f] sm:$0xff] }
  0xea   : > { %6588 = vmatprep.mubr.msk.f32.mxu1 %vm784_vm1, %v1270_v18  ;;  %v8330_v18 = vld [vmem:[#allocation2 + $0x97] sm:$0xff] }
  0xec   : > { %6837 = vmatmul.mubr.msk.f32.gmra.mrb[22].mxu0 %vm784_vm1, %v8096_v6 }
  0xed   : > { %6589 = vmatmul.mubr.msk.f32.gmra.mrb[6].mxu1 %vm784_vm1, %v1271_v7  ;;  %6839 = vmatprep.mubr.msk.f32.mxu0 %vm784_vm1, %v8100_v8  ;;  %v8335_v7 = vld [vmem:[#allocation2 + $0x9f] sm:$0xff] }
  0xee   : > { %6591 = vmatprep.mubr.msk.f32.mxu1 %vm784_vm1, %v1272_v9  ;;  %v8340_v9 = vld [vmem:[#allocation2 + $0xa7] sm:$0xff] }
  0xf0   : > { %6840 = vmatmul.mubr.msk.f32.gmra.mrb[24].mxu0 %vm784_vm1, %v8106_v10 }
  0xf1   : > { %6592 = vmatmul.mubr.msk.f32.gmra.mrb[8].mxu1 %vm784_vm1, %v1273_v43  ;;  %6842 = vmatprep.mubr.msk.f32.mxu0 %vm784_vm1, %v8110_v12  ;;  %v8345_v43 = vld [vmem:[#allocation2 + $0xaf] sm:$0xff] }
  0xf2   : > { %6594 = vmatprep.mubr.msk.f32.mxu1 %vm784_vm1, %v1274_v13  ;;  %v8351_v13 = vld [vmem:[#allocation2 + $0xb7] sm:$0xff] }
  0xf4   : > { %6843 = vmatmul.mubr.msk.f32.gmra.mrb[26].mxu0 %vm784_vm1, %v8116_v15 }
  0xf5   : > { %6595 = vmatmul.mubr.msk.f32.gmra.mrb[10].mxu1 %vm784_vm1, %v1275_v16  ;;  %6845 = vmatprep.mubr.msk.f32.mxu0 %vm784_vm1, %v8120_v17  ;;  %v8357_v16 = vld [vmem:[#allocation2 + $0xbf] sm:$0xff] }
  0xf6   : > { %6597 = vmatprep.mubr.msk.f32.mxu1 %vm784_vm1, %v1276_v19  ;;  %v8362_v19 = vld [vmem:[#allocation2 + $0xc7] sm:$0xff] }
  0xf8   : > { %6846 = vmatmul.mubr.msk.f32.gmra.mrb[28].mxu0 %vm784_vm1, %v8126_v20 }
  0xf9   : > { %6598 = vmatmul.mubr.msk.f32.gmra.mrb[12].mxu1 %vm784_vm1, %v1277_v49  ;;  %6848 = vmatprep.mubr.msk.f32.mxu0 %vm784_vm1, %v8130_v22  ;;  %v8367_v49 = vld [vmem:[#allocation2 + $0xcf] sm:$0xff] }
  0xfa   : > { %6600 = vmatprep.mubr.msk.f32.mxu1 %vm784_vm1, %v1278_v23  ;;  %v8372_v23 = vld [vmem:[#allocation2 + $0xd7] sm:$0xff] }
  0xfc   : > { %6849 = vmatmul.mubr.msk.f32.gmra.mrb[30].mxu0 %vm784_vm1, %v8136_v24 }
  0xfd   : > { %6601 = vmatmul.mubr.msk.f32.gmra.mrb[14].mxu1 %vm784_vm1, %v1279_v25  ;;  %6851 = vmatprep.mubr.msk.f32.mxu0 %vm784_vm1, %v8140_v26  ;;  %v8377_v25 = vld [vmem:[#allocation2 + $0xdf] sm:$0xff] }
  0xfe   : > { %6603 = vmatprep.mubr.msk.f32.mxu1 %vm784_vm1, %v1280_v27  ;;  %v8382_v27 = vld [vmem:[#allocation2 + $0xe7] sm:$0xff] }
 0x100   : > { %6852 = vmatmul.mubr.msk.f32.gmra.mrb[32].mxu0 %vm784_vm1, %v8146_v28 }
 0x101   : > { %6604 = vmatmul.mubr.msk.f32.gmra.mrb[16].mxu1 %vm784_vm1, %v1281_v55  ;;  %6854 = vmatprep.mubr.msk.f32.mxu0 %vm784_vm1, %v8150_v31  ;;  %v8387_v55 = vld [vmem:[#allocation2 + $0xef] sm:$0xff] }
 0x102   : > { %6606 = vmatprep.mubr.msk.f32.mxu1 %vm784_vm1, %v1282_v32  ;;  %v8392_v32 = vld [vmem:[#allocation2 + $0xf7] sm:$0xff] }
 0x104   : > { %6855 = vmatmul.mubr.msk.f32.gmra.mrb[34].mxu0 %vm784_vm1, %v8156_v33 }
 0x105   : > { %6607 = vmatmul.mubr.msk.f32.gmra.mrb[18].mxu1 %vm784_vm1, %v1283_v34  ;;  %6859 = vmatprep.mubr.msk.f32.mxu0 %vm784_vm1, %v7943_v40  ;;  %v1287_v40 = vld [vmem:[#allocation2 + $0xbe] sm:$0xff] }
 0x106   : > { %6609 = vmatprep.mubr.msk.f32.mxu1 %vm784_vm1, %v1284_v35  ;;  %v8397_v34 = vld [vmem:[#allocation2 + $0xff] sm:$0xff]  ;;  %v4288_v35 = vld [vmem:[#allocation2 + $0x8a] sm:$0xff] }
 0x108   : > { %6860 = vmatmul.mubr.msk.f32.vlgmr.msra.gmra.mrb[0].mxu0 %vm784_vm1, %v7953_v50  ;;  %v1289_v50 = vld [vmem:[#allocation2 + $0xce] sm:$0xff] }
 0x109   : > { %6914 = vmatpush3.msk.msra.mxu0 %vm979_vm0, %v7938_v36  ;;  %6610 = vmatmul.mubr.msk.f32.gmra.mrb[20].mxu1 %vm784_vm1, %v1285_v37  ;;  %v1288_v36 = vld [vmem:[#allocation2 + $0xc6] sm:$0xff] }
 0x10a   : > { %6862 = vmatprep.mubr.msk.f32.mxu0 %vm784_vm1, %v7959_v39  ;;  %6612 = vmatprep.mubr.msk.f32.mxu1 %vm784_vm1, %v1286_v61  ;;  %v1290_v39 = vld [vmem:[#allocation2 + $0xd6] sm:$0xff]  ;;  %v8402_v37 = vld [vmem:[#allocation2 + $0x107] sm:$0xff] }
 0x10b   : > { %6969 = vmatprep.subr.msk.mxu0 %vm979_vm0, %v8169_v38  ;;  %v8407_v61 = vld [vmem:[#allocation2 + $0x10f] sm:$0xff] }
 0x10c   : > { %6863 = vmatmul.mubr.msk.f32.gmra.mrb[2].mxu0 %vm784_vm1, %v7969_v1  ;;  %v1291_v1 = vld [vmem:[#allocation2 + $0xde] sm:$0xff] }
 0x10d   : > { %6613 = vmatmul.mubr.msk.f32.gmra.mrb[22].mxu1 %vm784_vm1, %v1287_v40  ;;  %6865 = vmatprep.mubr.msk.f32.mxu0 %vm784_vm1, %v7973_v2  ;;  %v1292_v2 = vld [vmem:[#allocation2 + $0xe6] sm:$0xff]  ;;  %v4290_v40 = vld [vmem:[#allocation2 + $0x9a] sm:$0xff] }
 0x10e   : > { %6615 = vmatprep.mubr.msk.f32.mxu1 %vm784_vm1, %v1288_v36  ;;  %v8412_v36 = vld [vmem:[#allocation2 + $0x117] sm:$0xff] }
 0x110   : > { %6866 = vmatmul.mubr.msk.f32.gmra.mrb[4].mxu0 %vm784_vm1, %v7985_v45  ;;  %v1293_v45 = vld [vmem:[#allocation2 + $0xee] sm:$0xff] }
 0x111   : > { %6616 = vmatmul.mubr.msk.f32.gmra.mrb[24].mxu1 %vm784_vm1, %v1289_v50  ;;  %6868 = vmatprep.mubr.msk.f32.mxu0 %vm784_vm1, %v7989_v11  ;;  %v1294_v11 = vld [vmem:[#allocation2 + $0xf6] sm:$0xff]  ;;  %v4291_v50 = vld [vmem:[#allocation2 + $0xa2] sm:$0xff] }
 0x112   : > { %6618 = vmatprep.mubr.msk.f32.mxu1 %vm784_vm1, %v1290_v39  ;;  %v8417_v39 = vld [vmem:[#allocation2 + $0x11f] sm:$0xff] }
 0x114   : > { %6869 = vmatmul.mubr.msk.f32.gmra.mrb[6].mxu0 %vm784_vm1, %v8001_v51  ;;  %v1295_v51 = vld [vmem:[#allocation2 + $0xfe] sm:$0xff] }
 0x115   : > { %6619 = vmatmul.mubr.msk.f32.gmra.mrb[26].mxu1 %vm784_vm1, %v1291_v1  ;;  %6871 = vmatprep.mubr.msk.f32.mxu0 %vm784_vm1, %v8005_v21  ;;  %v1296_v21 = vld [vmem:[#allocation2 + $0x106] sm:$0xff] }
 0x116   : > { %6621 = vmatprep.mubr.msk.f32.mxu1 %vm784_vm1, %v1292_v2  ;;  %v4292_v1 = vld [vmem:[#allocation2 + $0xaa] sm:$0xff]  ;;  %v4293_v2 = vld [vmem:[#allocation2 + $0xb2] sm:$0xff] }
 0x118   : > { %6872 = vmatmul.mubr.msk.f32.gmra.mrb[8].mxu0 %vm784_vm1, %v8017_v57  ;;  %v1297_v57 = vld [vmem:[#allocation2 + $0x10e] sm:$0xff] }
 0x119   : > { %6622 = vmatmul.mubr.msk.f32.gmra.mrb[28].mxu1 %vm784_vm1, %v1293_v45  ;;  %6874 = vmatprep.mubr.msk.f32.mxu0 %vm784_vm1, %v8021_v29  ;;  %v1298_v29 = vld [vmem:[#allocation2 + $0x116] sm:$0xff] }
 0x11a   : > { %6624 = vmatprep.mubr.msk.f32.mxu1 %vm784_vm1, %v1294_v11  ;;  %v4294_v45 = vld [vmem:[#allocation2 + $0xba] sm:$0xff]  ;;  %v4295_v11 = vld [vmem:[#allocation2 + $0xc2] sm:$0xff] }
 0x11c   : > { %6875 = vmatmul.mubr.msk.f32.gmra.mrb[10].mxu0 %vm784_vm1, %v8033_v63  ;;  %v1299_v63 = vld [vmem:[#allocation2 + $0x11e] sm:$0xff] }
 0x11d   : > { %6625 = vmatmul.mubr.msk.f32.gmra.mrb[30].mxu1 %vm784_vm1, %v1295_v51  ;;  %6877 = vmatprep.mubr.msk.f32.mxu0 %vm784_vm1, %v8037_v41  ;;  %v1766_v41 = vld [vmem:[#allocation2 + $0x7] sm:$0xff] }
 0x11e   : > { %6627 = vmatprep.mubr.msk.f32.mxu1 %vm784_vm1, %v1296_v21  ;;  %v4296_v51 = vld [vmem:[#allocation2 + $0xca] sm:$0xff]  ;;  %v4297_v21 = vld [vmem:[#allocation2 + $0xd2] sm:$0xff] }
 0x120   : > { %6878 = vmatmul.mubr.msk.f32.gmra.mrb[12].mxu0 %vm784_vm1, %v8047_v47  ;;  %v8247_v47 = vld [vmem:[#allocation2 + $0x27] sm:$0xff] }
 0x121   : > { %6628 = vmatmul.mubr.msk.f32.gmra.mrb[32].mxu1 %vm784_vm1, %v1297_v57  ;;  %6880 = vmatprep.mubr.msk.f32.mxu0 %vm784_vm1, %v8051_v3  ;;  %v8253_v3 = vld [vmem:[#allocation2 + $0x2f] sm:$0xff]  ;;  %v4298_v57 = vld [vmem:[#allocation2 + $0xda] sm:$0xff] }
 0x122   : > { %6630 = vmatprep.mubr.msk.f32.mxu1 %vm784_vm1, %v1298_v29  ;;  %v4299_v29 = vld [vmem:[#allocation2 + $0xe2] sm:$0xff] }
 0x124   : > { %6881 = vmatmul.mubr.msk.f32.gmra.mrb[14].mxu0 %vm784_vm1, %v8057_v14  ;;  %v8265_v14 = vld [vmem:[#allocation2 + $0x3f] sm:$0xff] }
 0x125   : > { %6631 = vmatmul.mubr.msk.f32.gmra.mrb[34].mxu1 %vm784_vm1, %v1299_v63  ;;  %6883 = vmatprep.mubr.msk.f32.mxu0 %vm784_vm1, %v8061_v52  ;;  %v8277_v52 = vld [vmem:[#allocation2 + $0x4f] sm:$0xff] }
 0x126   : > { %6635 = vmatprep.mubr.msk.f32.mxu1 %vm784_vm1, %v1766_v41  ;;  %v4300_v63 = vld [vmem:[#allocation2 + $0xea] sm:$0xff]  ;;  %v4301_v41 = vld [vmem:[#allocation2 + $0xf2] sm:$0xff] }
 0x128   : > { %6884 = vmatmul.mubr.msk.f32.gmra.mrb[16].mxu0 %vm784_vm1, %v8074_v58  ;;  %v8295_v58 = vld [vmem:[#allocation2 + $0x67] sm:$0xff] }
 0x129   : > { %6636 = vmatmul.mubr.msk.f32.vlgmr.msra.gmra.mrb[0].mxu1 %vm784_vm1, %v1767_v42  ;;  %6886 = vmatprep.mubr.msk.f32.mxu0 %vm784_vm1, %v8080_v60  ;;  %v8307_v60 = vld [vmem:[#allocation2 + $0x77] sm:$0xff] }
 0x12a   : > { %6638 = vmatprep.mubr.msk.f32.mxu1 %vm784_vm1, %v8226_v44  ;;  %6690 = vmatpush3.msk.msra.mxu1 %vm979_vm0, %v8066_v53  ;;  %v8283_v53 = vld [vmem:[#allocation2 + $0x57] sm:$0xff] }
 0x12b   : > { %7025 = vmatprep.subr.msk.mxu1 %vm979_vm0, %v8235_v46  ;;  %v4302_v42 = vld [vmem:[#allocation2 + $0xfa] sm:$0xff] }
 0x12c   : > { %6887 = vmatmul.mubr.msk.f32.gmra.mrb[18].mxu0 %vm784_vm1, %v8086_v56  ;;  %v8319_v56 = vld [vmem:[#allocation2 + $0x87] sm:$0xff] }
 0x12d   : > { %6639 = vmatmul.mubr.msk.f32.gmra.mrb[2].mxu1 %vm784_vm1, %v8241_v30  ;;  %6889 = vmatprep.mubr.msk.f32.mxu0 %vm784_vm1, %v8090_v4  ;;  %v3808_v4 = vld [vmem:[#allocation2 + $0x139] sm:$0xff] }
 0x12e   : > { %6641 = vmatprep.mubr.msk.f32.mxu1 %vm784_vm1, %v8247_v47 }
 0x130   : > { %6890 = vmatmul.mubr.msk.f32.gmra.mrb[20].mxu0 %vm784_vm1, %v8096_v6  ;;  %v3809_v6 = vld [vmem:[#allocation2 + $0x141] sm:$0xff] }
 0x131   : > { %6642 = vmatmul.mubr.msk.f32.gmra.mrb[4].mxu1 %vm784_vm1, %v8253_v3  ;;  %6892 = vmatprep.mubr.msk.f32.mxu0 %vm784_vm1, %v8100_v8  ;;  %v4276_v8 = vld [vmem:[#allocation2 + $0x2a] sm:$0xff] }
 0x132   : > { %6644 = vmatprep.mubr.msk.f32.mxu1 %vm784_vm1, %v8259_v5 }
 0x134   : > { %6893 = vmatmul.mubr.msk.f32.gmra.mrb[22].mxu0 %vm784_vm1, %v8106_v10  ;;  %v4277_v10 = vld [vmem:[#allocation2 + $0x32] sm:$0xff] }
 0x135   : > { %6645 = vmatmul.mubr.msk.f32.gmra.mrb[6].mxu1 %vm784_vm1, %v8265_v14  ;;  %6895 = vmatprep.mubr.msk.f32.mxu0 %vm784_vm1, %v8110_v12  ;;  %v4278_v12 = vld [vmem:[#allocation2 + $0x3a] sm:$0xff] }
 0x136   : > { %6647 = vmatprep.mubr.msk.f32.mxu1 %vm784_vm1, %v8271_v48 }
 0x138   : > { %6896 = vmatmul.mubr.msk.f32.gmra.mrb[24].mxu0 %vm784_vm1, %v8116_v15  ;;  %v4279_v15 = vld [vmem:[#allocation2 + $0x42] sm:$0xff] }
 0x139   : > { %6648 = vmatmul.mubr.msk.f32.gmra.mrb[8].mxu1 %vm784_vm1, %v8277_v52  ;;  %6898 = vmatprep.mubr.msk.f32.mxu0 %vm784_vm1, %v8120_v17  ;;  %v4280_v17 = vld [vmem:[#allocation2 + $0x4a] sm:$0xff] }
 0x13a   : > { %6650 = vmatprep.mubr.msk.f32.mxu1 %vm784_vm1, %v8283_v53 }
 0x13c   : > { %6899 = vmatmul.mubr.msk.f32.gmra.mrb[26].mxu0 %vm784_vm1, %v8126_v20  ;;  %v4281_v20 = vld [vmem:[#allocation2 + $0x52] sm:$0xff] }
 0x13d   : > { %6651 = vmatmul.mubr.msk.f32.gmra.mrb[10].mxu1 %vm784_vm1, %v8289_v54  ;;  %6901 = vmatprep.mubr.msk.f32.mxu0 %vm784_vm1, %v8130_v22  ;;  %v4282_v22 = vld [vmem:[#allocation2 + $0x5a] sm:$0xff] }
 0x13e   : > { %6653 = vmatprep.mubr.msk.f32.mxu1 %vm784_vm1, %v8295_v58 }
 0x140   : > { %6902 = vmatmul.mubr.msk.f32.gmra.mrb[28].mxu0 %vm784_vm1, %v8136_v24  ;;  %v4283_v24 = vld [vmem:[#allocation2 + $0x62] sm:$0xff] }
 0x141   : > { %6654 = vmatmul.mubr.msk.f32.gmra.mrb[12].mxu1 %vm784_vm1, %v8301_v59  ;;  %6904 = vmatprep.mubr.msk.f32.mxu0 %vm784_vm1, %v8140_v26  ;;  %v4284_v26 = vld [vmem:[#allocation2 + $0x6a] sm:$0xff] }
 0x142   : > { %6656 = vmatprep.mubr.msk.f32.mxu1 %vm784_vm1, %v8307_v60 }
 0x144   : > { %6905 = vmatmul.mubr.msk.f32.gmra.mrb[30].mxu0 %vm784_vm1, %v8146_v28  ;;  %v4285_v28 = vld [vmem:[#allocation2 + $0x72] sm:$0xff] }
 0x145   : > { %6657 = vmatmul.mubr.msk.f32.gmra.mrb[14].mxu1 %vm784_vm1, %v8313_v62  ;;  %6907 = vmatprep.mubr.msk.f32.mxu0 %vm784_vm1, %v8150_v31  ;;  %v4286_v31 = vld [vmem:[#allocation2 + $0x7a] sm:$0xff] }
 0x146   : > { %6659 = vmatprep.mubr.msk.f32.mxu1 %vm784_vm1, %v8319_v56 }
 0x148   : > { %6908 = vmatmul.mubr.msk.f32.gmra.mrb[32].mxu0 %vm784_vm1, %v8156_v33  ;;  %v4287_v33 = vld [vmem:[#allocation2 + $0x82] sm:$0xff] }
 0x149   : > { %6660 = vmatmul.mubr.msk.f32.gmra.mrb[16].mxu1 %vm784_vm1, %v8325_v0  ;;  %6910 = vmatprep.mubr.msk.f32.mxu0 %vm784_vm1, %v3808_v4  ;;  %v4786_v4 = vld [vmem:[#allocation2 + $0x6b] sm:$0xff] }
 0x14a   : > { %6662 = vmatprep.mubr.msk.f32.mxu1 %vm784_vm1, %v8330_v18 }
 0x14c   : > { %6911 = vmatmul.mubr.msk.f32.gmra.mrb[34].mxu0 %vm784_vm1, %v3809_v6  ;;  %v4788_v6 = vld [vmem:[#allocation2 + $0x7b] sm:$0xff] }
 0x14d   : > { %6663 = vmatmul.mubr.msk.f32.gmra.mrb[18].mxu1 %vm784_vm1, %v8335_v7  ;;  %6915 = vmatprep.mubr.msk.f32.mxu0 %vm784_vm1, %v4276_v8  ;;  %v4790_v8 = vld [vmem:[#allocation2 + $0x8b] sm:$0xff] }
 0x14e   : > { %6665 = vmatprep.mubr.msk.f32.mxu1 %vm784_vm1, %v8340_v9 }
 0x150   : > { %6916 = vmatmul.mubr.msk.f32.vlgmr.msra.gmra.mrb[0].mxu0 %vm784_vm1, %v4277_v10  ;;  %v4792_v10 = vld [vmem:[#allocation2 + $0x9b] sm:$0xff] }
 0x151   : > { %6970 = vmatpush3.msk.msra.mxu0 %vm979_vm0, %v8169_v38  ;;  %6666 = vmatmul.mubr.msk.f32.gmra.mrb[20].mxu1 %vm784_vm1, %v8345_v43  ;;  %v4289_v38 = vld [vmem:[#allocation2 + $0x92] sm:$0xff] }
 0x152   : > { %6918 = vmatprep.mubr.msk.f32.mxu0 %vm784_vm1, %v4278_v12  ;;  %6668 = vmatprep.mubr.msk.f32.mxu1 %vm784_vm1, %v8351_v13  ;;  %v4793_v12 = vld [vmem:[#allocation2 + $0xa3] sm:$0xff] }
 0x154   : > { %6919 = vmatmul.mubr.msk.f32.gmra.mrb[2].mxu0 %vm784_vm1, %v4279_v15  ;;  %v4794_v15 = vld [vmem:[#allocation2 + $0xab] sm:$0xff] }
 0x155   : > { %6669 = vmatmul.mubr.msk.f32.gmra.mrb[22].mxu1 %vm784_vm1, %v8357_v16  ;;  %6921 = vmatprep.mubr.msk.f32.mxu0 %vm784_vm1, %v4280_v17  ;;  %v4795_v17 = vld [vmem:[#allocation2 + $0xb3] sm:$0xff] }
 0x156   : > { %6671 = vmatprep.mubr.msk.f32.mxu1 %vm784_vm1, %v8362_v19 }
 0x158   : > { %6922 = vmatmul.mubr.msk.f32.gmra.mrb[4].mxu0 %vm784_vm1, %v4281_v20  ;;  %v4796_v20 = vld [vmem:[#allocation2 + $0xbb] sm:$0xff] }
 0x159   : > { %6672 = vmatmul.mubr.msk.f32.gmra.mrb[24].mxu1 %vm784_vm1, %v8367_v49  ;;  %6924 = vmatprep.mubr.msk.f32.mxu0 %vm784_vm1, %v4282_v22  ;;  %v4797_v22 = vld [vmem:[#allocation2 + $0xc3] sm:$0xff] }
 0x15a   : > { %6674 = vmatprep.mubr.msk.f32.mxu1 %vm784_vm1, %v8372_v23 }
 0x15c   : > { %6925 = vmatmul.mubr.msk.f32.gmra.mrb[6].mxu0 %vm784_vm1, %v4283_v24  ;;  %v4798_v24 = vld [vmem:[#allocation2 + $0xcb] sm:$0xff] }
 0x15d   : > { %6675 = vmatmul.mubr.msk.f32.gmra.mrb[26].mxu1 %vm784_vm1, %v8377_v25  ;;  %6927 = vmatprep.mubr.msk.f32.mxu0 %vm784_vm1, %v4284_v26  ;;  %v4799_v26 = vld [vmem:[#allocation2 + $0xd3] sm:$0xff] }
 0x15e   : > { %6677 = vmatprep.mubr.msk.f32.mxu1 %vm784_vm1, %v8382_v27 }
 0x160   : > { %6928 = vmatmul.mubr.msk.f32.gmra.mrb[8].mxu0 %vm784_vm1, %v4285_v28  ;;  %v4800_v28 = vld [vmem:[#allocation2 + $0xdb] sm:$0xff] }
 0x161   : > { %6678 = vmatmul.mubr.msk.f32.gmra.mrb[28].mxu1 %vm784_vm1, %v8387_v55  ;;  %6930 = vmatprep.mubr.msk.f32.mxu0 %vm784_vm1, %v4286_v31  ;;  %v4801_v31 = vld [vmem:[#allocation2 + $0xe3] sm:$0xff] }
 0x162   : > { %6680 = vmatprep.mubr.msk.f32.mxu1 %vm784_vm1, %v8392_v32 }
 0x164   : > { %6931 = vmatmul.mubr.msk.f32.gmra.mrb[10].mxu0 %vm784_vm1, %v4287_v33  ;;  %v4802_v33 = vld [vmem:[#allocation2 + $0xeb] sm:$0xff] }
 0x165   : > { %6681 = vmatmul.mubr.msk.f32.gmra.mrb[30].mxu1 %vm784_vm1, %v8397_v34  ;;  %6933 = vmatprep.mubr.msk.f32.mxu0 %vm784_vm1, %v4288_v35  ;;  %v4803_v35 = vld [vmem:[#allocation2 + $0xf3] sm:$0xff] }
 0x166   : > { %6683 = vmatprep.mubr.msk.f32.mxu1 %vm784_vm1, %v8402_v37 }
 0x168   : > { %6934 = vmatmul.mubr.msk.f32.gmra.mrb[12].mxu0 %vm784_vm1, %v4289_v38  ;;  %v4804_v38 = vld [vmem:[#allocation2 + $0xfb] sm:$0xff] }
 0x169   : > { %6684 = vmatmul.mubr.msk.f32.gmra.mrb[32].mxu1 %vm784_vm1, %v8407_v61  ;;  %6936 = vmatprep.mubr.msk.f32.mxu0 %vm784_vm1, %v4290_v40  ;;  %v4805_v40 = vld [vmem:[#allocation2 + $0x103] sm:$0xff] }
 0x16a   : > { %6686 = vmatprep.mubr.msk.f32.mxu1 %vm784_vm1, %v8412_v36 }
 0x16c   : > { %6937 = vmatmul.mubr.msk.f32.gmra.mrb[14].mxu0 %vm784_vm1, %v4291_v50  ;;  %v4806_v50 = vld [vmem:[#allocation2 + $0x10b] sm:$0xff] }
 0x16d   : > { %6687 = vmatmul.mubr.msk.f32.gmra.mrb[34].mxu1 %vm784_vm1, %v8417_v39  ;;  %6939 = vmatprep.mubr.msk.f32.mxu0 %vm784_vm1, %v4292_v1  ;;  %v4807_v1 = vld [vmem:[#allocation2 + $0x113] sm:$0xff] }
 0x16e   : > { %6691 = vmatprep.mubr.msk.f32.mxu1 %vm784_vm1, %v8226_v44  ;;  %v4303_v44 = vld [vmem:[#allocation2 + $0x102] sm:$0xff] }
 0x170   : > { %6940 = vmatmul.mubr.msk.f32.gmra.mrb[16].mxu0 %vm784_vm1, %v4293_v2  ;;  %v2801_v2 = vld [vmem:[#allocation2 + $0x110] sm:$0xff] }
 0x171   : > { %6692 = vmatmul.mubr.msk.f32.vlgmr.msra.gmra.mrb[0].mxu1 %vm784_vm1, %v8241_v30  ;;  %6942 = vmatprep.mubr.msk.f32.mxu0 %vm784_vm1, %v4294_v45  ;;  %v4305_v30 = vld [vmem:[#allocation2 + $0x112] sm:$0xff]  ;;  %v4808_v45 = vld [vmem:[#allocation2 + $0x11b] sm:$0xff] }
 0x172   : > { %6694 = vmatprep.mubr.msk.f32.mxu1 %vm784_vm1, %v8247_v47  ;;  %7026 = vmatpush3.msk.msra.mxu1 %vm979_vm0, %v8235_v46  ;;  %v4304_v46 = vld [vmem:[#allocation2 + $0x10a] sm:$0xff]  ;;  %v4306_v47 = vld [vmem:[#allocation2 + $0x11a] sm:$0xff] }
 0x174   : > { %6943 = vmatmul.mubr.msk.f32.gmra.mrb[18].mxu0 %vm784_vm1, %v4295_v11  ;;  %v2802_v11 = vld [vmem:[#allocation2 + $0x118] sm:$0xff] }
 0x175   : > { %6695 = vmatmul.mubr.msk.f32.gmra.mrb[2].mxu1 %vm784_vm1, %v8253_v3  ;;  %6945 = vmatprep.mubr.msk.f32.mxu0 %vm784_vm1, %v4296_v51  ;;  %v4307_v3 = vld [vmem:[#allocation2 + $0x122] sm:$0xff] }
 0x176   : > { %6697 = vmatprep.mubr.msk.f32.mxu1 %vm784_vm1, %v8259_v5  ;;  %v4308_v5 = vld [vmem:[#allocation2 + $0x12a] sm:$0xff] }
 0x177   : > { %v4809_v51 = vld [vmem:[#allocation2 + $0x123] sm:$0xff] }
 0x178   : > { %6946 = vmatmul.mubr.msk.f32.gmra.mrb[20].mxu0 %vm784_vm1, %v4297_v21  ;;  %v2803_v21 = vld [vmem:[#allocation2 + $0x120] sm:$0xff] }
 0x179   : > { %6698 = vmatmul.mubr.msk.f32.gmra.mrb[4].mxu1 %vm784_vm1, %v8265_v14  ;;  %6948 = vmatprep.mubr.msk.f32.mxu0 %vm784_vm1, %v4298_v57  ;;  %v4309_v14 = vld [vmem:[#allocation2 + $0x132] sm:$0xff] }
 0x17a   : > { %6700 = vmatprep.mubr.msk.f32.mxu1 %vm784_vm1, %v8271_v48  ;;  %v4310_v48 = vld [vmem:[#allocation2 + $0x13a] sm:$0xff]  ;;  %v4810_v57 = vld [vmem:[#allocation2 + $0x12b] sm:$0xff] }
 0x17c   : > { %6949 = vmatmul.mubr.msk.f32.gmra.mrb[22].mxu0 %vm784_vm1, %v4299_v29  ;;  %v2804_v29 = vld [vmem:[#allocation2 + $0x128] sm:$0xff] }
 0x17d   : > { %6701 = vmatmul.mubr.msk.f32.gmra.mrb[6].mxu1 %vm784_vm1, %v8277_v52  ;;  %6951 = vmatprep.mubr.msk.f32.mxu0 %vm784_vm1, %v4300_v63  ;;  %v4311_v52 = vld [vmem:[#allocation2 + $0x142] sm:$0xff]  ;;  %v4811_v63 = vld [vmem:[#allocation2 + $0x133] sm:$0xff] }
 0x17e   : > { %6703 = vmatprep.mubr.msk.f32.mxu1 %vm784_vm1, %v8283_v53  ;;  %v4778_v53 = vld [vmem:[#allocation2 + $0x2b] sm:$0xff] }
 0x180   : > { %6952 = vmatmul.mubr.msk.f32.gmra.mrb[24].mxu0 %vm784_vm1, %v4301_v41  ;;  %v2805_v41 = vld [vmem:[#allocation2 + $0x130] sm:$0xff] }
 0x181   : > { %6704 = vmatmul.mubr.msk.f32.gmra.mrb[8].mxu1 %vm784_vm1, %v8289_v54  ;;  %6954 = vmatprep.mubr.msk.f32.mxu0 %vm784_vm1, %v4302_v42  ;;  %v4779_v54 = vld [vmem:[#allocation2 + $0x33] sm:$0xff]  ;;  %v4812_v42 = vld [vmem:[#allocation2 + $0x13b] sm:$0xff] }
 0x182   : > { %6706 = vmatprep.mubr.msk.f32.mxu1 %vm784_vm1, %v8295_v58  ;;  %v4780_v58 = vld [vmem:[#allocation2 + $0x3b] sm:$0xff] }
 0x184   : > { %6955 = vmatmul.mubr.msk.f32.gmra.mrb[26].mxu0 %vm784_vm1, %v4303_v44  ;;  %v4813_v44 = vld [vmem:[#allocation2 + $0x143] sm:$0xff] }
 0x185   : > { %6707 = vmatmul.mubr.msk.f32.gmra.mrb[10].mxu1 %vm784_vm1, %v8301_v59  ;;  %6957 = vmatprep.mubr.msk.f32.mxu0 %vm784_vm1, %v4304_v46  ;;  %v4781_v59 = vld [vmem:[#allocation2 + $0x43] sm:$0xff] }
 0x186   : > { %6709 = vmatprep.mubr.msk.f32.mxu1 %vm784_vm1, %v8307_v60  ;;  %v4782_v60 = vld [vmem:[#allocation2 + $0x4b] sm:$0xff] }
 0x188   : > { %6958 = vmatmul.mubr.msk.f32.gmra.mrb[28].mxu0 %vm784_vm1, %v4305_v30 }
 0x189   : > { %6710 = vmatmul.mubr.msk.f32.gmra.mrb[12].mxu1 %vm784_vm1, %v8313_v62  ;;  %6960 = vmatprep.mubr.msk.f32.mxu0 %vm784_vm1, %v4306_v47  ;;  %v4783_v62 = vld [vmem:[#allocation2 + $0x53] sm:$0xff] }
 0x18a   : > { %6712 = vmatprep.mubr.msk.f32.mxu1 %vm784_vm1, %v8319_v56  ;;  %v4784_v56 = vld [vmem:[#allocation2 + $0x5b] sm:$0xff] }
 0x18c   : > { %6961 = vmatmul.mubr.msk.f32.gmra.mrb[30].mxu0 %vm784_vm1, %v4307_v3  ;;  %v5360_v3 = vpop.permute.xlu1 %5359 }
 0x18d   : > { %6713 = vmatmul.mubr.msk.f32.gmra.mrb[14].mxu1 %vm784_vm1, %v8325_v0  ;;  %6963 = vmatprep.mubr.msk.f32.mxu0 %vm784_vm1, %v4308_v5  ;;  %v4785_v0 = vld [vmem:[#allocation2 + $0x63] sm:$0xff] }
 0x18e   : > { %6715 = vmatprep.mubr.msk.f32.mxu1 %vm784_vm1, %v8330_v18  ;;  %v4787_v18 = vld [vmem:[#allocation2 + $0x73] sm:$0xff] }
 0x190   : > { %6964 = vmatmul.mubr.msk.f32.gmra.mrb[32].mxu0 %vm784_vm1, %v4309_v14  ;;  %v7374_v14 = vmov 0.0  }
 0x191   : > { %6716 = vmatmul.mubr.msk.f32.gmra.mrb[16].mxu1 %vm784_vm1, %v8335_v7  ;;  %6966 = vmatprep.mubr.msk.f32.mxu0 %vm784_vm1, %v4310_v48  ;;  %v4789_v7 = vld [vmem:[#allocation2 + $0x83] sm:$0xff]  ;;  %5688 = vst [vmem:[%s8572_s18] sm:$0xff] %v7374_v14  ;;  %5689 = vst [vmem:[%s8572_s18 + $0x8] sm:$0xff] %v7374_v14  ;;  %v5355_v48 = vpop.permute.xlu0 %5354 }
 0x192   : > { %6718 = vmatprep.mubr.msk.f32.mxu1 %vm784_vm1, %v8340_v9  ;;  %v4791_v9 = vld [vmem:[#allocation2 + $0x93] sm:$0xff]  ;;  %5690 = vst [vmem:[%s8572_s18 + $0x10] sm:$0xff] %v7374_v14  ;;  %5727 = vst [vmem:[%s8572_s18 + $0x138] sm:$0xff] %v7374_v14 }
 0x193   : > { %5728 = vst [vmem:[%s8572_s18 + $0x140] sm:$0xff] %v7374_v14  ;;  %5729 = vst [vmem:[%s8572_s18 + $0x148] sm:$0xff] %v7374_v14 }
 0x194   : > { %6967 = vmatmul.mubr.msk.f32.gmra.mrb[34].mxu0 %vm784_vm1, %v4311_v52 }
 0x195   : > { %6719 = vmatmul.mubr.msk.f32.gmra.mrb[18].mxu1 %vm784_vm1, %v8345_v43  ;;  %6971 = vmatprep.mubr.msk.f32.mxu0 %vm784_vm1, %v4778_v53  ;;  %v2302_v43 = vld [vmem:[#allocation2 + $0x127] sm:$0xff] }
 0x196   : > { %6721 = vmatprep.mubr.msk.f32.mxu1 %vm784_vm1, %v8351_v13  ;;  %v2303_v13 = vld [vmem:[#allocation2 + $0x12f] sm:$0xff] }
 0x198   : > { %6972 = vmatmul.mubr.msk.f32.vlgmr.msra.gmra.mrb[0].mxu0 %vm784_vm1, %v4779_v54  ;;  %v5370_v54 = vpop.permute.xlu1 %5369 }
 0x199   : > { %6722 = vmatmul.mubr.msk.f32.gmra.mrb[20].mxu1 %vm784_vm1, %v8357_v16  ;;  %6974 = vmatprep.mubr.msk.f32.mxu0 %vm784_vm1, %v4780_v58  ;;  %v2788_v16 = vld [vmem:[#allocation2 + $0xa8] sm:$0xff] }
 0x19a   : > { %6724 = vmatprep.mubr.msk.f32.mxu1 %vm784_vm1, %v8362_v19  ;;  %v2789_v19 = vld [vmem:[#allocation2 + $0xb0] sm:$0xff] }
 0x19c   : > { %6975 = vmatmul.mubr.msk.f32.gmra.mrb[2].mxu0 %vm784_vm1, %v4781_v59  ;;  %v5365_v59 = vpop.permute.xlu0 %5364 }
 0x19d   : > { %6725 = vmatmul.mubr.msk.f32.gmra.mrb[22].mxu1 %vm784_vm1, %v8367_v49  ;;  %6977 = vmatprep.mubr.msk.f32.mxu0 %vm784_vm1, %v4782_v60  ;;  %v2790_v49 = vld [vmem:[#allocation2 + $0xb8] sm:$0xff] }
 0x19e   : > { %6727 = vmatprep.mubr.msk.f32.mxu1 %vm784_vm1, %v8372_v23  ;;  %v2791_v23 = vld [vmem:[#allocation2 + $0xc0] sm:$0xff] }
 0x1a0   : > { %6978 = vmatmul.mubr.msk.f32.gmra.mrb[4].mxu0 %vm784_vm1, %v4783_v62 }
 0x1a1   : > { %6728 = vmatmul.mubr.msk.f32.gmra.mrb[24].mxu1 %vm784_vm1, %v8377_v25  ;;  %6980 = vmatprep.mubr.msk.f32.mxu0 %vm784_vm1, %v4784_v56  ;;  %v2792_v25 = vld [vmem:[#allocation2 + $0xc8] sm:$0xff]  ;;  %v5380_v56 = vpop.permute.xlu1 %5379 }
 0x1a2   : > { %6730 = vmatprep.mubr.msk.f32.mxu1 %vm784_vm1, %v8382_v27  ;;  %v2793_v27 = vld [vmem:[#allocation2 + $0xd0] sm:$0xff] }
 0x1a4   : > { %6981 = vmatmul.mubr.msk.f32.gmra.mrb[6].mxu0 %vm784_vm1, %v4785_v0 }
 0x1a5   : > { %6731 = vmatmul.mubr.msk.f32.gmra.mrb[26].mxu1 %vm784_vm1, %v8387_v55  ;;  %6983 = vmatprep.mubr.msk.f32.mxu0 %vm784_vm1, %v4786_v4  ;;  %v2794_v55 = vld [vmem:[#allocation2 + $0xd8] sm:$0xff]  ;;  %v5375_v4 = vpop.permute.xlu0 %5374 }
 0x1a6   : > { %6733 = vmatprep.mubr.msk.f32.mxu1 %vm784_vm1, %v8392_v32  ;;  %v2795_v32 = vld [vmem:[#allocation2 + $0xe0] sm:$0xff] }
 0x1a8   : > { %6984 = vmatmul.mubr.msk.f32.gmra.mrb[8].mxu0 %vm784_vm1, %v4787_v18 }
 0x1a9   : > { %6734 = vmatmul.mubr.msk.f32.gmra.mrb[28].mxu1 %vm784_vm1, %v8397_v34  ;;  %6986 = vmatprep.mubr.msk.f32.mxu0 %vm784_vm1, %v4788_v6  ;;  %v2796_v34 = vld [vmem:[#allocation2 + $0xe8] sm:$0xff] }
 0x1aa   : > { %6736 = vmatprep.mubr.msk.f32.mxu1 %vm784_vm1, %v8402_v37  ;;  %v2797_v37 = vld [vmem:[#allocation2 + $0xf0] sm:$0xff] }
 0x1ac   : > { %6987 = vmatmul.mubr.msk.f32.gmra.mrb[10].mxu0 %vm784_vm1, %v4789_v7  ;;  %v8588_v7 = vpop.permute.xlu1 %5389 }
 0x1ad   : > { %6737 = vmatmul.mubr.msk.f32.gmra.mrb[30].mxu1 %vm784_vm1, %v8407_v61  ;;  %6989 = vmatprep.mubr.msk.f32.mxu0 %vm784_vm1, %v4790_v8  ;;  %v2798_v61 = vld [vmem:[#allocation2 + $0xf8] sm:$0xff] }
 0x1ae   : > { %6739 = vmatprep.mubr.msk.f32.mxu1 %vm784_vm1, %v8412_v36  ;;  %v2799_v36 = vld [vmem:[#allocation2 + $0x100] sm:$0xff] }
 0x1b0   : > { %6990 = vmatmul.mubr.msk.f32.gmra.mrb[12].mxu0 %vm784_vm1, %v4791_v9  ;;  %v8592_v9 = vpop.permute.xlu0 %5384 }
 0x1b1   : > { %6740 = vmatmul.mubr.msk.f32.gmra.mrb[32].mxu1 %vm784_vm1, %v8417_v39  ;;  %6992 = vmatprep.mubr.msk.f32.mxu0 %vm784_vm1, %v4792_v10  ;;  %v2800_v39 = vld [vmem:[#allocation2 + $0x108] sm:$0xff] }
 0x1b2   : > { %6742 = vmatprep.mubr.msk.f32.mxu1 %vm784_vm1, %v2302_v43 }
 0x1b4   : > { %6993 = vmatmul.mubr.msk.f32.gmra.mrb[14].mxu0 %vm784_vm1, %v4793_v12  ;;  %v8598_v12 = vpop.permute.xlu1 %5399 }
 0x1b5   : > { %6743 = vmatmul.mubr.msk.f32.gmra.mrb[34].mxu1 %vm784_vm1, %v2303_v13  ;;  %6995 = vmatprep.mubr.msk.f32.mxu0 %vm784_vm1, %v4794_v15  ;;  %v8602_v15 = vpop.permute.xlu0 %5394 }
 0x1b6   : > { %6774 = vmatprep.mubr.msk.f32.mxu1 %vm784_vm1, %v2788_v16 }
 0x1b8   : > { %6996 = vmatmul.mubr.msk.f32.gmra.mrb[16].mxu0 %vm784_vm1, %v4795_v17 }
 0x1b9   : > { %6775 = vmatmul.mubr.msk.f32.vlgmr.msra.gmra.mrb[18].mxu1 %vm784_vm1, %v2789_v19  ;;  %6998 = vmatprep.mubr.msk.f32.mxu0 %vm784_vm1, %v4796_v20  ;;  %v8608_v19 = vpop.permute.xlu1 %5409  ;;  %v8613_v20 = vld [vmem:[%s8757_s2] ss:$0 sm:$0xff] }
 0x1ba   : > { %6777 = vmatprep.mubr.msk.f32.mxu1 %vm784_vm1, %v2790_v49  ;;  %v8615_v49 = vpop.permute.xlu0 %5404 }
 0x1bc   : > { %6999 = vmatmul.mubr.msk.f32.gmra.mrb[18].mxu0 %vm784_vm1, %v4797_v22 }
 0x1bd   : > { %6778 = vmatmul.mubr.msk.f32.gmra.mrb[20].mxu1 %vm784_vm1, %v2791_v23  ;;  %7001 = vmatprep.mubr.msk.f32.mxu0 %vm784_vm1, %v4798_v24 }
 0x1be   : > { %6780 = vmatprep.mubr.msk.f32.mxu1 %vm784_vm1, %v2792_v25 }
 0x1c0   : > { %7002 = vmatmul.mubr.msk.f32.gmra.mrb[20].mxu0 %vm784_vm1, %v4799_v26 }
 0x1c1   : > { %6781 = vmatmul.mubr.msk.f32.gmra.mrb[22].mxu1 %vm784_vm1, %v2793_v27  ;;  %7004 = vmatprep.mubr.msk.f32.mxu0 %vm784_vm1, %v4800_v28  ;;  %v8619_v27 = vpop.permute.xlu1 %5419 }
 0x1c2   : > { %6783 = vmatprep.mubr.msk.f32.mxu1 %vm784_vm1, %v2794_v55 }
 0x1c4   : > { %7005 = vmatmul.mubr.msk.f32.gmra.mrb[22].mxu0 %vm784_vm1, %v4801_v31 }
 0x1c5   : > { %6784 = vmatmul.mubr.msk.f32.gmra.mrb[24].mxu1 %vm784_vm1, %v2795_v32  ;;  %7007 = vmatprep.mubr.msk.f32.mxu0 %vm784_vm1, %v4802_v33  ;;  %v8622_v32 = vpop.permute.xlu0 %5414 }
 0x1c6   : > { %6786 = vmatprep.mubr.msk.f32.mxu1 %vm784_vm1, %v2796_v34 }
 0x1c8   : > { %7008 = vmatmul.mubr.msk.f32.gmra.mrb[24].mxu0 %vm784_vm1, %v4803_v35 }
 0x1c9   : > { %6787 = vmatmul.mubr.msk.f32.gmra.mrb[26].mxu1 %vm784_vm1, %v2797_v37  ;;  %7010 = vmatprep.mubr.msk.f32.mxu0 %vm784_vm1, %v4804_v38 }
 0x1ca   : > { %6789 = vmatprep.mubr.msk.f32.mxu1 %vm784_vm1, %v2798_v61 }
 0x1cc   : > { %7011 = vmatmul.mubr.msk.f32.gmra.mrb[26].mxu0 %vm784_vm1, %v4805_v40 }
 0x1cd   : > { %6790 = vmatmul.mubr.msk.f32.gmra.mrb[28].mxu1 %vm784_vm1, %v2799_v36  ;;  %7013 = vmatprep.mubr.msk.f32.mxu0 %vm784_vm1, %v4806_v50 }
 0x1ce   : > { %6792 = vmatprep.mubr.msk.f32.mxu1 %vm784_vm1, %v2800_v39 }
 0x1d0   : > { %7014 = vmatmul.mubr.msk.f32.gmra.mrb[28].mxu0 %vm784_vm1, %v4807_v1 }
 0x1d1   : > { %6793 = vmatmul.mubr.msk.f32.gmra.mrb[30].mxu1 %vm784_vm1, %v2801_v2  ;;  %7016 = vmatprep.mubr.msk.f32.mxu0 %vm784_vm1, %v4808_v45  ;;  %v8628_v2 = vpop.permute.xlu1 %5429 }
 0x1d2   : > { %6795 = vmatprep.mubr.msk.f32.mxu1 %vm784_vm1, %v2802_v11 }
 0x1d4   : > { %7017 = vmatmul.mubr.msk.f32.gmra.mrb[30].mxu0 %vm784_vm1, %v4809_v51 }
 0x1d5   : > { %6796 = vmatmul.mubr.msk.f32.gmra.mrb[32].mxu1 %vm784_vm1, %v2803_v21  ;;  %7019 = vmatprep.mubr.msk.f32.mxu0 %vm784_vm1, %v4810_v57 }
 0x1d6   : > { %6798 = vmatprep.mubr.msk.f32.mxu1 %vm784_vm1, %v2804_v29 }
 0x1d8   : > { %7020 = vmatmul.mubr.msk.f32.gmra.mrb[32].mxu0 %vm784_vm1, %v4811_v63  ;;  %v8632_v63 = vpop.permute.xlu0 %5424 }
 0x1d9   : > { %6799 = vmatmul.mubr.msk.f32.gmra.mrb[34].mxu1 %vm784_vm1, %v2805_v41  ;;  %7022 = vmatprep.mubr.msk.f32.mxu0 %vm784_vm1, %v4812_v42 }
 0x1dc   : > { %7023 = vmatmul.mubr.msk.f32.gmra.mrb[34].mxu0 %vm784_vm1, %v4813_v44 }
 0x244   : > { %v6693_v46 = vpop.f32.mrb[0].mxu1 }
 0x245   : > { %v2483_v30 = vpop.f32.mrb[1].mxu1  ;;  %v7027_v22 = vadd.f32 %v6693_v46, %v8613_v20 }
 0x246   : > { %v7029_v23 = vadd.f32 %v8613_v20, %v2483_v30 }
 0x248   : > { %v6696_v47 = vpop.f32.mrb[2].mxu1 }
 0x249   : > { %v2493_v5 = vpop.f32.mrb[3].mxu1  ;;  %v7031_v55 = vadd.f32 %v6696_v47, %v8613_v20 }
 0x24a   : > { %v7033_v33 = vadd.f32 %v8613_v20, %v2493_v5 }
 0x24c   : > { %v6699_v52 = vpop.f32.mrb[4].mxu1 }
 0x24d   : > { %v2503_v53 = vpop.f32.mrb[5].mxu1  ;;  %v7035_v39 = vadd.f32 %v6699_v52, %v8613_v20 }
 0x24e   : > { %v7037_v45 = vadd.f32 %v8613_v20, %v2503_v53 }
 0x250   : > { %v6702_v58 = vpop.f32.mrb[6].mxu1 }
 0x251   : > { %v2513_v60 = vpop.f32.mrb[7].mxu1  ;;  %v7039_v46 = vadd.f32 %v6702_v58, %v8613_v20 }
 0x252   : > { %v7041_v30 = vadd.f32 %v8613_v20, %v2513_v60 }
 0x254   : > { %v8580_v62 = vpop.f32.mrb[8].mxu1 }
 0x255   : > { %v8582_v0 = vpop.f32.mrb[9].mxu1  ;;  %v7043_v58 = vadd.f32 %v8580_v62, %v8613_v20 }
 0x256   : > { %v7045_v60 = vadd.f32 %v8613_v20, %v8582_v0 }
 0x258   : > { %v8584_v18 = vpop.f32.mrb[10].mxu1 }
 0x259   : > { %v8586_v6 = vpop.f32.mrb[11].mxu1  ;;  %v7047_v0 = vadd.f32 %v8584_v18, %v8613_v20 }
 0x25c   : > { %v8590_v8 = vpop.f32.mrb[12].mxu1 }
 0x25d   : > { %v8594_v10 = vpop.f32.mrb[13].mxu1 }
 0x260   : > { %v8596_v43 = vpop.f32.mrb[14].mxu1 }
 0x261   : > { %v8600_v13 = vpop.f32.mrb[15].mxu1 }
 0x264   : > { %v8604_v16 = vpop.f32.mrb[16].mxu1 }
 0x265   : > { %v8606_v17 = vpop.f32.mrb[17].mxu1 }
 0x26b   : > { %v6973_v24 = vpop.f32.mrb[0].mxu0 }
 0x26c   : > { %v7028_v25 = vadd.f32 %v7027_v22, %v6973_v24  ;;  %v4993_v26 = vpop.f32.mrb[1].mxu0 }
 0x26d   : > { %v7030_v28 = vadd.f32 %v7029_v23, %v4993_v26 }
 0x26e   : > { %v5533_v31 = vmul.f32 %v7028_v25, %v5360_v3 }
 0x26f   : > { %v5532_v34 = vmul.f32 %v7030_v28, %v5355_v48  ;;  %v6976_v35 = vpop.f32.mrb[2].mxu0 }
 0x270   : > { %v5611_v37 = vmul.f32 %v5533_v31, %v5533_v31  ;;  %5692 = vst [vmem:[%s8572_s18 + $0x20] sm:$0xff] %v5533_v31  ;;  %v7032_v38 = vadd.f32 %v7031_v55, %v6976_v35  ;;  %v5003_v61 = vpop.f32.mrb[3].mxu0 }
 0x271   : > { %v5568_v40 = vadd.f32 %v5533_v31, %v5532_v34  ;;  %v5610_v36 = vmul.f32 %v5532_v34, %v5532_v34  ;;  %5691 = vst [vmem:[%s8572_s18 + $0x18] sm:$0xff] %v5532_v34  ;;  %v7034_v50 = vadd.f32 %v7033_v33, %v5003_v61 }
 0x272   : > { %v5535_v1 = vmul.f32 %v7032_v38, %v5370_v54 }
 0x273   : > { %v5646_v11 = vadd.f32 %v5611_v37, %v5610_v36  ;;  %v5534_v51 = vmul.f32 %v7034_v50, %v5365_v59  ;;  %v6979_v21 = vpop.f32.mrb[4].mxu0  ;;  %v8638_v59 = vpop.permute.xlu1 %5439 }
 0x274   : > { %5694 = vst [vmem:[%s8572_s18 + $0x30] sm:$0xff] %v5535_v1  ;;  %v7036_v57 = vadd.f32 %v7035_v39, %v6979_v21  ;;  %v5013_v29 = vpop.f32.mrb[5].mxu0  ;;  %v5613_v3 = vmul.f32 %v5535_v1, %v5535_v1 }
 0x275   : > { %v5569_v41 = vadd.f32 %v5568_v40, %v5534_v51  ;;  %v5612_v42 = vmul.f32 %v5534_v51, %v5534_v51  ;;  %5693 = vst [vmem:[%s8572_s18 + $0x28] sm:$0xff] %v5534_v51  ;;  %v7038_v44 = vadd.f32 %v7037_v45, %v5013_v29 }
 0x276   : > { %v5537_v47 = vmul.f32 %v7036_v57, %v5380_v56 }
 0x277   : > { %v5647_v5 = vadd.f32 %v5646_v11, %v5612_v42  ;;  %v5536_v14 = vmul.f32 %v7038_v44, %v5375_v4  ;;  %v5570_v48 = vadd.f32 %v5569_v41, %v5535_v1  ;;  %v6982_v52 = vpop.f32.mrb[6].mxu0  ;;  %v8646_v4 = vpop.permute.xlu0 %5434 }
 0x278   : > { %5696 = vst [vmem:[%s8572_s18 + $0x40] sm:$0xff] %v5537_v47  ;;  %v7040_v53 = vadd.f32 %v7039_v46, %v6982_v52  ;;  %v5023_v54 = vpop.f32.mrb[7].mxu0  ;;  %v5615_v26 = vmul.f32 %v5537_v47, %v5537_v47  ;;  %v8656_v40 = vpop.permute.xlu1 %5449 }
 0x279   : > { %v5571_v22 = vadd.f32 %v5570_v48, %v5536_v14  ;;  %v5614_v23 = vmul.f32 %v5536_v14, %v5536_v14  ;;  %v5648_v24 = vadd.f32 %v5647_v5, %v5613_v3  ;;  %5695 = vst [vmem:[%s8572_s18 + $0x38] sm:$0xff] %v5536_v14  ;;  %v7042_v25 = vadd.f32 %v7041_v30, %v5023_v54 }
 0x27a   : > { %v5539_v56 = vmul.f32 %v7040_v53, %v8588_v7  ;;  %v7049_v7 = vadd.f32 %v8613_v20, %v8586_v6 }
 0x27b   : > { %v5649_v28 = vadd.f32 %v5648_v24, %v5614_v23  ;;  %v5538_v55 = vmul.f32 %v7042_v25, %v8592_v9  ;;  %v5572_v31 = vadd.f32 %v5571_v22, %v5537_v47  ;;  %v6985_v33 = vpop.f32.mrb[8].mxu0  ;;  %v8660_v21 = vpop.permute.xlu0 %5444 }
 0x27c   : > { %5698 = vst [vmem:[%s8572_s18 + $0x50] sm:$0xff] %v5539_v56  ;;  %v7044_v34 = vadd.f32 %v7043_v58, %v6985_v33  ;;  %v5033_v35 = vpop.f32.mrb[9].mxu0  ;;  %v5617_v36 = vmul.f32 %v5539_v56, %v5539_v56  ;;  %v8670_v14 = vpop.permute.xlu1 %5459 }
 0x27d   : > { %v5573_v37 = vadd.f32 %v5572_v31, %v5538_v55  ;;  %v5616_v38 = vmul.f32 %v5538_v55, %v5538_v55  ;;  %v5650_v62 = vadd.f32 %v5649_v28, %v5615_v26  ;;  %5697 = vst [vmem:[%s8572_s18 + $0x48] sm:$0xff] %v5538_v55  ;;  %v7046_v61 = vadd.f32 %v7045_v60, %v5033_v35 }
 0x27e   : > { %v5541_v9 = vmul.f32 %v7044_v34, %v8598_v12  ;;  %v7051_v12 = vadd.f32 %v8590_v8, %v8613_v20 }
 0x27f   : > { %v5651_v50 = vadd.f32 %v5650_v62, %v5616_v38  ;;  %v5540_v39 = vmul.f32 %v7046_v61, %v8602_v15  ;;  %v5574_v1 = vadd.f32 %v5573_v37, %v5539_v56  ;;  %v6988_v45 = vpop.f32.mrb[10].mxu0  ;;  %v7053_v15 = vadd.f32 %v8613_v20, %v8594_v10  ;;  %v8678_v54 = vpop.permute.xlu0 %5454 }
 0x280   : > { %5700 = vst [vmem:[%s8572_s18 + $0x60] sm:$0xff] %v5541_v9  ;;  %v7048_v11 = vadd.f32 %v7047_v0, %v6988_v45  ;;  %v5043_v51 = vpop.f32.mrb[11].mxu0  ;;  %v5619_v42 = vmul.f32 %v5541_v9, %v5541_v9  ;;  %v7055_v10 = vadd.f32 %v8596_v43, %v8613_v20  ;;  %v8686_v31 = vpop.permute.xlu1 %5469  ;;  %v7061_v38 = vadd.f32 %v8613_v20, %v8606_v17 }
 0x281   : > { %v5575_v18 = vadd.f32 %v5574_v1, %v5540_v39  ;;  %v5618_v57 = vmul.f32 %v5540_v39, %v5540_v39  ;;  %v5652_v29 = vadd.f32 %v5651_v50, %v5617_v36  ;;  %5699 = vst [vmem:[%s8572_s18 + $0x58] sm:$0xff] %v5540_v39  ;;  %v7050_v6 = vadd.f32 %v7049_v7, %v5043_v51 }
 0x282   : > { %v5543_v41 = vmul.f32 %v7048_v11, %v8608_v19  ;;  %v7057_v19 = vadd.f32 %v8613_v20, %v8600_v13  ;;  %v7059_v13 = vadd.f32 %v8604_v16, %v8613_v20 }
 0x283   : > { %v5653_v44 = vadd.f32 %v5652_v29, %v5618_v57  ;;  %v5542_v46 = vmul.f32 %v7050_v6, %v8615_v49  ;;  %v5576_v30 = vadd.f32 %v5575_v18, %v5541_v9  ;;  %v6991_v47 = vpop.f32.mrb[12].mxu0  ;;  %v8692_v16 = vpop.permute.xlu0 %5464 }
 0x284   : > { %5702 = vst [vmem:[%s8572_s18 + $0x70] sm:$0xff] %v5543_v41  ;;  %v7052_v3 = vadd.f32 %v7051_v12, %v6991_v47  ;;  %v5053_v5 = vpop.f32.mrb[13].mxu0  ;;  %v5621_v22 = vmul.f32 %v5543_v41, %v5543_v41  ;;  %v8700_v12 = vpop.permute.xlu1 %5479 }
 0x285   : > { %v5577_v48 = vadd.f32 %v5576_v30, %v5542_v46  ;;  %v5620_v52 = vmul.f32 %v5542_v46, %v5542_v46  ;;  %v5654_v8 = vadd.f32 %v5653_v44, %v5619_v42  ;;  %5701 = vst [vmem:[%s8572_s18 + $0x68] sm:$0xff] %v5542_v46  ;;  %v7054_v53 = vadd.f32 %v7053_v15, %v5053_v5 }
 0x286   : > { %v5545_v49 = vmul.f32 %v7052_v3, %v8619_v27 }
 0x287   : > { %v5655_v23 = vadd.f32 %v5654_v8, %v5620_v52  ;;  %v5544_v24 = vmul.f32 %v7054_v53, %v8622_v32  ;;  %v5578_v25 = vadd.f32 %v5577_v48, %v5543_v41  ;;  %v6994_v58 = vpop.f32.mrb[14].mxu0 }
 0x288   : > { %5704 = vst [vmem:[%s8572_s18 + $0x80] sm:$0xff] %v5545_v49  ;;  %v7056_v60 = vadd.f32 %v7055_v10, %v6994_v58  ;;  %v5063_v56 = vpop.f32.mrb[15].mxu0  ;;  %v5623_v32 = vmul.f32 %v5545_v49, %v5545_v49 }
 0x289   : > { %v5579_v26 = vadd.f32 %v5578_v25, %v5544_v24  ;;  %v5622_v28 = vmul.f32 %v5544_v24, %v5544_v24  ;;  %v5656_v43 = vadd.f32 %v5655_v23, %v5621_v22  ;;  %5703 = vst [vmem:[%s8572_s18 + $0x78] sm:$0xff] %v5544_v24  ;;  %v7058_v55 = vadd.f32 %v7057_v19, %v5063_v56 }
 0x28a   : > { %v5547_v27 = vmul.f32 %v7056_v60, %v8628_v2  ;;  %v5490_v60 = vpop.permute.xlu1 %5489 }
 0x28b   : > { %v5657_v33 = vadd.f32 %v5656_v43, %v5622_v28  ;;  %v5546_v34 = vmul.f32 %v7058_v55, %v8632_v63  ;;  %v5580_v35 = vadd.f32 %v5579_v26, %v5545_v49  ;;  %v6997_v37 = vpop.f32.mrb[16].mxu0 }
 0x28c   : > { %5706 = vst [vmem:[%s8572_s18 + $0x90] sm:$0xff] %v5547_v27  ;;  %v7060_v62 = vadd.f32 %v7059_v13, %v6997_v37  ;;  %v6776_v61 = vpop.f32.mrb[18].mxu1  ;;  %v5073_v0 = vpop.f32.mrb[17].mxu0  ;;  %v5625_v17 = vmul.f32 %v5547_v27, %v5547_v27 }
 0x28d   : > { %v5581_v2 = vadd.f32 %v5580_v35, %v5546_v34  ;;  %v5624_v7 = vmul.f32 %v5546_v34, %v5546_v34  ;;  %v5658_v9 = vadd.f32 %v5657_v33, %v5623_v32  ;;  %5705 = vst [vmem:[%s8572_s18 + $0x88] sm:$0xff] %v5546_v34  ;;  %v7063_v36 = vadd.f32 %v6776_v61, %v8613_v20  ;;  %v3075_v50 = vpop.f32.mrb[19].mxu1 }
 0x28e   : > { %v5549_v63 = vmul.f32 %v7060_v62, %v8638_v59  ;;  %v7062_v39 = vadd.f32 %v7061_v38, %v5073_v0  ;;  %v7065_v1 = vadd.f32 %v8613_v20, %v3075_v50 }
 0x28f   : > { %v5659_v45 = vadd.f32 %v5658_v9, %v5624_v7  ;;  %v5582_v11 = vadd.f32 %v5581_v2, %v5547_v27  ;;  %v7000_v51 = vpop.f32.mrb[18].mxu0 }
 0x290   : > { %5708 = vst [vmem:[%s8572_s18 + $0xa0] sm:$0xff] %v5549_v63  ;;  %v5548_v18 = vmul.f32 %v7062_v39, %v8646_v4  ;;  %v7064_v57 = vadd.f32 %v7063_v36, %v7000_v51  ;;  %v6779_v29 = vpop.f32.mrb[20].mxu1  ;;  %v5083_v6 = vpop.f32.mrb[19].mxu0  ;;  %v5627_v48 = vmul.f32 %v5549_v63, %v5549_v63 }
 0x291   : > { %v5660_v15 = vadd.f32 %v5659_v45, %v5625_v17  ;;  %v7067_v59 = vadd.f32 %v6779_v29, %v8613_v20  ;;  %v7066_v41 = vadd.f32 %v7065_v1, %v5083_v6  ;;  %v3085_v42 = vpop.f32.mrb[21].mxu1  ;;  %v5475_v4 = vpop.permute.xlu0 %5474 }
 0x292   : > { %v5583_v44 = vadd.f32 %v5582_v11, %v5548_v18  ;;  %v5626_v46 = vmul.f32 %v5548_v18, %v5548_v18  ;;  %5707 = vst [vmem:[%s8572_s18 + $0x98] sm:$0xff] %v5548_v18  ;;  %v5551_v30 = vmul.f32 %v7064_v57, %v8656_v40  ;;  %v7069_v47 = vadd.f32 %v8613_v20, %v3085_v42  ;;  %v5500_v1 = vpop.permute.xlu1 %5499 }
 0x293   : > { %v5550_v3 = vmul.f32 %v7066_v41, %v8660_v21  ;;  %v7003_v5 = vpop.f32.mrb[20].mxu0 }
 0x294   : > { %v5661_v52 = vadd.f32 %v5660_v15, %v5626_v46  ;;  %5710 = vst [vmem:[%s8572_s18 + $0xb0] sm:$0xff] %v5551_v30  ;;  %v5584_v8 = vadd.f32 %v5583_v44, %v5549_v63  ;;  %v7068_v53 = vadd.f32 %v7067_v59, %v7003_v5  ;;  %v6782_v10 = vpop.f32.mrb[22].mxu1  ;;  %v5093_v19 = vpop.f32.mrb[21].mxu0  ;;  %v5629_v28 = vmul.f32 %v5551_v30, %v5551_v30 }
 0x295   : > { %v5628_v49 = vmul.f32 %v5550_v3, %v5550_v3  ;;  %5709 = vst [vmem:[%s8572_s18 + $0xa8] sm:$0xff] %v5550_v3  ;;  %v7071_v22 = vadd.f32 %v6782_v10, %v8613_v20  ;;  %v7070_v23 = vadd.f32 %v7069_v47, %v5093_v19  ;;  %v3095_v40 = vpop.f32.mrb[23].mxu1  ;;  %v5485_v33 = vpop.permute.xlu0 %5484 }
 0x296   : > { %v5585_v24 = vadd.f32 %v5584_v8, %v5550_v3  ;;  %v5662_v25 = vadd.f32 %v5661_v52, %v5627_v48  ;;  %v5553_v21 = vmul.f32 %v7068_v53, %v8670_v14  ;;  %v7073_v58 = vadd.f32 %v8613_v20, %v3095_v40  ;;  %v5510_v53 = vpop.permute.xlu1 %5509 }
 0x297   : > { %v5552_v56 = vmul.f32 %v7070_v23, %v8678_v54  ;;  %v7006_v26 = vpop.f32.mrb[22].mxu0 }
 0x298   : > { %v5663_v43 = vadd.f32 %v5662_v25, %v5628_v49  ;;  %5712 = vst [vmem:[%s8572_s18 + $0xc0] sm:$0xff] %v5553_v21  ;;  %v5586_v55 = vadd.f32 %v5585_v24, %v5551_v30  ;;  %v7072_v13 = vadd.f32 %v7071_v22, %v7006_v26  ;;  %v6785_v27 = vpop.f32.mrb[24].mxu1  ;;  %v5103_v32 = vpop.f32.mrb[23].mxu0  ;;  %v5631_v7 = vmul.f32 %v5553_v21, %v5553_v21 }
 0x299   : > { %v5630_v34 = vmul.f32 %v5552_v56, %v5552_v56  ;;  %5711 = vst [vmem:[%s8572_s18 + $0xb8] sm:$0xff] %v5552_v56  ;;  %v7075_v35 = vadd.f32 %v6785_v27, %v8613_v20  ;;  %v7074_v14 = vadd.f32 %v7073_v58, %v5103_v32  ;;  %v3105_v37 = vpop.f32.mrb[25].mxu1  ;;  %v5495_v29 = vpop.permute.xlu0 %5494 }
 0x29a   : > { %v5587_v38 = vadd.f32 %v5586_v55, %v5552_v56  ;;  %v5664_v62 = vadd.f32 %v5663_v43, %v5629_v28  ;;  %v5555_v54 = vmul.f32 %v7072_v13, %v8686_v31  ;;  %v7077_v61 = vadd.f32 %v8613_v20, %v3105_v37 }
 0x29b   : > { %v5554_v0 = vmul.f32 %v7074_v14, %v8692_v16  ;;  %v7009_v2 = vpop.f32.mrb[24].mxu0 }
 0x29c   : > { %v5665_v9 = vadd.f32 %v5664_v62, %v5630_v34  ;;  %5714 = vst [vmem:[%s8572_s18 + $0xd0] sm:$0xff] %v5555_v54  ;;  %v5588_v36 = vadd.f32 %v5587_v38, %v5553_v21  ;;  %v7076_v50 = vadd.f32 %v7075_v35, %v7009_v2  ;;  %v6788_v63 = vpop.f32.mrb[26].mxu1  ;;  %v5113_v39 = vpop.f32.mrb[25].mxu0  ;;  %v5633_v59 = vmul.f32 %v5555_v54, %v5555_v54 }
 0x29d   : > { %v5632_v17 = vmul.f32 %v5554_v0, %v5554_v0  ;;  %5713 = vst [vmem:[%s8572_s18 + $0xc8] sm:$0xff] %v5554_v0  ;;  %v7079_v45 = vadd.f32 %v6788_v63, %v8613_v20  ;;  %v7078_v11 = vadd.f32 %v7077_v61, %v5113_v39  ;;  %v3115_v31 = vpop.f32.mrb[27].mxu1  ;;  %v5505_v21 = vpop.permute.xlu0 %5504 }
 0x29e   : > { %v5589_v51 = vadd.f32 %v5588_v36, %v5554_v0  ;;  %v5666_v18 = vadd.f32 %v5665_v9, %v5631_v7  ;;  %v5557_v16 = vmul.f32 %v7076_v50, %v8700_v12  ;;  %v7081_v57 = vadd.f32 %v8613_v20, %v3115_v31  ;;  %v5520_v2 = vpop.permute.xlu1 %5519 }
 0x29f   : > { %v5556_v6 = vmul.f32 %v7078_v11, %v5475_v4  ;;  %v7012_v15 = vpop.f32.mrb[26].mxu0 }
 0x2a0   : > { %v5667_v41 = vadd.f32 %v5666_v18, %v5632_v17  ;;  %5716 = vst [vmem:[%s8572_s18 + $0xe0] sm:$0xff] %v5557_v16  ;;  %v5590_v42 = vadd.f32 %v5589_v51, %v5555_v54  ;;  %v7080_v44 = vadd.f32 %v7079_v45, %v7012_v15  ;;  %v6791_v46 = vpop.f32.mrb[28].mxu1  ;;  %v5123_v30 = vpop.f32.mrb[27].mxu0  ;;  %v5635_v49 = vmul.f32 %v5557_v16, %v5557_v16 }
 0x2a1   : > { %v5634_v47 = vmul.f32 %v5556_v6, %v5556_v6  ;;  %5715 = vst [vmem:[%s8572_s18 + $0xd8] sm:$0xff] %v5556_v6  ;;  %v7083_v3 = vadd.f32 %v6791_v46, %v8613_v20  ;;  %v7082_v5 = vadd.f32 %v7081_v57, %v5123_v30  ;;  %v3125_v48 = vpop.f32.mrb[29].mxu1  ;;  %v5515_v63 = vpop.permute.xlu0 %5514 }
 0x2a2   : > { %v5591_v12 = vadd.f32 %v5590_v42, %v5556_v6  ;;  %v5668_v52 = vadd.f32 %v5667_v41, %v5633_v59  ;;  %v5559_v8 = vmul.f32 %v7080_v44, %v5490_v60  ;;  %v7085_v4 = vadd.f32 %v8613_v20, %v3125_v48 }
 0x2a3   : > { %v5558_v10 = vmul.f32 %v7082_v5, %v5485_v33  ;;  %v7015_v19 = vpop.f32.mrb[28].mxu0 }
 0x2a4   : > { %v5669_v22 = vadd.f32 %v5668_v52, %v5634_v47  ;;  %5718 = vst [vmem:[%s8572_s18 + $0xf0] sm:$0xff] %v5559_v8  ;;  %v5592_v23 = vadd.f32 %v5591_v12, %v5557_v16  ;;  %v7084_v40 = vadd.f32 %v7083_v3, %v7015_v19  ;;  %v6794_v24 = vpop.f32.mrb[30].mxu1  ;;  %v5133_v25 = vpop.f32.mrb[29].mxu0  ;;  %v5637_v33 = vmul.f32 %v5559_v8, %v5559_v8 }
 0x2a5   : > { %v5636_v58 = vmul.f32 %v5558_v10, %v5558_v10  ;;  %5717 = vst [vmem:[%s8572_s18 + $0xe8] sm:$0xff] %v5558_v10  ;;  %v7087_v56 = vadd.f32 %v6794_v24, %v8613_v20  ;;  %v7086_v26 = vadd.f32 %v7085_v4, %v5133_v25  ;;  %v3135_v60 = vpop.f32.mrb[31].mxu1  ;;  %v5530_v12 = vpop.permute.xlu1 %5529 }
 0x2a6   : > { %v5593_v28 = vadd.f32 %v5592_v23, %v5558_v10  ;;  %v5670_v43 = vadd.f32 %v5669_v22, %v5635_v49  ;;  %v5561_v55 = vmul.f32 %v7084_v40, %v5500_v1  ;;  %v7089_v13 = vadd.f32 %v8613_v20, %v3135_v60  ;;  %v5525_v4 = vpop.permute.xlu0 %5524 }
 0x2a7   : > { %v5560_v27 = vmul.f32 %v7086_v26, %v5495_v29  ;;  %v7018_v32 = vpop.f32.mrb[30].mxu0 }
 0x2a8   : > { %v5671_v34 = vadd.f32 %v5670_v43, %v5636_v58  ;;  %5720 = vst [vmem:[%s8572_s18 + $0x100] sm:$0xff] %v5561_v55  ;;  %v5594_v35 = vadd.f32 %v5593_v28, %v5559_v8  ;;  %v7088_v14 = vadd.f32 %v7087_v56, %v7018_v32  ;;  %v6797_v37 = vpop.f32.mrb[32].mxu1  ;;  %v5143_v38 = vpop.f32.mrb[31].mxu0  ;;  %v5639_v17 = vmul.f32 %v5561_v55, %v5561_v55 }
 0x2a9   : > { %v5638_v62 = vmul.f32 %v5560_v27, %v5560_v27  ;;  %5719 = vst [vmem:[%s8572_s18 + $0xf8] sm:$0xff] %v5560_v27  ;;  %v7091_v54 = vadd.f32 %v6797_v37, %v8613_v20  ;;  %v7090_v61 = vadd.f32 %v7089_v13, %v5143_v38  ;;  %v3145_v0 = vpop.f32.mrb[33].mxu1 }
 0x2aa   : > { %v5595_v7 = vadd.f32 %v5594_v35, %v5560_v27  ;;  %v5672_v9 = vadd.f32 %v5671_v34, %v5637_v33  ;;  %v5563_v36 = vmul.f32 %v7088_v14, %v5510_v53  ;;  %v7093_v50 = vadd.f32 %v8613_v20, %v3145_v0 }
 0x2ab   : > { %v5562_v39 = vmul.f32 %v7090_v61, %v5505_v21  ;;  %v7021_v1 = vpop.f32.mrb[32].mxu0 }
 0x2ac   : > { %v5673_v45 = vadd.f32 %v5672_v9, %v5638_v62  ;;  %5722 = vst [vmem:[%s8572_s18 + $0x110] sm:$0xff] %v5563_v36  ;;  %v5596_v11 = vadd.f32 %v5595_v7, %v5561_v55  ;;  %v7092_v31 = vadd.f32 %v7091_v54, %v7021_v1  ;;  %v6800_v51 = vpop.f32.mrb[34].mxu1  ;;  %v5153_v18 = vpop.f32.mrb[33].mxu0  ;;  %v5641_v30 = vmul.f32 %v5563_v36, %v5563_v36 }
 0x2ad   : > { %v5640_v16 = vmul.f32 %v5562_v39, %v5562_v39  ;;  %5721 = vst [vmem:[%s8572_s18 + $0x108] sm:$0xff] %v5562_v39  ;;  %v7095_v57 = vadd.f32 %v6800_v51, %v8613_v20  ;;  %v7094_v29 = vadd.f32 %v7093_v50, %v5153_v18  ;;  %v3155_v6 = vpop.f32.mrb[35].mxu1 }
 0x2ae   : > { %v5597_v15 = vadd.f32 %v5596_v11, %v5562_v39  ;;  %v5674_v59 = vadd.f32 %v5673_v45, %v5639_v17  ;;  %v5565_v41 = vmul.f32 %v7092_v31, %v5520_v2  ;;  %v7097_v42 = vadd.f32 %v8613_v20, %v3155_v6 }
 0x2af   : > { %v5564_v44 = vmul.f32 %v7094_v29, %v5515_v63  ;;  %v7024_v46 = vpop.f32.mrb[34].mxu0 }
 0x2b0   : > { %v5675_v47 = vadd.f32 %v5674_v59, %v5640_v16  ;;  %5724 = vst [vmem:[%s8572_s18 + $0x120] sm:$0xff] %v5565_v41  ;;  %v5598_v3 = vadd.f32 %v5597_v15, %v5563_v36  ;;  %v7096_v5 = vadd.f32 %v7095_v57, %v7024_v46  ;;  %v5163_v48 = vpop.f32.mrb[35].mxu0  ;;  %v5643_v20 = vmul.f32 %v5565_v41, %v5565_v41 }
 0x2b1   : > { %v5642_v52 = vmul.f32 %v5564_v44, %v5564_v44  ;;  %5723 = vst [vmem:[%s8572_s18 + $0x118] sm:$0xff] %v5564_v44  ;;  %v7098_v8 = vadd.f32 %v7097_v42, %v5163_v48 }
 0x2b2   : > { %v5599_v53 = vadd.f32 %v5598_v3, %v5564_v44  ;;  %v5676_v10 = vadd.f32 %v5675_v47, %v5641_v30  ;;  %v5567_v19 = vmul.f32 %v7096_v5, %v5530_v12 }
 0x2b3   : > { %v5566_v49 = vmul.f32 %v7098_v8, %v5525_v4 }
 0x2b4   : > { %v5677_v22 = vadd.f32 %v5676_v10, %v5642_v52  ;;  %5726 = vst [vmem:[%s8572_s18 + $0x130] sm:$0xff] %v5567_v19  ;;  %v5600_v23 = vadd.f32 %v5599_v53, %v5565_v41  ;;  %v5645_v21 = vmul.f32 %v5567_v19, %v5567_v19 }
 0x2b5   : > { %v5644_v40 = vmul.f32 %v5566_v49, %v5566_v49  ;;  %5725 = vst [vmem:[%s8572_s18 + $0x128] sm:$0xff] %v5566_v49 }
 0x2b6   : > { %v5601_v24 = vadd.f32 %v5600_v23, %v5566_v49  ;;  %v5678_v25 = vadd.f32 %v5677_v22, %v5643_v20 }
 0x2b8   : > { %v5602_v58 = vadd.f32 %v5601_v24, %v5567_v19  ;;  %v5679_v56 = vadd.f32 %v5678_v25, %v5644_v40 }
 0x2ba   : > { %v5603_v26 = vrot.slane %v5602_v58, 4  ;;  %v5680_v60 = vadd.f32 %v5679_v56, %v5645_v21 }
 0x2bc   : > { %v5604_v28 = vadd.f32 %v5603_v26, %v5602_v58  ;;  %v5681_v43 = vrot.slane %v5680_v60, 4 }
 0x2be   : > { %v5605_v55 = vrot.slane %v5604_v28, 2  ;;  %v5682_v13 = vadd.f32 %v5681_v43, %v5680_v60 }
 0x2c0   : > { %v5606_v27 = vadd.f32 %v5605_v55, %v5604_v28  ;;  %v5683_v32 = vrot.slane %v5682_v13, 2 }
 0x2c2   : > { %v5607_v33 = vrot.slane %v5606_v27, 1  ;;  %v5684_v34 = vadd.f32 %v5683_v32, %v5682_v13 }
 0x2c4   : > { %v5608_v35 = vadd.f32 %v5607_v33, %v5606_v27  ;;  %v5685_v14 = vrot.slane %v5684_v34, 1 }
 0x2c6   : > { %5609 = vst [vmem:[%s346_s22] sm:$0x1] %v5608_v35  ;;  %v5686_v37 = vadd.f32 %v5685_v14, %v5684_v34 }
 0x2c8   : > { %5687 = vst [vmem:[%s349_s25] sm:$0x1] %v5686_v37 }
 0x2c9 PF: > { %s20_s30 = sadd.s32 1, %s7371_s30  }
 0x2ca   : > { %p17_p4 = scmp.ge.s32.totalorder %s20_s30, 4  }
 0x2cc   :  { %19 = sbr.rel (!%p17_p4) target bundleno = 1 (0x1), region = 110 }

// kernel: conv_module_forward.4
= control target key start
LH: loop header
LB: loop body
LE: loop exit
PB: predicated region body
PF: predicated region fallthrough
CT: control target
= control target key end

     0   :  { %s7052_s30 = smov 0   ;;  %s8427_s0 = inlined_call_operand.vmem [shape: f32[2,336,128], index: 0, kind: input, shape index: {}]   ;;  %s8428_s1 = inlined_call_operand.vmem [shape: f32[9,128,128], index: 1, kind: input, shape index: {}]   ;;  %s8429_s2 = inlined_call_operand.vmem [shape: f32[1,128], index: 2, kind: input, shape index: {}]   ;;  %s8430_s3 = inlined_call_operand.vmem [shape: f32[1,128], index: 3, kind: input, shape index: {}]   ;;  %s8431_s4 = inlined_call_operand.vmem [shape: f32[1,128], index: 4, kind: input, shape index: {}]   ;;  %s8432_s5 = inlined_call_operand.vmem [shape: f32[336,1], index: 5, kind: input, shape index: {}]   ;;  %s8433_s6 = inlined_call_operand.vmem [shape: f32[288,1], index: 6, kind: input, shape index: {}]   ;;  %s8434_s7 = inlined_call_operand.vmem [shape: f32[2,336,128], index: 7, kind: output, shape index: {0}]   ;;  %s8435_s8 = inlined_call_operand.vmem [shape: f32[2,1,128], index: 8, kind: output, shape index: {1}]   ;;  %s8436_s9 = inlined_call_operand.vmem [shape: f32[2,1,128], index: 9, kind: output, shape index: {2}]  }
   0x1 LB: > { %s4969_s10 = sadd.s32 4294967295, %s6998_s30   ;;  %p4973_p0 = scmp.ge.s32.totalorder %s6998_s30, 1  ;;  %s6998_s30 = sphi %s7052_s30, %s20_s30  }
   0x2   : > { %p292_p1 = scmp.lt.s32.totalorder %s6998_s30, 3 }
   0x4   : > { %p293_p2 = pnand %p4973_p0, %p292_p1 }
   0x5   : > { %v444_v0 = vld [vmem:[%s8432_s5 + $0x10] sm:$0xff] (!%p293_p2)  ;;  %v442_v1 = vld [vmem:[%s8432_s5] sm:$0xff] (!%p293_p2)  ;;  %v7000_v2 = vmov (!%p293_p2), 0   ;;  %v445_v3 = vld [vmem:[%s8432_s5 + $0x18] sm:$0xff] (!%p293_p2)  ;;  %p334_p3 = scmp.lt.s32.totalorder (!%p293_p2), %s4969_s10, 1 }
   0x6   : > { %296 = sbr.rel (%p293_p2) target bundleno = 711 (0x2c7), region = 48  ;;  %6991 = vset.pattern.permute.xlu1 (!%p293_p2), %v7000_v2  ;;  %6990 = vset.pattern.permute.xlu0 (!%p293_p2), %v7000_v2  ;;  %v443_v4 = vld [vmem:[%s8432_s5 + $0x8] sm:$0xff] (!%p293_p2)  ;;  %v446_v6 = vld [vmem:[%s8432_s5 + $0x20] sm:$0xff] (!%p293_p2)  ;;  %v449_v7 = vld [vmem:[%s8432_s5 + $0x38] sm:$0xff] (!%p293_p2) }
   0x7   : > { %502 = vperm.xlu1 (!%p293_p2), %6991, %v444_v0   ;;  %492 = vperm.xlu0 (!%p293_p2), %6990, %v442_v1   ;;  %v447_v5 = vld [vmem:[%s8432_s5 + $0x28] sm:$0xff] (!%p293_p2)  ;;  %v448_v8 = vld [vmem:[%s8432_s5 + $0x30] sm:$0xff] (!%p293_p2)  ;;  %v450_v10 = vld [vmem:[%s8432_s5 + $0x40] sm:$0xff] (!%p293_p2) }
   0x8   : > { %v451_v9 = vld [vmem:[%s8432_s5 + $0x48] sm:$0xff] (!%p293_p2)  ;;  %v453_v11 = vld [vmem:[%s8432_s5 + $0x58] sm:$0xff] (!%p293_p2)  ;;  %v452_v12 = vld [vmem:[%s8432_s5 + $0x50] sm:$0xff] (!%p293_p2) }
   0x9   : > { %v862_v13 = vld [vmem:[%s8428_s1] sm:$0xff] (!%p293_p2)  ;;  %v863_v14 = vld [vmem:[%s8428_s1 + $0x8] sm:$0xff] (!%p293_p2)  ;;  %v864_v19 = vld [vmem:[%s8428_s1 + $0x10] sm:$0xff] (!%p293_p2) }
   0xa   : > { %v6351_v15 = vpack.c.bf16 (!%p293_p2), %v863_v14, %v862_v13  ;;  %v5027_v16 = vld [vmem:[%s8428_s1 + $0x200] sm:$0xff] (!%p293_p2)  ;;  %v5028_v17 = vld [vmem:[%s8428_s1 + $0x208] sm:$0xff] (!%p293_p2)  ;;  %v865_v20 = vld [vmem:[%s8428_s1 + $0x18] sm:$0xff] (!%p293_p2) }
   0xb   : > { %507 = vperm.xlu1 (!%p293_p2), %6991, %v445_v3   ;;  %497 = vperm.xlu0 (!%p293_p2), %6990, %v443_v4   ;;  %v7108_v18 = vpack.c.bf16 (!%p293_p2), %v5028_v17, %v5027_v16  ;;  %v455_v21 = vld [vmem:[%s8432_s5 + $0x68] sm:$0xff] (!%p293_p2)  ;;  %v6355_v22 = vpack.c.bf16 (!%p293_p2), %v865_v20, %v864_v19  ;;  %v5029_v23 = vld [vmem:[%s8428_s1 + $0x210] sm:$0xff] (!%p293_p2)  ;;  %v5030_v24 = vld [vmem:[%s8428_s1 + $0x218] sm:$0xff] (!%p293_p2) }
   0xc   : > { %v454_v25 = vld [vmem:[%s8432_s5 + $0x60] sm:$0xff] (!%p293_p2)  ;;  %6352 = vmatprep.subr.bf16.mxu1 (!%p293_p2), %v6351_v15  ;;  %v7129_v26 = vpack.c.bf16 (!%p293_p2), %v5030_v24, %v5029_v23  ;;  %v867_v28 = vld [vmem:[%s8428_s1 + $0x28] sm:$0xff] (!%p293_p2)  ;;  %v868_v33 = vld [vmem:[%s8428_s1 + $0x30] sm:$0xff] (!%p293_p2) }
   0xd   : > { %6480 = vmatprep.subr.bf16.mxu0 %v7108_v18  ;;  %v866_v27 = vld [vmem:[%s8428_s1 + $0x20] sm:$0xff]  ;;  %6354 = vmatpush3.bf16.msra.mxu1 %v6351_v15  ;;  %v5032_v30 = vld [vmem:[%s8428_s1 + $0x228] sm:$0xff]  ;;  %v869_v34 = vld [vmem:[%s8428_s1 + $0x38] sm:$0xff]  ;;  %s8438_s10 = smov (!%p334_p3, %s4969_s10), 1 }
   0xe   : > { %6482 = vmatpush3.bf16.msra.mxu0 %v7108_v18  ;;  %v5031_v29 = vld [vmem:[%s8428_s1 + $0x220] sm:$0xff]  ;;  %6356 = vmatprep.subr.bf16.mxu1 %v6355_v22  ;;  %v6359_v31 = vpack.c.bf16 %v867_v28, %v866_v27  ;;  %v5033_v35 = vld [vmem:[%s8428_s1 + $0x230] sm:$0xff]  ;;  %v5034_v36 = vld [vmem:[%s8428_s1 + $0x238] sm:$0xff]  ;;  %v6363_v39 = vpack.c.bf16 %v869_v34, %v868_v33  ;;  %s6979_s14 = smul.u32 336, %s8438_s10  ;;  %s346_s20 = scalar_lea.vmem %s8435_s8, %s8438_s10 }
   0xf   : > { %517 = vperm.xlu1 %6991, %v447_v5   ;;  %512 = vperm.xlu0 %6990, %v446_v6   ;;  %v7145_v32 = vpack.c.bf16 %v5032_v30, %v5031_v29  ;;  %v457_v37 = vld [vmem:[%s8432_s5 + $0x78] sm:$0xff]  ;;  %v456_v38 = vld [vmem:[%s8432_s5 + $0x70] sm:$0xff]  ;;  %v7167_v40 = vpack.c.bf16 %v5034_v36, %v5033_v35  ;;  %v870_v41 = vld [vmem:[%s8428_s1 + $0x40] sm:$0xff]  ;;  %s349_s24 = scalar_lea.vmem %s8436_s9, %s8438_s10 }
  0x10   : > { %6484 = vmatprep.subr.bf16.mxu0 %v7129_v26  ;;  %v871_v42 = vld [vmem:[%s8428_s1 + $0x48] sm:$0xff]  ;;  %v5035_v43 = vld [vmem:[%s8428_s1 + $0x240] sm:$0xff]  ;;  %v872_v49 = vld [vmem:[%s8428_s1 + $0x50] sm:$0xff]  ;;  %s7320_s21 = scalar_lea.vmem %s8427_s0, %s6979_s14  ;;  %s8259_s17 = scalar_lea.vmem %s8434_s7, %s6979_s14 }
  0x11   : > { %6358 = vmatpush3.bf16.msra.mxu1 %v6355_v22  ;;  %v5036_v44 = vld [vmem:[%s8428_s1 + $0x248] sm:$0xff]  ;;  %v458_v46 = vld [vmem:[%s8432_s5 + $0x80] sm:$0xff]  ;;  %v6367_v47 = vpack.c.bf16 %v871_v42, %v870_v41  ;;  %v873_v50 = vld [vmem:[%s8428_s1 + $0x58] sm:$0xff] }
  0x12   : > { %6486 = vmatpush3.bf16.msra.mxu0 %v7129_v26  ;;  %6360 = vmatprep.subr.bf16.mxu1 %v6359_v31  ;;  %v459_v45 = vld [vmem:[%s8432_s5 + $0x88] sm:$0xff]  ;;  %v7189_v48 = vpack.c.bf16 %v5036_v44, %v5035_v43  ;;  %v5037_v51 = vld [vmem:[%s8428_s1 + $0x250] sm:$0xff]  ;;  %v5038_v52 = vld [vmem:[%s8428_s1 + $0x258] sm:$0xff]  ;;  %v6371_v55 = vpack.c.bf16 %v873_v50, %v872_v49 }
  0x13   : > { %527 = vperm.xlu1 %6991, %v449_v7   ;;  %522 = vperm.xlu0 %6990, %v448_v8   ;;  %v461_v53 = vld [vmem:[%s8432_s5 + $0x98] sm:$0xff]  ;;  %v460_v54 = vld [vmem:[%s8432_s5 + $0x90] sm:$0xff]  ;;  %v7211_v56 = vpack.c.bf16 %v5038_v52, %v5037_v51  ;;  %v874_v57 = vld [vmem:[%s8428_s1 + $0x60] sm:$0xff] }
  0x14   : > { %6488 = vmatprep.subr.bf16.mxu0 %v7145_v32  ;;  %v875_v58 = vld [vmem:[%s8428_s1 + $0x68] sm:$0xff]  ;;  %v5039_v59 = vld [vmem:[%s8428_s1 + $0x260] sm:$0xff]  ;;  %v876_v1 = vld [vmem:[%s8428_s1 + $0x70] sm:$0xff] }
  0x15   : > { %6362 = vmatpush3.bf16.msra.mxu1 %v6359_v31  ;;  %v5040_v60 = vld [vmem:[%s8428_s1 + $0x268] sm:$0xff]  ;;  %v462_v62 = vld [vmem:[%s8432_s5 + $0xa0] sm:$0xff]  ;;  %v6375_v63 = vpack.c.bf16 %v875_v58, %v874_v57  ;;  %v877_v2 = vld [vmem:[%s8428_s1 + $0x78] sm:$0xff] }
  0x16   : > { %6490 = vmatpush3.bf16.msra.mxu0 %v7145_v32  ;;  %6364 = vmatprep.subr.bf16.mxu1 %v6363_v39  ;;  %v463_v61 = vld [vmem:[%s8432_s5 + $0xa8] sm:$0xff]  ;;  %v7233_v0 = vpack.c.bf16 %v5040_v60, %v5039_v59  ;;  %v5041_v3 = vld [vmem:[%s8428_s1 + $0x270] sm:$0xff]  ;;  %v5042_v4 = vld [vmem:[%s8428_s1 + $0x278] sm:$0xff]  ;;  %v6379_v7 = vpack.c.bf16 %v877_v2, %v876_v1 }
  0x17   : > { %537 = vperm.xlu1 %6991, %v451_v9   ;;  %532 = vperm.xlu0 %6990, %v450_v10   ;;  %v465_v5 = vld [vmem:[%s8432_s5 + $0xb8] sm:$0xff]  ;;  %v464_v6 = vld [vmem:[%s8432_s5 + $0xb0] sm:$0xff]  ;;  %v7255_v8 = vpack.c.bf16 %v5042_v4, %v5041_v3  ;;  %v4979_v9 = vld [vmem:[%s8428_s1 + $0x80] sm:$0xff] }
  0x18   : > { %6492 = vmatprep.subr.bf16.mxu0 %v7167_v40  ;;  %v4980_v10 = vld [vmem:[%s8428_s1 + $0x88] sm:$0xff]  ;;  %v466_v14 = vld [vmem:[%s8432_s5 + $0xc0] sm:$0xff]  ;;  %v469_v17 = vld [vmem:[%s8432_s5 + $0xd8] sm:$0xff] }
  0x19   : > { %6366 = vmatpush3.bf16.msra.mxu1 %v6363_v39  ;;  %v467_v13 = vld [vmem:[%s8432_s5 + $0xc8] sm:$0xff]  ;;  %v7277_v15 = vpack.c.bf16 %v4980_v10, %v4979_v9  ;;  %v468_v19 = vld [vmem:[%s8432_s5 + $0xd0] sm:$0xff]  ;;  %v473_v22 = vld [vmem:[%s8432_s5 + $0xf8] sm:$0xff] }
  0x1a   : > { %6494 = vmatpush3.bf16.msra.mxu0 %v7167_v40  ;;  %6368 = vmatprep.subr.bf16.mxu1 %v6367_v47  ;;  %v471_v20 = vld [vmem:[%s8432_s5 + $0xe8] sm:$0xff]  ;;  %v472_v23 = vld [vmem:[%s8432_s5 + $0xf0] sm:$0xff]  ;;  %v7325_v27 = vld [vmem:[%s8430_s3] ss:$0 sm:$0xff] }
  0x1b   : > { %547 = vperm.xlu1 %6991, %v453_v11   ;;  %542 = vperm.xlu0 %6990, %v452_v12   ;;  %v5043_v11 = vld [vmem:[%s8428_s1 + $0x280] sm:$0xff]  ;;  %v5044_v12 = vld [vmem:[%s8428_s1 + $0x288] sm:$0xff]  ;;  %v477_v29 = vld [vmem:[%s8432_s5 + $0x118] sm:$0xff] }
  0x1c   : > { %6496 = vmatprep.subr.bf16.mxu0 %v7189_v48  ;;  %v7279_v16 = vpack.c.bf16 %v5044_v12, %v5043_v11  ;;  %v475_v24 = vld [vmem:[%s8432_s5 + $0x108] sm:$0xff]  ;;  %v476_v30 = vld [vmem:[%s8432_s5 + $0x110] sm:$0xff]  ;;  %v382_v33 = vld [vmem:[%s7320_s21 + $0x100] sm:$0xff] }
  0x1d   : > { %6370 = vmatpush3.bf16.msra.mxu1 %v6367_v47  ;;  %v383_v28 = vld [vmem:[%s7320_s21 + $0x108] sm:$0xff]  ;;  %v7339_v34 = vmul.f32 %v7325_v27, %v382_v33  ;;  %v385_v35 = vld [vmem:[%s7320_s21 + $0x118] sm:$0xff]  ;;  %v384_v39 = vld [vmem:[%s7320_s21 + $0x110] sm:$0xff] }
  0x1e   : > { %6498 = vmatpush3.bf16.msra.mxu0 %v7189_v48  ;;  %6372 = vmatprep.subr.bf16.mxu1 %v6371_v55  ;;  %v7335_v31 = vmul.f32 %v7325_v27, %v383_v28  ;;  %v479_v36 = vld [vmem:[%s8432_s5 + $0x128] sm:$0xff]  ;;  %v7353_v41 = vmul.f32 %v7325_v27, %v384_v39  ;;  %v481_v43 = vld [vmem:[%s8432_s5 + $0x138] sm:$0xff]  ;;  %v480_v44 = vld [vmem:[%s8432_s5 + $0x130] sm:$0xff] }
  0x1f   : > { %557 = vperm.xlu1 %6991, %v455_v21   ;;  %552 = vperm.xlu0 %6990, %v454_v25   ;;  %v470_v21 = vld [vmem:[%s8432_s5 + $0xe0] sm:$0xff]  ;;  %v387_v42 = vld [vmem:[%s7320_s21 + $0x128] sm:$0xff]  ;;  %v389_v51 = vld [vmem:[%s7320_s21 + $0x138] sm:$0xff] }
  0x20   : > { %6500 = vmatprep.subr.bf16.mxu0 %v7211_v56  ;;  %v474_v25 = vld [vmem:[%s8432_s5 + $0x100] sm:$0xff]  ;;  %v483_v49 = vld [vmem:[%s8432_s5 + $0x148] sm:$0xff]  ;;  %v7377_v52 = vmul.f32 %v7325_v27, %v389_v51  ;;  %v4457_v3 = vld [vmem:[%s8433_s6 + $0x38] sm:$0xff] }
  0x21   : > { %6374 = vmatpush3.bf16.msra.mxu1 %v6371_v55  ;;  %v482_v50 = vld [vmem:[%s8432_s5 + $0x140] sm:$0xff]  ;;  %v391_v55 = vld [vmem:[%s7320_s21 + $0x148] sm:$0xff]  ;;  %v4456_v4 = vld [vmem:[%s8433_s6 + $0x30] sm:$0xff] }
  0x22   : > { %6502 = vmatpush3.bf16.msra.mxu0 %v7211_v56  ;;  %6376 = vmatprep.subr.bf16.mxu1 %v6375_v63  ;;  %v4451_v57 = vld [vmem:[%s8433_s6 + $0x8] sm:$0xff]  ;;  %v4450_v58 = vld [vmem:[%s8433_s6] sm:$0xff]  ;;  %v7391_v59 = vmul.f32 %v7325_v27, %v391_v55  ;;  %v4460_v9 = vld [vmem:[%s8433_s6 + $0x50] sm:$0xff] }
  0x23   : > { %567 = vperm.xlu1 %6991, %v457_v37   ;;  %562 = vperm.xlu0 %6990, %v456_v38   ;;  %v478_v37 = vld [vmem:[%s8432_s5 + $0x120] sm:$0xff]  ;;  %v7349_v38 = vmul.f32 %v7325_v27, %v385_v35  ;;  %v4455_v1 = vld [vmem:[%s8433_s6 + $0x28] sm:$0xff]  ;;  %v4465_v12 = vld [vmem:[%s8433_s6 + $0x78] sm:$0xff] }
  0x24   : > { %6504 = vmatprep.subr.bf16.mxu0 %v7233_v0  ;;  %v390_v60 = vld [vmem:[%s7320_s21 + $0x140] sm:$0xff]  ;;  %v4463_v10 = vld [vmem:[%s8433_s6 + $0x68] sm:$0xff]  ;;  %v4473_v28 = vld [vmem:[%s8433_s6 + $0xb8] sm:$0xff] }
  0x25   : > { %6378 = vmatpush3.bf16.msra.mxu1 %v6375_v63  ;;  %v4452_v63 = vld [vmem:[%s8433_s6 + $0x10] sm:$0xff]  ;;  %v4454_v2 = vld [vmem:[%s8433_s6 + $0x20] sm:$0xff]  ;;  %v351_v39 = vld [vmem:[%s7320_s21 + $0x8] sm:$0xff] }
  0x26   : > { %6506 = vmatpush3.bf16.msra.mxu0 %v7233_v0  ;;  %6380 = vmatprep.subr.bf16.mxu1 %v6379_v7  ;;  %v4462_v11 = vld [vmem:[%s8433_s6 + $0x60] sm:$0xff] }
  0x27   : > { %577 = vperm.xlu1 %6991, %v459_v45   ;;  %572 = vperm.xlu0 %6990, %v458_v46   ;;  %v7363_v45 = vmul.f32 %v7325_v27, %v387_v42  ;;  %v386_v46 = vld [vmem:[%s7320_s21 + $0x120] sm:$0xff] }
  0x28   : > { %6508 = vmatprep.subr.bf16.mxu0 %v7255_v8  ;;  %v7367_v47 = vmul.f32 %v7325_v27, %v386_v46  ;;  %v4474_v46 = vld [vmem:[%s8433_s6 + $0xc0] sm:$0xff] }
  0x29   : > { %6382 = vmatpush3.bf16.msra.mxu1 %v6379_v7  ;;  %v4461_v7 = vld [vmem:[%s8433_s6 + $0x58] sm:$0xff] }
  0x2a   : > { %6510 = vmatpush3.bf16.msra.mxu0 %v7255_v8  ;;  %6384 = vmatprep.subr.bf16.mxu1 %v7277_v15 }
  0x2b   : > { %587 = vperm.xlu1 %6991, %v461_v53   ;;  %582 = vperm.xlu0 %6990, %v460_v54   ;;  %v388_v53 = vld [vmem:[%s7320_s21 + $0x130] sm:$0xff] }
  0x2c   : > { %6512 = vmatprep.subr.bf16.mxu0 %v7279_v16  ;;  %v7381_v54 = vmul.f32 %v7325_v27, %v388_v53  ;;  %v400_v53 = vmul.f32 %v7325_v27, %v351_v39 }
  0x2f   : > { %597 = vperm.xlu1 %6991, %v463_v61   ;;  %592 = vperm.xlu0 %6990, %v462_v62   ;;  %v7395_v61 = vmul.f32 %v7325_v27, %v390_v60  ;;  %v4453_v62 = vld [vmem:[%s8433_s6 + $0x18] sm:$0xff]  ;;  %v354_v60 = vld [vmem:[%s7320_s21 + $0x20] sm:$0xff] }
  0x33   : > { %607 = vperm.xlu1 %6991, %v465_v5   ;;  %602 = vperm.xlu0 %6990, %v464_v6   ;;  %v4459_v5 = vld [vmem:[%s8433_s6 + $0x48] sm:$0xff]  ;;  %v4458_v6 = vld [vmem:[%s8433_s6 + $0x40] sm:$0xff] }
  0x37   : > { %617 = vperm.xlu1 %6991, %v467_v13   ;;  %612 = vperm.xlu0 %6990, %v466_v14   ;;  %v4464_v13 = vld [vmem:[%s8433_s6 + $0x70] sm:$0xff]  ;;  %v4467_v14 = vld [vmem:[%s8433_s6 + $0x88] sm:$0xff] }
  0x3b   : > { %627 = vperm.xlu1 %6991, %v469_v17   ;;  %622 = vperm.xlu0 %6990, %v468_v19   ;;  %v4466_v17 = vld [vmem:[%s8433_s6 + $0x80] sm:$0xff]  ;;  %v4469_v19 = vld [vmem:[%s8433_s6 + $0x98] sm:$0xff] }
  0x3f   : > { %637 = vperm.xlu1 %6991, %v471_v20   ;;  %632 = vperm.xlu0 %6990, %v470_v21   ;;  %v4468_v20 = vld [vmem:[%s8433_s6 + $0x90] sm:$0xff]  ;;  %v4471_v21 = vld [vmem:[%s8433_s6 + $0xa8] sm:$0xff] }
  0x43   : > { %647 = vperm.xlu1 %6991, %v473_v22   ;;  %642 = vperm.xlu0 %6990, %v472_v23   ;;  %v4470_v22 = vld [vmem:[%s8433_s6 + $0xa0] sm:$0xff]  ;;  %v352_v23 = vld [vmem:[%s7320_s21 + $0x10] sm:$0xff] }
  0x47   : > { %657 = vperm.xlu1 %6991, %v475_v24   ;;  %652 = vperm.xlu0 %6990, %v474_v25   ;;  %v350_v24 = vld [vmem:[%s7320_s21] sm:$0xff] }
  0x48   : > { %v7462_v25 = vld [vmem:[%s8431_s4] ss:$0 sm:$0xff]  ;;  %v399_v33 = vmul.f32 %v7325_v27, %v350_v24 }
  0x4b   : > { %667 = vperm.xlu1 %6991, %v477_v29   ;;  %662 = vperm.xlu0 %6990, %v476_v30   ;;  %v4472_v29 = vld [vmem:[%s8433_s6 + $0xb0] sm:$0xff]  ;;  %v401_v30 = vmul.f32 %v7325_v27, %v352_v23 }
  0x4f   : > { %677 = vperm.xlu1 %6991, %v479_v36   ;;  %672 = vperm.xlu0 %6990, %v478_v37   ;;  %v353_v37 = vld [vmem:[%s7320_s21 + $0x18] sm:$0xff] }
  0x50   : > { %v402_v51 = vmul.f32 %v7325_v27, %v353_v37 }
  0x53   : > { %687 = vperm.xlu1 %6991, %v481_v43   ;;  %682 = vperm.xlu0 %6990, %v480_v44   ;;  %v4475_v44 = vld [vmem:[%s8433_s6 + $0xc8] sm:$0xff] }
  0x57   : > { %697 = vperm.xlu1 %6991, %v483_v49   ;;  %692 = vperm.xlu0 %6990, %v482_v50  }
  0x5b   : > { %4493 = vperm.xlu1 %6991, %v4451_v57   ;;  %4488 = vperm.xlu0 %6990, %v4450_v58   ;;  %v355_v58 = vld [vmem:[%s7320_s21 + $0x28] sm:$0xff] }
  0x5f   : > { %4503 = vperm.xlu1 %6991, %v4453_v62   ;;  %4498 = vperm.xlu0 %6990, %v4452_v63  }
  0x63   : > { %4513 = vperm.xlu1 %6991, %v4455_v1   ;;  %4508 = vperm.xlu0 %6990, %v4454_v2   ;;  %v4477_v1 = vld [vmem:[%s8433_s6 + $0xd8] sm:$0xff]  ;;  %v4476_v2 = vld [vmem:[%s8433_s6 + $0xd0] sm:$0xff] }
  0x67   : > { %4523 = vperm.xlu1 %6991, %v4457_v3   ;;  %4518 = vperm.xlu0 %6990, %v4456_v4  }
  0x6b   : > { %4533 = vperm.xlu1 %6991, %v4459_v5   ;;  %4528 = vperm.xlu0 %6990, %v4458_v6   ;;  %v404_v5 = vmul.f32 %v7325_v27, %v355_v58  ;;  %v403_v6 = vmul.f32 %v7325_v27, %v354_v60 }
  0x6f   : > { %4543 = vperm.xlu1 %6991, %v4461_v7   ;;  %4538 = vperm.xlu0 %6990, %v4460_v9  }
  0x73   : > { %4553 = vperm.xlu1 %6991, %v4463_v10   ;;  %4548 = vperm.xlu0 %6990, %v4462_v11   ;;  %v357_v10 = vld [vmem:[%s7320_s21 + $0x38] sm:$0xff]  ;;  %v356_v11 = vld [vmem:[%s7320_s21 + $0x30] sm:$0xff] }
  0x74   : > { %v406_v23 = vmul.f32 %v7325_v27, %v357_v10  ;;  %v405_v24 = vmul.f32 %v7325_v27, %v356_v11  ;;  %v5047_v11 = vld [vmem:[%s8428_s1 + $0x2a0] sm:$0xff] }
  0x77   : > { %4563 = vperm.xlu1 %6991, %v4465_v12   ;;  %4558 = vperm.xlu0 %6990, %v4464_v13  }
  0x7b   : > { %4573 = vperm.xlu1 %6991, %v4467_v14   ;;  %4568 = vperm.xlu0 %6990, %v4466_v17   ;;  %v5045_v14 = vld [vmem:[%s8428_s1 + $0x290] sm:$0xff]  ;;  %v5046_v17 = vld [vmem:[%s8428_s1 + $0x298] sm:$0xff] }
  0x7f   : > { %4583 = vperm.xlu1 %6991, %v4469_v19   ;;  %4578 = vperm.xlu0 %6990, %v4468_v20   ;;  %v4479_v19 = vld [vmem:[%s8433_s6 + $0xe8] sm:$0xff]  ;;  %v4478_v20 = vld [vmem:[%s8433_s6 + $0xe0] sm:$0xff] }
  0x83   : > { %4593 = vperm.xlu1 %6991, %v4471_v21   ;;  %4588 = vperm.xlu0 %6990, %v4470_v22  }
  0x86   : > { %v503_v35 = vpop.permute.xlu1 %502  ;;  %v493_v36 = vpop.permute.xlu0 %492 }
  0x87   : > { %v702_v42 = vmul.f32 %v7462_v25, %v503_v35  ;;  %v700_v43 = vmul.f32 %v7462_v25, %v493_v36  ;;  %4603 = vperm.xlu1 %6991, %v4473_v28   ;;  %4598 = vperm.xlu0 %6990, %v4472_v29   ;;  %v359_v28 = vld [vmem:[%s7320_s21 + $0x48] sm:$0xff]  ;;  %v6515_v35 = vpack.c.bf16 %v5046_v17, %v5045_v14 }
  0x88   : > { %v408_v39 = vmul.f32 %v7325_v27, %v359_v28 }
  0x89   : > { %v744_v49 = vadd.f32 %v702_v42, %v401_v30  ;;  %v742_v50 = vadd.f32 %v700_v43, %v399_v33  ;;  %v358_v33 = vld [vmem:[%s7320_s21 + $0x40] sm:$0xff]  ;;  %v4481_v42 = vld [vmem:[%s8433_s6 + $0xf8] sm:$0xff]  ;;  %v4480_v43 = vld [vmem:[%s8433_s6 + $0xf0] sm:$0xff] }
  0x8a   : > { %v508_v55 = vpop.permute.xlu1 %507  ;;  %v498_v57 = vpop.permute.xlu0 %497 }
  0x8b   : > { %786 = vst [vmem:[#allocation2 + $0x10] sm:$0xff] %v744_v49  ;;  %784 = vst [vmem:[#allocation2] sm:$0xff] %v742_v50  ;;  %v703_v62 = vmul.f32 %v7462_v25, %v508_v55  ;;  %v701_v63 = vmul.f32 %v7462_v25, %v498_v57  ;;  %4613 = vperm.xlu1 %6991, %v4475_v44   ;;  %4608 = vperm.xlu0 %6990, %v4474_v46   ;;  %v361_v50 = vld [vmem:[%s7320_s21 + $0x58] sm:$0xff] }
  0x8c   : > { %v407_v49 = vmul.f32 %v7325_v27, %v358_v33 }
  0x8d   : > { %v745_v3 = vadd.f32 %v703_v62, %v402_v51  ;;  %v743_v4 = vadd.f32 %v701_v63, %v400_v53  ;;  %v4981_v51 = vld [vmem:[%s8428_s1 + $0x90] sm:$0xff]  ;;  %v4982_v53 = vld [vmem:[%s8428_s1 + $0x98] sm:$0xff] }
  0x8e   : > { %v518_v7 = vpop.permute.xlu1 %517  ;;  %v513_v9 = vpop.permute.xlu0 %512  ;;  %v360_v62 = vld [vmem:[%s7320_s21 + $0x50] sm:$0xff] }
  0x8f   : > { %787 = vst [vmem:[#allocation2 + $0x18] sm:$0xff] %v745_v3  ;;  %785 = vst [vmem:[#allocation2 + $0x8] sm:$0xff] %v743_v4  ;;  %v705_v12 = vmul.f32 %v7462_v25, %v518_v7  ;;  %v704_v13 = vmul.f32 %v7462_v25, %v513_v9  ;;  %4623 = vperm.xlu1 %6991, %v4477_v1   ;;  %4618 = vperm.xlu0 %6990, %v4476_v2   ;;  %v4483_v2 = vld [vmem:[%s8433_s6 + $0x108] sm:$0xff] }
  0x90   : > { %5953 = vmatprep.mubr.f32.mxu0 %v745_v3  ;;  %v410_v1 = vmul.f32 %v7325_v27, %v361_v50  ;;  %v4482_v3 = vld [vmem:[%s8433_s6 + $0x100] sm:$0xff]  ;;  %v363_v4 = vld [vmem:[%s7320_s21 + $0x68] sm:$0xff]  ;;  %v409_v10 = vmul.f32 %v7325_v27, %v360_v62 }
  0x91   : > { %v747_v21 = vadd.f32 %v705_v12, %v404_v5  ;;  %v746_v22 = vadd.f32 %v704_v13, %v403_v6  ;;  %v6387_v5 = vpack.c.bf16 %v4982_v53, %v4981_v51  ;;  %v5048_v12 = vld [vmem:[%s8428_s1 + $0x2a8] sm:$0xff] }
  0x92   : > { %v528_v29 = vpop.permute.xlu1 %527  ;;  %v523_v30 = vpop.permute.xlu0 %522  ;;  %v6519_v28 = vpack.c.bf16 %v5048_v12, %v5047_v11  ;;  %v5052_v62 = vld [vmem:[%s8428_s1 + $0x2c8] sm:$0xff] }
  0x93   : > { %789 = vst [vmem:[#allocation2 + $0x28] sm:$0xff] %v747_v21  ;;  %788 = vst [vmem:[#allocation2 + $0x20] sm:$0xff] %v746_v22  ;;  %v707_v36 = vmul.f32 %v7462_v25, %v528_v29  ;;  %v706_v37 = vmul.f32 %v7462_v25, %v523_v30  ;;  %4633 = vperm.xlu1 %6991, %v4479_v19   ;;  %4628 = vperm.xlu0 %6990, %v4478_v20   ;;  %v362_v19 = vld [vmem:[%s7320_s21 + $0x60] sm:$0xff]  ;;  %v5049_v29 = vld [vmem:[%s8428_s1 + $0x2b0] sm:$0xff] }
  0x94   : > { %5954 = vmatmul.mubr.f32.vlgmr.msra.gmra.mrb[0].mxu0 %v746_v22  ;;  %v4485_v22 = vld [vmem:[%s8433_s6 + $0x118] sm:$0xff] }
  0x95   : > { %v749_v44 = vadd.f32 %v707_v36, %v406_v23  ;;  %v748_v46 = vadd.f32 %v706_v37, %v405_v24  ;;  %6514 = vmatpush3.bf16.msra.mxu0 %v7279_v16  ;;  %5956 = vmatprep.mubr.f32.mxu0 %v747_v21  ;;  %v412_v23 = vmul.f32 %v7325_v27, %v363_v4  ;;  %v365_v24 = vld [vmem:[%s7320_s21 + $0x78] sm:$0xff] }
  0x96   : > { %v538_v55 = vpop.permute.xlu1 %537  ;;  %v533_v57 = vpop.permute.xlu0 %532  ;;  %v826_v58 = vld [vmem:[#allocation2 + $0x5] sm:$0xff]  ;;  %v827_v60 = vld [vmem:[#allocation2 + $0xd] sm:$0xff]  ;;  %6516 = vmatprep.subr.bf16.mxu0 %v6515_v35  ;;  %v828_v9 = vld [vmem:[#allocation2 + $0x15] sm:$0xff] }
  0x97   : > { %791 = vst [vmem:[#allocation2 + $0x38] sm:$0xff] %v749_v44  ;;  %790 = vst [vmem:[#allocation2 + $0x30] sm:$0xff] %v748_v46  ;;  %v709_v16 = vmul.f32 %v7462_v25, %v538_v55  ;;  %v708_v63 = vmul.f32 %v7462_v25, %v533_v57  ;;  %4643 = vperm.xlu1 %6991, %v4481_v42   ;;  %4638 = vperm.xlu0 %6990, %v4480_v43   ;;  %v5050_v30 = vld [vmem:[%s8428_s1 + $0x2b8] sm:$0xff]  ;;  %v4984_v42 = vld [vmem:[%s8428_s1 + $0xa8] sm:$0xff] }
  0x98   : > { %5609 = vmatprep.mubr.f32.mxu1 %v826_v58  ;;  %5957 = vmatmul.mubr.f32.gmra.mrb[2].mxu0 %v748_v46  ;;  %v6523_v53 = vpack.c.bf16 %v5050_v30, %v5049_v29  ;;  %v414_v55 = vmul.f32 %v7325_v27, %v365_v24  ;;  %v367_v57 = vld [vmem:[%s7320_s21 + $0x88] sm:$0xff]  ;;  %v4986_v4 = vld [vmem:[%s8428_s1 + $0xb8] sm:$0xff]  ;;  %v4987_v24 = vld [vmem:[%s8428_s1 + $0xc0] sm:$0xff] }
  0x99   : > { %v751_v6 = vadd.f32 %v709_v16, %v408_v39  ;;  %v750_v7 = vadd.f32 %v708_v63, %v407_v49  ;;  %5610 = vmatmul.mubr.f32.vlgmr.msra.gmra.mrb[0].mxu1 %v827_v60  ;;  %5959 = vmatprep.mubr.f32.mxu0 %v749_v44  ;;  %v411_v39 = vmul.f32 %v7325_v27, %v362_v19  ;;  %v364_v49 = vld [vmem:[%s7320_s21 + $0x70] sm:$0xff]  ;;  %v5051_v60 = vld [vmem:[%s8428_s1 + $0x2c0] sm:$0xff]  ;;  %v369_v19 = vld [vmem:[%s7320_s21 + $0x98] sm:$0xff] }
  0x9a   : > { %5612 = vmatprep.mubr.f32.mxu1 %v828_v9  ;;  %6386 = vmatpush3.bf16.msra.mxu1 %v7277_v15  ;;  %v548_v13 = vpop.permute.xlu1 %547  ;;  %v543_v14 = vpop.permute.xlu0 %542  ;;  %v829_v17 = vld [vmem:[#allocation2 + $0x1d] sm:$0xff]  ;;  %v4484_v15 = vld [vmem:[%s8433_s6 + $0x110] sm:$0xff]  ;;  %v830_v37 = vld [vmem:[#allocation2 + $0x25] sm:$0xff]  ;;  %v6527_v12 = vpack.c.bf16 %v5052_v62, %v5051_v60 }
  0x9b   : > { %793 = vst [vmem:[#allocation2 + $0x48] sm:$0xff] %v751_v6  ;;  %792 = vst [vmem:[#allocation2 + $0x40] sm:$0xff] %v750_v7  ;;  %v711_v20 = vmul.f32 %v7462_v25, %v548_v13  ;;  %v710_v21 = vmul.f32 %v7462_v25, %v543_v14  ;;  %4653 = vperm.xlu1 %6991, %v4483_v2   ;;  %4648 = vperm.xlu0 %6990, %v4482_v3   ;;  %v4985_v3 = vld [vmem:[%s8428_s1 + $0xb0] sm:$0xff]  ;;  %v366_v9 = vld [vmem:[%s7320_s21 + $0x80] sm:$0xff] }
  0x9c   : > { %6518 = vmatpush3.bf16.msra.mxu0 %v6515_v35  ;;  %6388 = vmatprep.subr.bf16.mxu1 %v6387_v5  ;;  %v4983_v35 = vld [vmem:[%s8428_s1 + $0xa0] sm:$0xff]  ;;  %v413_v2 = vmul.f32 %v7325_v27, %v364_v49  ;;  %v5053_v13 = vld [vmem:[%s8428_s1 + $0x2d0] sm:$0xff]  ;;  %v5054_v14 = vld [vmem:[%s8428_s1 + $0x2d8] sm:$0xff] }
  0x9d   : > { %v753_v33 = vadd.f32 %v711_v20, %v410_v1  ;;  %v752_v36 = vadd.f32 %v710_v21, %v409_v10  ;;  %5613 = vmatmul.mubr.f32.gmra.mrb[2].mxu1 %v829_v17  ;;  %5960 = vmatmul.mubr.f32.gmra.mrb[4].mxu0 %v750_v7  ;;  %v6391_v58 = vpack.c.bf16 %v4984_v42, %v4983_v35  ;;  %v5055_v42 = vld [vmem:[%s8428_s1 + $0x2e0] sm:$0xff] }
  0x9e   : > { %5615 = vmatprep.mubr.f32.mxu1 %v830_v37  ;;  %v558_v43 = vpop.permute.xlu1 %557  ;;  %v553_v44 = vpop.permute.xlu0 %552  ;;  %v831_v46 = vld [vmem:[#allocation2 + $0x2d] sm:$0xff]  ;;  %6390 = vmatpush3.bf16.msra.mxu1 %v6387_v5  ;;  %v832_v1 = vld [vmem:[#allocation2 + $0x35] sm:$0xff]  ;;  %v416_v17 = vmul.f32 %v7325_v27, %v367_v57  ;;  %v6395_v20 = vpack.c.bf16 %v4986_v4, %v4985_v3  ;;  %v6531_v37 = vpack.c.bf16 %v5054_v14, %v5053_v13  ;;  %v4991_v14 = vld [vmem:[%s8428_s1 + $0xe0] sm:$0xff] }
  0x9f   : > { %795 = vst [vmem:[#allocation2 + $0x58] sm:$0xff] %v753_v33  ;;  %794 = vst [vmem:[#allocation2 + $0x50] sm:$0xff] %v752_v36  ;;  %v713_v50 = vmul.f32 %v7462_v25, %v558_v43  ;;  %v712_v51 = vmul.f32 %v7462_v25, %v553_v44  ;;  %4663 = vperm.xlu1 %6991, %v4485_v22   ;;  %4658 = vperm.xlu0 %6990, %v4484_v15   ;;  %v5056_v43 = vld [vmem:[%s8428_s1 + $0x2e8] sm:$0xff]  ;;  %v4989_v57 = vld [vmem:[%s8428_s1 + $0xd0] sm:$0xff] }
  0xa0   : > { %6520 = vmatprep.subr.bf16.mxu0 %v6519_v28  ;;  %5962 = vmatprep.mubr.f32.mxu0 %v751_v6  ;;  %v418_v44 = vmul.f32 %v7325_v27, %v369_v19  ;;  %v5057_v4 = vld [vmem:[%s8428_s1 + $0x2f0] sm:$0xff] }
  0xa1   : > { %v755_v16 = vadd.f32 %v713_v50, %v412_v23  ;;  %v754_v63 = vadd.f32 %v712_v51, %v411_v39  ;;  %5616 = vmatmul.mubr.f32.gmra.mrb[4].mxu1 %v831_v46  ;;  %6522 = vmatpush3.bf16.msra.mxu0 %v6519_v28  ;;  %v415_v23 = vmul.f32 %v7325_v27, %v366_v9  ;;  %v4988_v28 = vld [vmem:[%s8428_s1 + $0xc8] sm:$0xff] }
  0xa2   : > { %5618 = vmatprep.mubr.f32.mxu1 %v832_v1  ;;  %v568_v5 = vpop.permute.xlu1 %567  ;;  %v563_v6 = vpop.permute.xlu0 %562  ;;  %v833_v7 = vld [vmem:[#allocation2 + $0x3d] sm:$0xff]  ;;  %5963 = vmatmul.mubr.f32.gmra.mrb[6].mxu0 %v752_v36  ;;  %v834_v15 = vld [vmem:[#allocation2 + $0x45] sm:$0xff]  ;;  %v368_v36 = vld [vmem:[%s7320_s21 + $0x90] sm:$0xff]  ;;  %v6399_v49 = vpack.c.bf16 %v4988_v28, %v4987_v24  ;;  %v6535_v1 = vpack.c.bf16 %v5056_v43, %v5055_v42 }
  0xa3   : > { %797 = vst [vmem:[#allocation2 + $0x68] sm:$0xff] %v755_v16  ;;  %796 = vst [vmem:[#allocation2 + $0x60] sm:$0xff] %v754_v63  ;;  %v715_v10 = vmul.f32 %v7462_v25, %v568_v5  ;;  %v714_v11 = vmul.f32 %v7462_v25, %v563_v6  ;;  %5965 = vmatprep.mubr.f32.mxu0 %v753_v33  ;;  %6524 = vmatprep.subr.bf16.mxu0 %v6523_v53  ;;  %v371_v46 = vld [vmem:[%s7320_s21 + $0xa8] sm:$0xff]  ;;  %v5058_v5 = vld [vmem:[%s8428_s1 + $0x2f8] sm:$0xff] }
  0xa4   : > { %6392 = vmatprep.subr.bf16.mxu1 %v6391_v58  ;;  %v420_v6 = vmul.f32 %v7325_v27, %v371_v46  ;;  %v5059_v28 = vld [vmem:[%s8428_s1 + $0x300] sm:$0xff]  ;;  %v4993_v43 = vld [vmem:[%s8428_s1 + $0xf0] sm:$0xff] }
  0xa5   : > { %v757_v21 = vadd.f32 %v715_v10, %v414_v55  ;;  %v756_v22 = vadd.f32 %v714_v11, %v413_v2  ;;  %5619 = vmatmul.mubr.f32.gmra.mrb[6].mxu1 %v833_v7  ;;  %6526 = vmatpush3.bf16.msra.mxu0 %v6523_v53  ;;  %v417_v55 = vmul.f32 %v7325_v27, %v368_v36  ;;  %v373_v7 = vld [vmem:[%s7320_s21 + $0xb8] sm:$0xff] }
  0xa6   : > { %5621 = vmatprep.mubr.f32.mxu1 %v834_v15  ;;  %v578_v29 = vpop.permute.xlu1 %577  ;;  %v573_v30 = vpop.permute.xlu0 %572  ;;  %v835_v33 = vld [vmem:[#allocation2 + $0x4d] sm:$0xff]  ;;  %6394 = vmatpush3.bf16.msra.mxu1 %v6391_v58  ;;  %v836_v53 = vld [vmem:[#allocation2 + $0x55] sm:$0xff]  ;;  %v6539_v15 = vpack.c.bf16 %v5058_v5, %v5057_v4 }
  0xa7   : > { %799 = vst [vmem:[#allocation2 + $0x78] sm:$0xff] %v757_v21  ;;  %798 = vst [vmem:[#allocation2 + $0x70] sm:$0xff] %v756_v22  ;;  %v717_v39 = vmul.f32 %v7462_v25, %v578_v29  ;;  %v716_v35 = vmul.f32 %v7462_v25, %v573_v30  ;;  %5966 = vmatmul.mubr.f32.gmra.mrb[8].mxu0 %v754_v63  ;;  %6528 = vmatprep.subr.bf16.mxu0 %v6527_v12  ;;  %v4990_v58 = vld [vmem:[%s8428_s1 + $0xd8] sm:$0xff]  ;;  %v370_v63 = vld [vmem:[%s7320_s21 + $0xa0] sm:$0xff] }
  0xa8   : > { %5968 = vmatprep.mubr.f32.mxu0 %v755_v16  ;;  %6396 = vmatprep.subr.bf16.mxu1 %v6395_v20  ;;  %v6403_v9 = vpack.c.bf16 %v4990_v58, %v4989_v57  ;;  %v419_v13 = vmul.f32 %v7325_v27, %v370_v63  ;;  %v5060_v29 = vld [vmem:[%s8428_s1 + $0x308] sm:$0xff]  ;;  %v422_v30 = vmul.f32 %v7325_v27, %v373_v7  ;;  %v5061_v7 = vld [vmem:[%s8428_s1 + $0x310] sm:$0xff] }
  0xa9   : > { %v759_v50 = vadd.f32 %v717_v39, %v416_v17  ;;  %v758_v51 = vadd.f32 %v716_v35, %v415_v23  ;;  %5622 = vmatmul.mubr.f32.gmra.mrb[8].mxu1 %v835_v33  ;;  %6530 = vmatpush3.bf16.msra.mxu0 %v6527_v12  ;;  %v4992_v17 = vld [vmem:[%s8428_s1 + $0xe8] sm:$0xff] }
  0xaa   : > { %5624 = vmatprep.mubr.f32.mxu1 %v836_v53  ;;  %v588_v60 = vpop.permute.xlu1 %587  ;;  %v583_v62 = vpop.permute.xlu0 %582  ;;  %v837_v16 = vld [vmem:[#allocation2 + $0x5d] sm:$0xff]  ;;  %6532 = vmatprep.subr.bf16.mxu0 %v6531_v37  ;;  %v838_v12 = vld [vmem:[#allocation2 + $0x65] sm:$0xff]  ;;  %v6407_v36 = vpack.c.bf16 %v4992_v17, %v4991_v14  ;;  %v7668_v53 = vpack.c.bf16 %v5060_v29, %v5059_v28 }
  0xab   : > { %801 = vst [vmem:[#allocation2 + $0x88] sm:$0xff] %v759_v50  ;;  %800 = vst [vmem:[#allocation2 + $0x80] sm:$0xff] %v758_v51  ;;  %v719_v2 = vmul.f32 %v7462_v25, %v588_v60  ;;  %v718_v3 = vmul.f32 %v7462_v25, %v583_v62  ;;  %5969 = vmatmul.mubr.f32.gmra.mrb[10].mxu0 %v756_v22  ;;  %6398 = vmatpush3.bf16.msra.mxu1 %v6395_v20  ;;  %v372_v22 = vld [vmem:[%s7320_s21 + $0xb0] sm:$0xff]  ;;  %v375_v33 = vld [vmem:[%s7320_s21 + $0xc8] sm:$0xff] }
  0xac   : > { %5971 = vmatprep.mubr.f32.mxu0 %v757_v21  ;;  %6400 = vmatprep.subr.bf16.mxu1 %v6399_v49  ;;  %v421_v42 = vmul.f32 %v7325_v27, %v372_v22  ;;  %v424_v58 = vmul.f32 %v7325_v27, %v375_v33  ;;  %v4996_v14 = vld [vmem:[%s8428_s1 + $0x108] sm:$0xff]  ;;  %v5063_v28 = vld [vmem:[%s8428_s1 + $0x320] sm:$0xff] }
  0xad   : > { %v761_v10 = vadd.f32 %v719_v2, %v418_v44  ;;  %v760_v11 = vadd.f32 %v718_v3, %v417_v55  ;;  %5625 = vmatmul.mubr.f32.gmra.mrb[10].mxu1 %v837_v16  ;;  %6534 = vmatpush3.bf16.msra.mxu0 %v6531_v37  ;;  %v4994_v44 = vld [vmem:[%s8428_s1 + $0xf8] sm:$0xff]  ;;  %v376_v3 = vld [vmem:[%s7320_s21 + $0xd0] sm:$0xff] }
  0xae   : > { %5627 = vmatprep.mubr.f32.mxu1 %v838_v12  ;;  %v598_v19 = vpop.permute.xlu1 %597  ;;  %v593_v20 = vpop.permute.xlu0 %592  ;;  %v839_v21 = vld [vmem:[#allocation2 + $0x6d] sm:$0xff]  ;;  %6536 = vmatprep.subr.bf16.mxu0 %v6535_v1  ;;  %v840_v35 = vld [vmem:[#allocation2 + $0x75] sm:$0xff]  ;;  %v6411_v60 = vpack.c.bf16 %v4994_v44, %v4993_v43 }
  0xaf   : > { %803 = vst [vmem:[#allocation2 + $0x98] sm:$0xff] %v761_v10  ;;  %802 = vst [vmem:[#allocation2 + $0x90] sm:$0xff] %v760_v11  ;;  %v721_v23 = vmul.f32 %v7462_v25, %v598_v19  ;;  %v720_v24 = vmul.f32 %v7462_v25, %v593_v20  ;;  %5972 = vmatmul.mubr.f32.gmra.mrb[12].mxu0 %v758_v51  ;;  %6402 = vmatpush3.bf16.msra.mxu1 %v6399_v49  ;;  %v374_v51 = vld [vmem:[%s7320_s21 + $0xc0] sm:$0xff]  ;;  %v377_v2 = vld [vmem:[%s7320_s21 + $0xd8] sm:$0xff] }
  0xb0   : > { %5974 = vmatprep.mubr.f32.mxu0 %v759_v50  ;;  %6404 = vmatprep.subr.bf16.mxu1 %v6403_v9  ;;  %v2790_v12 = vld [vmem:[#allocation2 + $0x19] sm:$0xff]  ;;  %v426_v17 = vmul.f32 %v7325_v27, %v377_v2  ;;  %v379_v19 = vld [vmem:[%s7320_s21 + $0xe8] sm:$0xff] }
  0xb1   : > { %v763_v37 = vadd.f32 %v721_v23, %v420_v6  ;;  %v762_v39 = vadd.f32 %v720_v24, %v419_v13  ;;  %5628 = vmatmul.mubr.f32.gmra.mrb[12].mxu1 %v839_v21  ;;  %6538 = vmatpush3.bf16.msra.mxu0 %v6535_v1  ;;  %v423_v1 = vmul.f32 %v7325_v27, %v374_v51  ;;  %v4995_v13 = vld [vmem:[%s8428_s1 + $0x100] sm:$0xff]  ;;  %v7705_v43 = vld [vmem:[#allocation2 + $0x29] sm:$0xff] }
  0xb2   : > { %5630 = vmatprep.mubr.f32.mxu1 %v840_v35  ;;  %v608_v46 = vpop.permute.xlu1 %607  ;;  %v603_v49 = vpop.permute.xlu0 %602  ;;  %v841_v50 = vld [vmem:[#allocation2 + $0x7d] sm:$0xff]  ;;  %6540 = vmatprep.subr.bf16.mxu0 %v6539_v15  ;;  %v842_v63 = vld [vmem:[#allocation2 + $0x85] sm:$0xff]  ;;  %v428_v44 = vmul.f32 %v7325_v27, %v379_v19 }
  0xb3   : > { %805 = vst [vmem:[#allocation2 + $0xa8] sm:$0xff] %v763_v37  ;;  %804 = vst [vmem:[#allocation2 + $0xa0] sm:$0xff] %v762_v39  ;;  %v723_v55 = vmul.f32 %v7462_v25, %v608_v46  ;;  %v722_v57 = vmul.f32 %v7462_v25, %v603_v49  ;;  %5975 = vmatmul.mubr.f32.gmra.mrb[14].mxu0 %v760_v11  ;;  %6406 = vmatpush3.bf16.msra.mxu1 %v6403_v9  ;;  %v5062_v9 = vld [vmem:[%s8428_s1 + $0x318] sm:$0xff]  ;;  %v378_v23 = vld [vmem:[%s7320_s21 + $0xe0] sm:$0xff] }
  0xb4   : > { %5977 = vmatprep.mubr.f32.mxu0 %v761_v10  ;;  %6408 = vmatprep.subr.bf16.mxu1 %v6407_v36  ;;  %v6547_v24 = vpack.c.bf16 %v5062_v9, %v5061_v7  ;;  %v5064_v37 = vld [vmem:[%s8428_s1 + $0x328] sm:$0xff]  ;;  %v427_v46 = vmul.f32 %v7325_v27, %v378_v23  ;;  %v381_v49 = vld [vmem:[%s7320_s21 + $0xf8] sm:$0xff] }
  0xb5   : > { %v765_v62 = vadd.f32 %v723_v55, %v422_v30  ;;  %v764_v16 = vadd.f32 %v722_v57, %v421_v42  ;;  %5631 = vmatmul.mubr.f32.gmra.mrb[14].mxu1 %v841_v50  ;;  %6542 = vmatpush3.bf16.msra.mxu0 %v6539_v15  ;;  %v425_v15 = vmul.f32 %v7325_v27, %v376_v3  ;;  %v380_v57 = vld [vmem:[%s7320_s21 + $0xf0] sm:$0xff]  ;;  %v7733_v19 = vld [vmem:[#allocation2 + $0x41] sm:$0xff] }
  0xb6   : > { %5633 = vmatprep.mubr.f32.mxu1 %v842_v63  ;;  %v618_v4 = vpop.permute.xlu1 %617  ;;  %v613_v5 = vpop.permute.xlu0 %612  ;;  %v843_v6 = vld [vmem:[#allocation2 + $0x8d] sm:$0xff]  ;;  %6544 = vmatprep.subr.bf16.mxu0 %v7668_v53  ;;  %v844_v22 = vld [vmem:[#allocation2 + $0x95] sm:$0xff] }
  0xb7   : > { %807 = vst [vmem:[#allocation2 + $0xb8] sm:$0xff] %v765_v62  ;;  %806 = vst [vmem:[#allocation2 + $0xb0] sm:$0xff] %v764_v16  ;;  %v725_v10 = vmul.f32 %v7462_v25, %v618_v4  ;;  %v724_v11 = vmul.f32 %v7462_v25, %v613_v5  ;;  %5978 = vmatmul.mubr.f32.gmra.mrb[16].mxu0 %v762_v39  ;;  %6410 = vmatpush3.bf16.msra.mxu1 %v6407_v36  ;;  %v2791_v36 = vld [vmem:[#allocation2 + $0x21] sm:$0xff]  ;;  %v7725_v4 = vld [vmem:[#allocation2 + $0x39] sm:$0xff] }
  0xb8   : > { %6039 = vmatprep.mubr.f32.mxu0 %v2790_v12  ;;  %6412 = vmatprep.subr.bf16.mxu1 %v6411_v60  ;;  %v7701_v39 = vpack.c.bf16 %v4996_v14, %v4995_v13  ;;  %v430_v5 = vmul.f32 %v7325_v27, %v381_v49  ;;  %v5067_v12 = vld [vmem:[%s8428_s1 + $0x340] sm:$0xff] }
  0xb9   : > { %v767_v20 = vadd.f32 %v725_v10, %v424_v58  ;;  %v766_v21 = vadd.f32 %v724_v11, %v423_v1  ;;  %5634 = vmatmul.mubr.f32.gmra.mrb[16].mxu1 %v843_v6  ;;  %v6551_v58 = vpack.c.bf16 %v5064_v37, %v5063_v28  ;;  %v7716_v1 = vld [vmem:[#allocation2 + $0x31] sm:$0xff]  ;;  %v429_v6 = vmul.f32 %v7325_v27, %v380_v57  ;;  %v5068_v27 = vld [vmem:[%s8428_s1 + $0x348] sm:$0xff]  ;;  %v5071_v57 = vld [vmem:[%s8428_s1 + $0x360] sm:$0xff] }
  0xba   : > { %5636 = vmatprep.mubr.f32.mxu1 %v844_v22  ;;  %v628_v29 = vpop.permute.xlu1 %627  ;;  %v623_v30 = vpop.permute.xlu0 %622  ;;  %v845_v33 = vld [vmem:[#allocation2 + $0x9d] sm:$0xff]  ;;  %v846_v55 = vld [vmem:[#allocation2 + $0xa5] sm:$0xff]  ;;  %v6559_v28 = vpack.c.bf16 %v5068_v27, %v5067_v12  ;;  %v7747_v37 = vld [vmem:[#allocation2 + $0x51] sm:$0xff] }
  0xbb   : > { %809 = vst [vmem:[#allocation2 + $0xc8] sm:$0xff] %v767_v20  ;;  %808 = vst [vmem:[#allocation2 + $0xc0] sm:$0xff] %v766_v21  ;;  %v727_v35 = vmul.f32 %v7462_v25, %v628_v29  ;;  %v726_v42 = vmul.f32 %v7462_v25, %v623_v30  ;;  %6040 = vmatmul.mubr.f32.vlgmr.msra.gmra.mrb[0].mxu0 %v2791_v36  ;;  %6414 = vmatpush3.bf16.msra.mxu1 %v6411_v60  ;;  %v5065_v60 = vld [vmem:[%s8428_s1 + $0x330] sm:$0xff] }
  0xbc   : > { %6546 = vmatpush3.bf16.msra.mxu0 %v7668_v53  ;;  %6042 = vmatprep.mubr.f32.mxu0 %v7705_v43  ;;  %v5066_v53 = vld [vmem:[%s8428_s1 + $0x338] sm:$0xff]  ;;  %v7741_v22 = vld [vmem:[#allocation2 + $0x49] sm:$0xff] }
  0xbd   : > { %v769_v50 = vadd.f32 %v727_v35, %v426_v17  ;;  %v768_v51 = vadd.f32 %v726_v42, %v425_v15  ;;  %5637 = vmatmul.mubr.f32.gmra.mrb[18].mxu1 %v845_v33  ;;  %6548 = vmatprep.subr.bf16.mxu0 %v6547_v24  ;;  %v6555_v11 = vpack.c.bf16 %v5066_v53, %v5065_v60  ;;  %v5069_v29 = vld [vmem:[%s8428_s1 + $0x350] sm:$0xff]  ;;  %v5070_v35 = vld [vmem:[%s8428_s1 + $0x358] sm:$0xff] }
  0xbe   : > { %5639 = vmatprep.mubr.f32.mxu1 %v846_v55  ;;  %v638_v62 = vpop.permute.xlu1 %637  ;;  %v633_v16 = vpop.permute.xlu0 %632  ;;  %v847_v63 = vld [vmem:[#allocation2 + $0xad] sm:$0xff]  ;;  %6416 = vmatprep.subr.bf16.mxu1 %v7701_v39  ;;  %v848_v10 = vld [vmem:[#allocation2 + $0xb5] sm:$0xff]  ;;  %v6563_v55 = vpack.c.bf16 %v5070_v35, %v5069_v29  ;;  %v7795_v29 = vld [vmem:[#allocation2 + $0x81] sm:$0xff] }
  0xbf   : > { %811 = vst [vmem:[#allocation2 + $0xd8] sm:$0xff] %v769_v50  ;;  %810 = vst [vmem:[#allocation2 + $0xd0] sm:$0xff] %v768_v51  ;;  %v729_v2 = vmul.f32 %v7462_v25, %v638_v62  ;;  %v728_v3 = vmul.f32 %v7462_v25, %v633_v16  ;;  %6043 = vmatmul.mubr.f32.gmra.mrb[2].mxu0 %v7716_v1  ;;  %v7763_v16 = vld [vmem:[#allocation2 + $0x61] sm:$0xff]  ;;  %v7771_v53 = vld [vmem:[#allocation2 + $0x69] sm:$0xff] }
  0xc0   : > { %6045 = vmatprep.mubr.f32.mxu0 %v7725_v4  ;;  %6550 = vmatpush3.bf16.msra.mxu0 %v6547_v24  ;;  %v7779_v12 = vld [vmem:[#allocation2 + $0x71] sm:$0xff] }
  0xc1   : > { %v771_v7 = vadd.f32 %v729_v2, %v428_v44  ;;  %v770_v9 = vadd.f32 %v728_v3, %v427_v46  ;;  %5640 = vmatmul.mubr.f32.gmra.mrb[20].mxu1 %v847_v63  ;;  %6552 = vmatprep.subr.bf16.mxu0 %v6551_v58  ;;  %v7755_v46 = vld [vmem:[#allocation2 + $0x59] sm:$0xff] }
  0xc2   : > { %5642 = vmatprep.mubr.f32.mxu1 %v848_v10  ;;  %v648_v13 = vpop.permute.xlu1 %647  ;;  %v643_v14 = vpop.permute.xlu0 %642  ;;  %v849_v17 = vld [vmem:[#allocation2 + $0xbd] sm:$0xff]  ;;  %v850_v24 = vld [vmem:[#allocation2 + $0xc5] sm:$0xff] }
  0xc3   : > { %813 = vst [vmem:[#allocation2 + $0xe8] sm:$0xff] %v771_v7  ;;  %812 = vst [vmem:[#allocation2 + $0xe0] sm:$0xff] %v770_v9  ;;  %v731_v20 = vmul.f32 %v7462_v25, %v648_v13  ;;  %v730_v21 = vmul.f32 %v7462_v25, %v643_v14  ;;  %6046 = vmatmul.mubr.f32.gmra.mrb[4].mxu0 %v7733_v19  ;;  %v5073_v7 = vld [vmem:[%s8428_s1 + $0x370] sm:$0xff]  ;;  %v7787_v14 = vld [vmem:[#allocation2 + $0x79] sm:$0xff] }
  0xc4   : > { %6048 = vmatprep.mubr.f32.mxu0 %v7741_v22  ;;  %6554 = vmatpush3.bf16.msra.mxu0 %v6551_v58 }
  0xc5   : > { %v773_v15 = vadd.f32 %v731_v20, %v430_v5  ;;  %v772_v23 = vadd.f32 %v730_v21, %v429_v6  ;;  %5643 = vmatmul.mubr.f32.gmra.mrb[22].mxu1 %v849_v17  ;;  %6556 = vmatprep.subr.bf16.mxu0 %v6555_v11 }
  0xc6   : > { %5645 = vmatprep.mubr.f32.mxu1 %v850_v24  ;;  %v658_v30 = vpop.permute.xlu1 %657  ;;  %v653_v33 = vpop.permute.xlu0 %652  ;;  %v851_v36 = vld [vmem:[#allocation2 + $0xcd] sm:$0xff]  ;;  %v852_v51 = vld [vmem:[#allocation2 + $0xd5] sm:$0xff] }
  0xc7   : > { %815 = vst [vmem:[#allocation2 + $0xf8] sm:$0xff] %v773_v15  ;;  %814 = vst [vmem:[#allocation2 + $0xf0] sm:$0xff] %v772_v23  ;;  %v733_v42 = vmul.f32 %v7462_v25, %v658_v30  ;;  %v732_v44 = vmul.f32 %v7462_v25, %v653_v33  ;;  %6049 = vmatmul.mubr.f32.gmra.mrb[6].mxu0 %v7747_v37  ;;  %v5075_v15 = vld [vmem:[%s8428_s1 + $0x380] sm:$0xff]  ;;  %v7803_v33 = vld [vmem:[#allocation2 + $0x89] sm:$0xff] }
  0xc8   : > { %6051 = vmatprep.mubr.f32.mxu0 %v7755_v46  ;;  %6558 = vmatpush3.bf16.msra.mxu0 %v6555_v11 }
  0xc9   : > { %v775_v49 = vadd.f32 %v733_v42, %v7335_v31  ;;  %v774_v50 = vadd.f32 %v732_v44, %v7339_v34  ;;  %5646 = vmatmul.mubr.f32.gmra.mrb[24].mxu1 %v851_v36  ;;  %6560 = vmatprep.subr.bf16.mxu0 %v6559_v28  ;;  %v5072_v31 = vld [vmem:[%s8428_s1 + $0x368] sm:$0xff] }
  0xca   : > { %5648 = vmatprep.mubr.f32.mxu1 %v852_v51  ;;  %v668_v58 = vpop.permute.xlu1 %667  ;;  %v663_v60 = vpop.permute.xlu0 %662  ;;  %v853_v62 = vld [vmem:[#allocation2 + $0xdd] sm:$0xff]  ;;  %v854_v5 = vld [vmem:[#allocation2 + $0xe5] sm:$0xff]  ;;  %v6567_v6 = vpack.c.bf16 %v5072_v31, %v5071_v57 }
  0xcb   : > { %817 = vst [vmem:[#allocation2 + $0x108] sm:$0xff] %v775_v49  ;;  %816 = vst [vmem:[#allocation2 + $0x100] sm:$0xff] %v774_v50  ;;  %v735_v34 = vmul.f32 %v7462_v25, %v668_v58  ;;  %v734_v63 = vmul.f32 %v7462_v25, %v663_v60  ;;  %6052 = vmatmul.mubr.f32.gmra.mrb[8].mxu0 %v7763_v16 }
  0xcc   : > { %6054 = vmatprep.mubr.f32.mxu0 %v7771_v53  ;;  %6562 = vmatpush3.bf16.msra.mxu0 %v6559_v28 }
  0xcd   : > { %v777_v2 = vadd.f32 %v735_v34, %v7349_v38  ;;  %v776_v3 = vadd.f32 %v734_v63, %v7353_v41  ;;  %5649 = vmatmul.mubr.f32.gmra.mrb[26].mxu1 %v853_v62  ;;  %6564 = vmatprep.subr.bf16.mxu0 %v6563_v55  ;;  %v5074_v38 = vld [vmem:[%s8428_s1 + $0x378] sm:$0xff]  ;;  %v7821_v34 = vld [vmem:[#allocation2 + $0xa1] sm:$0xff] }
  0xce   : > { %5651 = vmatprep.mubr.f32.mxu1 %v854_v5  ;;  %v678_v9 = vpop.permute.xlu1 %677  ;;  %v673_v10 = vpop.permute.xlu0 %672  ;;  %v855_v11 = vld [vmem:[#allocation2 + $0xed] sm:$0xff]  ;;  %v856_v20 = vld [vmem:[#allocation2 + $0xf5] sm:$0xff]  ;;  %v6571_v21 = vpack.c.bf16 %v5074_v38, %v5073_v7  ;;  %v4999_v7 = vld [vmem:[%s8428_s1 + $0x120] sm:$0xff] }
  0xcf   : > { %819 = vst [vmem:[#allocation2 + $0x118] sm:$0xff] %v777_v2  ;;  %818 = vst [vmem:[#allocation2 + $0x110] sm:$0xff] %v776_v3  ;;  %v737_v41 = vmul.f32 %v7462_v25, %v678_v9  ;;  %v736_v13 = vmul.f32 %v7462_v25, %v673_v10  ;;  %6055 = vmatmul.mubr.f32.gmra.mrb[10].mxu0 %v7779_v12  ;;  %v1166_v63 = vld [vmem:[#allocation2 + $0x6] sm:$0xff]  ;;  %v7833_v2 = vld [vmem:[#allocation2 + $0xb1] sm:$0xff] }
  0xd0   : > { %6057 = vmatprep.mubr.f32.mxu0 %v7787_v14  ;;  %6566 = vmatpush3.bf16.msra.mxu0 %v6563_v55  ;;  %v7810_v55 = vld [vmem:[#allocation2 + $0x91] sm:$0xff]  ;;  %v7836_v3 = vld [vmem:[#allocation2 + $0xb9] sm:$0xff]  ;;  %v5000_v9 = vld [vmem:[%s8428_s1 + $0x128] sm:$0xff] }
  0xd1   : > { %v779_v17 = vadd.f32 %v737_v41, %v7363_v45  ;;  %v778_v27 = vadd.f32 %v736_v13, %v7367_v47  ;;  %5652 = vmatmul.mubr.f32.gmra.mrb[28].mxu1 %v855_v11  ;;  %6568 = vmatprep.subr.bf16.mxu0 %v6567_v6  ;;  %v5076_v45 = vld [vmem:[%s8428_s1 + $0x388] sm:$0xff]  ;;  %v1168_v10 = vld [vmem:[#allocation2 + $0x16] sm:$0xff]  ;;  %v6423_v41 = vpack.c.bf16 %v5000_v9, %v4999_v7  ;;  %v1169_v13 = vld [vmem:[#allocation2 + $0x1e] sm:$0xff] }
  0xd2   : > { %5654 = vmatprep.mubr.f32.mxu1 %v856_v20  ;;  %v688_v23 = vpop.permute.xlu1 %687  ;;  %v683_v24 = vpop.permute.xlu0 %682  ;;  %v857_v28 = vld [vmem:[#allocation2 + $0xfd] sm:$0xff]  ;;  %v858_v42 = vld [vmem:[#allocation2 + $0x105] sm:$0xff]  ;;  %v7808_v44 = vpack.c.bf16 %v5076_v45, %v5075_v15  ;;  %v7858_v20 = vld [vmem:[#allocation2 + $0xd1] sm:$0xff] }
  0xd3   : > { %821 = vst [vmem:[#allocation2 + $0x128] sm:$0xff] %v779_v17  ;;  %820 = vst [vmem:[#allocation2 + $0x120] sm:$0xff] %v778_v27  ;;  %v739_v47 = vmul.f32 %v7462_v25, %v688_v23  ;;  %v738_v30 = vmul.f32 %v7462_v25, %v683_v24  ;;  %6058 = vmatmul.mubr.f32.gmra.mrb[12].mxu0 %v7795_v29  ;;  %v7846_v11 = vld [vmem:[#allocation2 + $0xc1] sm:$0xff]  ;;  %v7849_v38 = vld [vmem:[#allocation2 + $0xc9] sm:$0xff] }
  0xd4   : > { %6060 = vmatprep.mubr.f32.mxu0 %v7803_v33  ;;  %6570 = vmatpush3.bf16.msra.mxu0 %v6567_v6  ;;  %v1167_v6 = vld [vmem:[#allocation2 + $0xe] sm:$0xff]  ;;  %v5002_v27 = vld [vmem:[%s8428_s1 + $0x138] sm:$0xff]  ;;  %v5003_v24 = vld [vmem:[%s8428_s1 + $0x140] sm:$0xff] }
  0xd5   : > { %v781_v36 = vadd.f32 %v739_v47, %v7377_v52  ;;  %v780_v35 = vadd.f32 %v738_v30, %v7381_v54  ;;  %5655 = vmatmul.mubr.f32.gmra.mrb[30].mxu1 %v857_v28  ;;  %6572 = vmatprep.subr.bf16.mxu0 %v6571_v21  ;;  %v7815_v52 = vld [vmem:[#allocation2 + $0x99] sm:$0xff]  ;;  %v5001_v17 = vld [vmem:[%s8428_s1 + $0x130] sm:$0xff]  ;;  %v5004_v28 = vld [vmem:[%s8428_s1 + $0x148] sm:$0xff] }
  0xd6   : > { %5657 = vmatprep.mubr.f32.mxu1 %v858_v42  ;;  %v698_v49 = vpop.permute.xlu1 %697  ;;  %v693_v50 = vpop.permute.xlu0 %692  ;;  %v859_v51 = vld [vmem:[#allocation2 + $0x10d] sm:$0xff]  ;;  %v860_v62 = vld [vmem:[#allocation2 + $0x115] sm:$0xff]  ;;  %v6427_v15 = vpack.c.bf16 %v5002_v27, %v5001_v17  ;;  %v7870_v47 = vld [vmem:[#allocation2 + $0xe1] sm:$0xff] }
  0xd7   : > { %823 = vst [vmem:[#allocation2 + $0x138] sm:$0xff] %v781_v36  ;;  %822 = vst [vmem:[#allocation2 + $0x130] sm:$0xff] %v780_v35  ;;  %v741_v57 = vmul.f32 %v7462_v25, %v698_v49  ;;  %v740_v58 = vmul.f32 %v7462_v25, %v693_v50  ;;  %6061 = vmatmul.mubr.f32.gmra.mrb[14].mxu0 %v7810_v55  ;;  %v7824_v25 = vld [vmem:[#allocation2 + $0xa9] sm:$0xff]  ;;  %v1172_v45 = vld [vmem:[#allocation2 + $0x36] sm:$0xff]  ;;  %v6431_v36 = vpack.c.bf16 %v5004_v28, %v5003_v24 }
  0xd8   : > { %6063 = vmatprep.mubr.f32.mxu0 %v7815_v52  ;;  %6574 = vmatpush3.bf16.msra.mxu0 %v6571_v21  ;;  %v7861_v21 = vld [vmem:[#allocation2 + $0xd9] sm:$0xff]  ;;  %v1171_v23 = vld [vmem:[#allocation2 + $0x2e] sm:$0xff]  ;;  %v1174_v50 = vld [vmem:[#allocation2 + $0x46] sm:$0xff] }
  0xd9   : > { %v783_v54 = vadd.f32 %v741_v57, %v7391_v59  ;;  %v782_v60 = vadd.f32 %v740_v58, %v7395_v61  ;;  %5658 = vmatmul.mubr.f32.gmra.mrb[32].mxu1 %v859_v51  ;;  %6576 = vmatprep.subr.bf16.mxu0 %v7808_v44  ;;  %v4997_v59 = vld [vmem:[%s8428_s1 + $0x110] sm:$0xff]  ;;  %v4998_v61 = vld [vmem:[%s8428_s1 + $0x118] sm:$0xff]  ;;  %v1178_v9 = vld [vmem:[#allocation2 + $0x66] sm:$0xff] }
  0xda   : > { %5660 = vmatprep.mubr.f32.mxu1 %v860_v62  ;;  %v861_v31 = vld [vmem:[#allocation2 + $0x11d] sm:$0xff]  ;;  %v6419_v5 = vpack.c.bf16 %v4998_v61, %v4997_v59  ;;  %v7873_v30 = vld [vmem:[#allocation2 + $0xe9] sm:$0xff]  ;;  %v7882_v51 = vld [vmem:[#allocation2 + $0xf1] sm:$0xff] }
  0xdb   : > { %825 = vst [vmem:[#allocation2 + $0x148] sm:$0xff] %v783_v54  ;;  %824 = vst [vmem:[#allocation2 + $0x140] sm:$0xff] %v782_v60  ;;  %6064 = vmatmul.mubr.f32.gmra.mrb[16].mxu0 %v7821_v34  ;;  %v1173_v35 = vld [vmem:[#allocation2 + $0x3e] sm:$0xff]  ;;  %v5005_v42 = vld [vmem:[%s8428_s1 + $0x150] sm:$0xff] }
  0xdc   : > { %6066 = vmatprep.mubr.f32.mxu0 %v7824_v25  ;;  %v5006_v49 = vld [vmem:[%s8428_s1 + $0x158] sm:$0xff]  ;;  %v1175_v54 = vld [vmem:[#allocation2 + $0x4e] sm:$0xff]  ;;  %v5007_v60 = vld [vmem:[%s8428_s1 + $0x160] sm:$0xff] }
  0xdd   : > { %5661 = vmatmul.mubr.f32.gmra.mrb[34].mxu1 %v861_v31  ;;  %v7885_v57 = vld [vmem:[#allocation2 + $0xf9] sm:$0xff]  ;;  %v6435_v58 = vpack.c.bf16 %v5006_v49, %v5005_v42  ;;  %v5008_v62 = vld [vmem:[%s8428_s1 + $0x168] sm:$0xff]  ;;  %v5077_v42 = vld [vmem:[%s8428_s1 + $0x390] sm:$0xff] }
  0xde   : > { %5695 = vmatprep.mubr.f32.mxu1 %v1166_v63  ;;  %v1176_v31 = vld [vmem:[#allocation2 + $0x56] sm:$0xff]  ;;  %v7894_v59 = vld [vmem:[#allocation2 + $0x101] sm:$0xff]  ;;  %v7897_v61 = vld [vmem:[#allocation2 + $0x109] sm:$0xff]  ;;  %v6439_v63 = vpack.c.bf16 %v5008_v62, %v5007_v60 }
  0xdf   : > { %6067 = vmatmul.mubr.f32.gmra.mrb[18].mxu0 %v7833_v2  ;;  %v5010_v7 = vld [vmem:[%s8428_s1 + $0x178] sm:$0xff]  ;;  %v1179_v17 = vld [vmem:[#allocation2 + $0x6e] sm:$0xff]  ;;  %v5011_v27 = vld [vmem:[%s8428_s1 + $0x180] sm:$0xff] }
  0xe0   : > { %6069 = vmatprep.mubr.f32.mxu0 %v7836_v3  ;;  %v7921_v24 = vld [vmem:[#allocation2 + $0x129] sm:$0xff]  ;;  %v5078_v49 = vld [vmem:[%s8428_s1 + $0x398] sm:$0xff]  ;;  %v5079_v60 = vld [vmem:[%s8428_s1 + $0x3a0] sm:$0xff] }
  0xe1   : > { %5696 = vmatmul.mubr.f32.vlgmr.msra.gmra.mrb[0].mxu1 %v1167_v6  ;;  %v5009_v6 = vld [vmem:[%s8428_s1 + $0x170] sm:$0xff]  ;;  %v5080_v62 = vld [vmem:[%s8428_s1 + $0x3a8] sm:$0xff] }
  0xe2   : > { %5698 = vmatprep.mubr.f32.mxu1 %v1168_v10  ;;  %6418 = vmatpush3.bf16.msra.mxu1 %v7701_v39  ;;  %v1170_v39 = vld [vmem:[#allocation2 + $0x26] sm:$0xff]  ;;  %v7906_v10 = vld [vmem:[#allocation2 + $0x111] sm:$0xff] }
  0xe3   : > { %6070 = vmatmul.mubr.f32.gmra.mrb[20].mxu0 %v7846_v11  ;;  %6420 = vmatprep.subr.bf16.mxu1 %v6419_v5 }
  0xe4   : > { %6072 = vmatprep.mubr.f32.mxu0 %v7849_v38 }
  0xe5   : > { %5699 = vmatmul.mubr.f32.gmra.mrb[2].mxu1 %v1169_v13  ;;  %v6443_v13 = vpack.c.bf16 %v5010_v7, %v5009_v6  ;;  %v5082_v6 = vld [vmem:[%s8428_s1 + $0x3b8] sm:$0xff]  ;;  %v5083_v7 = vld [vmem:[%s8428_s1 + $0x3c0] sm:$0xff] }
  0xe6   : > { %5701 = vmatprep.mubr.f32.mxu1 %v1170_v39  ;;  %6422 = vmatpush3.bf16.msra.mxu1 %v6419_v5  ;;  %v1177_v5 = vld [vmem:[#allocation2 + $0x5e] sm:$0xff]  ;;  %v5012_v39 = vld [vmem:[%s8428_s1 + $0x188] sm:$0xff] }
  0xe7   : > { %6073 = vmatmul.mubr.f32.gmra.mrb[22].mxu0 %v7858_v20  ;;  %6424 = vmatprep.subr.bf16.mxu1 %v6423_v41  ;;  %v7923_v28 = vpack.c.bf16 %v5012_v39, %v5011_v27  ;;  %v5086_v27 = vld [vmem:[%s8428_s1 + $0x3d8] sm:$0xff] }
  0xe8   : > { %6075 = vmatprep.mubr.f32.mxu0 %v7861_v21 }
  0xe9   : > { %5702 = vmatmul.mubr.f32.gmra.mrb[4].mxu1 %v1171_v23  ;;  %v7918_v23 = vld [vmem:[#allocation2 + $0x121] sm:$0xff] }
  0xea   : > { %5704 = vmatprep.mubr.f32.mxu1 %v1172_v45  ;;  %6426 = vmatpush3.bf16.msra.mxu1 %v6423_v41  ;;  %v7909_v41 = vld [vmem:[#allocation2 + $0x119] sm:$0xff] }
  0xeb   : > { %6076 = vmatmul.mubr.f32.gmra.mrb[24].mxu0 %v7870_v47  ;;  %6428 = vmatprep.subr.bf16.mxu1 %v6427_v15  ;;  %v1181_v45 = vld [vmem:[#allocation2 + $0x7e] sm:$0xff] }
  0xec   : > { %6078 = vmatprep.mubr.f32.mxu0 %v7873_v30 }
  0xed   : > { %5705 = vmatmul.mubr.f32.gmra.mrb[6].mxu1 %v1173_v35  ;;  %v7926_v35 = vld [vmem:[#allocation2 + $0x131] sm:$0xff] }
  0xee   : > { %5707 = vmatprep.mubr.f32.mxu1 %v1174_v50  ;;  %6430 = vmatpush3.bf16.msra.mxu1 %v6427_v15  ;;  %v1180_v15 = vld [vmem:[#allocation2 + $0x76] sm:$0xff]  ;;  %v1183_v50 = vld [vmem:[#allocation2 + $0x8e] sm:$0xff] }
  0xef   : > { %6079 = vmatmul.mubr.f32.gmra.mrb[26].mxu0 %v7882_v51  ;;  %6432 = vmatprep.subr.bf16.mxu1 %v6431_v36 }
  0xf0   : > { %6081 = vmatprep.mubr.f32.mxu0 %v7885_v57 }
  0xf1   : > { %5708 = vmatmul.mubr.f32.gmra.mrb[8].mxu1 %v1175_v54  ;;  %v6579_v54 = vpack.c.bf16 %v5078_v49, %v5077_v42  ;;  %v5089_v42 = vld [vmem:[%s8428_s1 + $0x3f0] sm:$0xff]  ;;  %v5090_v49 = vld [vmem:[%s8428_s1 + $0x3f8] sm:$0xff] }
  0xf2   : > { %5710 = vmatprep.mubr.f32.mxu1 %v1176_v31  ;;  %6434 = vmatpush3.bf16.msra.mxu1 %v6431_v36  ;;  %v1182_v36 = vld [vmem:[#allocation2 + $0x86] sm:$0xff]  ;;  %v1185_v31 = vld [vmem:[#allocation2 + $0x9e] sm:$0xff] }
  0xf3   : > { %6082 = vmatmul.mubr.f32.gmra.mrb[28].mxu0 %v7894_v59  ;;  %6436 = vmatprep.subr.bf16.mxu1 %v6435_v58 }
  0xf4   : > { %6084 = vmatprep.mubr.f32.mxu0 %v7897_v61 }
  0xf5   : > { %5711 = vmatmul.mubr.f32.gmra.mrb[10].mxu1 %v1177_v5  ;;  %v5081_v5 = vld [vmem:[%s8428_s1 + $0x3b0] sm:$0xff] }
  0xf6   : > { %5713 = vmatprep.mubr.f32.mxu1 %v1178_v9  ;;  %6438 = vmatpush3.bf16.msra.mxu1 %v6435_v58  ;;  %v1184_v58 = vld [vmem:[#allocation2 + $0x96] sm:$0xff]  ;;  %v5084_v9 = vld [vmem:[%s8428_s1 + $0x3c8] sm:$0xff] }
  0xf7   : > { %6085 = vmatmul.mubr.f32.gmra.mrb[30].mxu0 %v7906_v10  ;;  %6440 = vmatprep.subr.bf16.mxu1 %v6439_v63 }
  0xf8   : > { %6087 = vmatprep.mubr.f32.mxu0 %v7909_v41 }
  0xf9   : > { %5714 = vmatmul.mubr.f32.gmra.mrb[12].mxu1 %v1179_v17  ;;  %v5085_v17 = vld [vmem:[%s8428_s1 + $0x3d0] sm:$0xff] }
  0xfa   : > { %5716 = vmatprep.mubr.f32.mxu1 %v1180_v15  ;;  %6442 = vmatpush3.bf16.msra.mxu1 %v6439_v63  ;;  %v6583_v63 = vpack.c.bf16 %v5080_v62, %v5079_v60  ;;  %v6595_v39 = vpack.c.bf16 %v5086_v27, %v5085_v17  ;;  %v5087_v15 = vld [vmem:[%s8428_s1 + $0x3e0] sm:$0xff]  ;;  %v1199_v62 = vld [vmem:[#allocation2 + $0x10e] sm:$0xff]  ;;  %v8072_v27 = vld [vmem:[#allocation2 + $0x57] sm:$0xff] }
  0xfb   : > { %6088 = vmatmul.mubr.f32.gmra.mrb[32].mxu0 %v7918_v23  ;;  %6444 = vmatprep.subr.bf16.mxu1 %v6443_v13  ;;  %v5024_v17 = vld [vmem:[%s8428_s1 + $0x1e8] sm:$0xff] }
  0xfc   : > { %6090 = vmatprep.mubr.f32.mxu0 %v7921_v24 }
  0xfd   : > { %5717 = vmatmul.mubr.f32.gmra.mrb[14].mxu1 %v1181_v45  ;;  %v5088_v45 = vld [vmem:[%s8428_s1 + $0x3e8] sm:$0xff] }
  0xfe   : > { %5719 = vmatprep.mubr.f32.mxu1 %v1182_v36  ;;  %6446 = vmatpush3.bf16.msra.mxu1 %v6443_v13  ;;  %v6591_v13 = vpack.c.bf16 %v5084_v9, %v5083_v7  ;;  %v6599_v36 = vpack.c.bf16 %v5088_v45, %v5087_v15  ;;  %v8044_v7 = vld [vmem:[#allocation2 + $0x37] sm:$0xff] }
  0xff   : > { %6091 = vmatmul.mubr.f32.gmra.mrb[34].mxu0 %v7926_v35  ;;  %6448 = vmatprep.subr.bf16.mxu1 %v7923_v28  ;;  %v5021_v9 = vld [vmem:[%s8428_s1 + $0x1d0] sm:$0xff]  ;;  %v3230_v45 = vld [vmem:[#allocation2 + $0x139] sm:$0xff] }
 0x100   : > { %6125 = vmatprep.mubr.f32.mxu0 %v7705_v43  ;;  %v1186_v43 = vld [vmem:[#allocation2 + $0xa6] sm:$0xff]  ;;  %v8094_v15 = vld [vmem:[#allocation2 + $0x77] sm:$0xff] }
 0x101   : > { %5720 = vmatmul.mubr.f32.gmra.mrb[16].mxu1 %v1183_v50  ;;  %v6603_v50 = vpack.c.bf16 %v5090_v49, %v5089_v42  ;;  %v8111_v42 = vld [vmem:[#allocation2 + $0x8f] sm:$0xff]  ;;  %v8114_v49 = vld [vmem:[#allocation2 + $0x97] sm:$0xff] }
 0x102   : > { %5722 = vmatprep.mubr.f32.mxu1 %v1184_v58  ;;  %v5091_v58 = vld [vmem:[%s8428_s1 + $0x400] sm:$0xff] }
 0x103   : > { %6126 = vmatmul.mubr.f32.vlgmr.msra.gmra.mrb[0].mxu0 %v7716_v1  ;;  %v1187_v1 = vld [vmem:[#allocation2 + $0xae] sm:$0xff] }
 0x104   : > { %6578 = vmatpush3.bf16.msra.mxu0 %v7808_v44  ;;  %6128 = vmatprep.mubr.f32.mxu0 %v7725_v4  ;;  %v1188_v4 = vld [vmem:[#allocation2 + $0xb6] sm:$0xff]  ;;  %v6587_v44 = vpack.c.bf16 %v5082_v6, %v5081_v5 }
 0x105   : > { %5723 = vmatmul.mubr.f32.gmra.mrb[18].mxu1 %v1185_v31  ;;  %6580 = vmatprep.subr.bf16.mxu0 %v6579_v54  ;;  %v1200_v31 = vld [vmem:[#allocation2 + $0x116] sm:$0xff] }
 0x106   : > { %5725 = vmatprep.mubr.f32.mxu1 %v1186_v43  ;;  %v8015_v5 = vld [vmem:[#allocation2 + $0x17] sm:$0xff] }
 0x107   : > { %6129 = vmatmul.mubr.f32.gmra.mrb[2].mxu0 %v7733_v19  ;;  %v1189_v19 = vld [vmem:[#allocation2 + $0xbe] sm:$0xff]  ;;  %v5017_v6 = vld [vmem:[%s8428_s1 + $0x1b0] sm:$0xff] }
 0x108   : > { %6131 = vmatprep.mubr.f32.mxu0 %v7741_v22  ;;  %6582 = vmatpush3.bf16.msra.mxu0 %v6579_v54  ;;  %v1190_v22 = vld [vmem:[#allocation2 + $0xc6] sm:$0xff] }
 0x109   : > { %5726 = vmatmul.mubr.f32.gmra.mrb[20].mxu1 %v1187_v1  ;;  %6584 = vmatprep.subr.bf16.mxu0 %v6583_v63  ;;  %v5092_v54 = vld [vmem:[%s8428_s1 + $0x408] sm:$0xff]  ;;  %v5018_v1 = vld [vmem:[%s8428_s1 + $0x1b8] sm:$0xff] }
 0x10a   : > { %5728 = vmatprep.mubr.f32.mxu1 %v1188_v4  ;;  %v7994_v60 = vpack.c.bf16 %v5092_v54, %v5091_v58  ;;  %v8030_v4 = vld [vmem:[#allocation2 + $0x27] sm:$0xff]  ;;  %v3604_v54 = vld [vmem:[#allocation2 + $0x3a] sm:$0xff] }
 0x10b   : > { %6132 = vmatmul.mubr.f32.gmra.mrb[4].mxu0 %v7747_v37  ;;  %v1191_v37 = vld [vmem:[#allocation2 + $0xce] sm:$0xff] }
 0x10c   : > { %6134 = vmatprep.mubr.f32.mxu0 %v7755_v46  ;;  %6586 = vmatpush3.bf16.msra.mxu0 %v6583_v63  ;;  %v1192_v46 = vld [vmem:[#allocation2 + $0xd6] sm:$0xff]  ;;  %v5096_v58 = vld [vmem:[%s8428_s1 + $0x428] sm:$0xff] }
 0x10d   : > { %5729 = vmatmul.mubr.f32.gmra.mrb[22].mxu1 %v1189_v19  ;;  %6588 = vmatprep.subr.bf16.mxu0 %v6587_v44  ;;  %v1573_v63 = vld [vmem:[#allocation2 + $0xf] sm:$0xff]  ;;  %v5022_v19 = vld [vmem:[%s8428_s1 + $0x1d8] sm:$0xff] }
 0x10e   : > { %5731 = vmatprep.mubr.f32.mxu1 %v1190_v22  ;;  %v8058_v22 = vld [vmem:[#allocation2 + $0x47] sm:$0xff] }
 0x10f   : > { %6135 = vmatmul.mubr.f32.gmra.mrb[6].mxu0 %v7763_v16  ;;  %v1193_v16 = vld [vmem:[#allocation2 + $0xde] sm:$0xff] }
 0x110   : > { %6137 = vmatprep.mubr.f32.mxu0 %v7771_v53  ;;  %6590 = vmatpush3.bf16.msra.mxu0 %v6587_v44  ;;  %v1194_v53 = vld [vmem:[#allocation2 + $0xe6] sm:$0xff] }
 0x111   : > { %5732 = vmatmul.mubr.f32.gmra.mrb[24].mxu1 %v1191_v37  ;;  %6592 = vmatprep.subr.bf16.mxu0 %v6591_v13  ;;  %v5020_v44 = vld [vmem:[%s8428_s1 + $0x1c8] sm:$0xff]  ;;  %v5025_v37 = vld [vmem:[%s8428_s1 + $0x1f0] sm:$0xff] }
 0x112   : > { %5734 = vmatprep.mubr.f32.mxu1 %v1192_v46  ;;  %v5026_v46 = vld [vmem:[%s8428_s1 + $0x1f8] sm:$0xff] }
 0x113   : > { %6138 = vmatmul.mubr.f32.gmra.mrb[8].mxu0 %v7779_v12  ;;  %v1195_v12 = vld [vmem:[#allocation2 + $0xee] sm:$0xff] }
 0x114   : > { %6140 = vmatprep.mubr.f32.mxu0 %v7787_v14  ;;  %6594 = vmatpush3.bf16.msra.mxu0 %v6591_v13  ;;  %v1196_v14 = vld [vmem:[#allocation2 + $0xf6] sm:$0xff]  ;;  %v5023_v13 = vld [vmem:[%s8428_s1 + $0x1e0] sm:$0xff] }
 0x115   : > { %5735 = vmatmul.mubr.f32.gmra.mrb[26].mxu1 %v1193_v16  ;;  %6596 = vmatprep.subr.bf16.mxu0 %v6595_v39  ;;  %v8098_v16 = vld [vmem:[#allocation2 + $0x7f] sm:$0xff] }
 0x116   : > { %5737 = vmatprep.mubr.f32.mxu1 %v1194_v53  ;;  %v5093_v53 = vld [vmem:[%s8428_s1 + $0x410] sm:$0xff] }
 0x117   : > { %6141 = vmatmul.mubr.f32.gmra.mrb[10].mxu0 %v7795_v29  ;;  %v1197_v29 = vld [vmem:[#allocation2 + $0xfe] sm:$0xff] }
 0x118   : > { %6143 = vmatprep.mubr.f32.mxu0 %v7803_v33  ;;  %6598 = vmatpush3.bf16.msra.mxu0 %v6595_v39  ;;  %v1198_v33 = vld [vmem:[#allocation2 + $0x106] sm:$0xff] }
 0x119   : > { %5738 = vmatmul.mubr.f32.gmra.mrb[28].mxu1 %v1195_v12  ;;  %6600 = vmatprep.subr.bf16.mxu0 %v6599_v36  ;;  %v8086_v39 = vld [vmem:[#allocation2 + $0x67] sm:$0xff] }
 0x11a   : > { %5740 = vmatprep.mubr.f32.mxu1 %v1196_v14  ;;  %v3603_v14 = vld [vmem:[#allocation2 + $0x32] sm:$0xff] }
 0x11b   : > { %6144 = vmatmul.mubr.f32.gmra.mrb[12].mxu0 %v7810_v55  ;;  %v1201_v55 = vld [vmem:[#allocation2 + $0x11e] sm:$0xff] }
 0x11c   : > { %6146 = vmatprep.mubr.f32.mxu0 %v7815_v52  ;;  %6602 = vmatpush3.bf16.msra.mxu0 %v6599_v36  ;;  %v5013_v52 = vld [vmem:[%s8428_s1 + $0x190] sm:$0xff] }
 0x11d   : > { %5741 = vmatmul.mubr.f32.gmra.mrb[30].mxu1 %v1197_v29  ;;  %6604 = vmatprep.subr.bf16.mxu0 %v6603_v50  ;;  %v3602_v36 = vld [vmem:[#allocation2 + $0x2a] sm:$0xff]  ;;  %v8123_v29 = vld [vmem:[#allocation2 + $0x9f] sm:$0xff] }
 0x11e   : > { %5743 = vmatprep.mubr.f32.mxu1 %v1198_v33  ;;  %v8127_v33 = vld [vmem:[#allocation2 + $0xa7] sm:$0xff] }
 0x11f   : > { %6147 = vmatmul.mubr.f32.gmra.mrb[14].mxu0 %v7821_v34  ;;  %v5014_v34 = vld [vmem:[%s8428_s1 + $0x198] sm:$0xff] }
 0x120   : > { %6149 = vmatprep.mubr.f32.mxu0 %v7824_v25  ;;  %6606 = vmatpush3.bf16.msra.mxu0 %v6603_v50  ;;  %v1572_v25 = vld [vmem:[#allocation2 + $0x7] sm:$0xff]  ;;  %v6451_v43 = vpack.c.bf16 %v5014_v34, %v5013_v52  ;;  %v5098_v52 = vld [vmem:[%s8428_s1 + $0x438] sm:$0xff]  ;;  %v8136_v34 = vld [vmem:[#allocation2 + $0xaf] sm:$0xff] }
 0x121   : > { %5744 = vmatmul.mubr.f32.gmra.mrb[32].mxu1 %v1199_v62  ;;  %6608 = vmatprep.subr.bf16.mxu0 %v7994_v60  ;;  %v5095_v50 = vld [vmem:[%s8428_s1 + $0x420] sm:$0xff] }
 0x122   : > { %5746 = vmatprep.mubr.f32.mxu1 %v1200_v31  ;;  %v6615_v62 = vpack.c.bf16 %v5096_v58, %v5095_v50  ;;  %v3605_v31 = vld [vmem:[#allocation2 + $0x42] sm:$0xff]  ;;  %v8187_v50 = vld [vmem:[#allocation2 + $0xf7] sm:$0xff] }
 0x123   : > { %6150 = vmatmul.mubr.f32.gmra.mrb[16].mxu0 %v7833_v2  ;;  %v5015_v2 = vld [vmem:[%s8428_s1 + $0x1a0] sm:$0xff] }
 0x124   : > { %6152 = vmatprep.mubr.f32.mxu0 %v7836_v3  ;;  %v5016_v3 = vld [vmem:[%s8428_s1 + $0x1a8] sm:$0xff] }
 0x125   : > { %5747 = vmatmul.mubr.f32.gmra.mrb[34].mxu1 %v1201_v55  ;;  %v5097_v55 = vld [vmem:[%s8428_s1 + $0x430] sm:$0xff] }
 0x126   : > { %5781 = vmatprep.mubr.f32.mxu1 %v1572_v25  ;;  %v8139_v25 = vld [vmem:[#allocation2 + $0xb7] sm:$0xff] }
 0x127   : > { %6153 = vmatmul.mubr.f32.gmra.mrb[18].mxu0 %v7846_v11  ;;  %v6455_v11 = vpack.c.bf16 %v5016_v3, %v5015_v2  ;;  %v5099_v2 = vld [vmem:[%s8428_s1 + $0x440] sm:$0xff]  ;;  %v5100_v3 = vld [vmem:[%s8428_s1 + $0x448] sm:$0xff] }
 0x128   : > { %6155 = vmatprep.mubr.f32.mxu0 %v7849_v38  ;;  %v8020_v38 = vld [vmem:[#allocation2 + $0x1f] sm:$0xff] }
 0x129   : > { %5782 = vmatmul.mubr.f32.vlgmr.msra.gmra.mrb[0].mxu1 %v1573_v63  ;;  %v3607_v63 = vld [vmem:[#allocation2 + $0x52] sm:$0xff] }
 0x12a   : > { %5784 = vmatprep.mubr.f32.mxu1 %v8015_v5  ;;  %6450 = vmatpush3.bf16.msra.mxu1 %v7923_v28  ;;  %v5019_v28 = vld [vmem:[%s8428_s1 + $0x1c0] sm:$0xff] }
 0x12b   : > { %6156 = vmatmul.mubr.f32.gmra.mrb[20].mxu0 %v7858_v20  ;;  %6452 = vmatprep.subr.bf16.mxu1 %v6451_v43  ;;  %v6459_v20 = vpack.c.bf16 %v5018_v1, %v5017_v6  ;;  %v8148_v6 = vld [vmem:[#allocation2 + $0xbf] sm:$0xff]  ;;  %v8151_v1 = vld [vmem:[#allocation2 + $0xc7] sm:$0xff] }
 0x12c   : > { %6158 = vmatprep.mubr.f32.mxu0 %v7861_v21  ;;  %v8034_v21 = vld [vmem:[#allocation2 + $0x2f] sm:$0xff] }
 0x12d   : > { %5785 = vmatmul.mubr.f32.gmra.mrb[2].mxu1 %v8020_v38 }
 0x12e   : > { %5787 = vmatprep.mubr.f32.mxu1 %v8030_v4  ;;  %6454 = vmatpush3.bf16.msra.mxu1 %v6451_v43  ;;  %v6619_v43 = vpack.c.bf16 %v5098_v52, %v5097_v55  ;;  %v8193_v55 = vld [vmem:[#allocation2 + $0x107] sm:$0xff] }
 0x12f   : > { %6159 = vmatmul.mubr.f32.gmra.mrb[22].mxu0 %v7870_v47  ;;  %6456 = vmatprep.subr.bf16.mxu1 %v6455_v11  ;;  %v6463_v47 = vpack.c.bf16 %v5020_v44, %v5019_v28  ;;  %v3609_v28 = vld [vmem:[#allocation2 + $0x62] sm:$0xff]  ;;  %v5101_v44 = vld [vmem:[%s8428_s1 + $0x450] sm:$0xff] }
 0x130   : > { %6161 = vmatprep.mubr.f32.mxu0 %v7873_v30  ;;  %v8048_v30 = vld [vmem:[#allocation2 + $0x3f] sm:$0xff] }
 0x131   : > { %5788 = vmatmul.mubr.f32.gmra.mrb[4].mxu1 %v8034_v21  ;;  %v3617_v52 = vld [vmem:[#allocation2 + $0xa2] sm:$0xff] }
 0x132   : > { %5790 = vmatprep.mubr.f32.mxu1 %v8044_v7  ;;  %6458 = vmatpush3.bf16.msra.mxu1 %v6455_v11  ;;  %v3608_v11 = vld [vmem:[#allocation2 + $0x5a] sm:$0xff] }
 0x133   : > { %6162 = vmatmul.mubr.f32.gmra.mrb[24].mxu0 %v7882_v51  ;;  %6460 = vmatprep.subr.bf16.mxu1 %v6459_v20  ;;  %v6467_v51 = vpack.c.bf16 %v5022_v19, %v5021_v9  ;;  %v3610_v9 = vld [vmem:[#allocation2 + $0x6a] sm:$0xff] }
 0x134   : > { %6164 = vmatprep.mubr.f32.mxu0 %v7885_v57  ;;  %v8062_v57 = vld [vmem:[#allocation2 + $0x4f] sm:$0xff] }
 0x135   : > { %5791 = vmatmul.mubr.f32.gmra.mrb[6].mxu1 %v8048_v30  ;;  %v8160_v19 = vld [vmem:[#allocation2 + $0xcf] sm:$0xff] }
 0x136   : > { %5793 = vmatprep.mubr.f32.mxu1 %v8058_v22  ;;  %6462 = vmatpush3.bf16.msra.mxu1 %v6459_v20  ;;  %v6623_v20 = vpack.c.bf16 %v5100_v3, %v5099_v2  ;;  %v3619_v2 = vld [vmem:[#allocation2 + $0xb2] sm:$0xff]  ;;  %v3620_v3 = vld [vmem:[#allocation2 + $0xba] sm:$0xff] }
 0x137   : > { %6165 = vmatmul.mubr.f32.gmra.mrb[26].mxu0 %v7894_v59  ;;  %6464 = vmatprep.subr.bf16.mxu1 %v6463_v47  ;;  %v6471_v59 = vpack.c.bf16 %v5024_v17, %v5023_v13  ;;  %v3611_v17 = vld [vmem:[#allocation2 + $0x72] sm:$0xff] }
 0x138   : > { %6167 = vmatprep.mubr.f32.mxu0 %v7897_v61  ;;  %v8076_v61 = vld [vmem:[#allocation2 + $0x5f] sm:$0xff] }
 0x139   : > { %5794 = vmatmul.mubr.f32.gmra.mrb[8].mxu1 %v8062_v57 }
 0x13a   : > { %5796 = vmatprep.mubr.f32.mxu1 %v8072_v27  ;;  %6466 = vmatpush3.bf16.msra.mxu1 %v6463_v47  ;;  %v5102_v47 = vld [vmem:[%s8428_s1 + $0x458] sm:$0xff] }
 0x13b   : > { %6168 = vmatmul.mubr.f32.gmra.mrb[28].mxu0 %v7906_v10  ;;  %6468 = vmatprep.subr.bf16.mxu1 %v6467_v51  ;;  %v6475_v10 = vpack.c.bf16 %v5026_v46, %v5025_v37  ;;  %v6627_v13 = vpack.c.bf16 %v5102_v47, %v5101_v44  ;;  %v5104_v37 = vld [vmem:[%s8428_s1 + $0x468] sm:$0xff]  ;;  %v3612_v46 = vld [vmem:[#allocation2 + $0x7a] sm:$0xff]  ;;  %v3623_v44 = vld [vmem:[#allocation2 + $0xd2] sm:$0xff] }
 0x13c   : > { %6170 = vmatprep.mubr.f32.mxu0 %v7909_v41  ;;  %v8090_v41 = vld [vmem:[#allocation2 + $0x6f] sm:$0xff]  ;;  %v3624_v47 = vld [vmem:[#allocation2 + $0xda] sm:$0xff] }
 0x13d   : > { %5797 = vmatmul.mubr.f32.gmra.mrb[10].mxu1 %v8076_v61 }
 0x13e   : > { %5799 = vmatprep.mubr.f32.mxu1 %v8086_v39  ;;  %6470 = vmatpush3.bf16.msra.mxu1 %v6467_v51  ;;  %v8163_v51 = vld [vmem:[#allocation2 + $0xd7] sm:$0xff] }
 0x13f   : > { %6171 = vmatmul.mubr.f32.gmra.mrb[30].mxu0 %v7918_v23  ;;  %6472 = vmatprep.subr.bf16.mxu1 %v6471_v59  ;;  %v8101_v23 = vld [vmem:[#allocation2 + $0x87] sm:$0xff] }
 0x140   : > { %6173 = vmatprep.mubr.f32.mxu0 %v7921_v24  ;;  %v3231_v24 = vld [vmem:[#allocation2 + $0x141] sm:$0xff] }
 0x141   : > { %5800 = vmatmul.mubr.f32.gmra.mrb[12].mxu1 %v8090_v41 }
 0x142   : > { %5802 = vmatprep.mubr.f32.mxu1 %v8094_v15  ;;  %6474 = vmatpush3.bf16.msra.mxu1 %v6471_v59  ;;  %v5103_v59 = vld [vmem:[%s8428_s1 + $0x460] sm:$0xff] }
 0x143   : > { %6174 = vmatmul.mubr.f32.gmra.mrb[32].mxu0 %v7926_v35  ;;  %6476 = vmatprep.subr.bf16.mxu1 %v6475_v10  ;;  %v5094_v35 = vld [vmem:[%s8428_s1 + $0x418] sm:$0xff] }
 0x144   : > { %6176 = vmatprep.mubr.f32.mxu0 %v3230_v45  ;;  %v6611_v12 = vpack.c.bf16 %v5094_v35, %v5093_v53  ;;  %v8175_v45 = vld [vmem:[#allocation2 + $0xe7] sm:$0xff]  ;;  %v5105_v35 = vld [vmem:[%s8428_s1 + $0x470] sm:$0xff] }
 0x145   : > { %5803 = vmatmul.mubr.f32.gmra.mrb[14].mxu1 %v8098_v16  ;;  %v3613_v53 = vld [vmem:[#allocation2 + $0x82] sm:$0xff] }
 0x146   : > { %5805 = vmatprep.mubr.f32.mxu1 %v8101_v23  ;;  %6478 = vmatpush3.bf16.msra.mxu1 %v6475_v10  ;;  %v8172_v10 = vld [vmem:[#allocation2 + $0xdf] sm:$0xff] }
 0x147   : > { %6177 = vmatmul.mubr.f32.gmra.mrb[34].mxu0 %v3231_v24  ;;  %6639 = vmatprep.subr.bf16.mxu1 %v7108_v18  ;;  %v6631_v24 = vpack.c.bf16 %v5104_v37, %v5103_v59  ;;  %v4028_v59 = vld [vmem:[#allocation2 + $0xcb] sm:$0xff] }
 0x148   : > { %6211 = vmatprep.mubr.f32.mxu0 %v3602_v36  ;;  %v5106_v36 = vld [vmem:[%s8428_s1 + $0x478] sm:$0xff]  ;;  %v2403_v37 = vld [vmem:[#allocation2 + $0xb0] sm:$0xff] }
 0x149   : > { %5806 = vmatmul.mubr.f32.gmra.mrb[16].mxu1 %v8111_v42  ;;  %v6635_v58 = vpack.c.bf16 %v5106_v36, %v5105_v35  ;;  %v4031_v35 = vld [vmem:[#allocation2 + $0xe3] sm:$0xff]  ;;  %v4032_v36 = vld [vmem:[#allocation2 + $0xeb] sm:$0xff] }
 0x14a   : > { %5808 = vmatprep.mubr.f32.mxu1 %v8114_v49 }
 0x14b   : > { %6212 = vmatmul.mubr.f32.vlgmr.msra.gmra.mrb[0].mxu0 %v3603_v14  ;;  %v8184_v14 = vld [vmem:[#allocation2 + $0xef] sm:$0xff] }
 0x14c   : > { %6610 = vmatpush3.bf16.msra.mxu0 %v7994_v60  ;;  %6214 = vmatprep.mubr.f32.mxu0 %v3604_v54  ;;  %v3606_v60 = vld [vmem:[#allocation2 + $0x4a] sm:$0xff]  ;;  %v3615_v54 = vld [vmem:[#allocation2 + $0x92] sm:$0xff] }
 0x14d   : > { %5809 = vmatmul.mubr.f32.gmra.mrb[18].mxu1 %v8123_v29  ;;  %6612 = vmatprep.subr.bf16.mxu0 %v6611_v12 }
 0x14e   : > { %5811 = vmatprep.mubr.f32.mxu1 %v8127_v33 }
 0x14f   : > { %6215 = vmatmul.mubr.f32.gmra.mrb[2].mxu0 %v3605_v31  ;;  %v8190_v31 = vld [vmem:[#allocation2 + $0xff] sm:$0xff] }
 0x150   : > { %6217 = vmatprep.mubr.f32.mxu0 %v3606_v60  ;;  %6614 = vmatpush3.bf16.msra.mxu0 %v6611_v12  ;;  %v3614_v12 = vld [vmem:[#allocation2 + $0x8a] sm:$0xff] }
 0x151   : > { %5812 = vmatmul.mubr.f32.gmra.mrb[20].mxu1 %v8136_v34  ;;  %6616 = vmatprep.subr.bf16.mxu0 %v6615_v62  ;;  %v3618_v60 = vld [vmem:[#allocation2 + $0xaa] sm:$0xff] }
 0x152   : > { %5814 = vmatprep.mubr.f32.mxu1 %v8139_v25 }
 0x153   : > { %6218 = vmatmul.mubr.f32.gmra.mrb[4].mxu0 %v3607_v63  ;;  %v8199_v63 = vld [vmem:[#allocation2 + $0x117] sm:$0xff] }
 0x154   : > { %6220 = vmatprep.mubr.f32.mxu0 %v3608_v11  ;;  %6618 = vmatpush3.bf16.msra.mxu0 %v6615_v62  ;;  %v3616_v62 = vld [vmem:[#allocation2 + $0x9a] sm:$0xff] }
 0x155   : > { %5815 = vmatmul.mubr.f32.gmra.mrb[22].mxu1 %v8148_v6  ;;  %6620 = vmatprep.subr.bf16.mxu0 %v6619_v43  ;;  %v8202_v11 = vld [vmem:[#allocation2 + $0x11f] sm:$0xff] }
 0x156   : > { %5817 = vmatprep.mubr.f32.mxu1 %v8151_v1 }
 0x157   : > { %6221 = vmatmul.mubr.f32.gmra.mrb[6].mxu0 %v3609_v28  ;;  %v3622_v28 = vld [vmem:[#allocation2 + $0xca] sm:$0xff] }
 0x158   : > { %6223 = vmatprep.mubr.f32.mxu0 %v3610_v9  ;;  %6622 = vmatpush3.bf16.msra.mxu0 %v6619_v43  ;;  %v8196_v43 = vld [vmem:[#allocation2 + $0x10f] sm:$0xff] }
 0x159   : > { %5818 = vmatmul.mubr.f32.gmra.mrb[24].mxu1 %v8160_v19  ;;  %6624 = vmatprep.subr.bf16.mxu0 %v6623_v20  ;;  %v3626_v9 = vld [vmem:[#allocation2 + $0xea] sm:$0xff] }
 0x15a   : > { %5820 = vmatprep.mubr.f32.mxu1 %v8163_v51 }
 0x15b   : > { %6224 = vmatmul.mubr.f32.gmra.mrb[8].mxu0 %v3611_v17  ;;  %v4027_v17 = vld [vmem:[#allocation2 + $0xc3] sm:$0xff] }
 0x15c   : > { %6226 = vmatprep.mubr.f32.mxu0 %v3612_v46  ;;  %6626 = vmatpush3.bf16.msra.mxu0 %v6623_v20  ;;  %v3621_v20 = vld [vmem:[#allocation2 + $0xc2] sm:$0xff]  ;;  %v2404_v46 = vld [vmem:[#allocation2 + $0xb8] sm:$0xff] }
 0x15d   : > { %5821 = vmatmul.mubr.f32.gmra.mrb[26].mxu1 %v8172_v10  ;;  %6628 = vmatprep.subr.bf16.mxu0 %v6627_v13 }
 0x15e   : > { %5823 = vmatprep.mubr.f32.mxu1 %v8175_v45 }
 0x15f   : > { %6227 = vmatmul.mubr.f32.gmra.mrb[10].mxu0 %v3613_v53  ;;  %v2406_v53 = vld [vmem:[#allocation2 + $0xc8] sm:$0xff] }
 0x160   : > { %6229 = vmatprep.mubr.f32.mxu0 %v3614_v12  ;;  %6630 = vmatpush3.bf16.msra.mxu0 %v6627_v13  ;;  %v2402_v13 = vld [vmem:[#allocation2 + $0xa8] sm:$0xff]  ;;  %v2407_v12 = vld [vmem:[#allocation2 + $0xd0] sm:$0xff] }
 0x161   : > { %5824 = vmatmul.mubr.f32.gmra.mrb[28].mxu1 %v8184_v14  ;;  %6632 = vmatprep.subr.bf16.mxu0 %v6631_v24 }
 0x162   : > { %5826 = vmatprep.mubr.f32.mxu1 %v8187_v50 }
 0x163   : > { %6230 = vmatmul.mubr.f32.gmra.mrb[12].mxu0 %v3615_v54  ;;  %v2409_v54 = vld [vmem:[#allocation2 + $0xe0] sm:$0xff] }
 0x164   : > { %6232 = vmatprep.mubr.f32.mxu0 %v3616_v62  ;;  %6634 = vmatpush3.bf16.msra.mxu0 %v6631_v24  ;;  %v2405_v24 = vld [vmem:[#allocation2 + $0xc0] sm:$0xff]  ;;  %v2410_v62 = vld [vmem:[#allocation2 + $0xe8] sm:$0xff] }
 0x165   : > { %5827 = vmatmul.mubr.f32.gmra.mrb[30].mxu1 %v8190_v31  ;;  %6636 = vmatprep.subr.bf16.mxu0 %v6635_v58 }
 0x166   : > { %5829 = vmatprep.mubr.f32.mxu1 %v8193_v55 }
 0x167   : > { %6233 = vmatmul.mubr.f32.gmra.mrb[14].mxu0 %v3617_v52  ;;  %v2411_v52 = vld [vmem:[#allocation2 + $0xf0] sm:$0xff] }
 0x168   : > { %6235 = vmatprep.mubr.f32.mxu0 %v3618_v60  ;;  %6638 = vmatpush3.bf16.msra.mxu0 %v6635_v58  ;;  %v4034_v58 = vld [vmem:[#allocation2 + $0xfb] sm:$0xff] }
 0x169   : > { %5830 = vmatmul.mubr.f32.gmra.mrb[32].mxu1 %v8196_v43  ;;  %v2412_v60 = vld [vmem:[#allocation2 + $0xf8] sm:$0xff] }
 0x16a   : > { %5832 = vmatprep.mubr.f32.mxu1 %v8199_v63 }
 0x16b   : > { %6236 = vmatmul.mubr.f32.gmra.mrb[16].mxu0 %v3619_v2  ;;  %v2413_v2 = vld [vmem:[#allocation2 + $0x100] sm:$0xff] }
 0x16c   : > { %6238 = vmatprep.mubr.f32.mxu0 %v3620_v3  ;;  %v2414_v3 = vld [vmem:[#allocation2 + $0x108] sm:$0xff] }
 0x16d   : > { %5833 = vmatmul.mubr.f32.gmra.mrb[34].mxu1 %v8202_v11 }
 0x16e   : > { %5867 = vmatprep.mubr.f32.mxu1 %v8015_v5  ;;  %v3625_v5 = vld [vmem:[#allocation2 + $0xe2] sm:$0xff] }
 0x16f   : > { %6239 = vmatmul.mubr.f32.gmra.mrb[18].mxu0 %v3621_v20  ;;  %v4040_v20 = vld [vmem:[#allocation2 + $0x12b] sm:$0xff] }
 0x170   : > { %6241 = vmatprep.mubr.f32.mxu0 %v3622_v28  ;;  %v2415_v28 = vld [vmem:[#allocation2 + $0x110] sm:$0xff] }
 0x171   : > { %5868 = vmatmul.mubr.f32.vlgmr.msra.gmra.mrb[0].mxu1 %v8020_v38  ;;  %v3628_v38 = vld [vmem:[#allocation2 + $0xfa] sm:$0xff] }
 0x172   : > { %5870 = vmatprep.mubr.f32.mxu1 %v8030_v4  ;;  %6647 = vmatpush3.bf16.msra.mxu1 %v7108_v18  ;;  %v3627_v18 = vld [vmem:[#allocation2 + $0xf2] sm:$0xff]  ;;  %v3630_v4 = vld [vmem:[#allocation2 + $0x10a] sm:$0xff] }
 0x173   : > { %6242 = vmatmul.mubr.f32.gmra.mrb[20].mxu0 %v3623_v44  ;;  %6640 = vmatprep.subr.bf16.mxu1 %v7129_v26  ;;  %v2416_v44 = vld [vmem:[#allocation2 + $0x118] sm:$0xff] }
 0x174   : > { %6244 = vmatprep.mubr.f32.mxu0 %v3624_v47  ;;  %v4041_v47 = vld [vmem:[#allocation2 + $0x133] sm:$0xff] }
 0x175   : > { %5871 = vmatmul.mubr.f32.gmra.mrb[2].mxu1 %v8034_v21  ;;  %v3632_v21 = vld [vmem:[#allocation2 + $0x11a] sm:$0xff] }
 0x176   : > { %5873 = vmatprep.mubr.f32.mxu1 %v8044_v7  ;;  %6648 = vmatpush3.bf16.msra.mxu1 %v7129_v26  ;;  %v3629_v26 = vld [vmem:[#allocation2 + $0x102] sm:$0xff]  ;;  %v3634_v7 = vld [vmem:[#allocation2 + $0x12a] sm:$0xff] }
 0x177   : > { %6245 = vmatmul.mubr.f32.gmra.mrb[22].mxu0 %v3625_v5  ;;  %6641 = vmatprep.subr.bf16.mxu1 %v7145_v32  ;;  %v4042_v5 = vld [vmem:[#allocation2 + $0x13b] sm:$0xff] }
 0x178   : > { %6247 = vmatprep.mubr.f32.mxu0 %v3626_v9  ;;  %v2417_v9 = vld [vmem:[#allocation2 + $0x120] sm:$0xff] }
 0x179   : > { %5874 = vmatmul.mubr.f32.gmra.mrb[4].mxu1 %v8048_v30  ;;  %v3636_v30 = vld [vmem:[#allocation2 + $0x13a] sm:$0xff] }
 0x17a   : > { %5876 = vmatprep.mubr.f32.mxu1 %v8058_v22  ;;  %6649 = vmatpush3.bf16.msra.mxu1 %v7145_v32  ;;  %v3631_v32 = vld [vmem:[#allocation2 + $0x112] sm:$0xff] }
 0x17b   : > { %6248 = vmatmul.mubr.f32.gmra.mrb[24].mxu0 %v3627_v18  ;;  %6642 = vmatprep.subr.bf16.mxu1 %v7167_v40  ;;  %v4008_v22 = vld [vmem:[#allocation2 + $0x2b] sm:$0xff] }
 0x17c   : > { %6250 = vmatprep.mubr.f32.mxu0 %v3628_v38  ;;  %v2418_v18 = vld [vmem:[#allocation2 + $0x128] sm:$0xff] }
 0x17d   : > { %5877 = vmatmul.mubr.f32.gmra.mrb[6].mxu1 %v8062_v57  ;;  %v4010_v57 = vld [vmem:[#allocation2 + $0x3b] sm:$0xff]  ;;  %v4043_v38 = vld [vmem:[#allocation2 + $0x143] sm:$0xff] }
 0x17e   : > { %5879 = vmatprep.mubr.f32.mxu1 %v8072_v27  ;;  %6650 = vmatpush3.bf16.msra.mxu1 %v7167_v40  ;;  %v3633_v40 = vld [vmem:[#allocation2 + $0x122] sm:$0xff] }
 0x17f   : > { %6251 = vmatmul.mubr.f32.gmra.mrb[26].mxu0 %v3629_v26  ;;  %6643 = vmatprep.subr.bf16.mxu1 %v7189_v48  ;;  %v4011_v27 = vld [vmem:[#allocation2 + $0x43] sm:$0xff]  ;;  %v2419_v26 = vld [vmem:[#allocation2 + $0x130] sm:$0xff] }
 0x180   : > { %6253 = vmatprep.mubr.f32.mxu0 %v3630_v4 }
 0x181   : > { %5880 = vmatmul.mubr.f32.gmra.mrb[8].mxu1 %v8076_v61  ;;  %v4012_v61 = vld [vmem:[#allocation2 + $0x4b] sm:$0xff] }
 0x182   : > { %5882 = vmatprep.mubr.f32.mxu1 %v8086_v39  ;;  %6651 = vmatpush3.bf16.msra.mxu1 %v7189_v48  ;;  %v3635_v48 = vld [vmem:[#allocation2 + $0x132] sm:$0xff]  ;;  %v4014_v39 = vld [vmem:[#allocation2 + $0x5b] sm:$0xff] }
 0x183   : > { %6254 = vmatmul.mubr.f32.gmra.mrb[28].mxu0 %v3631_v32  ;;  %6644 = vmatprep.subr.bf16.mxu1 %v7211_v56 }
 0x184   : > { %6256 = vmatprep.mubr.f32.mxu0 %v3632_v21  ;;  %v7001_v21 = vmov 0.0  }
 0x185   : > { %5883 = vmatmul.mubr.f32.gmra.mrb[10].mxu1 %v8090_v41  ;;  %v4015_v41 = vld [vmem:[#allocation2 + $0x63] sm:$0xff]  ;;  %4822 = vst [vmem:[%s8259_s17] sm:$0xff] %v7001_v21  ;;  %4823 = vst [vmem:[%s8259_s17 + $0x8] sm:$0xff] %v7001_v21 }
 0x186   : > { %5885 = vmatprep.mubr.f32.mxu1 %v8094_v15  ;;  %6652 = vmatpush3.bf16.msra.mxu1 %v7211_v56  ;;  %v3637_v56 = vld [vmem:[#allocation2 + $0x142] sm:$0xff]  ;;  %v4016_v15 = vld [vmem:[#allocation2 + $0x6b] sm:$0xff]  ;;  %4824 = vst [vmem:[%s8259_s17 + $0x10] sm:$0xff] %v7001_v21  ;;  %4861 = vst [vmem:[%s8259_s17 + $0x138] sm:$0xff] %v7001_v21 }
 0x187   : > { %6257 = vmatmul.mubr.f32.gmra.mrb[30].mxu0 %v3633_v40  ;;  %6645 = vmatprep.subr.bf16.mxu1 %v7233_v0  ;;  %4862 = vst [vmem:[%s8259_s17 + $0x140] sm:$0xff] %v7001_v21  ;;  %4863 = vst [vmem:[%s8259_s17 + $0x148] sm:$0xff] %v7001_v21 }
 0x188   : > { %6259 = vmatprep.mubr.f32.mxu0 %v3634_v7 }
 0x189   : > { %5886 = vmatmul.mubr.f32.gmra.mrb[12].mxu1 %v8098_v16  ;;  %v4017_v16 = vld [vmem:[#allocation2 + $0x73] sm:$0xff] }
 0x18a   : > { %5888 = vmatprep.mubr.f32.mxu1 %v8101_v23  ;;  %6653 = vmatpush3.bf16.msra.mxu1 %v7233_v0  ;;  %v4009_v0 = vld [vmem:[#allocation2 + $0x33] sm:$0xff]  ;;  %v4018_v23 = vld [vmem:[#allocation2 + $0x7b] sm:$0xff] }
 0x18b   : > { %6260 = vmatmul.mubr.f32.gmra.mrb[32].mxu0 %v3635_v48  ;;  %6646 = vmatprep.subr.bf16.mxu1 %v7255_v8  ;;  %v4494_v48 = vpop.permute.xlu1 %4493 }
 0x18c   : > { %6262 = vmatprep.mubr.f32.mxu0 %v3636_v30  ;;  %v4489_v30 = vpop.permute.xlu0 %4488 }
 0x18d   : > { %5889 = vmatmul.mubr.f32.gmra.mrb[14].mxu1 %v8111_v42  ;;  %v4019_v42 = vld [vmem:[#allocation2 + $0x83] sm:$0xff] }
 0x18e   : > { %5891 = vmatprep.mubr.f32.mxu1 %v8114_v49  ;;  %6654 = vmatpush3.bf16.msra.mxu1 %v7255_v8  ;;  %v4013_v8 = vld [vmem:[#allocation2 + $0x53] sm:$0xff]  ;;  %v4020_v49 = vld [vmem:[#allocation2 + $0x8b] sm:$0xff] }
 0x18f   : > { %6263 = vmatmul.mubr.f32.gmra.mrb[34].mxu0 %v3637_v56 }
 0x190   : > { %6297 = vmatprep.mubr.f32.mxu0 %v4008_v22 }
 0x191   : > { %5892 = vmatmul.mubr.f32.gmra.mrb[16].mxu1 %v8123_v29  ;;  %v4021_v29 = vld [vmem:[#allocation2 + $0x93] sm:$0xff] }
 0x192   : > { %5894 = vmatprep.mubr.f32.mxu1 %v8127_v33  ;;  %v4022_v33 = vld [vmem:[#allocation2 + $0x9b] sm:$0xff] }
 0x193   : > { %6298 = vmatmul.mubr.f32.vlgmr.msra.gmra.mrb[0].mxu0 %v4009_v0  ;;  %v4504_v0 = vpop.permute.xlu1 %4503 }
 0x194   : > { %6300 = vmatprep.mubr.f32.mxu0 %v4010_v57 }
 0x195   : > { %5895 = vmatmul.mubr.f32.gmra.mrb[18].mxu1 %v8136_v34  ;;  %v4023_v34 = vld [vmem:[#allocation2 + $0xa3] sm:$0xff] }
 0x196   : > { %5897 = vmatprep.mubr.f32.mxu1 %v8139_v25  ;;  %v4024_v25 = vld [vmem:[#allocation2 + $0xab] sm:$0xff] }
 0x197   : > { %6301 = vmatmul.mubr.f32.gmra.mrb[2].mxu0 %v4011_v27  ;;  %v4499_v27 = vpop.permute.xlu0 %4498 }
 0x198   : > { %6303 = vmatprep.mubr.f32.mxu0 %v4012_v61 }
 0x199   : > { %5898 = vmatmul.mubr.f32.gmra.mrb[20].mxu1 %v8148_v6  ;;  %v2012_v6 = vld [vmem:[#allocation2 + $0x127] sm:$0xff] }
 0x19a   : > { %5900 = vmatprep.mubr.f32.mxu1 %v8151_v1  ;;  %v4025_v1 = vld [vmem:[#allocation2 + $0xb3] sm:$0xff] }
 0x19b   : > { %6304 = vmatmul.mubr.f32.gmra.mrb[4].mxu0 %v4013_v8 }
 0x19c   : > { %6306 = vmatprep.mubr.f32.mxu0 %v4014_v39 }
 0x19d   : > { %5901 = vmatmul.mubr.f32.gmra.mrb[22].mxu1 %v8160_v19  ;;  %v4026_v19 = vld [vmem:[#allocation2 + $0xbb] sm:$0xff] }
 0x19e   : > { %5903 = vmatprep.mubr.f32.mxu1 %v8163_v51  ;;  %v2013_v51 = vld [vmem:[#allocation2 + $0x12f] sm:$0xff] }
 0x19f   : > { %6307 = vmatmul.mubr.f32.gmra.mrb[6].mxu0 %v4015_v41  ;;  %v4514_v41 = vpop.permute.xlu1 %4513 }
 0x1a0   : > { %6309 = vmatprep.mubr.f32.mxu0 %v4016_v15  ;;  %v4509_v15 = vpop.permute.xlu0 %4508 }
 0x1a1   : > { %5904 = vmatmul.mubr.f32.gmra.mrb[24].mxu1 %v8172_v10  ;;  %v4029_v10 = vld [vmem:[#allocation2 + $0xd3] sm:$0xff] }
 0x1a2   : > { %5906 = vmatprep.mubr.f32.mxu1 %v8175_v45  ;;  %v4030_v45 = vld [vmem:[#allocation2 + $0xdb] sm:$0xff] }
 0x1a3   : > { %6310 = vmatmul.mubr.f32.gmra.mrb[8].mxu0 %v4017_v16 }
 0x1a4   : > { %6312 = vmatprep.mubr.f32.mxu0 %v4018_v23 }
 0x1a5   : > { %5907 = vmatmul.mubr.f32.gmra.mrb[26].mxu1 %v8184_v14  ;;  %v2408_v14 = vld [vmem:[#allocation2 + $0xd8] sm:$0xff] }
 0x1a6   : > { %5909 = vmatprep.mubr.f32.mxu1 %v8187_v50  ;;  %v4033_v50 = vld [vmem:[#allocation2 + $0xf3] sm:$0xff] }
 0x1a7   : > { %6313 = vmatmul.mubr.f32.gmra.mrb[10].mxu0 %v4019_v42  ;;  %v8275_v42 = vpop.permute.xlu1 %4523 }
 0x1a8   : > { %6315 = vmatprep.mubr.f32.mxu0 %v4020_v49 }
 0x1a9   : > { %5910 = vmatmul.mubr.f32.gmra.mrb[28].mxu1 %v8190_v31  ;;  %v4035_v31 = vld [vmem:[#allocation2 + $0x103] sm:$0xff] }
 0x1aa   : > { %5912 = vmatprep.mubr.f32.mxu1 %v8193_v55  ;;  %v4036_v55 = vld [vmem:[#allocation2 + $0x10b] sm:$0xff] }
 0x1ab   : > { %6316 = vmatmul.mubr.f32.gmra.mrb[12].mxu0 %v4021_v29  ;;  %v8279_v29 = vpop.permute.xlu0 %4518 }
 0x1ac   : > { %6318 = vmatprep.mubr.f32.mxu0 %v4022_v33 }
 0x1ad   : > { %5913 = vmatmul.mubr.f32.gmra.mrb[30].mxu1 %v8196_v43  ;;  %v4037_v43 = vld [vmem:[#allocation2 + $0x113] sm:$0xff] }
 0x1ae   : > { %5915 = vmatprep.mubr.f32.mxu1 %v8199_v63  ;;  %v4038_v63 = vld [vmem:[#allocation2 + $0x11b] sm:$0xff] }
 0x1af   : > { %6319 = vmatmul.mubr.f32.gmra.mrb[14].mxu0 %v4023_v34 }
 0x1b0   : > { %6321 = vmatprep.mubr.f32.mxu0 %v4024_v25 }
 0x1b1   : > { %5916 = vmatmul.mubr.f32.gmra.mrb[32].mxu1 %v8202_v11  ;;  %v4039_v11 = vld [vmem:[#allocation2 + $0x123] sm:$0xff] }
 0x1b2   : > { %5918 = vmatprep.mubr.f32.mxu1 %v2012_v6  ;;  %v8287_v6 = vpop.permute.xlu1 %4533 }
 0x1b3   : > { %6322 = vmatmul.mubr.f32.gmra.mrb[16].mxu0 %v4025_v1  ;;  %v8292_v1 = vld [vmem:[%s8429_s2] ss:$0 sm:$0xff] }
 0x1b4   : > { %6324 = vmatprep.mubr.f32.mxu0 %v4026_v19  ;;  %v8294_v19 = vpop.permute.xlu0 %4528 }
 0x1b5   : > { %5919 = vmatmul.mubr.f32.gmra.mrb[34].mxu1 %v2013_v51 }
 0x1b6   : > { %5980 = vmatprep.mubr.f32.mxu1 %v2402_v13 }
 0x1b7   : > { %6325 = vmatmul.mubr.f32.gmra.mrb[18].mxu0 %v4027_v17 }
 0x1b8   : > { %6327 = vmatprep.mubr.f32.mxu0 %v4028_v59 }
 0x1b9   : > { %5981 = vmatmul.mubr.f32.vlgmr.msra.gmra.mrb[18].mxu1 %v2403_v37 }
 0x1ba   : > { %5983 = vmatprep.mubr.f32.mxu1 %v2404_v46 }
 0x1bb   : > { %6328 = vmatmul.mubr.f32.gmra.mrb[20].mxu0 %v4029_v10 }
 0x1bc   : > { %6330 = vmatprep.mubr.f32.mxu0 %v4030_v45  ;;  %v8302_v45 = vpop.permute.xlu1 %4543 }
 0x1bd   : > { %5984 = vmatmul.mubr.f32.gmra.mrb[20].mxu1 %v2405_v24 }
 0x1be   : > { %5986 = vmatprep.mubr.f32.mxu1 %v2406_v53  ;;  %v8304_v53 = vpop.permute.xlu0 %4538 }
 0x1bf   : > { %6331 = vmatmul.mubr.f32.gmra.mrb[22].mxu0 %v4031_v35 }
 0x1c0   : > { %6333 = vmatprep.mubr.f32.mxu0 %v4032_v36 }
 0x1c1   : > { %5987 = vmatmul.mubr.f32.gmra.mrb[22].mxu1 %v2407_v12 }
 0x1c2   : > { %5989 = vmatprep.mubr.f32.mxu1 %v2408_v14 }
 0x1c3   : > { %6334 = vmatmul.mubr.f32.gmra.mrb[24].mxu0 %v4033_v50 }
 0x1c4   : > { %6336 = vmatprep.mubr.f32.mxu0 %v4034_v58 }
 0x1c5   : > { %5990 = vmatmul.mubr.f32.gmra.mrb[24].mxu1 %v2409_v54 }
 0x1c6   : > { %5992 = vmatprep.mubr.f32.mxu1 %v2410_v62 }
 0x1c7   : > { %6337 = vmatmul.mubr.f32.gmra.mrb[26].mxu0 %v4035_v31 }
 0x1c8   : > { %6339 = vmatprep.mubr.f32.mxu0 %v4036_v55 }
 0x1c9   : > { %5993 = vmatmul.mubr.f32.gmra.mrb[26].mxu1 %v2411_v52 }
 0x1ca   : > { %5995 = vmatprep.mubr.f32.mxu1 %v2412_v60 }
 0x1cb   : > { %6340 = vmatmul.mubr.f32.gmra.mrb[28].mxu0 %v4037_v43 }
 0x1cc   : > { %6342 = vmatprep.mubr.f32.mxu0 %v4038_v63  ;;  %v8311_v63 = vpop.permute.xlu1 %4553 }
 0x1cd   : > { %5996 = vmatmul.mubr.f32.gmra.mrb[28].mxu1 %v2413_v2 }
 0x1ce   : > { %5998 = vmatprep.mubr.f32.mxu1 %v2414_v3 }
 0x1cf   : > { %6343 = vmatmul.mubr.f32.gmra.mrb[30].mxu0 %v4039_v11 }
 0x1d0   : > { %6345 = vmatprep.mubr.f32.mxu0 %v4040_v20 }
 0x1d1   : > { %5999 = vmatmul.mubr.f32.gmra.mrb[30].mxu1 %v2415_v28  ;;  %v8314_v28 = vpop.permute.xlu0 %4548 }
 0x1d2   : > { %6001 = vmatprep.mubr.f32.mxu1 %v2416_v44 }
 0x1d3   : > { %6346 = vmatmul.mubr.f32.gmra.mrb[32].mxu0 %v4041_v47 }
 0x1d4   : > { %6348 = vmatprep.mubr.f32.mxu0 %v4042_v5 }
 0x1d5   : > { %6002 = vmatmul.mubr.f32.gmra.mrb[32].mxu1 %v2417_v9 }
 0x1d6   : > { %6004 = vmatprep.mubr.f32.mxu1 %v2418_v18 }
 0x1d7   : > { %6349 = vmatmul.mubr.f32.gmra.mrb[34].mxu0 %v4043_v38 }
 0x1d9   : > { %6005 = vmatmul.mubr.f32.gmra.mrb[34].mxu1 %v2419_v26 }
 0x244   : > { %v5869_v4 = vpop.f32.mrb[0].mxu1 }
 0x245   : > { %v2097_v32 = vpop.f32.mrb[1].mxu1  ;;  %v6655_v13 = vadd.f32 %v5869_v4, %v8292_v1 }
 0x246   : > { %v6657_v59 = vadd.f32 %v8292_v1, %v2097_v32 }
 0x248   : > { %v5872_v40 = vpop.f32.mrb[2].mxu1 }
 0x249   : > { %v2107_v7 = vpop.f32.mrb[3].mxu1  ;;  %v6659_v35 = vadd.f32 %v5872_v40, %v8292_v1 }
 0x24a   : > { %v6661_v12 = vadd.f32 %v8292_v1, %v2107_v7 }
 0x24c   : > { %v5875_v56 = vpop.f32.mrb[4].mxu1 }
 0x24d   : > { %v2117_v22 = vpop.f32.mrb[5].mxu1  ;;  %v6663_v60 = vadd.f32 %v5875_v56, %v8292_v1 }
 0x24e   : > { %v6665_v2 = vadd.f32 %v8292_v1, %v2117_v22  ;;  %v8321_v22 = vpop.permute.xlu1 %4563 }
 0x250   : > { %v5878_v57 = vpop.f32.mrb[6].mxu1 }
 0x251   : > { %v2127_v61 = vpop.f32.mrb[7].mxu1  ;;  %v6667_v38 = vadd.f32 %v5878_v57, %v8292_v1  ;;  %v8324_v57 = vpop.permute.xlu0 %4558 }
 0x252   : > { %v6669_v26 = vadd.f32 %v8292_v1, %v2127_v61 }
 0x254   : > { %v8267_v8 = vpop.f32.mrb[8].mxu1 }
 0x255   : > { %v8269_v39 = vpop.f32.mrb[9].mxu1  ;;  %v6671_v61 = vadd.f32 %v8267_v8, %v8292_v1 }
 0x258   : > { %v8271_v16 = vpop.f32.mrb[10].mxu1 }
 0x259   : > { %v8273_v23 = vpop.f32.mrb[11].mxu1 }
 0x25c   : > { %v8277_v49 = vpop.f32.mrb[12].mxu1 }
 0x25d   : > { %v8281_v33 = vpop.f32.mrb[13].mxu1 }
 0x260   : > { %v8283_v34 = vpop.f32.mrb[14].mxu1 }
 0x261   : > { %v8285_v25 = vpop.f32.mrb[15].mxu1 }
 0x264   : > { %v8296_v51 = vpop.f32.mrb[16].mxu1 }
 0x265   : > { %v8299_v17 = vpop.f32.mrb[17].mxu1 }
 0x266   : > { %v6299_v37 = vpop.f32.mrb[0].mxu0 }
 0x267   : > { %v6656_v46 = vadd.f32 %v6655_v13, %v6299_v37  ;;  %v4127_v10 = vpop.f32.mrb[1].mxu0 }
 0x268   : > { %v6658_v24 = vadd.f32 %v6657_v59, %v4127_v10 }
 0x269   : > { %v4667_v36 = vmul.f32 %v6656_v46, %v4494_v48 }
 0x26a   : > { %v4666_v14 = vmul.f32 %v6658_v24, %v4489_v30  ;;  %v6302_v50 = vpop.f32.mrb[2].mxu0 }
 0x26b   : > { %v4745_v58 = vmul.f32 %v4667_v36, %v4667_v36  ;;  %4826 = vst [vmem:[%s8259_s17 + $0x20] sm:$0xff] %v4667_v36  ;;  %v6660_v54 = vadd.f32 %v6659_v35, %v6302_v50  ;;  %v4137_v62 = vpop.f32.mrb[3].mxu0 }
 0x26c   : > { %v4702_v31 = vadd.f32 %v4667_v36, %v4666_v14  ;;  %v4744_v55 = vmul.f32 %v4666_v14, %v4666_v14  ;;  %4825 = vst [vmem:[%s8259_s17 + $0x18] sm:$0xff] %v4666_v14  ;;  %v6662_v52 = vadd.f32 %v6661_v12, %v4137_v62 }
 0x26d   : > { %v4669_v43 = vmul.f32 %v6660_v54, %v4504_v0  ;;  %v8339_v54 = vpop.permute.xlu1 %4573 }
 0x26e   : > { %v4780_v3 = vadd.f32 %v4745_v58, %v4744_v55  ;;  %v4668_v11 = vmul.f32 %v6662_v52, %v4499_v27  ;;  %v6305_v20 = vpop.f32.mrb[4].mxu0 }
 0x26f   : > { %4828 = vst [vmem:[%s8259_s17 + $0x30] sm:$0xff] %v4669_v43  ;;  %v6664_v44 = vadd.f32 %v6663_v60, %v6305_v20  ;;  %v4147_v47 = vpop.f32.mrb[5].mxu0  ;;  %v4747_v32 = vmul.f32 %v4669_v43, %v4669_v43 }
 0x270   : > { %v4703_v5 = vadd.f32 %v4702_v31, %v4668_v11  ;;  %v4746_v9 = vmul.f32 %v4668_v11, %v4668_v11  ;;  %4827 = vst [vmem:[%s8259_s17 + $0x28] sm:$0xff] %v4668_v11  ;;  %v6666_v18 = vadd.f32 %v6665_v2, %v4147_v47 }
 0x271   : > { %v4671_v4 = vmul.f32 %v6664_v44, %v4514_v41  ;;  %v6673_v41 = vadd.f32 %v8292_v1, %v8269_v39  ;;  %v6675_v39 = vadd.f32 %v8271_v16, %v8292_v1 }
 0x272   : > { %v4781_v21 = vadd.f32 %v4780_v3, %v4746_v9  ;;  %v4670_v40 = vmul.f32 %v6666_v18, %v4509_v15  ;;  %v4704_v7 = vadd.f32 %v4703_v5, %v4669_v43  ;;  %v6308_v48 = vpop.f32.mrb[6].mxu0  ;;  %v8342_v43 = vpop.permute.xlu0 %4568 }
 0x273   : > { %4830 = vst [vmem:[%s8259_s17 + $0x40] sm:$0xff] %v4671_v4  ;;  %v6668_v30 = vadd.f32 %v6667_v38, %v6308_v48  ;;  %v4157_v56 = vpop.f32.mrb[7].mxu0  ;;  %v4749_v37 = vmul.f32 %v4671_v4, %v4671_v4 }
 0x274   : > { %v4705_v0 = vadd.f32 %v4704_v7, %v4670_v40  ;;  %v4748_v27 = vmul.f32 %v4670_v40, %v4670_v40  ;;  %v4782_v13 = vadd.f32 %v4781_v21, %v4747_v32  ;;  %4829 = vst [vmem:[%s8259_s17 + $0x38] sm:$0xff] %v4670_v40  ;;  %v6670_v59 = vadd.f32 %v6669_v26, %v4157_v56  ;;  %v8353_v32 = vpop.permute.xlu1 %4583 }
 0x275   : > { %v4673_v15 = vmul.f32 %v6668_v30, %v8275_v42  ;;  %v6677_v42 = vadd.f32 %v8292_v1, %v8273_v23 }
 0x276   : > { %v4783_v46 = vadd.f32 %v4782_v13, %v4748_v27  ;;  %v4672_v10 = vmul.f32 %v6670_v59, %v8279_v29  ;;  %v4706_v24 = vadd.f32 %v4705_v0, %v4671_v4  ;;  %v6311_v35 = vpop.f32.mrb[8].mxu0 }
 0x277   : > { %4832 = vst [vmem:[%s8259_s17 + $0x50] sm:$0xff] %v4673_v15  ;;  %v6672_v36 = vadd.f32 %v6671_v61, %v6311_v35  ;;  %v4167_v12 = vpop.f32.mrb[9].mxu0  ;;  %v4751_v62 = vmul.f32 %v4673_v15, %v4673_v15 }
 0x278   : > { %v4707_v14 = vadd.f32 %v4706_v24, %v4672_v10  ;;  %v4750_v50 = vmul.f32 %v4672_v10, %v4672_v10  ;;  %v4784_v58 = vadd.f32 %v4783_v46, %v4749_v37  ;;  %4831 = vst [vmem:[%s8259_s17 + $0x48] sm:$0xff] %v4672_v10  ;;  %v6674_v8 = vadd.f32 %v6673_v41, %v4167_v12  ;;  %v4594_v46 = vpop.permute.xlu1 %4593 }
 0x279   : > { %v4675_v29 = vmul.f32 %v6672_v36, %v8287_v6  ;;  %v6679_v6 = vadd.f32 %v8277_v49, %v8292_v1 }
 0x27a   : > { %v4785_v31 = vadd.f32 %v4784_v58, %v4750_v50  ;;  %v4674_v55 = vmul.f32 %v6674_v8, %v8294_v19  ;;  %v4708_v52 = vadd.f32 %v4707_v14, %v4673_v15  ;;  %v6314_v60 = vpop.f32.mrb[10].mxu0  ;;  %v6681_v19 = vadd.f32 %v8292_v1, %v8281_v33  ;;  %v8356_v33 = vpop.permute.xlu0 %4578 }
 0x27b   : > { %4834 = vst [vmem:[%s8259_s17 + $0x60] sm:$0xff] %v4675_v29  ;;  %v6676_v2 = vadd.f32 %v6675_v39, %v6314_v60  ;;  %v4177_v16 = vpop.f32.mrb[11].mxu0  ;;  %v4753_v47 = vmul.f32 %v4675_v29, %v4675_v29 }
 0x27c   : > { %v4709_v3 = vadd.f32 %v4708_v52, %v4674_v55  ;;  %v4752_v11 = vmul.f32 %v4674_v55, %v4674_v55  ;;  %v4786_v20 = vadd.f32 %v4785_v31, %v4751_v62  ;;  %4833 = vst [vmem:[%s8259_s17 + $0x58] sm:$0xff] %v4674_v55  ;;  %v6678_v23 = vadd.f32 %v6677_v42, %v4177_v16  ;;  %v4604_v52 = vpop.permute.xlu1 %4603 }
 0x27d   : > { %v4677_v44 = vmul.f32 %v6676_v2, %v8302_v45  ;;  %v6683_v45 = vadd.f32 %v8283_v34, %v8292_v1 }
 0x27e   : > { %v4787_v5 = vadd.f32 %v4786_v20, %v4752_v11  ;;  %v4676_v9 = vmul.f32 %v6678_v23, %v8304_v53  ;;  %v4710_v18 = vadd.f32 %v4709_v3, %v4675_v29  ;;  %v6317_v38 = vpop.f32.mrb[12].mxu0  ;;  %v6685_v53 = vadd.f32 %v8292_v1, %v8285_v25  ;;  %v4589_v14 = vpop.permute.xlu0 %4588 }
 0x27f   : > { %4836 = vst [vmem:[%s8259_s17 + $0x70] sm:$0xff] %v4677_v44  ;;  %v6680_v26 = vadd.f32 %v6679_v6, %v6317_v38  ;;  %v4187_v4 = vpop.f32.mrb[13].mxu0  ;;  %v4755_v30 = vmul.f32 %v4677_v44, %v4677_v44  ;;  %v6687_v25 = vadd.f32 %v8296_v51, %v8292_v1 }
 0x280   : > { %v4711_v21 = vadd.f32 %v4710_v18, %v4676_v9  ;;  %v4754_v40 = vmul.f32 %v4676_v9, %v4676_v9  ;;  %v4788_v49 = vadd.f32 %v4787_v5, %v4753_v47  ;;  %4835 = vst [vmem:[%s8259_s17 + $0x68] sm:$0xff] %v4676_v9  ;;  %v6682_v7 = vadd.f32 %v6681_v19, %v4187_v4 }
 0x281   : > { %v4679_v48 = vmul.f32 %v6680_v26, %v8311_v63  ;;  %v6689_v63 = vadd.f32 %v8292_v1, %v8299_v17 }
 0x282   : > { %v4789_v56 = vadd.f32 %v4788_v49, %v4754_v40  ;;  %v4678_v0 = vmul.f32 %v6682_v7, %v8314_v28  ;;  %v4712_v27 = vadd.f32 %v4711_v21, %v4677_v44  ;;  %v6320_v13 = vpop.f32.mrb[14].mxu0  ;;  %v4599_v11 = vpop.permute.xlu0 %4598 }
 0x283   : > { %4838 = vst [vmem:[%s8259_s17 + $0x80] sm:$0xff] %v4679_v48  ;;  %v6684_v59 = vadd.f32 %v6683_v45, %v6320_v13  ;;  %v4197_v61 = vpop.f32.mrb[15].mxu0  ;;  %v4757_v10 = vmul.f32 %v4679_v48, %v4679_v48  ;;  %v4614_v40 = vpop.permute.xlu1 %4613 }
 0x284   : > { %v4713_v41 = vadd.f32 %v4712_v27, %v4678_v0  ;;  %v4756_v15 = vmul.f32 %v4678_v0, %v4678_v0  ;;  %v4790_v37 = vadd.f32 %v4789_v56, %v4755_v30  ;;  %4837 = vst [vmem:[%s8259_s17 + $0x78] sm:$0xff] %v4678_v0  ;;  %v6686_v34 = vadd.f32 %v6685_v53, %v4197_v61 }
 0x285   : > { %v4681_v28 = vmul.f32 %v6684_v59, %v8321_v22 }
 0x286   : > { %v4791_v24 = vadd.f32 %v4790_v37, %v4756_v15  ;;  %v4680_v35 = vmul.f32 %v6686_v34, %v8324_v57  ;;  %v4714_v36 = vadd.f32 %v4713_v41, %v4679_v48  ;;  %v6323_v12 = vpop.f32.mrb[16].mxu0  ;;  %v4609_v53 = vpop.permute.xlu0 %4608 }
 0x287   : > { %4840 = vst [vmem:[%s8259_s17 + $0x90] sm:$0xff] %v4681_v28  ;;  %v6688_v50 = vadd.f32 %v6687_v25, %v6323_v12  ;;  %v4207_v58 = vpop.f32.mrb[17].mxu0  ;;  %v4759_v42 = vmul.f32 %v4681_v28, %v4681_v28 }
 0x288   : > { %v4715_v8 = vadd.f32 %v4714_v36, %v4680_v35  ;;  %v4758_v51 = vmul.f32 %v4680_v35, %v4680_v35  ;;  %v4792_v39 = vadd.f32 %v4791_v24, %v4757_v10  ;;  %4839 = vst [vmem:[%s8259_s17 + $0x88] sm:$0xff] %v4680_v35  ;;  %v6690_v17 = vadd.f32 %v6689_v63, %v4207_v58  ;;  %v4624_v10 = vpop.permute.xlu1 %4623 }
 0x289   : > { %v4683_v22 = vmul.f32 %v6688_v50, %v8339_v54 }
 0x28a   : > { %v4793_v29 = vadd.f32 %v4792_v39, %v4758_v51  ;;  %v4682_v62 = vmul.f32 %v6690_v17, %v8342_v43  ;;  %v4716_v57 = vadd.f32 %v4715_v8, %v4681_v28  ;;  %v6326_v31 = vpop.f32.mrb[18].mxu0  ;;  %v4619_v50 = vpop.permute.xlu0 %4618 }
 0x28b   : > { %4842 = vst [vmem:[%s8259_s17 + $0xa0] sm:$0xff] %v4683_v22  ;;  %v4217_v55 = vpop.f32.mrb[19].mxu0  ;;  %v4761_v6 = vmul.f32 %v4683_v22, %v4683_v22 }
 0x28c   : > { %v5982_v60 = vpop.f32.mrb[18].mxu1  ;;  %v4717_v2 = vadd.f32 %v4716_v57, %v4682_v62  ;;  %v4760_v16 = vmul.f32 %v4682_v62, %v4682_v62  ;;  %v4794_v3 = vadd.f32 %v4793_v29, %v4759_v42  ;;  %4841 = vst [vmem:[%s8259_s17 + $0x98] sm:$0xff] %v4682_v62 }
 0x28d   : > { %v6691_v20 = vadd.f32 %v5982_v60, %v8292_v1  ;;  %v2593_v23 = vpop.f32.mrb[19].mxu1 }
 0x28e   : > { %v4795_v54 = vadd.f32 %v4794_v3, %v4760_v16  ;;  %v6693_v19 = vadd.f32 %v8292_v1, %v2593_v23  ;;  %v4718_v43 = vadd.f32 %v4717_v2, %v4683_v22  ;;  %v6329_v44 = vpop.f32.mrb[20].mxu0  ;;  %v4634_v23 = vpop.permute.xlu1 %4633 }
 0x28f   : > { %v6692_v47 = vadd.f32 %v6691_v20, %v6326_v31  ;;  %v4227_v5 = vpop.f32.mrb[21].mxu0 }
 0x290   : > { %v5985_v9 = vpop.f32.mrb[20].mxu1  ;;  %v6694_v18 = vadd.f32 %v6693_v19, %v4217_v55  ;;  %v4796_v38 = vadd.f32 %v4795_v54, %v4761_v6 }
 0x291   : > { %v4685_v26 = vmul.f32 %v6692_v47, %v8353_v32  ;;  %v6695_v4 = vadd.f32 %v5985_v9, %v8292_v1  ;;  %v2603_v21 = vpop.f32.mrb[21].mxu1  ;;  %v4629_v47 = vpop.permute.xlu0 %4628 }
 0x292   : > { %v4684_v49 = vmul.f32 %v6694_v18, %v8356_v33  ;;  %v6697_v7 = vadd.f32 %v8292_v1, %v2603_v21  ;;  %v6332_v45 = vpop.f32.mrb[22].mxu0 }
 0x293   : > { %4844 = vst [vmem:[%s8259_s17 + $0xb0] sm:$0xff] %v4685_v26  ;;  %v6696_v48 = vadd.f32 %v6695_v4, %v6329_v44  ;;  %v4237_v30 = vpop.f32.mrb[23].mxu0  ;;  %v4763_v32 = vmul.f32 %v4685_v26, %v4685_v26 }
 0x294   : > { %v4719_v56 = vadd.f32 %v4718_v43, %v4684_v49  ;;  %v4762_v0 = vmul.f32 %v4684_v49, %v4684_v49  ;;  %4843 = vst [vmem:[%s8259_s17 + $0xa8] sm:$0xff] %v4684_v49  ;;  %v5988_v27 = vpop.f32.mrb[22].mxu1  ;;  %v6698_v13 = vadd.f32 %v6697_v7, %v4227_v5 }
 0x295   : > { %v4687_v59 = vmul.f32 %v6696_v48, %v4594_v46  ;;  %v6699_v61 = vadd.f32 %v5988_v27, %v8292_v1  ;;  %v2613_v41 = vpop.f32.mrb[23].mxu1 }
 0x296   : > { %v4797_v33 = vadd.f32 %v4796_v38, %v4762_v0  ;;  %v4686_v15 = vmul.f32 %v6698_v13, %v4589_v14  ;;  %v4720_v37 = vadd.f32 %v4719_v56, %v4685_v26  ;;  %v6701_v34 = vadd.f32 %v8292_v1, %v2613_v41  ;;  %v6335_v25 = vpop.f32.mrb[24].mxu0 }
 0x297   : > { %4846 = vst [vmem:[%s8259_s17 + $0xc0] sm:$0xff] %v4687_v59  ;;  %v6700_v63 = vadd.f32 %v6699_v61, %v6332_v45  ;;  %v4247_v28 = vpop.f32.mrb[25].mxu0  ;;  %v4765_v58 = vmul.f32 %v4687_v59, %v4687_v59 }
 0x298   : > { %v4721_v24 = vadd.f32 %v4720_v37, %v4686_v15  ;;  %v4764_v35 = vmul.f32 %v4686_v15, %v4686_v15  ;;  %v4798_v36 = vadd.f32 %v4797_v33, %v4763_v32  ;;  %4845 = vst [vmem:[%s8259_s17 + $0xb8] sm:$0xff] %v4686_v15  ;;  %v5991_v12 = vpop.f32.mrb[24].mxu1  ;;  %v6702_v46 = vadd.f32 %v6701_v34, %v4237_v30  ;;  %v4644_v32 = vpop.permute.xlu1 %4643 }
 0x299   : > { %v4689_v8 = vmul.f32 %v6700_v63, %v4604_v52  ;;  %v6703_v14 = vadd.f32 %v5991_v12, %v8292_v1  ;;  %v2623_v51 = vpop.f32.mrb[25].mxu1  ;;  %v4639_v37 = vpop.permute.xlu0 %4638 }
 0x29a   : > { %v4799_v39 = vadd.f32 %v4798_v36, %v4764_v35  ;;  %v4688_v17 = vmul.f32 %v6702_v46, %v4599_v11  ;;  %v4722_v22 = vadd.f32 %v4721_v24, %v4687_v59  ;;  %v6705_v42 = vadd.f32 %v8292_v1, %v2623_v51  ;;  %v6338_v29 = vpop.f32.mrb[26].mxu0 }
 0x29b   : > { %4848 = vst [vmem:[%s8259_s17 + $0xd0] sm:$0xff] %v4689_v8  ;;  %v6704_v62 = vadd.f32 %v6703_v14, %v6335_v25  ;;  %v4257_v57 = vpop.f32.mrb[27].mxu0  ;;  %v4767_v52 = vmul.f32 %v4689_v8, %v4689_v8 }
 0x29c   : > { %v4723_v31 = vadd.f32 %v4722_v22, %v4688_v17  ;;  %v4766_v55 = vmul.f32 %v4688_v17, %v4688_v17  ;;  %v4800_v60 = vadd.f32 %v4799_v39, %v4765_v58  ;;  %4847 = vst [vmem:[%s8259_s17 + $0xc8] sm:$0xff] %v4688_v17  ;;  %v5994_v2 = vpop.f32.mrb[26].mxu1  ;;  %v6706_v16 = vadd.f32 %v6705_v42, %v4247_v28 }
 0x29d   : > { %v4691_v3 = vmul.f32 %v6704_v62, %v4614_v40  ;;  %v6707_v20 = vadd.f32 %v5994_v2, %v8292_v1  ;;  %v2633_v11 = vpop.f32.mrb[27].mxu1  ;;  %v4654_v62 = vpop.permute.xlu1 %4653 }
 0x29e   : > { %v4801_v6 = vadd.f32 %v4800_v60, %v4766_v55  ;;  %v4690_v54 = vmul.f32 %v6706_v16, %v4609_v53  ;;  %v4724_v19 = vadd.f32 %v4723_v31, %v4689_v8  ;;  %v6709_v43 = vadd.f32 %v8292_v1, %v2633_v11  ;;  %v6341_v44 = vpop.f32.mrb[28].mxu0  ;;  %v4649_v16 = vpop.permute.xlu0 %4648 }
 0x29f   : > { %4850 = vst [vmem:[%s8259_s17 + $0xe0] sm:$0xff] %v4691_v3  ;;  %v6708_v5 = vadd.f32 %v6707_v20, %v6338_v29  ;;  %v4267_v9 = vpop.f32.mrb[29].mxu0  ;;  %v4769_v40 = vmul.f32 %v4691_v3, %v4691_v3 }
 0x2a0   : > { %v4725_v18 = vadd.f32 %v4724_v19, %v4690_v54  ;;  %v4768_v38 = vmul.f32 %v4690_v54, %v4690_v54  ;;  %v4802_v26 = vadd.f32 %v4801_v6, %v4767_v52  ;;  %4849 = vst [vmem:[%s8259_s17 + $0xd8] sm:$0xff] %v4690_v54  ;;  %v5997_v4 = vpop.f32.mrb[28].mxu1  ;;  %v6710_v21 = vadd.f32 %v6709_v43, %v4257_v57 }
 0x2a1   : > { %v4693_v49 = vmul.f32 %v6708_v5, %v4624_v10  ;;  %v6711_v7 = vadd.f32 %v5997_v4, %v8292_v1  ;;  %v2643_v45 = vpop.f32.mrb[29].mxu1  ;;  %v4664_v4 = vpop.permute.xlu1 %4663 }
 0x2a2   : > { %v4803_v53 = vadd.f32 %v4802_v26, %v4768_v38  ;;  %v4692_v48 = vmul.f32 %v6710_v21, %v4619_v50  ;;  %v4726_v30 = vadd.f32 %v4725_v18, %v4691_v3  ;;  %v6713_v56 = vadd.f32 %v8292_v1, %v2643_v45  ;;  %v6344_v0 = vpop.f32.mrb[30].mxu0  ;;  %v4659_v45 = vpop.permute.xlu0 %4658 }
 0x2a3   : > { %4852 = vst [vmem:[%s8259_s17 + $0xf0] sm:$0xff] %v4693_v49  ;;  %v6712_v27 = vadd.f32 %v6711_v7, %v6341_v44  ;;  %v4277_v13 = vpop.f32.mrb[31].mxu0  ;;  %v4771_v34 = vmul.f32 %v4693_v49, %v4693_v49 }
 0x2a4   : > { %v4727_v59 = vadd.f32 %v4726_v30, %v4692_v48  ;;  %v4770_v61 = vmul.f32 %v4692_v48, %v4692_v48  ;;  %v4804_v41 = vadd.f32 %v4803_v53, %v4769_v40  ;;  %4851 = vst [vmem:[%s8259_s17 + $0xe8] sm:$0xff] %v4692_v48  ;;  %v6000_v33 = vpop.f32.mrb[30].mxu1  ;;  %v6714_v15 = vadd.f32 %v6713_v56, %v4267_v9 }
 0x2a5   : > { %v4695_v25 = vmul.f32 %v6712_v27, %v4634_v23  ;;  %v6715_v63 = vadd.f32 %v6000_v33, %v8292_v1  ;;  %v2653_v28 = vpop.f32.mrb[31].mxu1 }
 0x2a6   : > { %v4805_v10 = vadd.f32 %v4804_v41, %v4770_v61  ;;  %v4694_v24 = vmul.f32 %v6714_v15, %v4629_v47  ;;  %v4728_v35 = vadd.f32 %v4727_v59, %v4693_v49  ;;  %v6717_v36 = vadd.f32 %v8292_v1, %v2653_v28  ;;  %v6347_v12 = vpop.f32.mrb[32].mxu0 }
 0x2a7   : > { %4854 = vst [vmem:[%s8259_s17 + $0x100] sm:$0xff] %v4695_v25  ;;  %v6716_v46 = vadd.f32 %v6715_v63, %v6344_v0  ;;  %v4287_v50 = vpop.f32.mrb[33].mxu0  ;;  %v4773_v17 = vmul.f32 %v4695_v25, %v4695_v25 }
 0x2a8   : > { %v4729_v58 = vadd.f32 %v4728_v35, %v4694_v24  ;;  %v4772_v8 = vmul.f32 %v4694_v24, %v4694_v24  ;;  %v4806_v14 = vadd.f32 %v4805_v10, %v4771_v34  ;;  %4853 = vst [vmem:[%s8259_s17 + $0xf8] sm:$0xff] %v4694_v24  ;;  %v6003_v51 = vpop.f32.mrb[32].mxu1  ;;  %v6718_v39 = vadd.f32 %v6717_v36, %v4277_v13 }
 0x2a9   : > { %v4697_v22 = vmul.f32 %v6716_v46, %v4644_v32  ;;  %v6719_v42 = vadd.f32 %v6003_v51, %v8292_v1  ;;  %v2663_v29 = vpop.f32.mrb[33].mxu1 }
 0x2aa   : > { %v4807_v57 = vadd.f32 %v4806_v14, %v4772_v8  ;;  %v4696_v31 = vmul.f32 %v6718_v39, %v4639_v37  ;;  %v4730_v55 = vadd.f32 %v4729_v58, %v4695_v25  ;;  %v6721_v60 = vadd.f32 %v8292_v1, %v2663_v29  ;;  %v6350_v2 = vpop.f32.mrb[34].mxu0 }
 0x2ab   : > { %4856 = vst [vmem:[%s8259_s17 + $0x110] sm:$0xff] %v4697_v22  ;;  %v6720_v52 = vadd.f32 %v6719_v42, %v6347_v12  ;;  %v4297_v3 = vpop.f32.mrb[35].mxu0  ;;  %v4775_v19 = vmul.f32 %v4697_v22, %v4697_v22 }
 0x2ac   : > { %v4731_v20 = vadd.f32 %v4730_v55, %v4696_v31  ;;  %v4774_v11 = vmul.f32 %v4696_v31, %v4696_v31  ;;  %v4808_v23 = vadd.f32 %v4807_v57, %v4773_v17  ;;  %4855 = vst [vmem:[%s8259_s17 + $0x108] sm:$0xff] %v4696_v31  ;;  %v6006_v6 = vpop.f32.mrb[34].mxu1  ;;  %v6722_v54 = vadd.f32 %v6721_v60, %v4287_v50 }
 0x2ad   : > { %v4699_v43 = vmul.f32 %v6720_v52, %v4654_v62  ;;  %v6723_v44 = vadd.f32 %v6006_v6, %v8292_v1  ;;  %v2673_v47 = vpop.f32.mrb[35].mxu1 }
 0x2ae   : > { %v4809_v5 = vadd.f32 %v4808_v23, %v4774_v11  ;;  %v4698_v9 = vmul.f32 %v6722_v54, %v4649_v16  ;;  %v4732_v18 = vadd.f32 %v4731_v20, %v4697_v22  ;;  %v6725_v38 = vadd.f32 %v8292_v1, %v2673_v47 }
 0x2af   : > { %4858 = vst [vmem:[%s8259_s17 + $0x120] sm:$0xff] %v4699_v43  ;;  %v6724_v26 = vadd.f32 %v6723_v44, %v6350_v2  ;;  %v4777_v48 = vmul.f32 %v4699_v43, %v4699_v43 }
 0x2b0   : > { %v4733_v21 = vadd.f32 %v4732_v18, %v4698_v9  ;;  %v4776_v40 = vmul.f32 %v4698_v9, %v4698_v9  ;;  %v4810_v49 = vadd.f32 %v4809_v5, %v4775_v19  ;;  %4857 = vst [vmem:[%s8259_s17 + $0x118] sm:$0xff] %v4698_v9  ;;  %v6726_v7 = vadd.f32 %v6725_v38, %v4297_v3 }
 0x2b1   : > { %v4701_v53 = vmul.f32 %v6724_v26, %v4664_v4 }
 0x2b2   : > { %v4811_v30 = vadd.f32 %v4810_v49, %v4776_v40  ;;  %v4700_v56 = vmul.f32 %v6726_v7, %v4659_v45  ;;  %v4734_v0 = vadd.f32 %v4733_v21, %v4699_v43 }
 0x2b3   : > { %4860 = vst [vmem:[%s8259_s17 + $0x130] sm:$0xff] %v4701_v53  ;;  %v4779_v32 = vmul.f32 %v4701_v53, %v4701_v53 }
 0x2b4   : > { %v4735_v27 = vadd.f32 %v4734_v0, %v4700_v56  ;;  %v4778_v13 = vmul.f32 %v4700_v56, %v4700_v56  ;;  %v4812_v1 = vadd.f32 %v4811_v30, %v4777_v48  ;;  %4859 = vst [vmem:[%s8259_s17 + $0x128] sm:$0xff] %v4700_v56 }
 0x2b6   : > { %v4736_v59 = vadd.f32 %v4735_v27, %v4701_v53  ;;  %v4813_v61 = vadd.f32 %v4812_v1, %v4778_v13 }
 0x2b8   : > { %v4737_v41 = vrot.slane %v4736_v59, 4  ;;  %v4814_v33 = vadd.f32 %v4813_v61, %v4779_v32 }
 0x2ba   : > { %v4738_v15 = vadd.f32 %v4737_v41, %v4736_v59  ;;  %v4815_v37 = vrot.slane %v4814_v33, 4 }
 0x2bc   : > { %v4739_v34 = vrot.slane %v4738_v15, 2  ;;  %v4816_v25 = vadd.f32 %v4815_v37, %v4814_v33 }
 0x2be   : > { %v4740_v63 = vadd.f32 %v4739_v34, %v4738_v15  ;;  %v4817_v28 = vrot.slane %v4816_v25, 2 }
 0x2c0   : > { %v4741_v10 = vrot.slane %v4740_v63, 1  ;;  %v4818_v24 = vadd.f32 %v4817_v28, %v4816_v25 }
 0x2c2   : > { %v4742_v35 = vadd.f32 %v4741_v10, %v4740_v63  ;;  %v4819_v36 = vrot.slane %v4818_v24, 1 }
 0x2c4   : > { %4743 = vst [vmem:[%s346_s20] sm:$0x1] %v4742_v35  ;;  %v4820_v12 = vadd.f32 %v4819_v36, %v4818_v24 }
 0x2c6   : > { %4821 = vst [vmem:[%s349_s24] sm:$0x1] %v4820_v12 }
 0x2c7 PF: > { %s20_s30 = sadd.s32 1, %s6998_s30  }
 0x2c8   : > { %p17_p4 = scmp.ge.s32.totalorder %s20_s30, 4  }
 0x2ca   :  { %19 = sbr.rel (!%p17_p4) target bundleno = 1 (0x1), region = 110 }

</bundles_post_ra>
